<compile_context>
chip_gen: v7x
topology: tpu7x:2x2x1
jax: 0.10.0
libtpu: 0.0.40
codegen_flags: <defaults>
</compile_context>

<pallas_src>
import math
import numpy as np

import jax
import jax.numpy as jnp
from jax.experimental import pallas as pl
from jax.experimental.pallas import tpu as pltpu

SQRT2 = math.sqrt(2.0)
LANE = 128
SUB = 8


def _round_up(x, m):
    return ((x + m - 1) // m) * m


def _pick_tile(dim_pad, unit, max_units):
    """Largest multiple of `unit` (<= max_units*unit) that divides dim_pad."""
    n = dim_pad // unit
    for d in range(min(max_units, n), 0, -1):
        if n % d == 0:
            return d * unit
    return unit


# ------------------------------------------------------------------
# Pallas kernels
# ------------------------------------------------------------------
def _make_mm_kernel(act, scale, has_skip, skip_gain):
    """Tiled matmul with fused epilogue:
         y = acc * scale + bias
         if act:      y = leaky_relu(y, 0.2) * sqrt(2)            (FusedLeakyReLU)
         if has_skip: y = (y * skip_gain + skip) / sqrt(g^2 + 1)  (ResBlock combine)
    """
    denom = 1.0 / math.sqrt(skip_gain * skip_gain + 1.0)

    def kernel(*refs):
        if has_skip:
            x_ref, w_ref, b_ref, s_ref, o_ref, acc_ref = refs
        else:
            x_ref, w_ref, b_ref, o_ref, acc_ref = refs
            s_ref = None

        @pl.when(pl.program_id(2) == 0)
        def _():
            acc_ref[...] = jnp.zeros_like(acc_ref)

        acc_ref[...] += jnp.dot(x_ref[...], w_ref[...],
                                preferred_element_type=jnp.float32)

        @pl.when(pl.program_id(2) == pl.num_programs(2) - 1)
        def _():
            y = acc_ref[...] * scale + b_ref[...]
            if act:
                y = jnp.where(y >= 0.0, y, 0.2 * y) * SQRT2
            if has_skip:
                y = (y * skip_gain + s_ref[...]) * denom
            o_ref[...] = y.astype(o_ref.dtype)

    return kernel


def matmul_bias_act(x, w, b, *, act, scale=1.0, skip=None, skip_gain=1.0):
    """x: (M, K_pad) f32; w: (K_pad, N_pad) bf16 pre-padded at init;
       b: (N_pad,) f32; skip: optional (M, N_pad) f32.
       Returns (M, N_pad) f32 (padded out-channels are exact zeros)."""
    M, K = x.shape
    K_pad, N_pad = w.shape
    assert K == K_pad and K_pad % LANE == 0 and N_pad % LANE == 0

    # Tile selection: lane-dense N, sublane-aligned M, blocked K.
    M8 = _round_up(M, SUB)
    tm = M8 if M8 <= 256 else 256
    M_pad = _round_up(M, tm)
    tn = _pick_tile(N_pad, LANE, 4)    # <= 512
    tk = _pick_tile(K_pad, LANE, 8)    # <= 1024

    if M_pad != M:
        x = jnp.pad(x, ((0, M_pad - M), (0, 0)))
    x = x.astype(jnp.bfloat16)
    b2 = b.reshape(1, N_pad)

    grid = (M_pad // tm, N_pad // tn, K_pad // tk)
    in_specs = [
        pl.BlockSpec((tm, tk), lambda i, j, k: (i, k)),
        pl.BlockSpec((tk, tn), lambda i, j, k: (k, j)),
        pl.BlockSpec((1, tn), lambda i, j, k: (0, j)),
    ]
    args = [x, w, b2]
    if skip is not None:
        skip = skip.astype(jnp.float32)
        if M_pad != M:
            skip = jnp.pad(skip, ((0, M_pad - M), (0, 0)))
        in_specs.append(pl.BlockSpec((tm, tn), lambda i, j, k: (i, j)))
        args.append(skip)

    out = pl.pallas_call(
        _make_mm_kernel(bool(act), float(scale), skip is not None,
                        float(skip_gain)),
        grid=grid,
        in_specs=in_specs,
        out_specs=pl.BlockSpec((tm, tn), lambda i, j, k: (i, j)),
        out_shape=jax.ShapeDtypeStruct((M_pad, N_pad), jnp.float32),
        scratch_shapes=[pltpu.VMEM((tm, tn), jnp.float32)],
        compiler_params=pltpu.CompilerParams(
            dimension_semantics=("parallel", "parallel", "arbitrary")),
    )(*args)
    return out[:M] if M_pad != M else out


def _make_blur_kernel(taps, Ho, Wo):
    taps = [float(t) for t in taps]

    def kernel(x_ref, o_ref):
        x = x_ref[...]
        # Separable FIR: 4 taps along H, then 4 taps along W (8 slices, not 16).
        t = taps[0] * x[:, 0:Ho, :, :]
        for i in range(1, len(taps)):
            t = t + taps[i] * x[:, i:i + Ho, :, :]
        o = taps[0] * t[:, :, 0:Wo, :]
        for j in range(1, len(taps)):
            o = o + taps[j] * t[:, :, j:j + Wo, :]
        o_ref[...] = o

    return kernel


def blur(x, pad, k1d):
    """upfirdn2d with up=down=1 on NHWC input (non-negative pads only).
       Channel dim must be a multiple of 128 (it is, padded end-to-end)."""
    pad0, pad1 = pad
    assert pad0 >= 0 and pad1 >= 0
    xp = jnp.pad(x, ((0, 0), (pad0, pad1), (pad0, pad1), (0, 0)))
    B, Hp, Wp, C = xp.shape
    assert C % LANE == 0
    KT = len(k1d)
    Ho, Wo = Hp - KT + 1, Wp - KT + 1
    kflip = list(k1d[::-1])   # true convolution (no-op for symmetric [1,3,3,1])
    return pl.pallas_call(
        _make_blur_kernel(kflip, Ho, Wo),
        grid=(B, C // LANE),
        in_specs=[pl.BlockSpec((1, Hp, Wp, LANE), lambda b, c: (b, 0, 0, c))],
        out_specs=pl.BlockSpec((1, Ho, Wo, LANE), lambda b, c: (b, 0, 0, c)),
        out_shape=jax.ShapeDtypeStruct((B, Ho, Wo, C), jnp.float32),
        compiler_params=pltpu.CompilerParams(
            dimension_semantics=("parallel", "parallel")),
    )(xp)


# ------------------------------------------------------------------
# JAX glue (im2col / param setup)
# ------------------------------------------------------------------
def make_blur_k1d(k):
    k = np.asarray(k, dtype=np.float32)
    return k / k.sum()          # outer(k1, k1) == normalized 2-D blur kernel


BLUR_K1D = make_blur_k1d([1, 3, 3, 1])


def im2col(x, kh, kw, stride, pad):
    """NHWC -> (B*Ho*Wo, kh*kw*C) patches matching F.conv2d semantics."""
    if pad > 0:
        x = jnp.pad(x, ((0, 0), (pad, pad), (pad, pad), (0, 0)))
    B, Hp, Wp, C = x.shape
    Ho = (Hp - kh) // stride + 1
    Wo = (Wp - kw) // stride + 1
    cols = []
    for i in range(kh):
        for j in range(kw):
            cols.append(
                x[:, i:i + stride * (Ho - 1) + 1:stride,
                     j:j + stride * (Wo - 1) + 1:stride, :])
    patches = jnp.concatenate(cols, axis=-1)
    return patches.reshape(B * Ho * Wo, kh * kw * C), (B, Ho, Wo)


def init_conv_layer(key, in_c, out_c, k, downsample=False, activate=True):
    in_pad = _round_up(in_c, LANE)
    out_pad = _round_up(out_c, LANE)
    w = jax.random.normal(key, (out_c, in_c, k, k), jnp.float32)
    # Matmul layout: rows ordered (ki, kj, c_in_pad), cols = out_pad.
    wmat = jnp.transpose(w, (2, 3, 1, 0))                       # (k, k, in, out)
    wmat = jnp.pad(wmat, ((0, 0), (0, 0),
                          (0, in_pad - in_c), (0, out_pad - out_c)))
    wmat = wmat.reshape(k * k * in_pad, out_pad)
    p = {
        'type': 'conv_layer',
        'wmat': wmat.astype(jnp.bfloat16),   # equalized-LR scale applied in epilogue
        'scale': 1.0 / math.sqrt(in_c * k * k),
        # EqualConv2d bias (bias and not activate) and FusedLeakyReLU bias
        # (activate and bias) are both zero-initialized -> one padded bias vector.
        'bias': jnp.zeros((out_pad,), jnp.float32),
        'kernel_size': k,
        'in_pad': in_pad,
        'out_pad': out_pad,
        'out_c': out_c,
        'activate': activate,
        'downsample': downsample,
    }
    if downsample:
        pp = len([1, 3, 3, 1]) - 2 + (k - 1)
        p['blur_pad'] = ((pp + 1) // 2, pp // 2)
        p['stride'] = 2
        p['padding'] = 0
    else:
        p['blur_pad'] = None
        p['stride'] = 1
        p['padding'] = k // 2
    return p


def conv_layer_forward(p, x, skip2d=None, skip_gain=1.0):
    """x: NHWC f32 with channels padded to p['in_pad'].
       Returns (y2d (M, out_pad) f32, (B, Ho, Wo))."""
    if p['downsample']:
        x = blur(x, p['blur_pad'], BLUR_K1D)
    k = p['kernel_size']
    patches, dims = im2col(x, k, k, p['stride'], p['padding'])
    y2d = matmul_bias_act(patches, p['wmat'], p['bias'],
                          act=p['activate'], scale=p['scale'],
                          skip=skip2d, skip_gain=skip_gain)
    return y2d, dims


def _to_nhwc(y2d, dims, out_pad):
    B, Ho, Wo = dims
    return y2d.reshape(B, Ho, Wo, out_pad)


def init_res_block(key, in_c, out_c, skip_gain=1.0):
    k1, k2, k3 = jax.random.split(key, 3)
    return {
        'type': 'res_block',
        'skip_gain': skip_gain,
        'conv1': init_conv_layer(k1, in_c, in_c, 3),
        'conv2': init_conv_layer(k2, in_c, out_c, 3, downsample=True),
        'skip': init_conv_layer(k3, in_c, out_c, 1, downsample=True,
                                activate=False),
    }


def res_block_forward(p, x):
    # Skip path first; its (M, out_pad) result is fused into conv2's epilogue:
    # out = (leaky(conv2(blur(conv1(x)))) * g + skip) / sqrt(g^2 + 1)
    skip2d, _ = conv_layer_forward(p['skip'], x)
    h2d, hdims = conv_layer_forward(p['conv1'], x)
    h = _to_nhwc(h2d, hdims, p['conv1']['out_pad'])
    out2d, odims = conv_layer_forward(p['conv2'], h,
                                      skip2d=skip2d, skip_gain=p['skip_gain'])
    return _to_nhwc(out2d, odims, p['conv2']['out_pad'])


def init_linear_from_nhwc(key, spatial, c_in, c_in_pad, out_dim,
                          activation=None, bias_init=0.0, lr_mul=1.0):
    """EqualLinear whose torch input is an NCHW flatten of (C,H,W)=(c_in, s).
       Rows are pre-permuted so it consumes the NHWC-channel-padded flatten
       (index = s*c_in_pad + c) directly — no transpose / slice at runtime."""
    in_dim = c_in * spatial
    out_pad = _round_up(out_dim, LANE)
    w = jax.random.normal(key, (out_dim, in_dim), jnp.float32) / lr_mul
    wt = w.T.reshape(c_in, spatial, out_dim)          # torch col = c*spatial + s
    wt = jnp.transpose(wt, (1, 0, 2))                 # -> (s, c, out)
    wt = jnp.pad(wt, ((0, 0), (0, c_in_pad - c_in), (0, out_pad - out_dim)))
    wmat = wt.reshape(spatial * c_in_pad, out_pad)
    b = jnp.pad(jnp.full((out_dim,), bias_init, jnp.float32) * lr_mul,
                (0, out_pad - out_dim))
    return {'wmat': wmat.astype(jnp.bfloat16), 'bias': b,
            'scale': (1.0 / math.sqrt(in_dim)) * lr_mul,
            'out_dim': out_dim, 'out_pad': out_pad, 'activation': activation}


def init_linear(key, in_dim, in_pad, out_dim,
                activation=None, bias_init=0.0, lr_mul=1.0):
    out_pad = _round_up(out_dim, LANE)
    w = jax.random.normal(key, (out_dim, in_dim), jnp.float32) / lr_mul
    wmat = jnp.pad(w.T, ((0, in_pad - in_dim), (0, out_pad - out_dim)))
    b = jnp.pad(jnp.full((out_dim,), bias_init, jnp.float32) * lr_mul,
                (0, out_pad - out_dim))
    return {'wmat': wmat.astype(jnp.bfloat16), 'bias': b,
            'scale': (1.0 / math.sqrt(in_dim)) * lr_mul,
            'out_dim': out_dim, 'out_pad': out_pad, 'activation': activation}


def linear_forward(p, x):
    return matmul_bias_act(x, p['wmat'], p['bias'],
                           act=(p['activation'] is not None), scale=p['scale'])


def init_discriminator(key, ndf=1, size=16):
    m = ndf / 64.0
    channels = {4: min(384, int(4096 * m)), 8: min(384, int(2048 * m)),
                16: min(384, int(1024 * m)), 32: min(384, int(512 * m)),
                64: int(256 * m), 128: int(128 * m), 256: int(64 * m),
                512: int(32 * m), 1024: int(16 * m)}
    log_size = int(math.log(size, 2))
    final_res_log2 = 2  # non-patch netD
    keys = iter(jax.random.split(key, 16))

    convs = [init_conv_layer(next(keys), 3, channels[size], 1)]
    in_ch = channels[size]
    for i in range(log_size, final_res_log2, -1):
        out_ch = channels[2 ** (i - 1)]
        convs.append(init_res_block(next(keys), in_ch, out_ch))
        in_ch = out_ch

    c4 = channels[4]
    c4_pad = _round_up(c4, LANE)
    return {
        'convs': convs,
        'final_conv': init_conv_layer(next(keys), in_ch, c4, 3),
        'lin1': init_linear_from_nhwc(next(keys), 4 * 4, c4, c4_pad, c4,
                                      activation='fused_lrelu'),
        'lin2': init_linear(next(keys), c4, c4_pad, 1, activation=None),
    }


def discriminator_forward(params, x_nchw):
    x = jnp.transpose(x_nchw, (0, 2, 3, 1)).astype(jnp.float32)  # NCHW -> NHWC
    first = params['convs'][0]
    # Pad image channels once; they stay lane-padded through the whole net.
    x = jnp.pad(x, ((0, 0), (0, 0), (0, 0), (0, first['in_pad'] - x.shape[-1])))
    y2d, dims = conv_layer_forward(first, x)
    out = _to_nhwc(y2d, dims, first['out_pad'])
    for layer in params['convs'][1:]:
        out = res_block_forward(layer, out)
    y2d, dims = conv_layer_forward(params['final_conv'], out)
    out = _to_nhwc(y2d, dims, params['final_conv']['out_pad'])
    B, H, W, Cp = out.shape
    # NHWC-padded flatten; lin1 weight rows are already permuted to match.
    flat = out.reshape(B, H * W * Cp)
    h = linear_forward(params['lin1'], flat)    # (B, 128) padded, zeros beyond c4
    y = linear_forward(params['lin2'], h)       # (B, 128) padded
    return y[:, :params['lin2']['out_dim']]


# ------------------------------------------------------------------
if __name__ == "__main__":
    key = jax.random.PRNGKey(0)
    kx, kp = jax.random.split(key)

    B, size = 2, 16
    x = jax.random.normal(kx, (B, 3, size, size), jnp.float32)  # NCHW like torch

    params = init_discriminator(kp, ndf=1, size=size)
    fwd = jax.jit(lambda inp: discriminator_forward(params, inp))
    out = jax.block_until_ready(fwd(x))

    assert out.shape == (B, 1), out.shape
    assert bool(jnp.all(jnp.isfinite(out)))
    print("KERNEL_OK")
</pallas_src>

<mosaic_0001>
module attributes {stable_mosaic.version = 11 : i64} {
  func.func @kernel(%arg0: i32, %arg1: i32, %arg2: i32, %arg3: memref<256x128xbf16, #tpu.memory_space<vmem>>, %arg4: memref<128x128xbf16, #tpu.memory_space<vmem>>, %arg5: memref<1x128xf32, #tpu.memory_space<vmem>>, %arg6: memref<256x128xf32, #tpu.memory_space<vmem>>, %arg7: memref<256x128xf32, #tpu.memory_space<vmem>>) attributes {dimension_semantics = [#tpu.dimension_semantics<parallel>, #tpu.dimension_semantics<parallel>, #tpu.dimension_semantics<arbitrary>], iteration_bounds = array<i64: 2, 1, 1>, scalar_prefetch = 0 : i64, scratch_operands = 1 : i64, tpu.core_type = #tpu.core_type<tc>, window_params = [{transform_indices = @transform_0, window_bounds = array<i64: 256, 128>}, {transform_indices = @transform_1, window_bounds = array<i64: 128, 128>}, {transform_indices = @transform_2, window_bounds = array<i64: 1, 128>}, {transform_indices = @transform_3, window_bounds = array<i64: 256, 128>}]} {
    %c0_i32 = arith.constant 0 : i32
    %0 = arith.cmpi eq, %arg2, %c0_i32 : i32
    %1 = arith.extui %0 : i1 to i32
    %c0_i32_0 = arith.constant 0 : i32
    %2 = arith.cmpi ne, %1, %c0_i32_0 : i32
    scf.if %2 {
      %cst_10 = arith.constant 0.000000e+00 : f32
      %12 = vector.broadcast %cst_10 : f32 to vector<256x128xf32>
      %c0_11 = arith.constant 0 : index
      %c0_12 = arith.constant 0 : index
      %13 = vector.load %arg7[%c0_11, %c0_12] : memref<256x128xf32, #tpu.memory_space<vmem>>, vector<256x128xf32>
      tpu.vector_store %arg7[%c0_11, %c0_12], %12 {strides = array<i32>} : memref<256x128xf32, #tpu.memory_space<vmem>>, vector<256x128xf32>,
    } else {
    }
    %c0 = arith.constant 0 : index
    %c0_1 = arith.constant 0 : index
    %3 = vector.load %arg7[%c0, %c0_1] : memref<256x128xf32, #tpu.memory_space<vmem>>, vector<256x128xf32>
    %c0_2 = arith.constant 0 : index
    %c0_3 = arith.constant 0 : index
    %4 = vector.load %arg3[%c0_2, %c0_3] : memref<256x128xbf16, #tpu.memory_space<vmem>>, vector<256x128xbf16>
    %c0_4 = arith.constant 0 : index
    %c0_5 = arith.constant 0 : index
    %5 = vector.load %arg4[%c0_4, %c0_5] : memref<128x128xbf16, #tpu.memory_space<vmem>>, vector<128x128xbf16>
    %cst = arith.constant dense<0.000000e+00> : vector<256x128xf32>
    %6 = tpu.matmul %4, %5, %cst {dimension_numbers = #tpu.dot_dimension_numbers<[1], [0], [0], [1], [0, 0, 1, 1], [], []>} : vector<256x128xbf16>, vector<128x128xbf16>, vector<256x128xf32> -> vector<256x128xf32>
    %7 = arith.addf %3, %6 : vector<256x128xf32>
    %c0_6 = arith.constant 0 : index
    %c0_7 = arith.constant 0 : index
    %8 = vector.load %arg7[%c0_6, %c0_7] : memref<256x128xf32, #tpu.memory_space<vmem>>, vector<256x128xf32>
    tpu.vector_store %arg7[%c0_6, %c0_7], %7 {strides = array<i32>} : memref<256x128xf32, #tpu.memory_space<vmem>>, vector<256x128xf32>,
    %c0_i32_8 = arith.constant 0 : i32
    %9 = arith.cmpi eq, %arg2, %c0_i32_8 : i32
    %10 = arith.extui %9 : i1 to i32
    %c0_i32_9 = arith.constant 0 : i32
    %11 = arith.cmpi ne, %10, %c0_i32_9 : i32
    scf.if %11 {
      %c0_10 = arith.constant 0 : index
      %c0_11 = arith.constant 0 : index
      %12 = vector.load %arg7[%c0_10, %c0_11] : memref<256x128xf32, #tpu.memory_space<vmem>>, vector<256x128xf32>
      %cst_12 = arith.constant 0.577350259 : f32
      %13 = vector.broadcast %cst_12 : f32 to vector<256x128xf32>
      %14 = arith.mulf %12, %13 : vector<256x128xf32>
      %c0_13 = arith.constant 0 : index
      %c0_14 = arith.constant 0 : index
      %15 = vector.load %arg5[%c0_13, %c0_14] : memref<1x128xf32, #tpu.memory_space<vmem>>, vector<1x128xf32>
      %16 = vector.broadcast %15 : vector<1x128xf32> to vector<256x128xf32>
      %17 = arith.addf %14, %16 : vector<256x128xf32>
      %cst_15 = arith.constant 0.000000e+00 : f32
      %18 = vector.broadcast %cst_15 : f32 to vector<256x128xf32>
      %19 = arith.cmpf oge, %17, %18 : vector<256x128xf32>
      %cst_16 = arith.constant 2.000000e-01 : f32
      %20 = vector.broadcast %cst_16 : f32 to vector<256x128xf32>
      %21 = arith.mulf %20, %17 : vector<256x128xf32>
      %22 = arith.select %19, %17, %21 : vector<256x128xi1>, vector<256x128xf32>
      %cst_17 = arith.constant 1.41421354 : f32
      %23 = vector.broadcast %cst_17 : f32 to vector<256x128xf32>
      %24 = arith.mulf %22, %23 : vector<256x128xf32>
      %c0_18 = arith.constant 0 : index
      %c0_19 = arith.constant 0 : index
      %25 = vector.load %arg6[%c0_18, %c0_19] : memref<256x128xf32, #tpu.memory_space<vmem>>, vector<256x128xf32>
      tpu.vector_store %arg6[%c0_18, %c0_19], %24 {strides = array<i32>} : memref<256x128xf32, #tpu.memory_space<vmem>>, vector<256x128xf32>,
    } else {
    }
    return
  }
  func.func @transform_0(%arg0: i32, %arg1: i32, %arg2: i32) -> (i32, i32) {
    %c0_i32 = arith.constant 0 : i32
    return %arg0, %arg2 : i32, i32
  }
  func.func @transform_1(%arg0: i32, %arg1: i32, %arg2: i32) -> (i32, i32) {
    %c0_i32 = arith.constant 0 : i32
    return %arg2, %arg1 : i32, i32
  }
  func.func @transform_2(%arg0: i32, %arg1: i32, %arg2: i32) -> (i32, i32) {
    %c0_i32 = arith.constant 0 : i32
    %c0_i32_0 = arith.constant 0 : i32
    return %c0_i32, %arg1 : i32, i32
  }
  func.func @transform_3(%arg0: i32, %arg1: i32, %arg2: i32) -> (i32, i32) {
    %c0_i32 = arith.constant 0 : i32
    return %arg0, %arg1 : i32, i32
  }
}

module attributes {stable_mosaic.version = 11 : i64} {
  func.func @kernel(%arg0: i32, %arg1: i32, %arg2: i32, %arg3: memref<256x384xbf16, #tpu.memory_space<vmem>>, %arg4: memref<384x128xbf16, #tpu.memory_space<vmem>>, %arg5: memref<1x128xf32, #tpu.memory_space<vmem>>, %arg6: memref<256x128xf32, #tpu.memory_space<vmem>>, %arg7: memref<256x128xf32, #tpu.memory_space<vmem>>) attributes {dimension_semantics = [#tpu.dimension_semantics<parallel>, #tpu.dimension_semantics<parallel>, #tpu.dimension_semantics<arbitrary>], iteration_bounds = array<i64: 2, 1, 3>, scalar_prefetch = 0 : i64, scratch_operands = 1 : i64, tpu.core_type = #tpu.core_type<tc>, window_params = [{transform_indices = @transform_0, window_bounds = array<i64: 256, 384>}, {transform_indices = @transform_1, window_bounds = array<i64: 384, 128>}, {transform_indices = @transform_2, window_bounds = array<i64: 1, 128>}, {transform_indices = @transform_3, window_bounds = array<i64: 256, 128>}]} {
    %c0_i32 = arith.constant 0 : i32
    %0 = arith.cmpi eq, %arg2, %c0_i32 : i32
    %1 = arith.extui %0 : i1 to i32
    %c0_i32_0 = arith.constant 0 : i32
    %2 = arith.cmpi ne, %1, %c0_i32_0 : i32
    scf.if %2 {
      %cst_9 = arith.constant 0.000000e+00 : f32
      %12 = vector.broadcast %cst_9 : f32 to vector<256x128xf32>
      %c0_10 = arith.constant 0 : index
      %c0_11 = arith.constant 0 : index
      %13 = vector.load %arg7[%c0_10, %c0_11] : memref<256x128xf32, #tpu.memory_space<vmem>>, vector<256x128xf32>
      tpu.vector_store %arg7[%c0_10, %c0_11], %12 {strides = array<i32>} : memref<256x128xf32, #tpu.memory_space<vmem>>, vector<256x128xf32>,
    } else {
    }
    %c0 = arith.constant 0 : index
    %c0_1 = arith.constant 0 : index
    %3 = vector.load %arg7[%c0, %c0_1] : memref<256x128xf32, #tpu.memory_space<vmem>>, vector<256x128xf32>
    %c0_2 = arith.constant 0 : index
    %c0_3 = arith.constant 0 : index
    %4 = vector.load %arg3[%c0_2, %c0_3] : memref<256x384xbf16, #tpu.memory_space<vmem>>, vector<256x384xbf16>
    %c0_4 = arith.constant 0 : index
    %c0_5 = arith.constant 0 : index
    %5 = vector.load %arg4[%c0_4, %c0_5] : memref<384x128xbf16, #tpu.memory_space<vmem>>, vector<384x128xbf16>
    %cst = arith.constant dense<0.000000e+00> : vector<256x128xf32>
    %6 = tpu.matmul %4, %5, %cst {dimension_numbers = #tpu.dot_dimension_numbers<[1], [0], [0], [1], [0, 0, 1, 1], [], []>} : vector<256x384xbf16>, vector<384x128xbf16>, vector<256x128xf32> -> vector<256x128xf32>
    %7 = arith.addf %3, %6 : vector<256x128xf32>
    %c0_6 = arith.constant 0 : index
    %c0_7 = arith.constant 0 : index
    %8 = vector.load %arg7[%c0_6, %c0_7] : memref<256x128xf32, #tpu.memory_space<vmem>>, vector<256x128xf32>
    tpu.vector_store %arg7[%c0_6, %c0_7], %7 {strides = array<i32>} : memref<256x128xf32, #tpu.memory_space<vmem>>, vector<256x128xf32>,
    %c2_i32 = arith.constant 2 : i32
    %9 = arith.cmpi eq, %arg2, %c2_i32 : i32
    %10 = arith.extui %9 : i1 to i32
    %c0_i32_8 = arith.constant 0 : i32
    %11 = arith.cmpi ne, %10, %c0_i32_8 : i32
    scf.if %11 {
      %c0_9 = arith.constant 0 : index
      %c0_10 = arith.constant 0 : index
      %12 = vector.load %arg7[%c0_9, %c0_10] : memref<256x128xf32, #tpu.memory_space<vmem>>, vector<256x128xf32>
      %cst_11 = arith.constant 0.0833333358 : f32
      %13 = vector.broadcast %cst_11 : f32 to vector<256x128xf32>
      %14 = arith.mulf %12, %13 : vector<256x128xf32>
      %c0_12 = arith.constant 0 : index
      %c0_13 = arith.constant 0 : index
      %15 = vector.load %arg5[%c0_12, %c0_13] : memref<1x128xf32, #tpu.memory_space<vmem>>, vector<1x128xf32>
      %16 = vector.broadcast %15 : vector<1x128xf32> to vector<256x128xf32>
      %17 = arith.addf %14, %16 : vector<256x128xf32>
      %cst_14 = arith.constant 0.000000e+00 : f32
      %18 = vector.broadcast %cst_14 : f32 to vector<256x128xf32>
      %19 = arith.cmpf oge, %17, %18 : vector<256x128xf32>
      %cst_15 = arith.constant 2.000000e-01 : f32
      %20 = vector.broadcast %cst_15 : f32 to vector<256x128xf32>
      %21 = arith.mulf %20, %17 : vector<256x128xf32>
      %22 = arith.select %19, %17, %21 : vector<256x128xi1>, vector<256x128xf32>
      %cst_16 = arith.constant 1.41421354 : f32
      %23 = vector.broadcast %cst_16 : f32 to vector<256x128xf32>
      %24 = arith.mulf %22, %23 : vector<256x128xf32>
      %c0_17 = arith.constant 0 : index
      %c0_18 = arith.constant 0 : index
      %25 = vector.load %arg6[%c0_17, %c0_18] : memref<256x128xf32, #tpu.memory_space<vmem>>, vector<256x128xf32>
      tpu.vector_store %arg6[%c0_17, %c0_18], %24 {strides = array<i32>} : memref<256x128xf32, #tpu.memory_space<vmem>>, vector<256x128xf32>,
    } else {
    }
    return
  }
  func.func @transform_0(%arg0: i32, %arg1: i32, %arg2: i32) -> (i32, i32) {
    %c0_i32 = arith.constant 0 : i32
    return %arg0, %arg2 : i32, i32
  }
  func.func @transform_1(%arg0: i32, %arg1: i32, %arg2: i32) -> (i32, i32) {
    %c0_i32 = arith.constant 0 : i32
    return %arg2, %arg1 : i32, i32
  }
  func.func @transform_2(%arg0: i32, %arg1: i32, %arg2: i32) -> (i32, i32) {
    %c0_i32 = arith.constant 0 : i32
    %c0_i32_0 = arith.constant 0 : i32
    return %c0_i32, %arg1 : i32, i32
  }
  func.func @transform_3(%arg0: i32, %arg1: i32, %arg2: i32) -> (i32, i32) {
    %c0_i32 = arith.constant 0 : i32
    return %arg0, %arg1 : i32, i32
  }
}

module attributes {stable_mosaic.version = 11 : i64} {
  func.func @kernel(%arg0: i32, %arg1: i32, %arg2: memref<1x20x20x128xf32, #tpu.memory_space<vmem>>, %arg3: memref<1x17x17x128xf32, #tpu.memory_space<vmem>>) attributes {dimension_semantics = [#tpu.dimension_semantics<parallel>, #tpu.dimension_semantics<parallel>], iteration_bounds = array<i64: 2, 1>, scalar_prefetch = 0 : i64, scratch_operands = 0 : i64, tpu.core_type = #tpu.core_type<tc>, window_params = [{transform_indices = @transform_0, window_bounds = array<i64: 1, 20, 20, 128>}, {transform_indices = @transform_1, window_bounds = array<i64: 1, 17, 17, 128>}]} {
    %c0 = arith.constant 0 : index
    %c0_0 = arith.constant 0 : index
    %c0_1 = arith.constant 0 : index
    %c0_2 = arith.constant 0 : index
    %0 = vector.load %arg2[%c0, %c0_0, %c0_1, %c0_2] : memref<1x20x20x128xf32, #tpu.memory_space<vmem>>, vector<1x20x20x128xf32>
    %1 = vector.extract_strided_slice %0 {offsets = [0, 0, 0, 0], sizes = [1, 17, 20, 128], strides = [1, 1, 1, 1]} : vector<1x20x20x128xf32> to vector<1x17x20x128xf32>
    %cst = arith.constant 1.250000e-01 : f32
    %2 = vector.broadcast %cst : f32 to vector<1x17x20x128xf32>
    %3 = arith.mulf %2, %1 : vector<1x17x20x128xf32>
    %4 = vector.extract_strided_slice %0 {offsets = [0, 1, 0, 0], sizes = [1, 17, 20, 128], strides = [1, 1, 1, 1]} : vector<1x20x20x128xf32> to vector<1x17x20x128xf32>
    %cst_3 = arith.constant 3.750000e-01 : f32
    %5 = vector.broadcast %cst_3 : f32 to vector<1x17x20x128xf32>
    %6 = arith.mulf %5, %4 : vector<1x17x20x128xf32>
    %7 = arith.addf %3, %6 : vector<1x17x20x128xf32>
    %8 = vector.extract_strided_slice %0 {offsets = [0, 2, 0, 0], sizes = [1, 17, 20, 128], strides = [1, 1, 1, 1]} : vector<1x20x20x128xf32> to vector<1x17x20x128xf32>
    %cst_4 = arith.constant 3.750000e-01 : f32
    %9 = vector.broadcast %cst_4 : f32 to vector<1x17x20x128xf32>
    %10 = arith.mulf %9, %8 : vector<1x17x20x128xf32>
    %11 = arith.addf %7, %10 : vector<1x17x20x128xf32>
    %12 = vector.extract_strided_slice %0 {offsets = [0, 3, 0, 0], sizes = [1, 17, 20, 128], strides = [1, 1, 1, 1]} : vector<1x20x20x128xf32> to vector<1x17x20x128xf32>
    %cst_5 = arith.constant 1.250000e-01 : f32
    %13 = vector.broadcast %cst_5 : f32 to vector<1x17x20x128xf32>
    %14 = arith.mulf %13, %12 : vector<1x17x20x128xf32>
    %15 = arith.addf %11, %14 : vector<1x17x20x128xf32>
    %16 = vector.extract_strided_slice %15 {offsets = [0, 0, 0, 0], sizes = [1, 17, 17, 128], strides = [1, 1, 1, 1]} : vector<1x17x20x128xf32> to vector<1x17x17x128xf32>
    %cst_6 = arith.constant 1.250000e-01 : f32
    %17 = vector.broadcast %cst_6 : f32 to vector<1x17x17x128xf32>
    %18 = arith.mulf %17, %16 : vector<1x17x17x128xf32>
    %19 = vector.extract_strided_slice %15 {offsets = [0, 0, 1, 0], sizes = [1, 17, 17, 128], strides = [1, 1, 1, 1]} : vector<1x17x20x128xf32> to vector<1x17x17x128xf32>
    %cst_7 = arith.constant 3.750000e-01 : f32
    %20 = vector.broadcast %cst_7 : f32 to vector<1x17x17x128xf32>
    %21 = arith.mulf %20, %19 : vector<1x17x17x128xf32>
    %22 = arith.addf %18, %21 : vector<1x17x17x128xf32>
    %23 = vector.extract_strided_slice %15 {offsets = [0, 0, 2, 0], sizes = [1, 17, 17, 128], strides = [1, 1, 1, 1]} : vector<1x17x20x128xf32> to vector<1x17x17x128xf32>
    %cst_8 = arith.constant 3.750000e-01 : f32
    %24 = vector.broadcast %cst_8 : f32 to vector<1x17x17x128xf32>
    %25 = arith.mulf %24, %23 : vector<1x17x17x128xf32>
    %26 = arith.addf %22, %25 : vector<1x17x17x128xf32>
    %27 = vector.extract_strided_slice %15 {offsets = [0, 0, 3, 0], sizes = [1, 17, 17, 128], strides = [1, 1, 1, 1]} : vector<1x17x20x128xf32> to vector<1x17x17x128xf32>
    %cst_9 = arith.constant 1.250000e-01 : f32
    %28 = vector.broadcast %cst_9 : f32 to vector<1x17x17x128xf32>
    %29 = arith.mulf %28, %27 : vector<1x17x17x128xf32>
    %30 = arith.addf %26, %29 : vector<1x17x17x128xf32>
    %c0_10 = arith.constant 0 : index
    %c0_11 = arith.constant 0 : index
    %c0_12 = arith.constant 0 : index
    %c0_13 = arith.constant 0 : index
    %31 = vector.load %arg3[%c0_10, %c0_11, %c0_12, %c0_13] : memref<1x17x17x128xf32, #tpu.memory_space<vmem>>, vector<1x17x17x128xf32>
    tpu.vector_store %arg3[%c0_10, %c0_11, %c0_12, %c0_13], %30 {strides = array<i32>} : memref<1x17x17x128xf32, #tpu.memory_space<vmem>>, vector<1x17x17x128xf32>,
    return
  }
  func.func @transform_0(%arg0: i32, %arg1: i32) -> (i32, i32, i32, i32) {
    %c0_i32 = arith.constant 0 : i32
    %c0_i32_0 = arith.constant 0 : i32
    %c0_i32_1 = arith.constant 0 : i32
    return %arg0, %c0_i32, %c0_i32_0, %arg1 : i32, i32, i32, i32
  }
  func.func @transform_1(%arg0: i32, %arg1: i32) -> (i32, i32, i32, i32) {
    %c0_i32 = arith.constant 0 : i32
    %c0_i32_0 = arith.constant 0 : i32
    %c0_i32_1 = arith.constant 0 : i32
    return %arg0, %c0_i32, %c0_i32_0, %arg1 : i32, i32, i32, i32
  }
}

module attributes {stable_mosaic.version = 11 : i64} {
  func.func @kernel(%arg0: i32, %arg1: i32, %arg2: memref<1x18x18x128xf32, #tpu.memory_space<vmem>>, %arg3: memref<1x15x15x128xf32, #tpu.memory_space<vmem>>) attributes {dimension_semantics = [#tpu.dimension_semantics<parallel>, #tpu.dimension_semantics<parallel>], iteration_bounds = array<i64: 2, 1>, scalar_prefetch = 0 : i64, scratch_operands = 0 : i64, tpu.core_type = #tpu.core_type<tc>, window_params = [{transform_indices = @transform_0, window_bounds = array<i64: 1, 18, 18, 128>}, {transform_indices = @transform_1, window_bounds = array<i64: 1, 15, 15, 128>}]} {
    %c0 = arith.constant 0 : index
    %c0_0 = arith.constant 0 : index
    %c0_1 = arith.constant 0 : index
    %c0_2 = arith.constant 0 : index
    %0 = vector.load %arg2[%c0, %c0_0, %c0_1, %c0_2] : memref<1x18x18x128xf32, #tpu.memory_space<vmem>>, vector<1x18x18x128xf32>
    %1 = vector.extract_strided_slice %0 {offsets = [0, 0, 0, 0], sizes = [1, 15, 18, 128], strides = [1, 1, 1, 1]} : vector<1x18x18x128xf32> to vector<1x15x18x128xf32>
    %cst = arith.constant 1.250000e-01 : f32
    %2 = vector.broadcast %cst : f32 to vector<1x15x18x128xf32>
    %3 = arith.mulf %2, %1 : vector<1x15x18x128xf32>
    %4 = vector.extract_strided_slice %0 {offsets = [0, 1, 0, 0], sizes = [1, 15, 18, 128], strides = [1, 1, 1, 1]} : vector<1x18x18x128xf32> to vector<1x15x18x128xf32>
    %cst_3 = arith.constant 3.750000e-01 : f32
    %5 = vector.broadcast %cst_3 : f32 to vector<1x15x18x128xf32>
    %6 = arith.mulf %5, %4 : vector<1x15x18x128xf32>
    %7 = arith.addf %3, %6 : vector<1x15x18x128xf32>
    %8 = vector.extract_strided_slice %0 {offsets = [0, 2, 0, 0], sizes = [1, 15, 18, 128], strides = [1, 1, 1, 1]} : vector<1x18x18x128xf32> to vector<1x15x18x128xf32>
    %cst_4 = arith.constant 3.750000e-01 : f32
    %9 = vector.broadcast %cst_4 : f32 to vector<1x15x18x128xf32>
    %10 = arith.mulf %9, %8 : vector<1x15x18x128xf32>
    %11 = arith.addf %7, %10 : vector<1x15x18x128xf32>
    %12 = vector.extract_strided_slice %0 {offsets = [0, 3, 0, 0], sizes = [1, 15, 18, 128], strides = [1, 1, 1, 1]} : vector<1x18x18x128xf32> to vector<1x15x18x128xf32>
    %cst_5 = arith.constant 1.250000e-01 : f32
    %13 = vector.broadcast %cst_5 : f32 to vector<1x15x18x128xf32>
    %14 = arith.mulf %13, %12 : vector<1x15x18x128xf32>
    %15 = arith.addf %11, %14 : vector<1x15x18x128xf32>
    %16 = vector.extract_strided_slice %15 {offsets = [0, 0, 0, 0], sizes = [1, 15, 15, 128], strides = [1, 1, 1, 1]} : vector<1x15x18x128xf32> to vector<1x15x15x128xf32>
    %cst_6 = arith.constant 1.250000e-01 : f32
    %17 = vector.broadcast %cst_6 : f32 to vector<1x15x15x128xf32>
    %18 = arith.mulf %17, %16 : vector<1x15x15x128xf32>
    %19 = vector.extract_strided_slice %15 {offsets = [0, 0, 1, 0], sizes = [1, 15, 15, 128], strides = [1, 1, 1, 1]} : vector<1x15x18x128xf32> to vector<1x15x15x128xf32>
    %cst_7 = arith.constant 3.750000e-01 : f32
    %20 = vector.broadcast %cst_7 : f32 to vector<1x15x15x128xf32>
    %21 = arith.mulf %20, %19 : vector<1x15x15x128xf32>
    %22 = arith.addf %18, %21 : vector<1x15x15x128xf32>
    %23 = vector.extract_strided_slice %15 {offsets = [0, 0, 2, 0], sizes = [1, 15, 15, 128], strides = [1, 1, 1, 1]} : vector<1x15x18x128xf32> to vector<1x15x15x128xf32>
    %cst_8 = arith.constant 3.750000e-01 : f32
    %24 = vector.broadcast %cst_8 : f32 to vector<1x15x15x128xf32>
    %25 = arith.mulf %24, %23 : vector<1x15x15x128xf32>
    %26 = arith.addf %22, %25 : vector<1x15x15x128xf32>
    %27 = vector.extract_strided_slice %15 {offsets = [0, 0, 3, 0], sizes = [1, 15, 15, 128], strides = [1, 1, 1, 1]} : vector<1x15x18x128xf32> to vector<1x15x15x128xf32>
    %cst_9 = arith.constant 1.250000e-01 : f32
    %28 = vector.broadcast %cst_9 : f32 to vector<1x15x15x128xf32>
    %29 = arith.mulf %28, %27 : vector<1x15x15x128xf32>
    %30 = arith.addf %26, %29 : vector<1x15x15x128xf32>
    %c0_10 = arith.constant 0 : index
    %c0_11 = arith.constant 0 : index
    %c0_12 = arith.constant 0 : index
    %c0_13 = arith.constant 0 : index
    %31 = vector.load %arg3[%c0_10, %c0_11, %c0_12, %c0_13] : memref<1x15x15x128xf32, #tpu.memory_space<vmem>>, vector<1x15x15x128xf32>
    tpu.vector_store %arg3[%c0_10, %c0_11, %c0_12, %c0_13], %30 {strides = array<i32>} : memref<1x15x15x128xf32, #tpu.memory_space<vmem>>, vector<1x15x15x128xf32>,
    return
  }
  func.func @transform_0(%arg0: i32, %arg1: i32) -> (i32, i32, i32, i32) {
    %c0_i32 = arith.constant 0 : i32
    %c0_i32_0 = arith.constant 0 : i32
    %c0_i32_1 = arith.constant 0 : i32
    return %arg0, %c0_i32, %c0_i32_0, %arg1 : i32, i32, i32, i32
  }
  func.func @transform_1(%arg0: i32, %arg1: i32) -> (i32, i32, i32, i32) {
    %c0_i32 = arith.constant 0 : i32
    %c0_i32_0 = arith.constant 0 : i32
    %c0_i32_1 = arith.constant 0 : i32
    return %arg0, %c0_i32, %c0_i32_0, %arg1 : i32, i32, i32, i32
  }
}

module attributes {stable_mosaic.version = 11 : i64} {
  func.func @kernel(%arg0: i32, %arg1: i32, %arg2: i32, %arg3: memref<128x384xbf16, #tpu.memory_space<vmem>>, %arg4: memref<384x128xbf16, #tpu.memory_space<vmem>>, %arg5: memref<1x128xf32, #tpu.memory_space<vmem>>, %arg6: memref<128x128xf32, #tpu.memory_space<vmem>>, %arg7: memref<128x128xf32, #tpu.memory_space<vmem>>, %arg8: memref<128x128xf32, #tpu.memory_space<vmem>>) attributes {dimension_semantics = [#tpu.dimension_semantics<parallel>, #tpu.dimension_semantics<parallel>, #tpu.dimension_semantics<arbitrary>], iteration_bounds = array<i64: 1, 1, 3>, scalar_prefetch = 0 : i64, scratch_operands = 1 : i64, tpu.core_type = #tpu.core_type<tc>, window_params = [{transform_indices = @transform_0, window_bounds = array<i64: 128, 384>}, {transform_indices = @transform_1, window_bounds = array<i64: 384, 128>}, {transform_indices = @transform_2, window_bounds = array<i64: 1, 128>}, {transform_indices = @transform_3, window_bounds = array<i64: 128, 128>}, {transform_indices = @transform_4, window_bounds = array<i64: 128, 128>}]} {
    %c0_i32 = arith.constant 0 : i32
    %0 = arith.cmpi eq, %arg2, %c0_i32 : i32
    %1 = arith.extui %0 : i1 to i32
    %c0_i32_0 = arith.constant 0 : i32
    %2 = arith.cmpi ne, %1, %c0_i32_0 : i32
    scf.if %2 {
      %cst_9 = arith.constant 0.000000e+00 : f32
      %12 = vector.broadcast %cst_9 : f32 to vector<128x128xf32>
      %c0_10 = arith.constant 0 : index
      %c0_11 = arith.constant 0 : index
      %13 = vector.load %arg8[%c0_10, %c0_11] : memref<128x128xf32, #tpu.memory_space<vmem>>, vector<128x128xf32>
      tpu.vector_store %arg8[%c0_10, %c0_11], %12 {strides = array<i32>} : memref<128x128xf32, #tpu.memory_space<vmem>>, vector<128x128xf32>,
    } else {
    }
    %c0 = arith.constant 0 : index
    %c0_1 = arith.constant 0 : index
    %3 = vector.load %arg8[%c0, %c0_1] : memref<128x128xf32, #tpu.memory_space<vmem>>, vector<128x128xf32>
    %c0_2 = arith.constant 0 : index
    %c0_3 = arith.constant 0 : index
    %4 = vector.load %arg3[%c0_2, %c0_3] : memref<128x384xbf16, #tpu.memory_space<vmem>>, vector<128x384xbf16>
    %c0_4 = arith.constant 0 : index
    %c0_5 = arith.constant 0 : index
    %5 = vector.load %arg4[%c0_4, %c0_5] : memref<384x128xbf16, #tpu.memory_space<vmem>>, vector<384x128xbf16>
    %cst = arith.constant dense<0.000000e+00> : vector<128x128xf32>
    %6 = tpu.matmul %4, %5, %cst {dimension_numbers = #tpu.dot_dimension_numbers<[1], [0], [0], [1], [0, 0, 1, 1], [], []>} : vector<128x384xbf16>, vector<384x128xbf16>, vector<128x128xf32> -> vector<128x128xf32>
    %7 = arith.addf %3, %6 : vector<128x128xf32>
    %c0_6 = arith.constant 0 : index
    %c0_7 = arith.constant 0 : index
    %8 = vector.load %arg8[%c0_6, %c0_7] : memref<128x128xf32, #tpu.memory_space<vmem>>, vector<128x128xf32>
    tpu.vector_store %arg8[%c0_6, %c0_7], %7 {strides = array<i32>} : memref<128x128xf32, #tpu.memory_space<vmem>>, vector<128x128xf32>,
    %c2_i32 = arith.constant 2 : i32
    %9 = arith.cmpi eq, %arg2, %c2_i32 : i32
    %10 = arith.extui %9 : i1 to i32
    %c0_i32_8 = arith.constant 0 : i32
    %11 = arith.cmpi ne, %10, %c0_i32_8 : i32
    scf.if %11 {
      %c0_9 = arith.constant 0 : index
      %c0_10 = arith.constant 0 : index
      %12 = vector.load %arg8[%c0_9, %c0_10] : memref<128x128xf32, #tpu.memory_space<vmem>>, vector<128x128xf32>
      %cst_11 = arith.constant 0.0833333358 : f32
      %13 = vector.broadcast %cst_11 : f32 to vector<128x128xf32>
      %14 = arith.mulf %12, %13 : vector<128x128xf32>
      %c0_12 = arith.constant 0 : index
      %c0_13 = arith.constant 0 : index
      %15 = vector.load %arg5[%c0_12, %c0_13] : memref<1x128xf32, #tpu.memory_space<vmem>>, vector<1x128xf32>
      %16 = vector.broadcast %15 : vector<1x128xf32> to vector<128x128xf32>
      %17 = arith.addf %14, %16 : vector<128x128xf32>
      %cst_14 = arith.constant 0.000000e+00 : f32
      %18 = vector.broadcast %cst_14 : f32 to vector<128x128xf32>
      %19 = arith.cmpf oge, %17, %18 : vector<128x128xf32>
      %cst_15 = arith.constant 2.000000e-01 : f32
      %20 = vector.broadcast %cst_15 : f32 to vector<128x128xf32>
      %21 = arith.mulf %20, %17 : vector<128x128xf32>
      %22 = arith.select %19, %17, %21 : vector<128x128xi1>, vector<128x128xf32>
      %cst_16 = arith.constant 1.41421354 : f32
      %23 = vector.broadcast %cst_16 : f32 to vector<128x128xf32>
      %24 = arith.mulf %22, %23 : vector<128x128xf32>
      %cst_17 = arith.constant 1.000000e+00 : f32
      %25 = vector.broadcast %cst_17 : f32 to vector<128x128xf32>
      %26 = arith.mulf %24, %25 : vector<128x128xf32>
      %c0_18 = arith.constant 0 : index
      %c0_19 = arith.constant 0 : index
      %27 = vector.load %arg6[%c0_18, %c0_19] : memref<128x128xf32, #tpu.memory_space<vmem>>, vector<128x128xf32>
      %28 = arith.addf %26, %27 : vector<128x128xf32>
      %cst_20 = arith.constant 0.707106769 : f32
      %29 = vector.broadcast %cst_20 : f32 to vector<128x128xf32>
      %30 = arith.mulf %28, %29 : vector<128x128xf32>
      %c0_21 = arith.constant 0 : index
      %c0_22 = arith.constant 0 : index
      %31 = vector.load %arg7[%c0_21, %c0_22] : memref<128x128xf32, #tpu.memory_space<vmem>>, vector<128x128xf32>
      tpu.vector_store %arg7[%c0_21, %c0_22], %30 {strides = array<i32>} : memref<128x128xf32, #tpu.memory_space<vmem>>, vector<128x128xf32>,
    } else {
    }
    return
  }
  func.func @transform_0(%arg0: i32, %arg1: i32, %arg2: i32) -> (i32, i32) {
    %c0_i32 = arith.constant 0 : i32
    return %arg0, %arg2 : i32, i32
  }
  func.func @transform_1(%arg0: i32, %arg1: i32, %arg2: i32) -> (i32, i32) {
    %c0_i32 = arith.constant 0 : i32
    return %arg2, %arg1 : i32, i32
  }
  func.func @transform_2(%arg0: i32, %arg1: i32, %arg2: i32) -> (i32, i32) {
    %c0_i32 = arith.constant 0 : i32
    %c0_i32_0 = arith.constant 0 : i32
    return %c0_i32, %arg1 : i32, i32
  }
  func.func @transform_3(%arg0: i32, %arg1: i32, %arg2: i32) -> (i32, i32) {
    %c0_i32 = arith.constant 0 : i32
    return %arg0, %arg1 : i32, i32
  }
  func.func @transform_4(%arg0: i32, %arg1: i32, %arg2: i32) -> (i32, i32) {
    %c0_i32 = arith.constant 0 : i32
    return %arg0, %arg1 : i32, i32
  }
}

module attributes {stable_mosaic.version = 11 : i64} {
  func.func @kernel(%arg0: i32, %arg1: i32, %arg2: i32, %arg3: memref<128x128xbf16, #tpu.memory_space<vmem>>, %arg4: memref<128x128xbf16, #tpu.memory_space<vmem>>, %arg5: memref<1x128xf32, #tpu.memory_space<vmem>>, %arg6: memref<128x128xf32, #tpu.memory_space<vmem>>, %arg7: memref<128x128xf32, #tpu.memory_space<vmem>>) attributes {dimension_semantics = [#tpu.dimension_semantics<parallel>, #tpu.dimension_semantics<parallel>, #tpu.dimension_semantics<arbitrary>], iteration_bounds = array<i64: 1, 1, 1>, scalar_prefetch = 0 : i64, scratch_operands = 1 : i64, tpu.core_type = #tpu.core_type<tc>, window_params = [{transform_indices = @transform_0, window_bounds = array<i64: 128, 128>}, {transform_indices = @transform_1, window_bounds = array<i64: 128, 128>}, {transform_indices = @transform_2, window_bounds = array<i64: 1, 128>}, {transform_indices = @transform_3, window_bounds = array<i64: 128, 128>}]} {
    %c0_i32 = arith.constant 0 : i32
    %0 = arith.cmpi eq, %arg2, %c0_i32 : i32
    %1 = arith.extui %0 : i1 to i32
    %c0_i32_0 = arith.constant 0 : i32
    %2 = arith.cmpi ne, %1, %c0_i32_0 : i32
    scf.if %2 {
      %cst_10 = arith.constant 0.000000e+00 : f32
      %12 = vector.broadcast %cst_10 : f32 to vector<128x128xf32>
      %c0_11 = arith.constant 0 : index
      %c0_12 = arith.constant 0 : index
      %13 = vector.load %arg7[%c0_11, %c0_12] : memref<128x128xf32, #tpu.memory_space<vmem>>, vector<128x128xf32>
      tpu.vector_store %arg7[%c0_11, %c0_12], %12 {strides = array<i32>} : memref<128x128xf32, #tpu.memory_space<vmem>>, vector<128x128xf32>,
    } else {
    }
    %c0 = arith.constant 0 : index
    %c0_1 = arith.constant 0 : index
    %3 = vector.load %arg7[%c0, %c0_1] : memref<128x128xf32, #tpu.memory_space<vmem>>, vector<128x128xf32>
    %c0_2 = arith.constant 0 : index
    %c0_3 = arith.constant 0 : index
    %4 = vector.load %arg3[%c0_2, %c0_3] : memref<128x128xbf16, #tpu.memory_space<vmem>>, vector<128x128xbf16>
    %c0_4 = arith.constant 0 : index
    %c0_5 = arith.constant 0 : index
    %5 = vector.load %arg4[%c0_4, %c0_5] : memref<128x128xbf16, #tpu.memory_space<vmem>>, vector<128x128xbf16>
    %cst = arith.constant dense<0.000000e+00> : vector<128x128xf32>
    %6 = tpu.matmul %4, %5, %cst {dimension_numbers = #tpu.dot_dimension_numbers<[1], [0], [0], [1], [0, 0, 1, 1], [], []>} : vector<128x128xbf16>, vector<128x128xbf16>, vector<128x128xf32> -> vector<128x128xf32>
    %7 = arith.addf %3, %6 : vector<128x128xf32>
    %c0_6 = arith.constant 0 : index
    %c0_7 = arith.constant 0 : index
    %8 = vector.load %arg7[%c0_6, %c0_7] : memref<128x128xf32, #tpu.memory_space<vmem>>, vector<128x128xf32>
    tpu.vector_store %arg7[%c0_6, %c0_7], %7 {strides = array<i32>} : memref<128x128xf32, #tpu.memory_space<vmem>>, vector<128x128xf32>,
    %c0_i32_8 = arith.constant 0 : i32
    %9 = arith.cmpi eq, %arg2, %c0_i32_8 : i32
    %10 = arith.extui %9 : i1 to i32
    %c0_i32_9 = arith.constant 0 : i32
    %11 = arith.cmpi ne, %10, %c0_i32_9 : i32
    scf.if %11 {
      %c0_10 = arith.constant 0 : index
      %c0_11 = arith.constant 0 : index
      %12 = vector.load %arg7[%c0_10, %c0_11] : memref<128x128xf32, #tpu.memory_space<vmem>>, vector<128x128xf32>
      %cst_12 = arith.constant 2.500000e-01 : f32
      %13 = vector.broadcast %cst_12 : f32 to vector<128x128xf32>
      %14 = arith.mulf %12, %13 : vector<128x128xf32>
      %c0_13 = arith.constant 0 : index
      %c0_14 = arith.constant 0 : index
      %15 = vector.load %arg5[%c0_13, %c0_14] : memref<1x128xf32, #tpu.memory_space<vmem>>, vector<1x128xf32>
      %16 = vector.broadcast %15 : vector<1x128xf32> to vector<128x128xf32>
      %17 = arith.addf %14, %16 : vector<128x128xf32>
      %c0_15 = arith.constant 0 : index
      %c0_16 = arith.constant 0 : index
      %18 = vector.load %arg6[%c0_15, %c0_16] : memref<128x128xf32, #tpu.memory_space<vmem>>, vector<128x128xf32>
      tpu.vector_store %arg6[%c0_15, %c0_16], %17 {strides = array<i32>} : memref<128x128xf32, #tpu.memory_space<vmem>>, vector<128x128xf32>,
    } else {
    }
    return
  }
  func.func @transform_0(%arg0: i32, %arg1: i32, %arg2: i32) -> (i32, i32) {
    %c0_i32 = arith.constant 0 : i32
    return %arg0, %arg2 : i32, i32
  }
  func.func @transform_1(%arg0: i32, %arg1: i32, %arg2: i32) -> (i32, i32) {
    %c0_i32 = arith.constant 0 : i32
    return %arg2, %arg1 : i32, i32
  }
  func.func @transform_2(%arg0: i32, %arg1: i32, %arg2: i32) -> (i32, i32) {
    %c0_i32 = arith.constant 0 : i32
    %c0_i32_0 = arith.constant 0 : i32
    return %c0_i32, %arg1 : i32, i32
  }
  func.func @transform_3(%arg0: i32, %arg1: i32, %arg2: i32) -> (i32, i32) {
    %c0_i32 = arith.constant 0 : i32
    return %arg0, %arg1 : i32, i32
  }
}

module attributes {stable_mosaic.version = 11 : i64} {
  func.func @kernel(%arg0: i32, %arg1: i32, %arg2: memref<1x12x12x128xf32, #tpu.memory_space<vmem>>, %arg3: memref<1x9x9x128xf32, #tpu.memory_space<vmem>>) attributes {dimension_semantics = [#tpu.dimension_semantics<parallel>, #tpu.dimension_semantics<parallel>], iteration_bounds = array<i64: 2, 1>, scalar_prefetch = 0 : i64, scratch_operands = 0 : i64, tpu.core_type = #tpu.core_type<tc>, window_params = [{transform_indices = @transform_0, window_bounds = array<i64: 1, 12, 12, 128>}, {transform_indices = @transform_1, window_bounds = array<i64: 1, 9, 9, 128>}]} {
    %c0 = arith.constant 0 : index
    %c0_0 = arith.constant 0 : index
    %c0_1 = arith.constant 0 : index
    %c0_2 = arith.constant 0 : index
    %0 = vector.load %arg2[%c0, %c0_0, %c0_1, %c0_2] : memref<1x12x12x128xf32, #tpu.memory_space<vmem>>, vector<1x12x12x128xf32>
    %1 = vector.extract_strided_slice %0 {offsets = [0, 0, 0, 0], sizes = [1, 9, 12, 128], strides = [1, 1, 1, 1]} : vector<1x12x12x128xf32> to vector<1x9x12x128xf32>
    %cst = arith.constant 1.250000e-01 : f32
    %2 = vector.broadcast %cst : f32 to vector<1x9x12x128xf32>
    %3 = arith.mulf %2, %1 : vector<1x9x12x128xf32>
    %4 = vector.extract_strided_slice %0 {offsets = [0, 1, 0, 0], sizes = [1, 9, 12, 128], strides = [1, 1, 1, 1]} : vector<1x12x12x128xf32> to vector<1x9x12x128xf32>
    %cst_3 = arith.constant 3.750000e-01 : f32
    %5 = vector.broadcast %cst_3 : f32 to vector<1x9x12x128xf32>
    %6 = arith.mulf %5, %4 : vector<1x9x12x128xf32>
    %7 = arith.addf %3, %6 : vector<1x9x12x128xf32>
    %8 = vector.extract_strided_slice %0 {offsets = [0, 2, 0, 0], sizes = [1, 9, 12, 128], strides = [1, 1, 1, 1]} : vector<1x12x12x128xf32> to vector<1x9x12x128xf32>
    %cst_4 = arith.constant 3.750000e-01 : f32
    %9 = vector.broadcast %cst_4 : f32 to vector<1x9x12x128xf32>
    %10 = arith.mulf %9, %8 : vector<1x9x12x128xf32>
    %11 = arith.addf %7, %10 : vector<1x9x12x128xf32>
    %12 = vector.extract_strided_slice %0 {offsets = [0, 3, 0, 0], sizes = [1, 9, 12, 128], strides = [1, 1, 1, 1]} : vector<1x12x12x128xf32> to vector<1x9x12x128xf32>
    %cst_5 = arith.constant 1.250000e-01 : f32
    %13 = vector.broadcast %cst_5 : f32 to vector<1x9x12x128xf32>
    %14 = arith.mulf %13, %12 : vector<1x9x12x128xf32>
    %15 = arith.addf %11, %14 : vector<1x9x12x128xf32>
    %16 = vector.extract_strided_slice %15 {offsets = [0, 0, 0, 0], sizes = [1, 9, 9, 128], strides = [1, 1, 1, 1]} : vector<1x9x12x128xf32> to vector<1x9x9x128xf32>
    %cst_6 = arith.constant 1.250000e-01 : f32
    %17 = vector.broadcast %cst_6 : f32 to vector<1x9x9x128xf32>
    %18 = arith.mulf %17, %16 : vector<1x9x9x128xf32>
    %19 = vector.extract_strided_slice %15 {offsets = [0, 0, 1, 0], sizes = [1, 9, 9, 128], strides = [1, 1, 1, 1]} : vector<1x9x12x128xf32> to vector<1x9x9x128xf32>
    %cst_7 = arith.constant 3.750000e-01 : f32
    %20 = vector.broadcast %cst_7 : f32 to vector<1x9x9x128xf32>
    %21 = arith.mulf %20, %19 : vector<1x9x9x128xf32>
    %22 = arith.addf %18, %21 : vector<1x9x9x128xf32>
    %23 = vector.extract_strided_slice %15 {offsets = [0, 0, 2, 0], sizes = [1, 9, 9, 128], strides = [1, 1, 1, 1]} : vector<1x9x12x128xf32> to vector<1x9x9x128xf32>
    %cst_8 = arith.constant 3.750000e-01 : f32
    %24 = vector.broadcast %cst_8 : f32 to vector<1x9x9x128xf32>
    %25 = arith.mulf %24, %23 : vector<1x9x9x128xf32>
    %26 = arith.addf %22, %25 : vector<1x9x9x128xf32>
    %27 = vector.extract_strided_slice %15 {offsets = [0, 0, 3, 0], sizes = [1, 9, 9, 128], strides = [1, 1, 1, 1]} : vector<1x9x12x128xf32> to vector<1x9x9x128xf32>
    %cst_9 = arith.constant 1.250000e-01 : f32
    %28 = vector.broadcast %cst_9 : f32 to vector<1x9x9x128xf32>
    %29 = arith.mulf %28, %27 : vector<1x9x9x128xf32>
    %30 = arith.addf %26, %29 : vector<1x9x9x128xf32>
    %c0_10 = arith.constant 0 : index
    %c0_11 = arith.constant 0 : index
    %c0_12 = arith.constant 0 : index
    %c0_13 = arith.constant 0 : index
    %31 = vector.load %arg3[%c0_10, %c0_11, %c0_12, %c0_13] : memref<1x9x9x128xf32, #tpu.memory_space<vmem>>, vector<1x9x9x128xf32>
    tpu.vector_store %arg3[%c0_10, %c0_11, %c0_12, %c0_13], %30 {strides = array<i32>} : memref<1x9x9x128xf32, #tpu.memory_space<vmem>>, vector<1x9x9x128xf32>,
    return
  }
  func.func @transform_0(%arg0: i32, %arg1: i32) -> (i32, i32, i32, i32) {
    %c0_i32 = arith.constant 0 : i32
    %c0_i32_0 = arith.constant 0 : i32
    %c0_i32_1 = arith.constant 0 : i32
    return %arg0, %c0_i32, %c0_i32_0, %arg1 : i32, i32, i32, i32
  }
  func.func @transform_1(%arg0: i32, %arg1: i32) -> (i32, i32, i32, i32) {
    %c0_i32 = arith.constant 0 : i32
    %c0_i32_0 = arith.constant 0 : i32
    %c0_i32_1 = arith.constant 0 : i32
    return %arg0, %c0_i32, %c0_i32_0, %arg1 : i32, i32, i32, i32
  }
}

module attributes {stable_mosaic.version = 11 : i64} {
  func.func @kernel(%arg0: i32, %arg1: i32, %arg2: i32, %arg3: memref<128x384xbf16, #tpu.memory_space<vmem>>, %arg4: memref<384x128xbf16, #tpu.memory_space<vmem>>, %arg5: memref<1x128xf32, #tpu.memory_space<vmem>>, %arg6: memref<128x128xf32, #tpu.memory_space<vmem>>, %arg7: memref<128x128xf32, #tpu.memory_space<vmem>>) attributes {dimension_semantics = [#tpu.dimension_semantics<parallel>, #tpu.dimension_semantics<parallel>, #tpu.dimension_semantics<arbitrary>], iteration_bounds = array<i64: 1, 1, 3>, scalar_prefetch = 0 : i64, scratch_operands = 1 : i64, tpu.core_type = #tpu.core_type<tc>, window_params = [{transform_indices = @transform_0, window_bounds = array<i64: 128, 384>}, {transform_indices = @transform_1, window_bounds = array<i64: 384, 128>}, {transform_indices = @transform_2, window_bounds = array<i64: 1, 128>}, {transform_indices = @transform_3, window_bounds = array<i64: 128, 128>}]} {
    %c0_i32 = arith.constant 0 : i32
    %0 = arith.cmpi eq, %arg2, %c0_i32 : i32
    %1 = arith.extui %0 : i1 to i32
    %c0_i32_0 = arith.constant 0 : i32
    %2 = arith.cmpi ne, %1, %c0_i32_0 : i32
    scf.if %2 {
      %cst_9 = arith.constant 0.000000e+00 : f32
      %12 = vector.broadcast %cst_9 : f32 to vector<128x128xf32>
      %c0_10 = arith.constant 0 : index
      %c0_11 = arith.constant 0 : index
      %13 = vector.load %arg7[%c0_10, %c0_11] : memref<128x128xf32, #tpu.memory_space<vmem>>, vector<128x128xf32>
      tpu.vector_store %arg7[%c0_10, %c0_11], %12 {strides = array<i32>} : memref<128x128xf32, #tpu.memory_space<vmem>>, vector<128x128xf32>,
    } else {
    }
    %c0 = arith.constant 0 : index
    %c0_1 = arith.constant 0 : index
    %3 = vector.load %arg7[%c0, %c0_1] : memref<128x128xf32, #tpu.memory_space<vmem>>, vector<128x128xf32>
    %c0_2 = arith.constant 0 : index
    %c0_3 = arith.constant 0 : index
    %4 = vector.load %arg3[%c0_2, %c0_3] : memref<128x384xbf16, #tpu.memory_space<vmem>>, vector<128x384xbf16>
    %c0_4 = arith.constant 0 : index
    %c0_5 = arith.constant 0 : index
    %5 = vector.load %arg4[%c0_4, %c0_5] : memref<384x128xbf16, #tpu.memory_space<vmem>>, vector<384x128xbf16>
    %cst = arith.constant dense<0.000000e+00> : vector<128x128xf32>
    %6 = tpu.matmul %4, %5, %cst {dimension_numbers = #tpu.dot_dimension_numbers<[1], [0], [0], [1], [0, 0, 1, 1], [], []>} : vector<128x384xbf16>, vector<384x128xbf16>, vector<128x128xf32> -> vector<128x128xf32>
    %7 = arith.addf %3, %6 : vector<128x128xf32>
    %c0_6 = arith.constant 0 : index
    %c0_7 = arith.constant 0 : index
    %8 = vector.load %arg7[%c0_6, %c0_7] : memref<128x128xf32, #tpu.memory_space<vmem>>, vector<128x128xf32>
    tpu.vector_store %arg7[%c0_6, %c0_7], %7 {strides = array<i32>} : memref<128x128xf32, #tpu.memory_space<vmem>>, vector<128x128xf32>,
    %c2_i32 = arith.constant 2 : i32
    %9 = arith.cmpi eq, %arg2, %c2_i32 : i32
    %10 = arith.extui %9 : i1 to i32
    %c0_i32_8 = arith.constant 0 : i32
    %11 = arith.cmpi ne, %10, %c0_i32_8 : i32
    scf.if %11 {
      %c0_9 = arith.constant 0 : index
      %c0_10 = arith.constant 0 : index
      %12 = vector.load %arg7[%c0_9, %c0_10] : memref<128x128xf32, #tpu.memory_space<vmem>>, vector<128x128xf32>
      %cst_11 = arith.constant 0.0589255653 : f32
      %13 = vector.broadcast %cst_11 : f32 to vector<128x128xf32>
      %14 = arith.mulf %12, %13 : vector<128x128xf32>
      %c0_12 = arith.constant 0 : index
      %c0_13 = arith.constant 0 : index
      %15 = vector.load %arg5[%c0_12, %c0_13] : memref<1x128xf32, #tpu.memory_space<vmem>>, vector<1x128xf32>
      %16 = vector.broadcast %15 : vector<1x128xf32> to vector<128x128xf32>
      %17 = arith.addf %14, %16 : vector<128x128xf32>
      %cst_14 = arith.constant 0.000000e+00 : f32
      %18 = vector.broadcast %cst_14 : f32 to vector<128x128xf32>
      %19 = arith.cmpf oge, %17, %18 : vector<128x128xf32>
      %cst_15 = arith.constant 2.000000e-01 : f32
      %20 = vector.broadcast %cst_15 : f32 to vector<128x128xf32>
      %21 = arith.mulf %20, %17 : vector<128x128xf32>
      %22 = arith.select %19, %17, %21 : vector<128x128xi1>, vector<128x128xf32>
      %cst_16 = arith.constant 1.41421354 : f32
      %23 = vector.broadcast %cst_16 : f32 to vector<128x128xf32>
      %24 = arith.mulf %22, %23 : vector<128x128xf32>
      %c0_17 = arith.constant 0 : index
      %c0_18 = arith.constant 0 : index
      %25 = vector.load %arg6[%c0_17, %c0_18] : memref<128x128xf32, #tpu.memory_space<vmem>>, vector<128x128xf32>
      tpu.vector_store %arg6[%c0_17, %c0_18], %24 {strides = array<i32>} : memref<128x128xf32, #tpu.memory_space<vmem>>, vector<128x128xf32>,
    } else {
    }
    return
  }
  func.func @transform_0(%arg0: i32, %arg1: i32, %arg2: i32) -> (i32, i32) {
    %c0_i32 = arith.constant 0 : i32
    return %arg0, %arg2 : i32, i32
  }
  func.func @transform_1(%arg0: i32, %arg1: i32, %arg2: i32) -> (i32, i32) {
    %c0_i32 = arith.constant 0 : i32
    return %arg2, %arg1 : i32, i32
  }
  func.func @transform_2(%arg0: i32, %arg1: i32, %arg2: i32) -> (i32, i32) {
    %c0_i32 = arith.constant 0 : i32
    %c0_i32_0 = arith.constant 0 : i32
    return %c0_i32, %arg1 : i32, i32
  }
  func.func @transform_3(%arg0: i32, %arg1: i32, %arg2: i32) -> (i32, i32) {
    %c0_i32 = arith.constant 0 : i32
    return %arg0, %arg1 : i32, i32
  }
}

module attributes {stable_mosaic.version = 11 : i64} {
  func.func @kernel(%arg0: i32, %arg1: i32, %arg2: memref<1x10x10x128xf32, #tpu.memory_space<vmem>>, %arg3: memref<1x7x7x128xf32, #tpu.memory_space<vmem>>) attributes {dimension_semantics = [#tpu.dimension_semantics<parallel>, #tpu.dimension_semantics<parallel>], iteration_bounds = array<i64: 2, 1>, scalar_prefetch = 0 : i64, scratch_operands = 0 : i64, tpu.core_type = #tpu.core_type<tc>, window_params = [{transform_indices = @transform_0, window_bounds = array<i64: 1, 10, 10, 128>}, {transform_indices = @transform_1, window_bounds = array<i64: 1, 7, 7, 128>}]} {
    %c0 = arith.constant 0 : index
    %c0_0 = arith.constant 0 : index
    %c0_1 = arith.constant 0 : index
    %c0_2 = arith.constant 0 : index
    %0 = vector.load %arg2[%c0, %c0_0, %c0_1, %c0_2] : memref<1x10x10x128xf32, #tpu.memory_space<vmem>>, vector<1x10x10x128xf32>
    %1 = vector.extract_strided_slice %0 {offsets = [0, 0, 0, 0], sizes = [1, 7, 10, 128], strides = [1, 1, 1, 1]} : vector<1x10x10x128xf32> to vector<1x7x10x128xf32>
    %cst = arith.constant 1.250000e-01 : f32
    %2 = vector.broadcast %cst : f32 to vector<1x7x10x128xf32>
    %3 = arith.mulf %2, %1 : vector<1x7x10x128xf32>
    %4 = vector.extract_strided_slice %0 {offsets = [0, 1, 0, 0], sizes = [1, 7, 10, 128], strides = [1, 1, 1, 1]} : vector<1x10x10x128xf32> to vector<1x7x10x128xf32>
    %cst_3 = arith.constant 3.750000e-01 : f32
    %5 = vector.broadcast %cst_3 : f32 to vector<1x7x10x128xf32>
    %6 = arith.mulf %5, %4 : vector<1x7x10x128xf32>
    %7 = arith.addf %3, %6 : vector<1x7x10x128xf32>
    %8 = vector.extract_strided_slice %0 {offsets = [0, 2, 0, 0], sizes = [1, 7, 10, 128], strides = [1, 1, 1, 1]} : vector<1x10x10x128xf32> to vector<1x7x10x128xf32>
    %cst_4 = arith.constant 3.750000e-01 : f32
    %9 = vector.broadcast %cst_4 : f32 to vector<1x7x10x128xf32>
    %10 = arith.mulf %9, %8 : vector<1x7x10x128xf32>
    %11 = arith.addf %7, %10 : vector<1x7x10x128xf32>
    %12 = vector.extract_strided_slice %0 {offsets = [0, 3, 0, 0], sizes = [1, 7, 10, 128], strides = [1, 1, 1, 1]} : vector<1x10x10x128xf32> to vector<1x7x10x128xf32>
    %cst_5 = arith.constant 1.250000e-01 : f32
    %13 = vector.broadcast %cst_5 : f32 to vector<1x7x10x128xf32>
    %14 = arith.mulf %13, %12 : vector<1x7x10x128xf32>
    %15 = arith.addf %11, %14 : vector<1x7x10x128xf32>
    %16 = vector.extract_strided_slice %15 {offsets = [0, 0, 0, 0], sizes = [1, 7, 7, 128], strides = [1, 1, 1, 1]} : vector<1x7x10x128xf32> to vector<1x7x7x128xf32>
    %cst_6 = arith.constant 1.250000e-01 : f32
    %17 = vector.broadcast %cst_6 : f32 to vector<1x7x7x128xf32>
    %18 = arith.mulf %17, %16 : vector<1x7x7x128xf32>
    %19 = vector.extract_strided_slice %15 {offsets = [0, 0, 1, 0], sizes = [1, 7, 7, 128], strides = [1, 1, 1, 1]} : vector<1x7x10x128xf32> to vector<1x7x7x128xf32>
    %cst_7 = arith.constant 3.750000e-01 : f32
    %20 = vector.broadcast %cst_7 : f32 to vector<1x7x7x128xf32>
    %21 = arith.mulf %20, %19 : vector<1x7x7x128xf32>
    %22 = arith.addf %18, %21 : vector<1x7x7x128xf32>
    %23 = vector.extract_strided_slice %15 {offsets = [0, 0, 2, 0], sizes = [1, 7, 7, 128], strides = [1, 1, 1, 1]} : vector<1x7x10x128xf32> to vector<1x7x7x128xf32>
    %cst_8 = arith.constant 3.750000e-01 : f32
    %24 = vector.broadcast %cst_8 : f32 to vector<1x7x7x128xf32>
    %25 = arith.mulf %24, %23 : vector<1x7x7x128xf32>
    %26 = arith.addf %22, %25 : vector<1x7x7x128xf32>
    %27 = vector.extract_strided_slice %15 {offsets = [0, 0, 3, 0], sizes = [1, 7, 7, 128], strides = [1, 1, 1, 1]} : vector<1x7x10x128xf32> to vector<1x7x7x128xf32>
    %cst_9 = arith.constant 1.250000e-01 : f32
    %28 = vector.broadcast %cst_9 : f32 to vector<1x7x7x128xf32>
    %29 = arith.mulf %28, %27 : vector<1x7x7x128xf32>
    %30 = arith.addf %26, %29 : vector<1x7x7x128xf32>
    %c0_10 = arith.constant 0 : index
    %c0_11 = arith.constant 0 : index
    %c0_12 = arith.constant 0 : index
    %c0_13 = arith.constant 0 : index
    %31 = vector.load %arg3[%c0_10, %c0_11, %c0_12, %c0_13] : memref<1x7x7x128xf32, #tpu.memory_space<vmem>>, vector<1x7x7x128xf32>
    tpu.vector_store %arg3[%c0_10, %c0_11, %c0_12, %c0_13], %30 {strides = array<i32>} : memref<1x7x7x128xf32, #tpu.memory_space<vmem>>, vector<1x7x7x128xf32>,
    return
  }
  func.func @transform_0(%arg0: i32, %arg1: i32) -> (i32, i32, i32, i32) {
    %c0_i32 = arith.constant 0 : i32
    %c0_i32_0 = arith.constant 0 : i32
    %c0_i32_1 = arith.constant 0 : i32
    return %arg0, %c0_i32, %c0_i32_0, %arg1 : i32, i32, i32, i32
  }
  func.func @transform_1(%arg0: i32, %arg1: i32) -> (i32, i32, i32, i32) {
    %c0_i32 = arith.constant 0 : i32
    %c0_i32_0 = arith.constant 0 : i32
    %c0_i32_1 = arith.constant 0 : i32
    return %arg0, %c0_i32, %c0_i32_0, %arg1 : i32, i32, i32, i32
  }
}

module attributes {stable_mosaic.version = 11 : i64} {
  func.func @kernel(%arg0: i32, %arg1: i32, %arg2: i32, %arg3: memref<32x384xbf16, #tpu.memory_space<vmem>>, %arg4: memref<384x128xbf16, #tpu.memory_space<vmem>>, %arg5: memref<1x128xf32, #tpu.memory_space<vmem>>, %arg6: memref<32x128xf32, #tpu.memory_space<vmem>>, %arg7: memref<32x128xf32, #tpu.memory_space<vmem>>, %arg8: memref<32x128xf32, #tpu.memory_space<vmem>>) attributes {dimension_semantics = [#tpu.dimension_semantics<parallel>, #tpu.dimension_semantics<parallel>, #tpu.dimension_semantics<arbitrary>], iteration_bounds = array<i64: 1, 1, 3>, scalar_prefetch = 0 : i64, scratch_operands = 1 : i64, tpu.core_type = #tpu.core_type<tc>, window_params = [{transform_indices = @transform_0, window_bounds = array<i64: 32, 384>}, {transform_indices = @transform_1, window_bounds = array<i64: 384, 128>}, {transform_indices = @transform_2, window_bounds = array<i64: 1, 128>}, {transform_indices = @transform_3, window_bounds = array<i64: 32, 128>}, {transform_indices = @transform_4, window_bounds = array<i64: 32, 128>}]} {
    %c0_i32 = arith.constant 0 : i32
    %0 = arith.cmpi eq, %arg2, %c0_i32 : i32
    %1 = arith.extui %0 : i1 to i32
    %c0_i32_0 = arith.constant 0 : i32
    %2 = arith.cmpi ne, %1, %c0_i32_0 : i32
    scf.if %2 {
      %cst_9 = arith.constant 0.000000e+00 : f32
      %12 = vector.broadcast %cst_9 : f32 to vector<32x128xf32>
      %c0_10 = arith.constant 0 : index
      %c0_11 = arith.constant 0 : index
      %13 = vector.load %arg8[%c0_10, %c0_11] : memref<32x128xf32, #tpu.memory_space<vmem>>, vector<32x128xf32>
      tpu.vector_store %arg8[%c0_10, %c0_11], %12 {strides = array<i32>} : memref<32x128xf32, #tpu.memory_space<vmem>>, vector<32x128xf32>,
    } else {
    }
    %c0 = arith.constant 0 : index
    %c0_1 = arith.constant 0 : index
    %3 = vector.load %arg8[%c0, %c0_1] : memref<32x128xf32, #tpu.memory_space<vmem>>, vector<32x128xf32>
    %c0_2 = arith.constant 0 : index
    %c0_3 = arith.constant 0 : index
    %4 = vector.load %arg3[%c0_2, %c0_3] : memref<32x384xbf16, #tpu.memory_space<vmem>>, vector<32x384xbf16>
    %c0_4 = arith.constant 0 : index
    %c0_5 = arith.constant 0 : index
    %5 = vector.load %arg4[%c0_4, %c0_5] : memref<384x128xbf16, #tpu.memory_space<vmem>>, vector<384x128xbf16>
    %cst = arith.constant dense<0.000000e+00> : vector<32x128xf32>
    %6 = tpu.matmul %4, %5, %cst {dimension_numbers = #tpu.dot_dimension_numbers<[1], [0], [0], [1], [0, 0, 1, 1], [], []>} : vector<32x384xbf16>, vector<384x128xbf16>, vector<32x128xf32> -> vector<32x128xf32>
    %7 = arith.addf %3, %6 : vector<32x128xf32>
    %c0_6 = arith.constant 0 : index
    %c0_7 = arith.constant 0 : index
    %8 = vector.load %arg8[%c0_6, %c0_7] : memref<32x128xf32, #tpu.memory_space<vmem>>, vector<32x128xf32>
    tpu.vector_store %arg8[%c0_6, %c0_7], %7 {strides = array<i32>} : memref<32x128xf32, #tpu.memory_space<vmem>>, vector<32x128xf32>,
    %c2_i32 = arith.constant 2 : i32
    %9 = arith.cmpi eq, %arg2, %c2_i32 : i32
    %10 = arith.extui %9 : i1 to i32
    %c0_i32_8 = arith.constant 0 : i32
    %11 = arith.cmpi ne, %10, %c0_i32_8 : i32
    scf.if %11 {
      %c0_9 = arith.constant 0 : index
      %c0_10 = arith.constant 0 : index
      %12 = vector.load %arg8[%c0_9, %c0_10] : memref<32x128xf32, #tpu.memory_space<vmem>>, vector<32x128xf32>
      %cst_11 = arith.constant 0.0589255653 : f32
      %13 = vector.broadcast %cst_11 : f32 to vector<32x128xf32>
      %14 = arith.mulf %12, %13 : vector<32x128xf32>
      %c0_12 = arith.constant 0 : index
      %c0_13 = arith.constant 0 : index
      %15 = vector.load %arg5[%c0_12, %c0_13] : memref<1x128xf32, #tpu.memory_space<vmem>>, vector<1x128xf32>
      %16 = vector.broadcast %15 : vector<1x128xf32> to vector<32x128xf32>
      %17 = arith.addf %14, %16 : vector<32x128xf32>
      %cst_14 = arith.constant 0.000000e+00 : f32
      %18 = vector.broadcast %cst_14 : f32 to vector<32x128xf32>
      %19 = arith.cmpf oge, %17, %18 : vector<32x128xf32>
      %cst_15 = arith.constant 2.000000e-01 : f32
      %20 = vector.broadcast %cst_15 : f32 to vector<32x128xf32>
      %21 = arith.mulf %20, %17 : vector<32x128xf32>
      %22 = arith.select %19, %17, %21 : vector<32x128xi1>, vector<32x128xf32>
      %cst_16 = arith.constant 1.41421354 : f32
      %23 = vector.broadcast %cst_16 : f32 to vector<32x128xf32>
      %24 = arith.mulf %22, %23 : vector<32x128xf32>
      %cst_17 = arith.constant 1.000000e+00 : f32
      %25 = vector.broadcast %cst_17 : f32 to vector<32x128xf32>
      %26 = arith.mulf %24, %25 : vector<32x128xf32>
      %c0_18 = arith.constant 0 : index
      %c0_19 = arith.constant 0 : index
      %27 = vector.load %arg6[%c0_18, %c0_19] : memref<32x128xf32, #tpu.memory_space<vmem>>, vector<32x128xf32>
      %28 = arith.addf %26, %27 : vector<32x128xf32>
      %cst_20 = arith.constant 0.707106769 : f32
      %29 = vector.broadcast %cst_20 : f32 to vector<32x128xf32>
      %30 = arith.mulf %28, %29 : vector<32x128xf32>
      %c0_21 = arith.constant 0 : index
      %c0_22 = arith.constant 0 : index
      %31 = vector.load %arg7[%c0_21, %c0_22] : memref<32x128xf32, #tpu.memory_space<vmem>>, vector<32x128xf32>
      tpu.vector_store %arg7[%c0_21, %c0_22], %30 {strides = array<i32>} : memref<32x128xf32, #tpu.memory_space<vmem>>, vector<32x128xf32>,
    } else {
    }
    return
  }
  func.func @transform_0(%arg0: i32, %arg1: i32, %arg2: i32) -> (i32, i32) {
    %c0_i32 = arith.constant 0 : i32
    return %arg0, %arg2 : i32, i32
  }
  func.func @transform_1(%arg0: i32, %arg1: i32, %arg2: i32) -> (i32, i32) {
    %c0_i32 = arith.constant 0 : i32
    return %arg2, %arg1 : i32, i32
  }
  func.func @transform_2(%arg0: i32, %arg1: i32, %arg2: i32) -> (i32, i32) {
    %c0_i32 = arith.constant 0 : i32
    %c0_i32_0 = arith.constant 0 : i32
    return %c0_i32, %arg1 : i32, i32
  }
  func.func @transform_3(%arg0: i32, %arg1: i32, %arg2: i32) -> (i32, i32) {
    %c0_i32 = arith.constant 0 : i32
    return %arg0, %arg1 : i32, i32
  }
  func.func @transform_4(%arg0: i32, %arg1: i32, %arg2: i32) -> (i32, i32) {
    %c0_i32 = arith.constant 0 : i32
    return %arg0, %arg1 : i32, i32
  }
}

module attributes {stable_mosaic.version = 11 : i64} {
  func.func @kernel(%arg0: i32, %arg1: i32, %arg2: i32, %arg3: memref<32x128xbf16, #tpu.memory_space<vmem>>, %arg4: memref<128x128xbf16, #tpu.memory_space<vmem>>, %arg5: memref<1x128xf32, #tpu.memory_space<vmem>>, %arg6: memref<32x128xf32, #tpu.memory_space<vmem>>, %arg7: memref<32x128xf32, #tpu.memory_space<vmem>>) attributes {dimension_semantics = [#tpu.dimension_semantics<parallel>, #tpu.dimension_semantics<parallel>, #tpu.dimension_semantics<arbitrary>], iteration_bounds = array<i64: 1, 1, 1>, scalar_prefetch = 0 : i64, scratch_operands = 1 : i64, tpu.core_type = #tpu.core_type<tc>, window_params = [{transform_indices = @transform_0, window_bounds = array<i64: 32, 128>}, {transform_indices = @transform_1, window_bounds = array<i64: 128, 128>}, {transform_indices = @transform_2, window_bounds = array<i64: 1, 128>}, {transform_indices = @transform_3, window_bounds = array<i64: 32, 128>}]} {
    %c0_i32 = arith.constant 0 : i32
    %0 = arith.cmpi eq, %arg2, %c0_i32 : i32
    %1 = arith.extui %0 : i1 to i32
    %c0_i32_0 = arith.constant 0 : i32
    %2 = arith.cmpi ne, %1, %c0_i32_0 : i32
    scf.if %2 {
      %cst_10 = arith.constant 0.000000e+00 : f32
      %12 = vector.broadcast %cst_10 : f32 to vector<32x128xf32>
      %c0_11 = arith.constant 0 : index
      %c0_12 = arith.constant 0 : index
      %13 = vector.load %arg7[%c0_11, %c0_12] : memref<32x128xf32, #tpu.memory_space<vmem>>, vector<32x128xf32>
      tpu.vector_store %arg7[%c0_11, %c0_12], %12 {strides = array<i32>} : memref<32x128xf32, #tpu.memory_space<vmem>>, vector<32x128xf32>,
    } else {
    }
    %c0 = arith.constant 0 : index
    %c0_1 = arith.constant 0 : index
    %3 = vector.load %arg7[%c0, %c0_1] : memref<32x128xf32, #tpu.memory_space<vmem>>, vector<32x128xf32>
    %c0_2 = arith.constant 0 : index
    %c0_3 = arith.constant 0 : index
    %4 = vector.load %arg3[%c0_2, %c0_3] : memref<32x128xbf16, #tpu.memory_space<vmem>>, vector<32x128xbf16>
    %c0_4 = arith.constant 0 : index
    %c0_5 = arith.constant 0 : index
    %5 = vector.load %arg4[%c0_4, %c0_5] : memref<128x128xbf16, #tpu.memory_space<vmem>>, vector<128x128xbf16>
    %cst = arith.constant dense<0.000000e+00> : vector<32x128xf32>
    %6 = tpu.matmul %4, %5, %cst {dimension_numbers = #tpu.dot_dimension_numbers<[1], [0], [0], [1], [0, 0, 1, 1], [], []>} : vector<32x128xbf16>, vector<128x128xbf16>, vector<32x128xf32> -> vector<32x128xf32>
    %7 = arith.addf %3, %6 : vector<32x128xf32>
    %c0_6 = arith.constant 0 : index
    %c0_7 = arith.constant 0 : index
    %8 = vector.load %arg7[%c0_6, %c0_7] : memref<32x128xf32, #tpu.memory_space<vmem>>, vector<32x128xf32>
    tpu.vector_store %arg7[%c0_6, %c0_7], %7 {strides = array<i32>} : memref<32x128xf32, #tpu.memory_space<vmem>>, vector<32x128xf32>,
    %c0_i32_8 = arith.constant 0 : i32
    %9 = arith.cmpi eq, %arg2, %c0_i32_8 : i32
    %10 = arith.extui %9 : i1 to i32
    %c0_i32_9 = arith.constant 0 : i32
    %11 = arith.cmpi ne, %10, %c0_i32_9 : i32
    scf.if %11 {
      %c0_10 = arith.constant 0 : index
      %c0_11 = arith.constant 0 : index
      %12 = vector.load %arg7[%c0_10, %c0_11] : memref<32x128xf32, #tpu.memory_space<vmem>>, vector<32x128xf32>
      %cst_12 = arith.constant 0.176776692 : f32
      %13 = vector.broadcast %cst_12 : f32 to vector<32x128xf32>
      %14 = arith.mulf %12, %13 : vector<32x128xf32>
      %c0_13 = arith.constant 0 : index
      %c0_14 = arith.constant 0 : index
      %15 = vector.load %arg5[%c0_13, %c0_14] : memref<1x128xf32, #tpu.memory_space<vmem>>, vector<1x128xf32>
      %16 = vector.broadcast %15 : vector<1x128xf32> to vector<32x128xf32>
      %17 = arith.addf %14, %16 : vector<32x128xf32>
      %c0_15 = arith.constant 0 : index
      %c0_16 = arith.constant 0 : index
      %18 = vector.load %arg6[%c0_15, %c0_16] : memref<32x128xf32, #tpu.memory_space<vmem>>, vector<32x128xf32>
      tpu.vector_store %arg6[%c0_15, %c0_16], %17 {strides = array<i32>} : memref<32x128xf32, #tpu.memory_space<vmem>>, vector<32x128xf32>,
    } else {
    }
    return
  }
  func.func @transform_0(%arg0: i32, %arg1: i32, %arg2: i32) -> (i32, i32) {
    %c0_i32 = arith.constant 0 : i32
    return %arg0, %arg2 : i32, i32
  }
  func.func @transform_1(%arg0: i32, %arg1: i32, %arg2: i32) -> (i32, i32) {
    %c0_i32 = arith.constant 0 : i32
    return %arg2, %arg1 : i32, i32
  }
  func.func @transform_2(%arg0: i32, %arg1: i32, %arg2: i32) -> (i32, i32) {
    %c0_i32 = arith.constant 0 : i32
    %c0_i32_0 = arith.constant 0 : i32
    return %c0_i32, %arg1 : i32, i32
  }
  func.func @transform_3(%arg0: i32, %arg1: i32, %arg2: i32) -> (i32, i32) {
    %c0_i32 = arith.constant 0 : i32
    return %arg0, %arg1 : i32, i32
  }
}

module attributes {stable_mosaic.version = 11 : i64} {
  func.func @kernel(%arg0: i32, %arg1: i32, %arg2: i32, %arg3: memref<32x384xbf16, #tpu.memory_space<vmem>>, %arg4: memref<384x128xbf16, #tpu.memory_space<vmem>>, %arg5: memref<1x128xf32, #tpu.memory_space<vmem>>, %arg6: memref<32x128xf32, #tpu.memory_space<vmem>>, %arg7: memref<32x128xf32, #tpu.memory_space<vmem>>) attributes {dimension_semantics = [#tpu.dimension_semantics<parallel>, #tpu.dimension_semantics<parallel>, #tpu.dimension_semantics<arbitrary>], iteration_bounds = array<i64: 1, 1, 3>, scalar_prefetch = 0 : i64, scratch_operands = 1 : i64, tpu.core_type = #tpu.core_type<tc>, window_params = [{transform_indices = @transform_0, window_bounds = array<i64: 32, 384>}, {transform_indices = @transform_1, window_bounds = array<i64: 384, 128>}, {transform_indices = @transform_2, window_bounds = array<i64: 1, 128>}, {transform_indices = @transform_3, window_bounds = array<i64: 32, 128>}]} {
    %c0_i32 = arith.constant 0 : i32
    %0 = arith.cmpi eq, %arg2, %c0_i32 : i32
    %1 = arith.extui %0 : i1 to i32
    %c0_i32_0 = arith.constant 0 : i32
    %2 = arith.cmpi ne, %1, %c0_i32_0 : i32
    scf.if %2 {
      %cst_9 = arith.constant 0.000000e+00 : f32
      %12 = vector.broadcast %cst_9 : f32 to vector<32x128xf32>
      %c0_10 = arith.constant 0 : index
      %c0_11 = arith.constant 0 : index
      %13 = vector.load %arg7[%c0_10, %c0_11] : memref<32x128xf32, #tpu.memory_space<vmem>>, vector<32x128xf32>
      tpu.vector_store %arg7[%c0_10, %c0_11], %12 {strides = array<i32>} : memref<32x128xf32, #tpu.memory_space<vmem>>, vector<32x128xf32>,
    } else {
    }
    %c0 = arith.constant 0 : index
    %c0_1 = arith.constant 0 : index
    %3 = vector.load %arg7[%c0, %c0_1] : memref<32x128xf32, #tpu.memory_space<vmem>>, vector<32x128xf32>
    %c0_2 = arith.constant 0 : index
    %c0_3 = arith.constant 0 : index
    %4 = vector.load %arg3[%c0_2, %c0_3] : memref<32x384xbf16, #tpu.memory_space<vmem>>, vector<32x384xbf16>
    %c0_4 = arith.constant 0 : index
    %c0_5 = arith.constant 0 : index
    %5 = vector.load %arg4[%c0_4, %c0_5] : memref<384x128xbf16, #tpu.memory_space<vmem>>, vector<384x128xbf16>
    %cst = arith.constant dense<0.000000e+00> : vector<32x128xf32>
    %6 = tpu.matmul %4, %5, %cst {dimension_numbers = #tpu.dot_dimension_numbers<[1], [0], [0], [1], [0, 0, 1, 1], [], []>} : vector<32x384xbf16>, vector<384x128xbf16>, vector<32x128xf32> -> vector<32x128xf32>
    %7 = arith.addf %3, %6 : vector<32x128xf32>
    %c0_6 = arith.constant 0 : index
    %c0_7 = arith.constant 0 : index
    %8 = vector.load %arg7[%c0_6, %c0_7] : memref<32x128xf32, #tpu.memory_space<vmem>>, vector<32x128xf32>
    tpu.vector_store %arg7[%c0_6, %c0_7], %7 {strides = array<i32>} : memref<32x128xf32, #tpu.memory_space<vmem>>, vector<32x128xf32>,
    %c2_i32 = arith.constant 2 : i32
    %9 = arith.cmpi eq, %arg2, %c2_i32 : i32
    %10 = arith.extui %9 : i1 to i32
    %c0_i32_8 = arith.constant 0 : i32
    %11 = arith.cmpi ne, %10, %c0_i32_8 : i32
    scf.if %11 {
      %c0_9 = arith.constant 0 : index
      %c0_10 = arith.constant 0 : index
      %12 = vector.load %arg7[%c0_9, %c0_10] : memref<32x128xf32, #tpu.memory_space<vmem>>, vector<32x128xf32>
      %cst_11 = arith.constant 0.0416666679 : f32
      %13 = vector.broadcast %cst_11 : f32 to vector<32x128xf32>
      %14 = arith.mulf %12, %13 : vector<32x128xf32>
      %c0_12 = arith.constant 0 : index
      %c0_13 = arith.constant 0 : index
      %15 = vector.load %arg5[%c0_12, %c0_13] : memref<1x128xf32, #tpu.memory_space<vmem>>, vector<1x128xf32>
      %16 = vector.broadcast %15 : vector<1x128xf32> to vector<32x128xf32>
      %17 = arith.addf %14, %16 : vector<32x128xf32>
      %cst_14 = arith.constant 0.000000e+00 : f32
      %18 = vector.broadcast %cst_14 : f32 to vector<32x128xf32>
      %19 = arith.cmpf oge, %17, %18 : vector<32x128xf32>
      %cst_15 = arith.constant 2.000000e-01 : f32
      %20 = vector.broadcast %cst_15 : f32 to vector<32x128xf32>
      %21 = arith.mulf %20, %17 : vector<32x128xf32>
      %22 = arith.select %19, %17, %21 : vector<32x128xi1>, vector<32x128xf32>
      %cst_16 = arith.constant 1.41421354 : f32
      %23 = vector.broadcast %cst_16 : f32 to vector<32x128xf32>
      %24 = arith.mulf %22, %23 : vector<32x128xf32>
      %c0_17 = arith.constant 0 : index
      %c0_18 = arith.constant 0 : index
      %25 = vector.load %arg6[%c0_17, %c0_18] : memref<32x128xf32, #tpu.memory_space<vmem>>, vector<32x128xf32>
      tpu.vector_store %arg6[%c0_17, %c0_18], %24 {strides = array<i32>} : memref<32x128xf32, #tpu.memory_space<vmem>>, vector<32x128xf32>,
    } else {
    }
    return
  }
  func.func @transform_0(%arg0: i32, %arg1: i32, %arg2: i32) -> (i32, i32) {
    %c0_i32 = arith.constant 0 : i32
    return %arg0, %arg2 : i32, i32
  }
  func.func @transform_1(%arg0: i32, %arg1: i32, %arg2: i32) -> (i32, i32) {
    %c0_i32 = arith.constant 0 : i32
    return %arg2, %arg1 : i32, i32
  }
  func.func @transform_2(%arg0: i32, %arg1: i32, %arg2: i32) -> (i32, i32) {
    %c0_i32 = arith.constant 0 : i32
    %c0_i32_0 = arith.constant 0 : i32
    return %c0_i32, %arg1 : i32, i32
  }
  func.func @transform_3(%arg0: i32, %arg1: i32, %arg2: i32) -> (i32, i32) {
    %c0_i32 = arith.constant 0 : i32
    return %arg0, %arg1 : i32, i32
  }
}

module attributes {stable_mosaic.version = 11 : i64} {
  func.func @kernel(%arg0: i32, %arg1: i32, %arg2: i32, %arg3: memref<8x128xbf16, #tpu.memory_space<vmem>>, %arg4: memref<128x128xbf16, #tpu.memory_space<vmem>>, %arg5: memref<1x128xf32, #tpu.memory_space<vmem>>, %arg6: memref<8x128xf32, #tpu.memory_space<vmem>>, %arg7: memref<8x128xf32, #tpu.memory_space<vmem>>) attributes {dimension_semantics = [#tpu.dimension_semantics<parallel>, #tpu.dimension_semantics<parallel>, #tpu.dimension_semantics<arbitrary>], iteration_bounds = array<i64: 1, 1, 1>, scalar_prefetch = 0 : i64, scratch_operands = 1 : i64, tpu.core_type = #tpu.core_type<tc>, window_params = [{transform_indices = @transform_0, window_bounds = array<i64: 8, 128>}, {transform_indices = @transform_1, window_bounds = array<i64: 128, 128>}, {transform_indices = @transform_2, window_bounds = array<i64: 1, 128>}, {transform_indices = @transform_3, window_bounds = array<i64: 8, 128>}]} {
    %c0_i32 = arith.constant 0 : i32
    %0 = arith.cmpi eq, %arg2, %c0_i32 : i32
    %1 = arith.extui %0 : i1 to i32
    %c0_i32_0 = arith.constant 0 : i32
    %2 = arith.cmpi ne, %1, %c0_i32_0 : i32
    scf.if %2 {
      %cst_10 = arith.constant 0.000000e+00 : f32
      %12 = vector.broadcast %cst_10 : f32 to vector<8x128xf32>
      %c0_11 = arith.constant 0 : index
      %c0_12 = arith.constant 0 : index
      %13 = vector.load %arg7[%c0_11, %c0_12] : memref<8x128xf32, #tpu.memory_space<vmem>>, vector<8x128xf32>
      tpu.vector_store %arg7[%c0_11, %c0_12], %12 {strides = array<i32>} : memref<8x128xf32, #tpu.memory_space<vmem>>, vector<8x128xf32>,
    } else {
    }
    %c0 = arith.constant 0 : index
    %c0_1 = arith.constant 0 : index
    %3 = vector.load %arg7[%c0, %c0_1] : memref<8x128xf32, #tpu.memory_space<vmem>>, vector<8x128xf32>
    %c0_2 = arith.constant 0 : index
    %c0_3 = arith.constant 0 : index
    %4 = vector.load %arg3[%c0_2, %c0_3] : memref<8x128xbf16, #tpu.memory_space<vmem>>, vector<8x128xbf16>
    %c0_4 = arith.constant 0 : index
    %c0_5 = arith.constant 0 : index
    %5 = vector.load %arg4[%c0_4, %c0_5] : memref<128x128xbf16, #tpu.memory_space<vmem>>, vector<128x128xbf16>
    %cst = arith.constant dense<0.000000e+00> : vector<8x128xf32>
    %6 = tpu.matmul %4, %5, %cst {dimension_numbers = #tpu.dot_dimension_numbers<[1], [0], [0], [1], [0, 0, 1, 1], [], []>} : vector<8x128xbf16>, vector<128x128xbf16>, vector<8x128xf32> -> vector<8x128xf32>
    %7 = arith.addf %3, %6 : vector<8x128xf32>
    %c0_6 = arith.constant 0 : index
    %c0_7 = arith.constant 0 : index
    %8 = vector.load %arg7[%c0_6, %c0_7] : memref<8x128xf32, #tpu.memory_space<vmem>>, vector<8x128xf32>
    tpu.vector_store %arg7[%c0_6, %c0_7], %7 {strides = array<i32>} : memref<8x128xf32, #tpu.memory_space<vmem>>, vector<8x128xf32>,
    %c0_i32_8 = arith.constant 0 : i32
    %9 = arith.cmpi eq, %arg2, %c0_i32_8 : i32
    %10 = arith.extui %9 : i1 to i32
    %c0_i32_9 = arith.constant 0 : i32
    %11 = arith.cmpi ne, %10, %c0_i32_9 : i32
    scf.if %11 {
      %c0_10 = arith.constant 0 : index
      %c0_11 = arith.constant 0 : index
      %12 = vector.load %arg7[%c0_10, %c0_11] : memref<8x128xf32, #tpu.memory_space<vmem>>, vector<8x128xf32>
      %cst_12 = arith.constant 1.250000e-01 : f32
      %13 = vector.broadcast %cst_12 : f32 to vector<8x128xf32>
      %14 = arith.mulf %12, %13 : vector<8x128xf32>
      %c0_13 = arith.constant 0 : index
      %c0_14 = arith.constant 0 : index
      %15 = vector.load %arg5[%c0_13, %c0_14] : memref<1x128xf32, #tpu.memory_space<vmem>>, vector<1x128xf32>
      %16 = vector.broadcast %15 : vector<1x128xf32> to vector<8x128xf32>
      %17 = arith.addf %14, %16 : vector<8x128xf32>
      %c0_15 = arith.constant 0 : index
      %c0_16 = arith.constant 0 : index
      %18 = vector.load %arg6[%c0_15, %c0_16] : memref<8x128xf32, #tpu.memory_space<vmem>>, vector<8x128xf32>
      tpu.vector_store %arg6[%c0_15, %c0_16], %17 {strides = array<i32>} : memref<8x128xf32, #tpu.memory_space<vmem>>, vector<8x128xf32>,
    } else {
    }
    return
  }
  func.func @transform_0(%arg0: i32, %arg1: i32, %arg2: i32) -> (i32, i32) {
    %c0_i32 = arith.constant 0 : i32
    return %arg0, %arg2 : i32, i32
  }
  func.func @transform_1(%arg0: i32, %arg1: i32, %arg2: i32) -> (i32, i32) {
    %c0_i32 = arith.constant 0 : i32
    return %arg2, %arg1 : i32, i32
  }
  func.func @transform_2(%arg0: i32, %arg1: i32, %arg2: i32) -> (i32, i32) {
    %c0_i32 = arith.constant 0 : i32
    %c0_i32_0 = arith.constant 0 : i32
    return %c0_i32, %arg1 : i32, i32
  }
  func.func @transform_3(%arg0: i32, %arg1: i32, %arg2: i32) -> (i32, i32) {
    %c0_i32 = arith.constant 0 : i32
    return %arg0, %arg1 : i32, i32
  }
}

module attributes {stable_mosaic.version = 11 : i64} {
  func.func @kernel(%arg0: i32, %arg1: i32, %arg2: i32, %arg3: memref<8x1024xbf16, #tpu.memory_space<vmem>>, %arg4: memref<1024x128xbf16, #tpu.memory_space<vmem>>, %arg5: memref<1x128xf32, #tpu.memory_space<vmem>>, %arg6: memref<8x128xf32, #tpu.memory_space<vmem>>, %arg7: memref<8x128xf32, #tpu.memory_space<vmem>>) attributes {dimension_semantics = [#tpu.dimension_semantics<parallel>, #tpu.dimension_semantics<parallel>, #tpu.dimension_semantics<arbitrary>], iteration_bounds = array<i64: 1, 1, 2>, scalar_prefetch = 0 : i64, scratch_operands = 1 : i64, tpu.core_type = #tpu.core_type<tc>, window_params = [{transform_indices = @transform_0, window_bounds = array<i64: 8, 1024>}, {transform_indices = @transform_1, window_bounds = array<i64: 1024, 128>}, {transform_indices = @transform_2, window_bounds = array<i64: 1, 128>}, {transform_indices = @transform_3, window_bounds = array<i64: 8, 128>}]} {
    %c0_i32 = arith.constant 0 : i32
    %0 = arith.cmpi eq, %arg2, %c0_i32 : i32
    %1 = arith.extui %0 : i1 to i32
    %c0_i32_0 = arith.constant 0 : i32
    %2 = arith.cmpi ne, %1, %c0_i32_0 : i32
    scf.if %2 {
      %cst_9 = arith.constant 0.000000e+00 : f32
      %12 = vector.broadcast %cst_9 : f32 to vector<8x128xf32>
      %c0_10 = arith.constant 0 : index
      %c0_11 = arith.constant 0 : index
      %13 = vector.load %arg7[%c0_10, %c0_11] : memref<8x128xf32, #tpu.memory_space<vmem>>, vector<8x128xf32>
      tpu.vector_store %arg7[%c0_10, %c0_11], %12 {strides = array<i32>} : memref<8x128xf32, #tpu.memory_space<vmem>>, vector<8x128xf32>,
    } else {
    }
    %c0 = arith.constant 0 : index
    %c0_1 = arith.constant 0 : index
    %3 = vector.load %arg7[%c0, %c0_1] : memref<8x128xf32, #tpu.memory_space<vmem>>, vector<8x128xf32>
    %c0_2 = arith.constant 0 : index
    %c0_3 = arith.constant 0 : index
    %4 = vector.load %arg3[%c0_2, %c0_3] : memref<8x1024xbf16, #tpu.memory_space<vmem>>, vector<8x1024xbf16>
    %c0_4 = arith.constant 0 : index
    %c0_5 = arith.constant 0 : index
    %5 = vector.load %arg4[%c0_4, %c0_5] : memref<1024x128xbf16, #tpu.memory_space<vmem>>, vector<1024x128xbf16>
    %cst = arith.constant dense<0.000000e+00> : vector<8x128xf32>
    %6 = tpu.matmul %4, %5, %cst {dimension_numbers = #tpu.dot_dimension_numbers<[1], [0], [0], [1], [0, 0, 1, 1], [], []>} : vector<8x1024xbf16>, vector<1024x128xbf16>, vector<8x128xf32> -> vector<8x128xf32>
    %7 = arith.addf %3, %6 : vector<8x128xf32>
    %c0_6 = arith.constant 0 : index
    %c0_7 = arith.constant 0 : index
    %8 = vector.load %arg7[%c0_6, %c0_7] : memref<8x128xf32, #tpu.memory_space<vmem>>, vector<8x128xf32>
    tpu.vector_store %arg7[%c0_6, %c0_7], %7 {strides = array<i32>} : memref<8x128xf32, #tpu.memory_space<vmem>>, vector<8x128xf32>,
    %c1_i32 = arith.constant 1 : i32
    %9 = arith.cmpi eq, %arg2, %c1_i32 : i32
    %10 = arith.extui %9 : i1 to i32
    %c0_i32_8 = arith.constant 0 : i32
    %11 = arith.cmpi ne, %10, %c0_i32_8 : i32
    scf.if %11 {
      %c0_9 = arith.constant 0 : index
      %c0_10 = arith.constant 0 : index
      %12 = vector.load %arg7[%c0_9, %c0_10] : memref<8x128xf32, #tpu.memory_space<vmem>>, vector<8x128xf32>
      %cst_11 = arith.constant 3.125000e-02 : f32
      %13 = vector.broadcast %cst_11 : f32 to vector<8x128xf32>
      %14 = arith.mulf %12, %13 : vector<8x128xf32>
      %c0_12 = arith.constant 0 : index
      %c0_13 = arith.constant 0 : index
      %15 = vector.load %arg5[%c0_12, %c0_13] : memref<1x128xf32, #tpu.memory_space<vmem>>, vector<1x128xf32>
      %16 = vector.broadcast %15 : vector<1x128xf32> to vector<8x128xf32>
      %17 = arith.addf %14, %16 : vector<8x128xf32>
      %cst_14 = arith.constant 0.000000e+00 : f32
      %18 = vector.broadcast %cst_14 : f32 to vector<8x128xf32>
      %19 = arith.cmpf oge, %17, %18 : vector<8x128xf32>
      %cst_15 = arith.constant 2.000000e-01 : f32
      %20 = vector.broadcast %cst_15 : f32 to vector<8x128xf32>
      %21 = arith.mulf %20, %17 : vector<8x128xf32>
      %22 = arith.select %19, %17, %21 : vector<8x128xi1>, vector<8x128xf32>
      %cst_16 = arith.constant 1.41421354 : f32
      %23 = vector.broadcast %cst_16 : f32 to vector<8x128xf32>
      %24 = arith.mulf %22, %23 : vector<8x128xf32>
      %c0_17 = arith.constant 0 : index
      %c0_18 = arith.constant 0 : index
      %25 = vector.load %arg6[%c0_17, %c0_18] : memref<8x128xf32, #tpu.memory_space<vmem>>, vector<8x128xf32>
      tpu.vector_store %arg6[%c0_17, %c0_18], %24 {strides = array<i32>} : memref<8x128xf32, #tpu.memory_space<vmem>>, vector<8x128xf32>,
    } else {
    }
    return
  }
  func.func @transform_0(%arg0: i32, %arg1: i32, %arg2: i32) -> (i32, i32) {
    %c0_i32 = arith.constant 0 : i32
    return %arg0, %arg2 : i32, i32
  }
  func.func @transform_1(%arg0: i32, %arg1: i32, %arg2: i32) -> (i32, i32) {
    %c0_i32 = arith.constant 0 : i32
    return %arg2, %arg1 : i32, i32
  }
  func.func @transform_2(%arg0: i32, %arg1: i32, %arg2: i32) -> (i32, i32) {
    %c0_i32 = arith.constant 0 : i32
    %c0_i32_0 = arith.constant 0 : i32
    return %c0_i32, %arg1 : i32, i32
  }
  func.func @transform_3(%arg0: i32, %arg1: i32, %arg2: i32) -> (i32, i32) {
    %c0_i32 = arith.constant 0 : i32
    return %arg0, %arg1 : i32, i32
  }
}

</mosaic_0001>

<bundles_post_ra>
// kernel: _lambda_.14
= control target key start
LH: loop header
LB: loop body
LE: loop exit
PB: predicated region body
PF: predicated region fallthrough
CT: control target
= control target key end

     0   :  { %8 = vsyncpa [#allocation4], 0  ;;  %s1381_s12 = smov 0   ;;  %s1383_s13 = smov 0   ;;  %s1564_s0 = inlined_call_operand.vmem [shape: bf16[512,128], index: 0, kind: input, shape index: {}]   ;;  %s1565_s1 = inlined_call_operand.hbm [shape: bf16[128,128], index: 1, kind: input, shape index: {}]   ;;  %s1566_s2 = inlined_call_operand.vmem [shape: f32[1,128], index: 2, kind: input, shape index: {}]   ;;  %s1567_s3 = inlined_call_operand.vmem [shape: f32[512,128], index: 3, kind: output, shape index: {}]  }
   0x1   :  { %s1385_s14 = smov 0  }
   0x2 LB: > { %s1114_s15 = sadd.s32 4294967295, %s1356_s14   ;;  %s33_s16 = sadd.s32 1, %s1352_s13  ;;  %s1356_s14 = sphi %s1385_s14, %s14_s14   ;;  %s1352_s13 = sphi %s1383_s13, %s1577_s13   ;;  %s1348_s12 = sphi %s1381_s12, %s1576_s12  }
   0x3   : > { %p35_p0 = scmp.ge.s32.totalorder %s33_s16, 2  ;;  %p1116_p1 = scmp.ge.s32.totalorder %s1356_s14, 1 }
   0x4   : > { %p148_p2 = scmp.lt.s32.totalorder %s1356_s14, 3  ;;  %p1406_p4 = scmp.eq.s32.totalorder %s1114_s15, 0 }
   0x5   : > { %s1579_s16 = smov (%p35_p0, %s33_s16), 0  ;;  %s1358_s19 = smov [#allocation3]  }
   0x6   : > { %p1402_p3 = pnand %p1116_p1, %p148_p2  ;;  %s164_s20 = sshll.u32 %s1358_s19, 4  ;;  %s165_s20 = int_to_ptr.vmem [resolvable:$true] %s164_s20 }
   0x7   : > { %s1572_s18 = scalar_select %p1406_p4, 1, 0 }
   0x8   : > { %s1571_s17 = scalar_select %p1402_p3, 1, 0 }
   0x9   : > { %p1245_p5 = pneg %p1402_p3  ;;  %s1302_s24 = scalar_lea.hbm %s1565_s1, 1024 }
   0xa   : > { %p1303_p7 = scmp.ne.s32.totalorder %s1565_s1, %s1302_s24  ;;  %p1309_p11 = scmp.lt.u32.totalorder %s1302_s24, %s1565_s1 }
   0xb   : > { %p1414_p6 = pnand %p1406_p4, %p1245_p5 }
   0xd   : > { %p1304_p8 = pneg %p1414_p6 }
   0xf   : > { %p1305_p9 = pnand %p1304_p8, %p1303_p7 }
  0x11   : > { %p1306_p10 = pneg %p1305_p9 }
  0x13   : > { %p1311_p12 = pnand %p1309_p11, %p1306_p10 }
  0x15   : > { %1314 = shalt.err (!%p1311_p12)
}
  0x16   : > { %s1315_s29 = scalar_lea.vmem %s165_s20, 1024  ;;  %p1323_p2 = scmp.lt.s32.totalorder %s165_s20, %s165_s20 }
  0x17   : > { %p1316_p13 = scmp.ne.s32.totalorder %s165_s20, %s1315_s29  ;;  %p1324_p5 = scmp.lt.s32.totalorder %s1315_s29, %s1315_s29 }
  0x19   : > { %p1318_p0 = pnand %p1316_p13, %p1304_p8  ;;  %p1325_p4 = por %p1324_p5, %p1323_p2 }
  0x1b   : > { %p1319_p1 = pneg %p1318_p0 }
  0x1d   : > { %p1326_p3 = pnand %p1325_p4, %p1319_p1 }
  0x1f   : > { %1329 = shalt.err (!%p1326_p3)
}
  0x20   : > { %s1359_s30 = smov 64   ;;  %s1360_s4 = smov 4  }
  0x21   : > { %1248 = dma.hbm_to_vmem [thread:$0]  (!%p1414_p6), %s1565_s1, 1024, %s165_s20, [#allocation4], %s1359_s30, %s1359_s30, %s1360_s4  }
  0x22   : > { %p1574_p7 = scmp.ne.s32.totalorder %s1571_s17, 0 }
  0x23   : > { %p1575_p9 = scmp.ne.s32.totalorder (!%p1574_p7), %s1572_s18, 0 }
  0x24   : > { %198 = sbr.rel (%p1574_p7) target bundleno = 348 (0x15c), region = 32 }
  0x2b   : > { %1343 = dma.done.wait (%p1575_p9), [#allocation4], 1024  }
  0x2c   : > { %1345 = vsyncadd (%p1575_p9), [#allocation4], 4294966272  ;;  %s1122_s7 = sshll.u32 %s1348_s12, 5  ;;  %v1278_v0 = vld [vmem:[#allocation3] sm:$0xff]   ;;  %v1279_v1 = vld [vmem:[#allocation3 + $0x8] sm:$0xff]  }
  0x2d   : > { %p232_p3 = scmp.lt.s32.totalorder %s1122_s7, 63  ;;  %1177 = vmatprep.subr.bf16.mxu0 %v1278_v0  ;;  %1225 = vmatprep.subr.bf16.mxu1 %v1278_v0  ;;  %v1280_v2 = vld [vmem:[#allocation3 + $0x10] sm:$0xff]   ;;  %v1281_v3 = vld [vmem:[#allocation3 + $0x18] sm:$0xff]   ;;  %v1282_v6 = vld [vmem:[#allocation3 + $0x20] sm:$0xff]  }
  0x2e   : > { %1178 = vmatpush3.bf16.msra.mxu0 %v1278_v0  ;;  %1233 = vmatpush3.bf16.msra.mxu1 %v1278_v0  ;;  %v1283_v7 = vld [vmem:[#allocation3 + $0x28] sm:$0xff]   ;;  %v1284_v8 = vld [vmem:[#allocation3 + $0x30] sm:$0xff]   ;;  %v1285_v9 = vld [vmem:[#allocation3 + $0x38] sm:$0xff]  }
  0x2f   : > { %s1581_s7 = smov (!%p232_p3, %s1122_s7), 63  ;;  %1179 = vmatprep.subr.bf16.mxu0 %v1279_v1  ;;  %1226 = vmatprep.subr.bf16.mxu1 %v1279_v1  ;;  %v1468_v25 = vld [vmem:[%s1566_s2] ss:$0 sm:$0xff] }
  0x30   : > { %s1123_s8 = sshll.u32 %s1581_s7, 2  ;;  %s1125_s17 = sshll.u32 %s1581_s7, 3 }
  0x31   : > { %s1447_s11 = scalar_lea.vmem %s1564_s0, %s1123_s8  ;;  %s1478_s20 = scalar_lea.vmem %s1567_s3, %s1125_s17 }
  0x32   : > { %1180 = vmatpush3.bf16.msra.mxu0 %v1279_v1  ;;  %1234 = vmatpush3.bf16.msra.mxu1 %v1279_v1  ;;  %v1286_v4 = vld [vmem:[%s1447_s11] sm:$0xff]   ;;  %v1288_v10 = vld [vmem:[%s1447_s11 + $0x8] sm:$0xff]   ;;  %v1290_v12 = vld [vmem:[%s1447_s11 + $0x10] sm:$0xff]  }
  0x33   : > { %1181 = vmatprep.subr.bf16.mxu0 %v1280_v2  ;;  %1227 = vmatprep.subr.bf16.mxu1 %v1280_v2  ;;  %v1287_v5 = vld [vmem:[%s1447_s11 + $0x40] sm:$0xff]   ;;  %v1289_v11 = vld [vmem:[%s1447_s11 + $0x48] sm:$0xff]   ;;  %v1291_v13 = vld [vmem:[%s1447_s11 + $0x50] sm:$0xff]  }
  0x34   : > { %1193 = vmatprep.mubr.bf16.mxu0 %v1286_v4  ;;  %1209 = vmatprep.mubr.bf16.mxu1 %v1287_v5  ;;  %v1292_v14 = vld [vmem:[%s1447_s11 + $0x18] sm:$0xff]   ;;  %v1294_v16 = vld [vmem:[%s1447_s11 + $0x20] sm:$0xff]   ;;  %v1296_v18 = vld [vmem:[%s1447_s11 + $0x28] sm:$0xff]  }
  0x35   : > { %v1293_v15 = vld [vmem:[%s1447_s11 + $0x58] sm:$0xff]   ;;  %v1295_v17 = vld [vmem:[%s1447_s11 + $0x60] sm:$0xff]   ;;  %v1297_v19 = vld [vmem:[%s1447_s11 + $0x68] sm:$0xff]  }
  0x36   : > { %1182 = vmatpush3.bf16.msra.mxu0 %v1280_v2  ;;  %1235 = vmatpush3.bf16.msra.mxu1 %v1280_v2  ;;  %v1298_v20 = vld [vmem:[%s1447_s11 + $0x30] sm:$0xff]   ;;  %v1300_v22 = vld [vmem:[%s1447_s11 + $0x38] sm:$0xff]  }
  0x37   : > { %1183 = vmatprep.subr.bf16.mxu0 %v1281_v3  ;;  %1228 = vmatprep.subr.bf16.mxu1 %v1281_v3  ;;  %v1299_v21 = vld [vmem:[%s1447_s11 + $0x70] sm:$0xff]   ;;  %v1301_v23 = vld [vmem:[%s1447_s11 + $0x78] sm:$0xff]  }
  0x3a   : > { %1184 = vmatpush3.bf16.msra.mxu0 %v1281_v3  ;;  %1236 = vmatpush3.bf16.msra.mxu1 %v1281_v3 }
  0x3b   : > { %1185 = vmatprep.subr.bf16.mxu0 %v1282_v6  ;;  %1229 = vmatprep.subr.bf16.mxu1 %v1282_v6 }
  0x3e   : > { %1186 = vmatpush3.bf16.msra.mxu0 %v1282_v6  ;;  %1237 = vmatpush3.bf16.msra.mxu1 %v1282_v6 }
  0x3f   : > { %1187 = vmatprep.subr.bf16.mxu0 %v1283_v7  ;;  %1230 = vmatprep.subr.bf16.mxu1 %v1283_v7 }
  0x42   : > { %1188 = vmatpush3.bf16.msra.mxu0 %v1283_v7  ;;  %1238 = vmatpush3.bf16.msra.mxu1 %v1283_v7 }
  0x43   : > { %1189 = vmatprep.subr.bf16.mxu0 %v1284_v8  ;;  %1231 = vmatprep.subr.bf16.mxu1 %v1284_v8 }
  0x46   : > { %1190 = vmatpush3.bf16.msra.mxu0 %v1284_v8  ;;  %1239 = vmatpush3.bf16.msra.mxu1 %v1284_v8 }
  0x47   : > { %1191 = vmatprep.subr.bf16.mxu0 %v1285_v9  ;;  %1232 = vmatprep.subr.bf16.mxu1 %v1285_v9 }
  0x4a   : > { %1192 = vmatpush3.bf16.msra.mxu0 %v1285_v9  ;;  %1240 = vmatpush3.bf16.msra.mxu1 %v1285_v9 }
  0x4d   : > { %1194 = vmatmul.mubr.bf16.vlgmr.msra.gmra.mrb[0].mxu0 %v1288_v10  ;;  %1210 = vmatmul.mubr.bf16.vlgmr.msra.gmra.mrb[0].mxu1 %v1289_v11 }
  0x4e   : > { %1197 = vmatprep.mubr.bf16.mxu0 %v1290_v12  ;;  %1213 = vmatprep.mubr.bf16.mxu1 %v1291_v13 }
  0x55   : > { %1198 = vmatmul.mubr.bf16.gmra.mrb[4].mxu0 %v1292_v14  ;;  %1214 = vmatmul.mubr.bf16.gmra.mrb[4].mxu1 %v1293_v15 }
  0x56   : > { %1201 = vmatprep.mubr.bf16.mxu0 %v1294_v16  ;;  %1217 = vmatprep.mubr.bf16.mxu1 %v1295_v17 }
  0x5d   : > { %1202 = vmatmul.mubr.bf16.gmra.mrb[8].mxu0 %v1296_v18  ;;  %1218 = vmatmul.mubr.bf16.gmra.mrb[8].mxu1 %v1297_v19 }
  0x5e   : > { %1205 = vmatprep.mubr.bf16.mxu0 %v1298_v20  ;;  %1221 = vmatprep.mubr.bf16.mxu1 %v1299_v21 }
  0x65   : > { %1206 = vmatmul.mubr.bf16.gmra.mrb[12].mxu0 %v1300_v22  ;;  %1222 = vmatmul.mubr.bf16.gmra.mrb[12].mxu1 %v1301_v23 }
 0x120   : > { %v1195_v24 = vpop.f32.mrb[0].mxu0  ;;  %v1211_v26 = vpop.f32.mrb[0].mxu1 }
 0x121   : > { %v776_v27 = vmul.f32 0.57735026, %v1195_v24  ;;  %v792_v28 = vmul.f32 0.57735026, %v1211_v26  ;;  %v548_v29 = vpop.f32.mrb[1].mxu0  ;;  %v612_v30 = vpop.f32.mrb[1].mxu1 }
 0x122   : > { %v774_v31 = vmul.f32 0.57735026, %v548_v29  ;;  %v790_v32 = vmul.f32 0.57735026, %v612_v30  ;;  %v1196_v33 = vpop.f32.mrb[2].mxu0  ;;  %v1212_v34 = vpop.f32.mrb[2].mxu1 }
 0x123   : > { %v815_v35 = vadd.f32 %v1468_v25, %v776_v27  ;;  %v831_v36 = vadd.f32 %v1468_v25, %v792_v28  ;;  %v777_v37 = vmul.f32 0.57735026, %v1196_v33  ;;  %v793_v38 = vmul.f32 0.57735026, %v1212_v34  ;;  %v551_v39 = vpop.f32.mrb[3].mxu0  ;;  %v615_v40 = vpop.f32.mrb[3].mxu1 }
 0x124   : > { %v813_v41 = vadd.f32 %v1468_v25, %v774_v31  ;;  %v829_v42 = vadd.f32 %v1468_v25, %v790_v32  ;;  %v775_v43 = vmul.f32 0.57735026, %v551_v39  ;;  %v791_v44 = vmul.f32 0.57735026, %v615_v40 }
 0x125   : > { %vm847_vm0 = vcmp.ge.f32.partialorder %v815_v35, 0.0  ;;  %v879_v45 = vmul.f32 0.2, %v815_v35  ;;  %vm863_vm1 = vcmp.ge.f32.partialorder %v831_v36, 0.0  ;;  %v895_v46 = vmul.f32 0.2, %v831_v36 }
 0x126   : > { %vm845_vm2 = vcmp.ge.f32.partialorder %v813_v41, 0.0  ;;  %v877_v47 = vmul.f32 0.2, %v813_v41  ;;  %vm861_vm3 = vcmp.ge.f32.partialorder %v829_v42, 0.0  ;;  %v893_v48 = vmul.f32 0.2, %v829_v42 }
 0x127   : > { %v911_v49 = vsel %vm847_vm0, %v815_v35, %v879_v45  ;;  %v927_v50 = vsel %vm863_vm1, %v831_v36, %v895_v46  ;;  %v816_v51 = vadd.f32 %v1468_v25, %v777_v37  ;;  %v832_v52 = vadd.f32 %v1468_v25, %v793_v38 }
 0x128   : > { %v943_v53 = vmul.f32 1.4142135, %v911_v49  ;;  %v959_v54 = vmul.f32 1.4142135, %v927_v50  ;;  %v909_v55 = vsel %vm845_vm2, %v813_v41, %v877_v47  ;;  %v925_v56 = vsel %vm861_vm3, %v829_v42, %v893_v48  ;;  %v1199_v57 = vpop.f32.mrb[4].mxu0  ;;  %v1215_v58 = vpop.f32.mrb[4].mxu1 }
 0x129   : > { %v941_v59 = vmul.f32 1.4142135, %v909_v55  ;;  %v957_v60 = vmul.f32 1.4142135, %v925_v56  ;;  %vm848_vm4 = vcmp.ge.f32.partialorder %v816_v51, 0.0  ;;  %vm864_vm5 = vcmp.ge.f32.partialorder %v832_v52, 0.0 }
 0x12a   : > { %975 = vst [vmem:[%s1478_s20 + $0x10] sm:$0xff] %v943_v53  ;;  %991 = vst [vmem:[%s1478_s20 + $0x90] sm:$0xff] %v959_v54  ;;  %v880_v61 = vmul.f32 0.2, %v816_v51  ;;  %v896_v62 = vmul.f32 0.2, %v832_v52  ;;  %v814_v63 = vadd.f32 %v1468_v25, %v775_v43  ;;  %v830_v0 = vadd.f32 %v1468_v25, %v791_v44 }
 0x12b   : > { %v564_v1 = vpop.f32.mrb[5].mxu0  ;;  %v628_v2 = vpop.f32.mrb[5].mxu1  ;;  %973 = vst [vmem:[%s1478_s20] sm:$0xff] %v941_v59  ;;  %989 = vst [vmem:[%s1478_s20 + $0x80] sm:$0xff] %v957_v60  ;;  %v780_v3 = vmul.f32 0.57735026, %v1199_v57 }
 0x12c   : > { %v796_v4 = vmul.f32 0.57735026, %v1215_v58  ;;  %v778_v5 = vmul.f32 0.57735026, %v564_v1  ;;  %v912_v6 = vsel %vm848_vm4, %v816_v51, %v880_v61  ;;  %v928_v7 = vsel %vm864_vm5, %v832_v52, %v896_v62  ;;  %v1200_v9 = vpop.f32.mrb[6].mxu0  ;;  %v1216_v10 = vpop.f32.mrb[6].mxu1 }
 0x12d   : > { %vm846_vm6 = vcmp.ge.f32.partialorder %v814_v63, 0.0  ;;  %v878_v8 = vmul.f32 0.2, %v814_v63  ;;  %v944_v11 = vmul.f32 1.4142135, %v912_v6  ;;  %vm862_vm7 = vcmp.ge.f32.partialorder %v830_v0, 0.0 }
 0x12e   : > { %v960_v12 = vmul.f32 1.4142135, %v928_v7  ;;  %v819_v13 = vadd.f32 %v1468_v25, %v780_v3  ;;  %v567_v14 = vpop.f32.mrb[7].mxu0  ;;  %v894_v16 = vmul.f32 0.2, %v830_v0  ;;  %v835_v17 = vadd.f32 %v1468_v25, %v796_v4  ;;  %v631_v19 = vpop.f32.mrb[7].mxu1 }
 0x12f   : > { %v910_v15 = vsel %vm846_vm6, %v814_v63, %v878_v8  ;;  %v817_v18 = vadd.f32 %v1468_v25, %v778_v5  ;;  %976 = vst [vmem:[%s1478_s20 + $0x18] sm:$0xff] %v944_v11  ;;  %v794_v30 = vmul.f32 0.57735026, %v628_v2  ;;  %v781_v33 = vmul.f32 0.57735026, %v1200_v9 }
 0x130   : > { %992 = vst [vmem:[%s1478_s20 + $0x98] sm:$0xff] %v960_v12  ;;  %v942_v20 = vmul.f32 1.4142135, %v910_v15  ;;  %vm851_vm8 = vcmp.ge.f32.partialorder %v819_v13, 0.0  ;;  %v883_v21 = vmul.f32 0.2, %v819_v13  ;;  %v926_v22 = vsel %vm862_vm7, %v830_v0, %v894_v16 }
 0x131   : > { %vm867_vm9 = vcmp.ge.f32.partialorder %v835_v17, 0.0  ;;  %v899_v23 = vmul.f32 0.2, %v835_v17  ;;  %vm849_vm10 = vcmp.ge.f32.partialorder %v817_v18, 0.0  ;;  %v1203_v24 = vpop.f32.mrb[8].mxu0  ;;  %v1219_v26 = vpop.f32.mrb[8].mxu1  ;;  %v833_v37 = vadd.f32 %v1468_v25, %v794_v30 }
 0x132   : > { %974 = vst [vmem:[%s1478_s20 + $0x8] sm:$0xff] %v942_v20  ;;  %v958_v27 = vmul.f32 1.4142135, %v926_v22  ;;  %v915_v28 = vsel %vm851_vm8, %v819_v13, %v883_v21  ;;  %v881_v29 = vmul.f32 0.2, %v817_v18  ;;  %v580_v39 = vpop.f32.mrb[9].mxu0  ;;  %v820_v42 = vadd.f32 %v1468_v25, %v781_v33 }
 0x133   : > { %v947_v31 = vmul.f32 1.4142135, %v915_v28  ;;  %v931_v32 = vsel %vm867_vm9, %v835_v17, %v899_v23  ;;  %v797_v34 = vmul.f32 0.57735026, %v1216_v10  ;;  %v779_v38 = vmul.f32 0.57735026, %v567_v14 }
 0x134   : > { %990 = vst [vmem:[%s1478_s20 + $0x88] sm:$0xff] %v958_v27  ;;  %v963_v35 = vmul.f32 1.4142135, %v931_v32  ;;  %v913_v36 = vsel %vm849_vm10, %v817_v18, %v881_v29  ;;  %v644_v40 = vpop.f32.mrb[9].mxu1  ;;  %v795_v44 = vmul.f32 0.57735026, %v631_v19 }
 0x135   : > { %979 = vst [vmem:[%s1478_s20 + $0x30] sm:$0xff] %v947_v31  ;;  %v945_v41 = vmul.f32 1.4142135, %v913_v36  ;;  %v836_v43 = vadd.f32 %v1468_v25, %v797_v34  ;;  %v1204_v45 = vpop.f32.mrb[10].mxu0  ;;  %v1220_v46 = vpop.f32.mrb[10].mxu1  ;;  %vm865_vm11 = vcmp.ge.f32.partialorder %v833_v37, 0.0  ;;  %v818_v48 = vadd.f32 %v1468_v25, %v779_v38 }
 0x136   : > { %995 = vst [vmem:[%s1478_s20 + $0xb0] sm:$0xff] %v963_v35  ;;  %v897_v47 = vmul.f32 0.2, %v833_v37  ;;  %v784_v49 = vmul.f32 0.57735026, %v1203_v24  ;;  %v1501_v50 = vpop.f32.mrb[11].mxu0  ;;  %v834_v55 = vadd.f32 %v1468_v25, %v795_v44 }
 0x137   : > { %977 = vst [vmem:[%s1478_s20 + $0x20] sm:$0xff] %v945_v41  ;;  %vm852_vm12 = vcmp.ge.f32.partialorder %v820_v42, 0.0  ;;  %v884_v51 = vmul.f32 0.2, %v820_v42  ;;  %vm868_vm13 = vcmp.ge.f32.partialorder %v836_v43, 0.0  ;;  %vm850_vm14 = vcmp.ge.f32.partialorder %v818_v48, 0.0 }
 0x138   : > { %v900_v52 = vmul.f32 0.2, %v836_v43  ;;  %v929_v53 = vsel %vm865_vm11, %v833_v37, %v897_v47  ;;  %v882_v54 = vmul.f32 0.2, %v818_v48  ;;  %v1505_v56 = vpop.f32.mrb[11].mxu1  ;;  %v823_v60 = vadd.f32 %v1468_v25, %v784_v49  ;;  %v1207_v61 = vpop.f32.mrb[12].mxu0 }
 0x139   : > { %v961_v57 = vmul.f32 1.4142135, %v929_v53  ;;  %v916_v58 = vsel %vm852_vm12, %v820_v42, %v884_v51  ;;  %v1508_v62 = vpop.f32.mrb[12].mxu1  ;;  %vm866_vm15 = vcmp.ge.f32.partialorder %v834_v55, 0.0  ;;  %v596_v2 = vpop.f32.mrb[13].mxu0 }
 0x13a   : > { %v932_v59 = vsel %vm868_vm13, %v836_v43, %v900_v52  ;;  %v948_v63 = vmul.f32 1.4142135, %v916_v58  ;;  %v914_v1 = vsel %vm850_vm14, %v818_v48, %v882_v54  ;;  %v898_v4 = vmul.f32 0.2, %v834_v55  ;;  %v660_v5 = vpop.f32.mrb[13].mxu1  ;;  %v1208_v17 = vpop.f32.mrb[14].mxu0 }
 0x13b   : > { %v964_v0 = vmul.f32 1.4142135, %v932_v59  ;;  %993 = vst [vmem:[%s1478_s20 + $0xa0] sm:$0xff] %v961_v57  ;;  %v946_v3 = vmul.f32 1.4142135, %v914_v1  ;;  %vm855_vm0 = vcmp.ge.f32.partialorder %v823_v60, 0.0 }
 0x13c   : > { %980 = vst [vmem:[%s1478_s20 + $0x38] sm:$0xff] %v948_v63  ;;  %v887_v6 = vmul.f32 0.2, %v823_v60  ;;  %v800_v7 = vmul.f32 0.57735026, %v1219_v26  ;;  %v930_v9 = vsel %vm866_vm15, %v834_v55, %v898_v4  ;;  %v1224_v18 = vpop.f32.mrb[14].mxu1 }
 0x13d   : > { %996 = vst [vmem:[%s1478_s20 + $0xb8] sm:$0xff] %v964_v0  ;;  %v782_v8 = vmul.f32 0.57735026, %v580_v39  ;;  %978 = vst [vmem:[%s1478_s20 + $0x28] sm:$0xff] %v946_v3  ;;  %v798_v10 = vmul.f32 0.57735026, %v644_v40 }
 0x13e   : > { %v785_v11 = vmul.f32 0.57735026, %v1204_v45  ;;  %v801_v12 = vmul.f32 0.57735026, %v1220_v46  ;;  %v962_v13 = vmul.f32 1.4142135, %v930_v9  ;;  %v919_v14 = vsel %vm855_vm0, %v823_v60, %v887_v6 }
 0x13f   : > { %v839_v15 = vadd.f32 %v1468_v25, %v800_v7  ;;  %v821_v16 = vadd.f32 %v1468_v25, %v782_v8  ;;  %v951_v19 = vmul.f32 1.4142135, %v919_v14  ;;  %v837_v20 = vadd.f32 %v1468_v25, %v798_v10  ;;  %v1519_v23 = vpop.f32.mrb[15].mxu0  ;;  %v1521_v24 = vpop.f32.mrb[15].mxu1 }
 0x140   : > { %v824_v21 = vadd.f32 %v1468_v25, %v785_v11  ;;  %v840_v22 = vadd.f32 %v1468_v25, %v801_v12  ;;  %994 = vst [vmem:[%s1478_s20 + $0xa8] sm:$0xff] %v962_v13  ;;  %v783_v40 = vmul.f32 0.57735026, %v1501_v50  ;;  %v799_v42 = vmul.f32 0.57735026, %v1505_v56 }
 0x141   : > { %vm871_vm1 = vcmp.ge.f32.partialorder %v839_v15, 0.0  ;;  %v903_v26 = vmul.f32 0.2, %v839_v15  ;;  %vm853_vm2 = vcmp.ge.f32.partialorder %v821_v16, 0.0  ;;  %v885_v27 = vmul.f32 0.2, %v821_v16 }
 0x142   : > { %983 = vst [vmem:[%s1478_s20 + $0x50] sm:$0xff] %v951_v19  ;;  %vm869_vm3 = vcmp.ge.f32.partialorder %v837_v20, 0.0  ;;  %v901_v28 = vmul.f32 0.2, %v837_v20  ;;  %vm856_vm4 = vcmp.ge.f32.partialorder %v824_v21, 0.0  ;;  %vm872_vm5 = vcmp.ge.f32.partialorder %v840_v22, 0.0 }
 0x143   : > { %v888_v29 = vmul.f32 0.2, %v824_v21  ;;  %v935_v30 = vsel %vm871_vm1, %v839_v15, %v903_v26  ;;  %v917_v31 = vsel %vm853_vm2, %v821_v16, %v885_v27  ;;  %v904_v32 = vmul.f32 0.2, %v840_v22 }
 0x144   : > { %v967_v33 = vmul.f32 1.4142135, %v935_v30  ;;  %v949_v34 = vmul.f32 1.4142135, %v917_v31  ;;  %v933_v35 = vsel %vm869_vm3, %v837_v20, %v901_v28  ;;  %v788_v43 = vmul.f32 0.57735026, %v1207_v61 }
 0x145   : > { %v920_v36 = vsel %vm856_vm4, %v824_v21, %v888_v29  ;;  %v965_v37 = vmul.f32 1.4142135, %v933_v35  ;;  %v936_v39 = vsel %vm872_vm5, %v840_v22, %v904_v32  ;;  %v822_v44 = vadd.f32 %v1468_v25, %v783_v40 }
 0x146   : > { %v952_v38 = vmul.f32 1.4142135, %v920_v36  ;;  %999 = vst [vmem:[%s1478_s20 + $0xd0] sm:$0xff] %v967_v33  ;;  %981 = vst [vmem:[%s1478_s20 + $0x40] sm:$0xff] %v949_v34  ;;  %v968_v41 = vmul.f32 1.4142135, %v936_v39  ;;  %v838_v48 = vadd.f32 %v1468_v25, %v799_v42  ;;  %v827_v49 = vadd.f32 %v1468_v25, %v788_v43 }
 0x147   : > { %997 = vst [vmem:[%s1478_s20 + $0xc0] sm:$0xff] %v965_v37  ;;  %v804_v45 = vmul.f32 0.57735026, %v1508_v62  ;;  %v786_v46 = vmul.f32 0.57735026, %v596_v2  ;;  %vm854_vm6 = vcmp.ge.f32.partialorder %v822_v44, 0.0 }
 0x148   : > { %984 = vst [vmem:[%s1478_s20 + $0x58] sm:$0xff] %v952_v38  ;;  %v802_v47 = vmul.f32 0.57735026, %v660_v5  ;;  %1000 = vst [vmem:[%s1478_s20 + $0xd8] sm:$0xff] %v968_v41  ;;  %v789_v50 = vmul.f32 0.57735026, %v1208_v17 }
 0x149   : > { %v805_v51 = vmul.f32 0.57735026, %v1224_v18  ;;  %v886_v52 = vmul.f32 0.2, %v822_v44  ;;  %v843_v53 = vadd.f32 %v1468_v25, %v804_v45  ;;  %v825_v54 = vadd.f32 %v1468_v25, %v786_v46 }
 0x14a   : > { %vm870_vm7 = vcmp.ge.f32.partialorder %v838_v48, 0.0  ;;  %v902_v55 = vmul.f32 0.2, %v838_v48  ;;  %vm859_vm8 = vcmp.ge.f32.partialorder %v827_v49, 0.0  ;;  %v891_v56 = vmul.f32 0.2, %v827_v49 }
 0x14b   : > { %v918_v57 = vsel %vm854_vm6, %v822_v44, %v886_v52  ;;  %vm875_vm9 = vcmp.ge.f32.partialorder %v843_v53, 0.0  ;;  %v907_v58 = vmul.f32 0.2, %v843_v53  ;;  %vm857_vm10 = vcmp.ge.f32.partialorder %v825_v54, 0.0 }
 0x14c   : > { %v950_v59 = vmul.f32 1.4142135, %v918_v57  ;;  %v934_v60 = vsel %vm870_vm7, %v838_v48, %v902_v55  ;;  %v923_v61 = vsel %vm859_vm8, %v827_v49, %v891_v56  ;;  %v889_v62 = vmul.f32 0.2, %v825_v54 }
 0x14d   : > { %v966_v63 = vmul.f32 1.4142135, %v934_v60  ;;  %v955_v0 = vmul.f32 1.4142135, %v923_v61  ;;  %v939_v1 = vsel %vm875_vm9, %v843_v53, %v907_v58  ;;  %v841_v2 = vadd.f32 %v1468_v25, %v802_v47 }
 0x14e   : > { %982 = vst [vmem:[%s1478_s20 + $0x48] sm:$0xff] %v950_v59  ;;  %v971_v3 = vmul.f32 1.4142135, %v939_v1  ;;  %v921_v4 = vsel %vm857_vm10, %v825_v54, %v889_v62  ;;  %v828_v5 = vadd.f32 %v1468_v25, %v789_v50  ;;  %v844_v6 = vadd.f32 %v1468_v25, %v805_v51 }
 0x14f   : > { %998 = vst [vmem:[%s1478_s20 + $0xc8] sm:$0xff] %v966_v63  ;;  %987 = vst [vmem:[%s1478_s20 + $0x70] sm:$0xff] %v955_v0  ;;  %v953_v7 = vmul.f32 1.4142135, %v921_v4  ;;  %vm873_vm11 = vcmp.ge.f32.partialorder %v841_v2, 0.0 }
 0x150   : > { %v905_v8 = vmul.f32 0.2, %v841_v2  ;;  %1003 = vst [vmem:[%s1478_s20 + $0xf0] sm:$0xff] %v971_v3  ;;  %vm860_vm12 = vcmp.ge.f32.partialorder %v828_v5, 0.0  ;;  %v892_v9 = vmul.f32 0.2, %v828_v5 }
 0x151   : > { %vm876_vm13 = vcmp.ge.f32.partialorder %v844_v6, 0.0  ;;  %v908_v10 = vmul.f32 0.2, %v844_v6  ;;  %985 = vst [vmem:[%s1478_s20 + $0x60] sm:$0xff] %v953_v7  ;;  %v787_v12 = vmul.f32 0.57735026, %v1519_v23 }
 0x152   : > { %v937_v11 = vsel %vm873_vm11, %v841_v2, %v905_v8  ;;  %v803_v13 = vmul.f32 0.57735026, %v1521_v24  ;;  %v924_v15 = vsel %vm860_vm12, %v828_v5, %v892_v9 }
 0x153   : > { %v969_v14 = vmul.f32 1.4142135, %v937_v11  ;;  %v940_v16 = vsel %vm876_vm13, %v844_v6, %v908_v10  ;;  %v956_v17 = vmul.f32 1.4142135, %v924_v15  ;;  %v826_v19 = vadd.f32 %v1468_v25, %v787_v12 }
 0x154   : > { %v972_v18 = vmul.f32 1.4142135, %v940_v16  ;;  %v842_v20 = vadd.f32 %v1468_v25, %v803_v13 }
 0x155   : > { %1001 = vst [vmem:[%s1478_s20 + $0xe0] sm:$0xff] %v969_v14  ;;  %988 = vst [vmem:[%s1478_s20 + $0x78] sm:$0xff] %v956_v17  ;;  %vm858_vm14 = vcmp.ge.f32.partialorder %v826_v19, 0.0  ;;  %v890_v21 = vmul.f32 0.2, %v826_v19 }
 0x156   : > { %1004 = vst [vmem:[%s1478_s20 + $0xf8] sm:$0xff] %v972_v18  ;;  %vm874_vm15 = vcmp.ge.f32.partialorder %v842_v20, 0.0  ;;  %v906_v22 = vmul.f32 0.2, %v842_v20 }
 0x157   : > { %v922_v23 = vsel %vm858_vm14, %v826_v19, %v890_v21 }
 0x158   : > { %v938_v24 = vsel %vm874_vm15, %v842_v20, %v906_v22  ;;  %v954_v26 = vmul.f32 1.4142135, %v922_v23 }
 0x159   : > { %v970_v27 = vmul.f32 1.4142135, %v938_v24 }
 0x15a   : > { %986 = vst [vmem:[%s1478_s20 + $0x68] sm:$0xff] %v954_v26 }
 0x15b   : > { %1002 = vst [vmem:[%s1478_s20 + $0xe8] sm:$0xff] %v970_v27 }
 0x15c PF: > { %s14_s14 = sadd.s32 1, %s1356_s14   ;;  %s1576_s12 = smov %s1352_s13 }
 0x15d   : > { %p11_p4 = scmp.ge.s32.totalorder %s14_s14, 4   ;;  %s1577_s13 = smov %s1579_s16 }
 0x15f   :  { %13 = sbr.rel (!%p11_p4) target bundleno = 2 (0x2), region = 79 }
 0x166   :  { %1033 = vsyncpa [#allocation4], 1 }
 0x167   :  { %1035 = vsyncpa [#allocation4 + $0x1], 1 }

// kernel: _lambda_.18
= control target key start
LH: loop header
LB: loop body
LE: loop exit
PB: predicated region body
PF: predicated region fallthrough
CT: control target
= control target key end

     0   :  { %s1446_s6 = smov 0   ;;  %s1448_s7 = smov 0   ;;  %s2092_s0 = inlined_call_operand.vmem [shape: f32[2,20,20,128], index: 0, kind: input, shape index: {}]   ;;  %s2093_s1 = inlined_call_operand.vmem [shape: f32[2,17,17,128], index: 1, kind: output, shape index: {}]  }
   0x1   :  { %s1450_s8 = smov 0  }
   0x2 LB: > { %s23_s9 = sadd.s32 1, %s1430_s7  ;;  %p1381_p0 = scmp.ge.s32.totalorder %s1434_s8, 1  ;;  %s1434_s8 = sphi %s1450_s8, %s11_s8   ;;  %s1430_s7 = sphi %s1448_s7, %s2095_s7   ;;  %s1426_s6 = sphi %s1446_s6, %s2094_s6  }
   0x3   : > { %p25_p1 = scmp.ge.s32.totalorder %s23_s9, 2  ;;  %p106_p2 = scmp.lt.s32.totalorder %s1434_s8, 3 }
   0x5   : > { %s2097_s9 = smov (%p25_p1, %s23_s9), 0  ;;  %p107_p3 = pnand %p1381_p0, %p106_p2 }
   0x6   : > { %p132_p4 = scmp.lt.s32.totalorder (!%p107_p3), %s1426_s6, 1  ;;  %vm628_vm0 = vcmask (!%p107_p3), 1046528   ;;  %vm816_vm1 = vcmask (!%p107_p3), 1045504   ;;  %vm1055_vm2 = vcmask (!%p107_p3), 1044480  }
   0x7   : > { %110 = sbr.rel (%p107_p3) target bundleno = 223 (0xdf), region = 24 }
   0xe   : > { %s2099_s6 = smov (!%p132_p4, %s1426_s6), 1 }
   0xf   : > { %s1386_s10 = smul.u32 480, %s2099_s6 }
  0x10   : > { %s1387_s14 = smul.u32 408, %s2099_s6 }
  0x11   : > { %s1470_s13 = scalar_lea.vmem %s2092_s0, %s1386_s10 }
  0x12   : > { %v148_v0 = vld [vmem:[%s1470_s13] sm:$0xff]  ;;  %v149_v1 = vld [vmem:[%s1470_s13 + $0x8] sm:$0xff]  ;;  %v151_v2 = vld [vmem:[%s1470_s13 + $0x18] sm:$0xff]  ;;  %s1547_s17 = scalar_lea.vmem %s2093_s1, %s1387_s14 }
  0x13   : > { %v152_v3 = vld [vmem:[%s1470_s13 + $0x20] sm:$0xff]  ;;  %v1477_v4 = vld [vmem:[%s1470_s13 + $0x30] sm:$0xff]  ;;  %v1480_v5 = vld [vmem:[%s1470_s13 + $0x38] sm:$0xff]  ;;  %v208_v6 = vmul.f32 0.125, %v148_v0  ;;  %v209_v7 = vmul.f32 0.125, %v149_v1  ;;  %v259_v8 = vmul.f32 0.375, %v151_v2 }
  0x14   : > { %v157_v9 = vld [vmem:[%s1470_s13 + $0x48] sm:$0xff]  ;;  %v158_v10 = vld [vmem:[%s1470_s13 + $0x50] sm:$0xff]  ;;  %v260_v11 = vmul.f32 0.375, %v152_v3  ;;  %v262_v12 = vmul.f32 0.375, %v1477_v4  ;;  %v263_v13 = vmul.f32 0.375, %v1480_v5  ;;  %v1487_v14 = vld [vmem:[%s1470_s13 + $0x60] sm:$0xff] }
  0x15   : > { %v1489_v15 = vmul.f32 0.125, %v157_v9  ;;  %v1491_v16 = vmul.f32 0.125, %v158_v10  ;;  %v310_v17 = vadd.f32 %v259_v8, %v208_v6  ;;  %v150_v18 = vld [vmem:[%s1470_s13 + $0x10] sm:$0xf]  ;;  %v153_v19 = vld [vmem:[%s1470_s13 + $0x28] sm:$0xf] }
  0x16   : > { %v311_v20 = vadd.f32 %v260_v11, %v209_v7  ;;  %v1496_v21 = vld [vmem:[%s1470_s13 + $0x40] sm:$0xf]  ;;  %v159_v22 = vld [vmem:[%s1470_s13 + $0x58] sm:$0xf]  ;;  %v210_v23 = vmul.f32 0.125, %v150_v18  ;;  %v261_v24 = vmul.f32 0.375, %v153_v19 }
  0x17   : > { %v364_v25 = vadd.f32 %v310_v17, %v262_v12  ;;  %v1499_v26 = vmul.f32 0.125, %v159_v22  ;;  %v1502_v27 = vmul.f32 0.375, %v1496_v21  ;;  %v1505_v28 = vld [vmem:[%s1470_s13 + $0x68] sm:$0xff]  ;;  %v211_v29 = vmul.f32 0.125, %v151_v2  ;;  %v1511_v34 = vld [vmem:[%s1470_s13 + $0x70] sm:$0xf] }
  0x18   : > { %v365_v30 = vadd.f32 %v311_v20, %v263_v13  ;;  %v312_v31 = vadd.f32 %v261_v24, %v210_v23  ;;  %v212_v32 = vmul.f32 0.125, %v152_v3  ;;  %v1508_v33 = vmul.f32 0.125, %v1487_v14 }
  0x19   : > { %v424_v35 = vadd.f32 %v364_v25, %v1489_v15  ;;  %v1515_v36 = vmul.f32 0.125, %v1505_v28  ;;  %v1517_v37 = vmul.f32 0.375, %v157_v9  ;;  %v1519_v38 = vmul.f32 0.375, %v158_v10 }
  0x1a   : > { %v425_v39 = vadd.f32 %v365_v30, %v1491_v16  ;;  %v366_v40 = vadd.f32 %v312_v31, %v1502_v27  ;;  %v313_v41 = vadd.f32 %v262_v12, %v211_v29  ;;  %v314_v42 = vadd.f32 %v263_v13, %v212_v32 }
  0x1b   : > { %v475_v43 = vmul.f32 0.125, %v424_v35  ;;  %v526_v44 = vmul.f32 0.375, %v424_v35  ;;  %v213_v45 = vmul.f32 0.125, %v153_v19  ;;  %v1524_v46 = vmul.f32 0.125, %v1511_v34 }
  0x1c   : > { %v476_v47 = vmul.f32 0.125, %v425_v39  ;;  %v527_v48 = vmul.f32 0.375, %v425_v39  ;;  %v426_v49 = vadd.f32 %v366_v40, %v1499_v26  ;;  %v367_v50 = vadd.f32 %v313_v41, %v1517_v37  ;;  %v163_v41 = vld [vmem:[%s1470_s13 + $0x78] sm:$0xff] }
  0x1d   : > { %v629_v51 = vrot.slane %v526_v44, 1  ;;  %v817_v52 = vrot.slane %v526_v44, 2  ;;  %v1056_v53 = vrot.slane %v475_v43, 3  ;;  %v368_v54 = vadd.f32 %v314_v42, %v1519_v38  ;;  %v164_v42 = vld [vmem:[%s1470_s13 + $0x80] sm:$0xff] }
  0x1e   : > { %v630_v55 = vrot.slane %v527_v48, 1  ;;  %v818_v56 = vrot.slane %v527_v48, 2  ;;  %v1057_v57 = vrot.slane %v476_v47, 3  ;;  %v477_v58 = vmul.f32 0.125, %v426_v49 }
  0x1f   : > { %v528_v59 = vmul.f32 0.375, %v426_v49  ;;  %v427_v60 = vadd.f32 %v367_v50, %v1508_v33  ;;  %v428_v61 = vadd.f32 %v368_v54, %v1515_v36  ;;  %v1531_v62 = vmul.f32 0.375, %v159_v22 }
  0x20   : > { %v631_v63 = vsel %vm628_vm0, %v629_v51, %v630_v55  ;;  %v819_v0 = vsel %vm816_vm1, %v817_v52, %v818_v56  ;;  %v1058_v1 = vsel %vm1055_vm2, %v1056_v53, %v1057_v57  ;;  %v1059_v2 = vrot.slane %v477_v58, 3 }
  0x21   : > { %v765_v3 = vadd.f32 %v631_v63, %v475_v43  ;;  %v632_v6 = vrot.slane %v528_v59, 1  ;;  %v820_v7 = vrot.slane %v528_v59, 2  ;;  %v478_v8 = vmul.f32 0.125, %v427_v60  ;;  %v1580_v59 = vld [vmem:[%s1470_s13 + $0x98] sm:$0xff] }
  0x22   : > { %v1060_v9 = vsel %vm1055_vm2, %v1057_v57, %v1059_v2  ;;  %v1538_v10 = vmul.f32 0.125, %v428_v61  ;;  %v529_v11 = vmul.f32 0.375, %v427_v60  ;;  %v1540_v12 = vmul.f32 0.375, %v428_v61 }
  0x23   : > { %v953_v13 = vadd.f32 %v819_v0, %v765_v3  ;;  %v633_v17 = vsel %vm628_vm0, %v630_v55, %v632_v6  ;;  %v821_v18 = vsel %vm816_vm1, %v818_v56, %v820_v7  ;;  %v767_v19 = vadd.f32 %v632_v6, %v477_v58  ;;  %v1577_v58 = vld [vmem:[%s1470_s13 + $0x90] sm:$0xff] }
  0x24   : > { %v766_v20 = vadd.f32 %v633_v17, %v476_v47  ;;  %v634_v22 = vrot.slane %v529_v11, 1  ;;  %v635_v23 = vrot.slane %v1540_v12, 1  ;;  %v822_v24 = vrot.slane %v529_v11, 2 }
  0x25   : > { %v1192_v25 = vadd.f32 %v1058_v1, %v953_v13  ;;  %v955_v29 = vadd.f32 %v820_v7, %v767_v19  ;;  %v823_v30 = vrot.slane %v1540_v12, 2  ;;  %v1061_v31 = vrot.slane %v478_v8, 3 }
  0x26   : > { %v954_v32 = vadd.f32 %v821_v18, %v766_v20  ;;  %v636_v35 = vsel %vm628_vm0, %v634_v22, %v635_v23  ;;  %v1062_v39 = vrot.slane %v1538_v10, 3  ;;  %v315_v40 = vadd.f32 %v1502_v27, %v213_v45  ;;  %v1563_v27 = vld [vmem:[%s1470_s13 + $0x88] sm:$0xf] }
  0x27   : > { %1243 = vst [vmem:[%s1547_s17] sm:$0xff] %v1192_v25  ;;  %v1194_v43 = vadd.f32 %v1059_v2, %v955_v29  ;;  %v768_v44 = vadd.f32 %v636_v35, %v478_v8  ;;  %v824_v47 = vsel %vm816_vm1, %v822_v24, %v823_v30  ;;  %v214_v48 = vmul.f32 0.125, %v1477_v4 }
  0x28   : > { %v1193_v49 = vadd.f32 %v1060_v9, %v954_v32  ;;  %v1063_v50 = vsel %vm1055_vm2, %v1061_v31, %v1062_v39  ;;  %v369_v51 = vadd.f32 %v315_v40, %v1531_v62  ;;  %v215_v52 = vmul.f32 0.125, %v1480_v5 }
  0x29   : > { %1245 = vst [vmem:[%s1547_s17 + $0x10] sm:$0x1] %v1194_v43  ;;  %v956_v45 = vadd.f32 %v824_v47, %v768_v44  ;;  %v1566_v53 = vmul.f32 0.125, %v163_v41  ;;  %v1568_v54 = vmul.f32 0.125, %v164_v42  ;;  %v268_v55 = vmul.f32 0.375, %v1487_v14 }
  0x2a   : > { %1244 = vst [vmem:[%s1547_s17 + $0x8] sm:$0xff] %v1193_v49  ;;  %v429_v4 = vadd.f32 %v369_v51, %v1524_v46  ;;  %v269_v56 = vmul.f32 0.375, %v1505_v28  ;;  %v316_v57 = vadd.f32 %v1517_v37, %v214_v48  ;;  %v317_v5 = vadd.f32 %v1519_v38, %v215_v52  ;;  %v168_v49 = vld [vmem:[%s1470_s13 + $0xa0] sm:$0xf] }
  0x2b   : > { %v1195_v60 = vadd.f32 %v1063_v50, %v956_v45  ;;  %v216_v61 = vmul.f32 0.125, %v1496_v21  ;;  %v1584_v63 = vmul.f32 0.125, %v1563_v27  ;;  %v1587_v14 = vmul.f32 0.375, %v1511_v34 }
  0x2c   : > { %v480_v0 = vmul.f32 0.125, %v429_v4  ;;  %v531_v1 = vmul.f32 0.375, %v429_v4  ;;  %v370_v28 = vadd.f32 %v316_v57, %v268_v55  ;;  %v371_v2 = vadd.f32 %v317_v5, %v269_v56 }
  0x2d   : > { %1246 = vst [vmem:[%s1547_s17 + $0x18] sm:$0xff] %v1195_v60  ;;  %v318_v37 = vadd.f32 %v1531_v62, %v216_v61  ;;  %v1592_v38 = vmul.f32 0.125, %v1577_v58  ;;  %v1595_v3 = vmul.f32 0.125, %v1580_v59  ;;  %v1597_v21 = vmul.f32 0.375, %v163_v41 }
  0x2e   : > { %v637_v6 = vrot.slane %v531_v1, 1  ;;  %v825_v7 = vrot.slane %v531_v1, 2  ;;  %v1064_v8 = vrot.slane %v480_v0, 3  ;;  %v430_v34 = vadd.f32 %v370_v28, %v1566_v53 }
  0x2f   : > { %v431_v9 = vadd.f32 %v371_v2, %v1568_v54  ;;  %v372_v11 = vadd.f32 %v318_v37, %v1587_v14  ;;  %v1602_v12 = vmul.f32 0.375, %v164_v42  ;;  %v319_v62 = vadd.f32 %v268_v55, %v1489_v15 }
  0x30   : > { %v638_v13 = vsel %vm628_vm0, %v635_v23, %v637_v6  ;;  %v826_v17 = vsel %vm816_vm1, %v823_v30, %v825_v7  ;;  %v1065_v18 = vsel %vm1055_vm2, %v1062_v39, %v1064_v8  ;;  %v770_v19 = vadd.f32 %v637_v6, %v480_v0 }
  0x31   : > { %v769_v20 = vadd.f32 %v638_v13, %v1538_v10  ;;  %v481_v22 = vmul.f32 0.125, %v430_v34  ;;  %v482_v24 = vmul.f32 0.125, %v431_v9  ;;  %v532_v25 = vmul.f32 0.375, %v430_v34 }
  0x32   : > { %v958_v29 = vadd.f32 %v825_v7, %v770_v19  ;;  %v533_v31 = vmul.f32 0.375, %v431_v9  ;;  %v432_v32 = vadd.f32 %v372_v11, %v1584_v63  ;;  %v320_v15 = vadd.f32 %v269_v56, %v1491_v16  ;;  %v169_v19 = vld [vmem:[%s1470_s13 + $0xa8] sm:$0xff] }
  0x33   : > { %v957_v35 = vadd.f32 %v826_v17, %v769_v20  ;;  %v639_v23 = vrot.slane %v532_v25, 1  ;;  %v827_v40 = vrot.slane %v532_v25, 2  ;;  %v1066_v30 = vrot.slane %v481_v22, 3  ;;  %v170_v20 = vld [vmem:[%s1470_s13 + $0xb0] sm:$0xff] }
  0x34   : > { %v1197_v39 = vadd.f32 %v1064_v8, %v958_v29  ;;  %v640_v41 = vrot.slane %v533_v31, 1  ;;  %v828_v42 = vrot.slane %v533_v31, 2  ;;  %v1067_v10 = vrot.slane %v482_v24, 3 }
  0x35   : > { %v1196_v43 = vadd.f32 %v1065_v18, %v957_v35  ;;  %v483_v44 = vmul.f32 0.125, %v432_v32  ;;  %v534_v47 = vmul.f32 0.375, %v432_v32  ;;  %v373_v48 = vadd.f32 %v319_v62, %v1597_v21 }
  0x36   : > { %1248 = vst [vmem:[%s1547_s17 + $0x28] sm:$0x1] %v1197_v39  ;;  %v641_v50 = vsel %vm628_vm0, %v639_v23, %v640_v41  ;;  %v829_v16 = vsel %vm816_vm1, %v827_v40, %v828_v42  ;;  %v1068_v51 = vsel %vm1055_vm2, %v1066_v30, %v1067_v10  ;;  %v374_v52 = vadd.f32 %v320_v15, %v1602_v12  ;;  %v1634_v15 = vld [vmem:[%s1470_s13 + $0xb8] sm:$0xf] }
  0x37   : > { %1247 = vst [vmem:[%s1547_s17 + $0x20] sm:$0xff] %v1196_v43  ;;  %v771_v45 = vadd.f32 %v641_v50, %v481_v22  ;;  %v642_v55 = vrot.slane %v534_v47, 1  ;;  %v830_v4 = vrot.slane %v534_v47, 2  ;;  %v1069_v56 = vrot.slane %v483_v44, 3  ;;  %v1648_v43 = vld [vmem:[%s1470_s13 + $0xc0] sm:$0xff] }
  0x38   : > { %v433_v57 = vadd.f32 %v373_v48, %v1592_v38  ;;  %v434_v5 = vadd.f32 %v374_v52, %v1595_v3  ;;  %v1621_v60 = vmul.f32 0.125, %v168_v49  ;;  %v273_v61 = vmul.f32 0.375, %v1563_v27 }
  0x39   : > { %v959_v0 = vadd.f32 %v829_v16, %v771_v45  ;;  %v643_v1 = vsel %vm628_vm0, %v640_v41, %v642_v55  ;;  %v831_v28 = vsel %vm816_vm1, %v828_v42, %v830_v4  ;;  %v1070_v2 = vsel %vm1055_vm2, %v1067_v10, %v1069_v56 }
  0x3a   : > { %v772_v37 = vadd.f32 %v643_v1, %v482_v24  ;;  %v773_v6 = vadd.f32 %v642_v55, %v483_v44  ;;  %v484_v7 = vmul.f32 0.125, %v433_v57  ;;  %v485_v8 = vmul.f32 0.125, %v434_v5  ;;  %v1651_v44 = vld [vmem:[%s1470_s13 + $0xc8] sm:$0xff] }
  0x3b   : > { %v1198_v34 = vadd.f32 %v1068_v51, %v959_v0  ;;  %v535_v9 = vmul.f32 0.375, %v433_v57  ;;  %v536_v11 = vmul.f32 0.375, %v434_v5  ;;  %v321_v27 = vadd.f32 %v1587_v14, %v1499_v26 }
  0x3c   : > { %v960_v62 = vadd.f32 %v831_v28, %v772_v37  ;;  %v961_v13 = vadd.f32 %v830_v4, %v773_v6  ;;  %v1071_v17 = vrot.slane %v484_v7, 3  ;;  %v1072_v18 = vrot.slane %v485_v8, 3 }
  0x3d   : > { %1249 = vst [vmem:[%s1547_s17 + $0x30] sm:$0xff] %v1198_v34  ;;  %v644_v22 = vrot.slane %v535_v9, 1  ;;  %v645_v24 = vrot.slane %v536_v11, 1  ;;  %v832_v25 = vrot.slane %v535_v9, 2  ;;  %v833_v29 = vrot.slane %v536_v11, 2 }
  0x3e   : > { %v1199_v31 = vadd.f32 %v1070_v2, %v960_v62  ;;  %v1200_v32 = vadd.f32 %v1069_v56, %v961_v13  ;;  %v1073_v26 = vsel %vm1055_vm2, %v1071_v17, %v1072_v18  ;;  %v375_v14 = vadd.f32 %v321_v27, %v273_v61 }
  0x3f   : > { %v646_v35 = vsel %vm628_vm0, %v644_v22, %v645_v24  ;;  %v834_v23 = vsel %vm816_vm1, %v832_v25, %v833_v29  ;;  %v1638_v40 = vmul.f32 0.125, %v169_v19  ;;  %v1640_v30 = vmul.f32 0.125, %v170_v20 }
  0x40   : > { %1250 = vst [vmem:[%s1547_s17 + $0x38] sm:$0xff] %v1199_v31  ;;  %1251 = vst [vmem:[%s1547_s17 + $0x40] sm:$0x1] %v1200_v32  ;;  %v774_v39 = vadd.f32 %v646_v35, %v484_v7  ;;  %v435_v41 = vadd.f32 %v375_v14, %v1621_v60  ;;  %v274_v42 = vmul.f32 0.375, %v1577_v58  ;;  %v275_v10 = vmul.f32 0.375, %v1580_v59 }
  0x41   : > { %v322_v47 = vadd.f32 %v1597_v21, %v1508_v33  ;;  %v323_v48 = vadd.f32 %v1602_v12, %v1515_v36  ;;  %v1658_v50 = vmul.f32 0.125, %v1634_v15  ;;  %v1660_v16 = vmul.f32 0.375, %v168_v49 }
  0x42   : > { %v962_v51 = vadd.f32 %v834_v23, %v774_v39  ;;  %v486_v58 = vmul.f32 0.125, %v435_v41  ;;  %v537_v52 = vmul.f32 0.375, %v435_v41  ;;  %v324_v59 = vadd.f32 %v273_v61, %v1524_v46 }
  0x43   : > { %v376_v45 = vadd.f32 %v322_v47, %v274_v42  ;;  %v377_v55 = vadd.f32 %v323_v48, %v275_v10  ;;  %v1664_v4 = vmul.f32 0.125, %v1648_v43  ;;  %v1667_v33 = vmul.f32 0.125, %v1651_v44 }
  0x44   : > { %v1201_v36 = vadd.f32 %v1073_v26, %v962_v51  ;;  %v647_v21 = vrot.slane %v537_v52, 1  ;;  %v835_v12 = vrot.slane %v537_v52, 2  ;;  %v1074_v56 = vrot.slane %v486_v58, 3  ;;  %v1683_v26 = vld [vmem:[%s1470_s13 + $0xd0] sm:$0xf]  ;;  %v1698_v52 = vld [vmem:[%s1470_s13 + $0xd8] sm:$0xff] }
  0x45   : > { %v436_v49 = vadd.f32 %v376_v45, %v1638_v40  ;;  %v437_v57 = vadd.f32 %v377_v55, %v1640_v30  ;;  %v378_v5 = vadd.f32 %v324_v59, %v1660_v16  ;;  %v1672_v0 = vmul.f32 0.375, %v169_v19  ;;  %v1701_v59 = vld [vmem:[%s1470_s13 + $0xe0] sm:$0xff] }
  0x46   : > { %1252 = vst [vmem:[%s1547_s17 + $0x48] sm:$0xff] %v1201_v36  ;;  %v648_v46 = vsel %vm628_vm0, %v645_v24, %v647_v21  ;;  %v836_v61 = vsel %vm816_vm1, %v833_v29, %v835_v12  ;;  %v1075_v1 = vsel %vm1055_vm2, %v1072_v18, %v1074_v56  ;;  %v776_v28 = vadd.f32 %v647_v21, %v486_v58 }
  0x47   : > { %v775_v2 = vadd.f32 %v648_v46, %v485_v8  ;;  %v487_v37 = vmul.f32 0.125, %v436_v49  ;;  %v488_v6 = vmul.f32 0.125, %v437_v57  ;;  %v538_v7 = vmul.f32 0.375, %v436_v49 }
  0x48   : > { %v964_v34 = vadd.f32 %v835_v12, %v776_v28  ;;  %v539_v9 = vmul.f32 0.375, %v437_v57  ;;  %v438_v11 = vadd.f32 %v378_v5, %v1658_v50  ;;  %v1679_v27 = vmul.f32 0.375, %v170_v20 }
  0x49   : > { %v963_v62 = vadd.f32 %v836_v61, %v775_v2  ;;  %v649_v13 = vrot.slane %v538_v7, 1  ;;  %v837_v17 = vrot.slane %v538_v7, 2  ;;  %v1076_v19 = vrot.slane %v487_v37, 3 }
  0x4a   : > { %v1203_v22 = vadd.f32 %v1074_v56, %v964_v34  ;;  %v650_v18 = vrot.slane %v539_v9, 1  ;;  %v838_v24 = vrot.slane %v539_v9, 2  ;;  %v1077_v8 = vrot.slane %v488_v6, 3 }
  0x4b   : > { %v1202_v25 = vadd.f32 %v1075_v1, %v963_v62  ;;  %v489_v29 = vmul.f32 0.125, %v438_v11  ;;  %v540_v31 = vmul.f32 0.375, %v438_v11  ;;  %v325_v32 = vadd.f32 %v274_v42, %v1566_v53  ;;  %v1721_v11 = vld [vmem:[%s1470_s13 + $0xe8] sm:$0xf] }
  0x4c   : > { %1254 = vst [vmem:[%s1547_s17 + $0x58] sm:$0x1] %v1203_v22  ;;  %v651_v20 = vsel %vm628_vm0, %v649_v13, %v650_v18  ;;  %v839_v14 = vsel %vm816_vm1, %v837_v17, %v838_v24  ;;  %v1078_v35 = vsel %vm1055_vm2, %v1076_v19, %v1077_v8  ;;  %v326_v23 = vadd.f32 %v275_v10, %v1568_v54 }
  0x4d   : > { %1253 = vst [vmem:[%s1547_s17 + $0x50] sm:$0xff] %v1202_v25  ;;  %v777_v39 = vadd.f32 %v651_v20, %v487_v37  ;;  %v652_v41 = vrot.slane %v540_v31, 1  ;;  %v840_v47 = vrot.slane %v540_v31, 2  ;;  %v1079_v48 = vrot.slane %v489_v29, 3 }
  0x4e   : > { %v379_v53 = vadd.f32 %v325_v32, %v1672_v0  ;;  %v380_v42 = vadd.f32 %v326_v23, %v1679_v27  ;;  %v1694_v51 = vmul.f32 0.125, %v1683_v26  ;;  %v279_v58 = vmul.f32 0.375, %v1634_v15  ;;  %v1742_v23 = vld [vmem:[%s1470_s13 + $0xf8] sm:$0xff] }
  0x4f   : > { %v965_v45 = vadd.f32 %v839_v14, %v777_v39  ;;  %v653_v54 = vsel %vm628_vm0, %v650_v18, %v652_v41  ;;  %v841_v10 = vsel %vm816_vm1, %v838_v24, %v840_v47  ;;  %v1080_v55 = vsel %vm1055_vm2, %v1077_v8, %v1079_v48  ;;  %v1731_v8 = vld [vmem:[%s1470_s13 + $0xf0] sm:$0xff] }
  0x50   : > { %v778_v36 = vadd.f32 %v653_v54, %v488_v6  ;;  %v779_v21 = vadd.f32 %v652_v41, %v489_v29  ;;  %v439_v12 = vadd.f32 %v379_v53, %v1664_v4  ;;  %v440_v56 = vadd.f32 %v380_v42, %v1667_v33 }
  0x51   : > { %v1204_v49 = vadd.f32 %v1078_v35, %v965_v45  ;;  %v327_v15 = vadd.f32 %v1660_v16, %v1584_v63  ;;  %v1711_v57 = vmul.f32 0.125, %v1698_v52  ;;  %v1714_v5 = vmul.f32 0.125, %v1701_v59 }
  0x52   : > { %v966_v46 = vadd.f32 %v841_v10, %v778_v36  ;;  %v967_v61 = vadd.f32 %v840_v47, %v779_v21  ;;  %v490_v1 = vmul.f32 0.125, %v439_v12  ;;  %v491_v28 = vmul.f32 0.125, %v440_v56 }
  0x53   : > { %1255 = vst [vmem:[%s1547_s17 + $0x60] sm:$0xff] %v1204_v49  ;;  %v541_v2 = vmul.f32 0.375, %v439_v12  ;;  %v542_v37 = vmul.f32 0.375, %v440_v56  ;;  %v381_v6 = vadd.f32 %v327_v15, %v279_v58  ;;  %v1718_v7 = vmul.f32 0.375, %v1648_v43 }
  0x54   : > { %v1205_v63 = vadd.f32 %v1080_v55, %v966_v46  ;;  %v1206_v16 = vadd.f32 %v1079_v48, %v967_v61  ;;  %v1081_v34 = vrot.slane %v490_v1, 3  ;;  %v1082_v9 = vrot.slane %v491_v28, 3 }
  0x55   : > { %v654_v62 = vrot.slane %v541_v2, 1  ;;  %v655_v13 = vrot.slane %v542_v37, 1  ;;  %v842_v17 = vrot.slane %v541_v2, 2  ;;  %v843_v19 = vrot.slane %v542_v37, 2 }
  0x56   : > { %1256 = vst [vmem:[%s1547_s17 + $0x68] sm:$0xff] %v1205_v63  ;;  %1257 = vst [vmem:[%s1547_s17 + $0x70] sm:$0x1] %v1206_v16  ;;  %v1083_v22 = vsel %vm1055_vm2, %v1081_v34, %v1082_v9  ;;  %v441_v18 = vadd.f32 %v381_v6, %v1694_v51  ;;  %v281_v43 = vmul.f32 0.375, %v1651_v44  ;;  %v328_v24 = vadd.f32 %v1672_v0, %v1592_v38 }
  0x57   : > { %v656_v25 = vsel %vm628_vm0, %v654_v62, %v655_v13  ;;  %v844_v29 = vsel %vm816_vm1, %v842_v17, %v843_v19  ;;  %v329_v31 = vadd.f32 %v1679_v27, %v1595_v3  ;;  %v1738_v32 = vmul.f32 0.125, %v1721_v11  ;;  %v1764_v17 = vld [vmem:[%s1470_s13 + $0x100] sm:$0xf] }
  0x58   : > { %v780_v20 = vadd.f32 %v656_v25, %v490_v1  ;;  %v492_v14 = vmul.f32 0.125, %v441_v18  ;;  %v543_v35 = vmul.f32 0.375, %v441_v18  ;;  %v382_v44 = vadd.f32 %v328_v24, %v1718_v7 }
  0x59   : > { %v383_v38 = vadd.f32 %v329_v31, %v281_v43  ;;  %v282_v0 = vmul.f32 0.375, %v1683_v26  ;;  %v330_v39 = vadd.f32 %v279_v58, %v1621_v60  ;;  %v1747_v41 = vmul.f32 0.125, %v1731_v8 }
  0x5a   : > { %v968_v47 = vadd.f32 %v844_v29, %v780_v20  ;;  %v657_v3 = vrot.slane %v543_v35, 1  ;;  %v845_v27 = vrot.slane %v543_v35, 2  ;;  %v1084_v48 = vrot.slane %v492_v14, 3 }
  0x5b   : > { %v442_v53 = vadd.f32 %v382_v44, %v1711_v57  ;;  %v443_v42 = vadd.f32 %v383_v38, %v1714_v5  ;;  %v384_v45 = vadd.f32 %v330_v39, %v282_v0  ;;  %v1752_v54 = vmul.f32 0.125, %v1742_v23 }
  0x5c   : > { %v1207_v10 = vadd.f32 %v1083_v22, %v968_v47  ;;  %v658_v26 = vsel %vm628_vm0, %v655_v13, %v657_v3  ;;  %v846_v60 = vsel %vm816_vm1, %v843_v19, %v845_v27  ;;  %v1085_v58 = vsel %vm1055_vm2, %v1082_v9, %v1084_v48 }
  0x5d   : > { %v781_v55 = vadd.f32 %v658_v26, %v491_v28  ;;  %v782_v36 = vadd.f32 %v657_v3, %v492_v14  ;;  %v493_v21 = vmul.f32 0.125, %v442_v53  ;;  %v494_v12 = vmul.f32 0.125, %v443_v42  ;;  %v1783_v3 = vld [vmem:[%s1470_s13 + $0x108] sm:$0xff] }
  0x5e   : > { %1258 = vst [vmem:[%s1547_s17 + $0x78] sm:$0xff] %v1207_v10  ;;  %v544_v56 = vmul.f32 0.375, %v442_v53  ;;  %v545_v49 = vmul.f32 0.375, %v443_v42  ;;  %v444_v15 = vadd.f32 %v384_v45, %v1738_v32  ;;  %v1760_v46 = vmul.f32 0.375, %v1698_v52 }
  0x5f   : > { %v969_v61 = vadd.f32 %v846_v60, %v781_v55  ;;  %v970_v1 = vadd.f32 %v845_v27, %v782_v36  ;;  %v1086_v2 = vrot.slane %v493_v21, 3  ;;  %v1087_v37 = vrot.slane %v494_v12, 3 }
  0x60   : > { %v659_v6 = vrot.slane %v544_v56, 1  ;;  %v660_v28 = vrot.slane %v545_v49, 1  ;;  %v847_v63 = vrot.slane %v544_v56, 2  ;;  %v848_v16 = vrot.slane %v545_v49, 2 }
  0x61   : > { %v1208_v34 = vadd.f32 %v1085_v58, %v969_v61  ;;  %v1209_v9 = vadd.f32 %v1084_v48, %v970_v1  ;;  %v1088_v62 = vsel %vm1055_vm2, %v1086_v2, %v1087_v37  ;;  %v495_v13 = vmul.f32 0.125, %v444_v15 }
  0x62   : > { %v661_v52 = vsel %vm628_vm0, %v659_v6, %v660_v28  ;;  %v849_v19 = vsel %vm816_vm1, %v847_v63, %v848_v16  ;;  %v546_v22 = vmul.f32 0.375, %v444_v15  ;;  %v284_v18 = vmul.f32 0.375, %v1701_v59 }
  0x63   : > { %1259 = vst [vmem:[%s1547_s17 + $0x80] sm:$0xff] %v1208_v34  ;;  %1260 = vst [vmem:[%s1547_s17 + $0x88] sm:$0x1] %v1209_v9  ;;  %v783_v24 = vadd.f32 %v661_v52, %v493_v21  ;;  %v1089_v25 = vrot.slane %v495_v13, 3  ;;  %v331_v29 = vadd.f32 %v1718_v7, %v1638_v40  ;;  %v332_v31 = vadd.f32 %v281_v43, %v1640_v30  ;;  %v1786_v40 = vld [vmem:[%s1470_s13 + $0x110] sm:$0xff] }
  0x64   : > { %v662_v20 = vrot.slane %v546_v22, 1  ;;  %v850_v14 = vrot.slane %v546_v22, 2  ;;  %v1775_v35 = vmul.f32 0.125, %v1764_v17  ;;  %v1778_v44 = vmul.f32 0.375, %v1721_v11  ;;  %v183_v9 = vld [vmem:[%s1470_s13 + $0x118] sm:$0xf] }
  0x65   : > { %v971_v38 = vadd.f32 %v849_v19, %v783_v24  ;;  %v1090_v59 = vsel %vm1055_vm2, %v1087_v37, %v1089_v25  ;;  %v385_v39 = vadd.f32 %v331_v29, %v1760_v46  ;;  %v386_v47 = vadd.f32 %v332_v31, %v284_v18 }
  0x66   : > { %v663_v30 = vsel %vm628_vm0, %v660_v28, %v662_v20  ;;  %v851_v7 = vsel %vm816_vm1, %v848_v16, %v850_v14  ;;  %v785_v43 = vadd.f32 %v662_v20, %v495_v13  ;;  %v333_v27 = vadd.f32 %v282_v0, %v1658_v50 }
  0x67   : > { %v1210_v11 = vadd.f32 %v1088_v62, %v971_v38  ;;  %v784_v48 = vadd.f32 %v663_v30, %v494_v12  ;;  %v445_v53 = vadd.f32 %v385_v39, %v1747_v41  ;;  %v446_v42 = vadd.f32 %v386_v47, %v1752_v54 }
  0x68   : > { %v973_v45 = vadd.f32 %v850_v14, %v785_v43  ;;  %v387_v10 = vadd.f32 %v333_v27, %v1778_v44  ;;  %v1795_v26 = vmul.f32 0.125, %v1783_v3  ;;  %v1798_v60 = vmul.f32 0.125, %v1786_v40 }
  0x69   : > { %1261 = vst [vmem:[%s1547_s17 + $0x90] sm:$0xff] %v1210_v11  ;;  %v972_v58 = vadd.f32 %v851_v7, %v784_v48  ;;  %v496_v55 = vmul.f32 0.125, %v445_v53  ;;  %v497_v50 = vmul.f32 0.125, %v446_v42  ;;  %v547_v0 = vmul.f32 0.375, %v445_v53 }
  0x6a   : > { %v1212_v36 = vadd.f32 %v1089_v25, %v973_v45  ;;  %v548_v21 = vmul.f32 0.375, %v446_v42  ;;  %v447_v12 = vadd.f32 %v387_v10, %v1775_v35  ;;  %v1803_v56 = vmul.f32 0.375, %v1731_v8 }
  0x6b   : > { %v1211_v49 = vadd.f32 %v1090_v59, %v972_v58  ;;  %v664_v15 = vrot.slane %v547_v0, 1  ;;  %v852_v61 = vrot.slane %v547_v0, 2  ;;  %v1091_v1 = vrot.slane %v496_v55, 3 }
  0x6c   : > { %1263 = vst [vmem:[%s1547_s17 + $0xa0] sm:$0x1] %v1212_v36  ;;  %v665_v2 = vrot.slane %v548_v21, 1  ;;  %v853_v37 = vrot.slane %v548_v21, 2  ;;  %v1092_v6 = vrot.slane %v497_v50, 3  ;;  %v498_v28 = vmul.f32 0.125, %v447_v12 }
  0x6d   : > { %1262 = vst [vmem:[%s1547_s17 + $0x98] sm:$0xff] %v1211_v49  ;;  %v549_v63 = vmul.f32 0.375, %v447_v12  ;;  %v287_v16 = vmul.f32 0.375, %v1742_v23  ;;  %v334_v34 = vadd.f32 %v1760_v46, %v1664_v4  ;;  %v335_v8 = vadd.f32 %v284_v18, %v1667_v33  ;;  %v1821_v46 = vld [vmem:[%s1470_s13 + $0x120] sm:$0xff]  ;;  %v1824_v18 = vld [vmem:[%s1470_s13 + $0x128] sm:$0xff] }
  0x6e   : > { %v666_v62 = vsel %vm628_vm0, %v664_v15, %v665_v2  ;;  %v854_v13 = vsel %vm816_vm1, %v852_v61, %v853_v37  ;;  %v1093_v52 = vsel %vm1055_vm2, %v1091_v1, %v1092_v6  ;;  %v1094_v19 = vrot.slane %v498_v28, 3 }
  0x6f   : > { %v786_v22 = vadd.f32 %v666_v62, %v496_v55  ;;  %v667_v24 = vrot.slane %v549_v63, 1  ;;  %v855_v25 = vrot.slane %v549_v63, 2  ;;  %v388_v23 = vadd.f32 %v334_v34, %v1803_v56 }
  0x70   : > { %v1095_v29 = vsel %vm1055_vm2, %v1092_v6, %v1094_v19  ;;  %v389_v31 = vadd.f32 %v335_v8, %v287_v16  ;;  %v1817_v4 = vmul.f32 0.125, %v183_v9  ;;  %v288_v33 = vmul.f32 0.375, %v1764_v17  ;;  %v1856_v6 = vld [vmem:[%s1470_s13 + $0x138] sm:$0xff] }
  0x71   : > { %v974_v20 = vadd.f32 %v854_v13, %v786_v22  ;;  %v668_v14 = vsel %vm628_vm0, %v665_v2, %v667_v24  ;;  %v856_v38 = vsel %vm816_vm1, %v853_v37, %v855_v25  ;;  %v788_v59 = vadd.f32 %v667_v24, %v498_v28 }
  0x72   : > { %v787_v39 = vadd.f32 %v668_v14, %v497_v50  ;;  %v448_v47 = vadd.f32 %v388_v23, %v1795_v26  ;;  %v449_v30 = vadd.f32 %v389_v31, %v1798_v60  ;;  %v336_v17 = vadd.f32 %v1778_v44, %v1694_v51  ;;  %v1843_v44 = vld [vmem:[%s1470_s13 + $0x130] sm:$0xf] }
  0x73   : > { %v1213_v7 = vadd.f32 %v1093_v52, %v974_v20  ;;  %v976_v43 = vadd.f32 %v855_v25, %v788_v59  ;;  %v1833_v27 = vmul.f32 0.125, %v1821_v46  ;;  %v1836_v11 = vmul.f32 0.125, %v1824_v18 }
  0x74   : > { %v975_v48 = vadd.f32 %v856_v38, %v787_v39  ;;  %v499_v53 = vmul.f32 0.125, %v448_v47  ;;  %v500_v42 = vmul.f32 0.125, %v449_v30  ;;  %v550_v45 = vmul.f32 0.375, %v448_v47 }
  0x75   : > { %1264 = vst [vmem:[%s1547_s17 + $0xa8] sm:$0xff] %v1213_v7  ;;  %v1215_v10 = vadd.f32 %v1094_v19, %v976_v43  ;;  %v551_v58 = vmul.f32 0.375, %v449_v30  ;;  %v390_v55 = vadd.f32 %v336_v17, %v288_v33  ;;  %v1840_v51 = vmul.f32 0.375, %v1783_v3 }
  0x76   : > { %v1214_v50 = vadd.f32 %v1095_v29, %v975_v48  ;;  %v669_v0 = vrot.slane %v550_v45, 1  ;;  %v857_v36 = vrot.slane %v550_v45, 2  ;;  %v1096_v21 = vrot.slane %v499_v53, 3 }
  0x77   : > { %1266 = vst [vmem:[%s1547_s17 + $0xb8] sm:$0x1] %v1215_v10  ;;  %v670_v12 = vrot.slane %v551_v58, 1  ;;  %v858_v49 = vrot.slane %v551_v58, 2  ;;  %v1097_v15 = vrot.slane %v500_v42, 3  ;;  %v450_v61 = vadd.f32 %v390_v55, %v1817_v4 }
  0x78   : > { %1265 = vst [vmem:[%s1547_s17 + $0xb0] sm:$0xff] %v1214_v50  ;;  %v290_v1 = vmul.f32 0.375, %v1786_v40  ;;  %v337_v3 = vadd.f32 %v1803_v56, %v1711_v57  ;;  %v338_v2 = vadd.f32 %v287_v16, %v1714_v5  ;;  %v1853_v37 = vmul.f32 0.125, %v1843_v44  ;;  %v1863_v57 = vld [vmem:[%s1470_s13 + $0x140] sm:$0xff] }
  0x79   : > { %v671_v28 = vsel %vm628_vm0, %v669_v0, %v670_v12  ;;  %v859_v63 = vsel %vm816_vm1, %v857_v36, %v858_v49  ;;  %v1098_v34 = vsel %vm1055_vm2, %v1096_v21, %v1097_v15  ;;  %v501_v8 = vmul.f32 0.125, %v450_v61 }
  0x7a   : > { %v789_v62 = vadd.f32 %v671_v28, %v499_v53  ;;  %v552_v13 = vmul.f32 0.375, %v450_v61  ;;  %v391_v40 = vadd.f32 %v337_v3, %v1840_v51  ;;  %v392_v52 = vadd.f32 %v338_v2, %v290_v1 }
  0x7b   : > { %v1099_v5 = vrot.slane %v501_v8, 3  ;;  %v291_v56 = vmul.f32 0.375, %v183_v9  ;;  %v339_v16 = vadd.f32 %v288_v33, %v1738_v32  ;;  %v1867_v19 = vmul.f32 0.125, %v1856_v6 }
  0x7c   : > { %v977_v22 = vadd.f32 %v859_v63, %v789_v62  ;;  %v672_v24 = vrot.slane %v552_v13, 1  ;;  %v860_v25 = vrot.slane %v552_v13, 2  ;;  %v451_v23 = vadd.f32 %v391_v40, %v1833_v27 }
  0x7d   : > { %v1100_v29 = vsel %vm1055_vm2, %v1097_v15, %v1099_v5  ;;  %v452_v31 = vadd.f32 %v392_v52, %v1836_v11  ;;  %v393_v20 = vadd.f32 %v339_v16, %v291_v56  ;;  %v1873_v14 = vmul.f32 0.125, %v1863_v57  ;;  %v1884_v15 = vld [vmem:[%s1470_s13 + $0x148] sm:$0xf]  ;;  %v1900_v52 = vld [vmem:[%s1470_s13 + $0x150] sm:$0xff] }
  0x7e   : > { %v1216_v9 = vadd.f32 %v1098_v34, %v977_v22  ;;  %v673_v32 = vsel %vm628_vm0, %v670_v12, %v672_v24  ;;  %v861_v33 = vsel %vm816_vm1, %v858_v49, %v860_v25  ;;  %v791_v38 = vadd.f32 %v672_v24, %v501_v8 }
  0x7f   : > { %v790_v59 = vadd.f32 %v673_v32, %v500_v42  ;;  %v502_v39 = vmul.f32 0.125, %v451_v23  ;;  %v503_v47 = vmul.f32 0.125, %v452_v31  ;;  %v553_v30 = vmul.f32 0.375, %v451_v23 }
  0x80   : > { %1267 = vst [vmem:[%s1547_s17 + $0xc0] sm:$0xff] %v1216_v9  ;;  %v979_v17 = vadd.f32 %v860_v25, %v791_v38  ;;  %v554_v7 = vmul.f32 0.375, %v452_v31  ;;  %v453_v43 = vadd.f32 %v393_v20, %v1853_v37  ;;  %v1880_v48 = vmul.f32 0.375, %v1821_v46 }
  0x81   : > { %v978_v53 = vadd.f32 %v861_v33, %v790_v59  ;;  %v674_v45 = vrot.slane %v553_v30, 1  ;;  %v862_v10 = vrot.slane %v553_v30, 2  ;;  %v1101_v58 = vrot.slane %v502_v39, 3 }
  0x82   : > { %v1218_v55 = vadd.f32 %v1099_v5, %v979_v17  ;;  %v675_v42 = vrot.slane %v554_v7, 1  ;;  %v863_v50 = vrot.slane %v554_v7, 2  ;;  %v1102_v0 = vrot.slane %v503_v47, 3  ;;  %v1903_v5 = vld [vmem:[%s1470_s13 + $0x158] sm:$0xff]  ;;  %v1925_v7 = vld [vmem:[%s1470_s13 + $0x160] sm:$0xf] }
  0x83   : > { %v1217_v36 = vadd.f32 %v1100_v29, %v978_v53  ;;  %v504_v21 = vmul.f32 0.125, %v453_v43  ;;  %v555_v12 = vmul.f32 0.375, %v453_v43  ;;  %v293_v49 = vmul.f32 0.375, %v1824_v18 }
  0x84   : > { %1269 = vst [vmem:[%s1547_s17 + $0xd0] sm:$0x1] %v1218_v55  ;;  %v676_v46 = vsel %vm628_vm0, %v674_v45, %v675_v42  ;;  %v864_v61 = vsel %vm816_vm1, %v862_v10, %v863_v50  ;;  %v1103_v3 = vsel %vm1055_vm2, %v1101_v58, %v1102_v0  ;;  %v340_v2 = vadd.f32 %v1840_v51, %v1747_v41 }
  0x85   : > { %1268 = vst [vmem:[%s1547_s17 + $0xc8] sm:$0xff] %v1217_v36  ;;  %v792_v28 = vadd.f32 %v676_v46, %v502_v39  ;;  %v677_v63 = vrot.slane %v555_v12, 1  ;;  %v865_v34 = vrot.slane %v555_v12, 2  ;;  %v1104_v8 = vrot.slane %v504_v21, 3 }
  0x86   : > { %v341_v18 = vadd.f32 %v290_v1, %v1752_v54  ;;  %v394_v62 = vadd.f32 %v340_v2, %v1880_v48  ;;  %v1896_v13 = vmul.f32 0.125, %v1884_v15  ;;  %v294_v40 = vmul.f32 0.375, %v1843_v44 }
  0x87   : > { %v980_v16 = vadd.f32 %v864_v61, %v792_v28  ;;  %v678_v41 = vsel %vm628_vm0, %v675_v42, %v677_v63  ;;  %v866_v51 = vsel %vm816_vm1, %v863_v50, %v865_v34  ;;  %v1105_v22 = vsel %vm1055_vm2, %v1102_v0, %v1104_v8 }
  0x88   : > { %v793_v54 = vadd.f32 %v678_v41, %v503_v47  ;;  %v794_v1 = vadd.f32 %v677_v63, %v504_v21  ;;  %v395_v24 = vadd.f32 %v341_v18, %v293_v49  ;;  %v454_v25 = vadd.f32 %v394_v62, %v1867_v19 }
  0x89   : > { %v1219_v23 = vadd.f32 %v1103_v3, %v980_v16  ;;  %v342_v44 = vadd.f32 %v291_v56, %v1775_v35  ;;  %v1911_v29 = vmul.f32 0.125, %v1900_v52  ;;  %v1914_v31 = vmul.f32 0.125, %v1903_v5 }
  0x8a   : > { %v981_v20 = vadd.f32 %v866_v51, %v793_v54  ;;  %v982_v9 = vadd.f32 %v865_v34, %v794_v1  ;;  %v455_v32 = vadd.f32 %v395_v24, %v1873_v14  ;;  %v505_v33 = vmul.f32 0.125, %v454_v25  ;;  %v1945_v34 = vld [vmem:[%s1470_s13 + $0x168] sm:$0xff] }
  0x8b   : > { %1270 = vst [vmem:[%s1547_s17 + $0xd8] sm:$0xff] %v1219_v23  ;;  %v556_v38 = vmul.f32 0.375, %v454_v25  ;;  %v396_v59 = vadd.f32 %v342_v44, %v294_v40  ;;  %v1919_v39 = vmul.f32 0.375, %v1856_v6  ;;  %v1922_v35 = vmul.f32 0.375, %v1863_v57 }
  0x8c   : > { %v1220_v56 = vadd.f32 %v1105_v22, %v981_v20  ;;  %v1221_v47 = vadd.f32 %v1104_v8, %v982_v9  ;;  %v506_v30 = vmul.f32 0.125, %v455_v32  ;;  %v557_v17 = vmul.f32 0.375, %v455_v32  ;;  %v194_v20 = vld [vmem:[%s1470_s13 + $0x170] sm:$0xff] }
  0x8d   : > { %v679_v43 = vrot.slane %v556_v38, 1  ;;  %v867_v53 = vrot.slane %v556_v38, 2  ;;  %v1106_v45 = vrot.slane %v505_v33, 3  ;;  %v456_v10 = vadd.f32 %v396_v59, %v1896_v13 }
  0x8e   : > { %1271 = vst [vmem:[%s1547_s17 + $0xe0] sm:$0xff] %v1220_v56  ;;  %1272 = vst [vmem:[%s1547_s17 + $0xe8] sm:$0x1] %v1221_v47  ;;  %v680_v58 = vrot.slane %v557_v17, 1  ;;  %v868_v55 = vrot.slane %v557_v17, 2  ;;  %v1107_v6 = vrot.slane %v506_v30, 3  ;;  %v343_v57 = vadd.f32 %v1880_v48, %v1795_v26 }
  0x8f   : > { %v507_v42 = vmul.f32 0.125, %v456_v10  ;;  %v558_v50 = vmul.f32 0.375, %v456_v10  ;;  %v344_v0 = vadd.f32 %v293_v49, %v1798_v60  ;;  %v1934_v36 = vmul.f32 0.125, %v1925_v7  ;;  %v1960_v10 = vld [vmem:[%s1470_s13 + $0x178] sm:$0xf] }
  0x90   : > { %v681_v21 = vsel %vm628_vm0, %v679_v43, %v680_v58  ;;  %v869_v12 = vsel %vm816_vm1, %v867_v53, %v868_v55  ;;  %v1108_v46 = vsel %vm1055_vm2, %v1106_v45, %v1107_v6  ;;  %v397_v61 = vadd.f32 %v343_v57, %v1919_v39 }
  0x91   : > { %v795_v3 = vadd.f32 %v681_v21, %v505_v33  ;;  %v682_v2 = vrot.slane %v558_v50, 1  ;;  %v870_v28 = vrot.slane %v558_v50, 2  ;;  %v1109_v26 = vrot.slane %v507_v42, 3 }
  0x92   : > { %v398_v48 = vadd.f32 %v344_v0, %v1922_v35  ;;  %v457_v63 = vadd.f32 %v397_v61, %v1911_v29  ;;  %v297_v60 = vmul.f32 0.375, %v1884_v15  ;;  %v345_v49 = vadd.f32 %v294_v40, %v1817_v4 }
  0x93   : > { %v983_v8 = vadd.f32 %v869_v12, %v795_v3  ;;  %v683_v18 = vsel %vm628_vm0, %v680_v58, %v682_v2  ;;  %v871_v62 = vsel %vm816_vm1, %v868_v55, %v870_v28  ;;  %v1110_v16 = vsel %vm1055_vm2, %v1107_v6, %v1109_v26 }
  0x94   : > { %v796_v41 = vadd.f32 %v683_v18, %v506_v30  ;;  %v797_v51 = vadd.f32 %v682_v2, %v507_v42  ;;  %v458_v22 = vadd.f32 %v398_v48, %v1914_v31  ;;  %v508_v54 = vmul.f32 0.125, %v457_v63 }
  0x95   : > { %v1222_v1 = vadd.f32 %v1108_v46, %v983_v8  ;;  %v559_v15 = vmul.f32 0.375, %v457_v63  ;;  %v399_v24 = vadd.f32 %v345_v49, %v297_v60  ;;  %v1952_v4 = vmul.f32 0.125, %v1945_v34 }
  0x96   : > { %v984_v40 = vadd.f32 %v871_v62, %v796_v41  ;;  %v985_v25 = vadd.f32 %v870_v28, %v797_v51  ;;  %v509_v23 = vmul.f32 0.125, %v458_v22  ;;  %v560_v44 = vmul.f32 0.375, %v458_v22 }
  0x97   : > { %1273 = vst [vmem:[%s1547_s17 + $0xf0] sm:$0xff] %v1222_v1  ;;  %v684_v9 = vrot.slane %v559_v15, 1  ;;  %v872_v32 = vrot.slane %v559_v15, 2  ;;  %v1111_v33 = vrot.slane %v508_v54, 3  ;;  %v459_v38 = vadd.f32 %v399_v24, %v1934_v36 }
  0x98   : > { %v1223_v59 = vadd.f32 %v1110_v16, %v984_v40  ;;  %v1224_v56 = vadd.f32 %v1109_v26, %v985_v25  ;;  %v685_v47 = vrot.slane %v560_v44, 1  ;;  %v873_v30 = vrot.slane %v560_v44, 2  ;;  %v1979_v26 = vld [vmem:[%s1470_s13 + $0x180] sm:$0xff] }
  0x99   : > { %v1112_v17 = vrot.slane %v509_v23, 3  ;;  %v510_v43 = vmul.f32 0.125, %v459_v38  ;;  %v561_v53 = vmul.f32 0.375, %v459_v38  ;;  %v1957_v45 = vmul.f32 0.125, %v194_v20 }
  0x9a   : > { %1274 = vst [vmem:[%s1547_s17 + $0xf8] sm:$0xff] %v1223_v59  ;;  %1275 = vst [vmem:[%s1547_s17 + $0x100] sm:$0x1] %v1224_v56  ;;  %v686_v58 = vsel %vm628_vm0, %v684_v9, %v685_v47  ;;  %v874_v55 = vsel %vm816_vm1, %v872_v32, %v873_v30  ;;  %v298_v6 = vmul.f32 0.375, %v1900_v52  ;;  %v299_v57 = vmul.f32 0.375, %v1903_v5 }
  0x9b   : > { %v798_v42 = vadd.f32 %v686_v58, %v508_v54  ;;  %v1113_v50 = vsel %vm1055_vm2, %v1111_v33, %v1112_v17  ;;  %v687_v0 = vrot.slane %v561_v53, 1  ;;  %v875_v21 = vrot.slane %v561_v53, 2  ;;  %v2001_v9 = vld [vmem:[%s1470_s13 + $0x190] sm:$0xf] }
  0x9c   : > { %v1114_v12 = vrot.slane %v510_v43, 3  ;;  %v346_v46 = vadd.f32 %v1919_v39, %v1833_v27  ;;  %v347_v61 = vadd.f32 %v1922_v35, %v1836_v11  ;;  %v1974_v3 = vmul.f32 0.125, %v1960_v10  ;;  %v1983_v39 = vld [vmem:[%s1470_s13 + $0x188] sm:$0xff] }
  0x9d   : > { %v986_v2 = vadd.f32 %v874_v55, %v798_v42  ;;  %v688_v52 = vsel %vm628_vm0, %v685_v47, %v687_v0  ;;  %v876_v5 = vsel %vm816_vm1, %v873_v30, %v875_v21  ;;  %v800_v28 = vadd.f32 %v687_v0, %v510_v43 }
  0x9e   : > { %v799_v48 = vadd.f32 %v688_v52, %v509_v23  ;;  %v1115_v63 = vsel %vm1055_vm2, %v1112_v17, %v1114_v12  ;;  %v400_v49 = vadd.f32 %v346_v46, %v298_v6  ;;  %v401_v27 = vadd.f32 %v347_v61, %v299_v57 }
  0x9f   : > { %v1225_v11 = vadd.f32 %v1113_v50, %v986_v2  ;;  %v988_v35 = vadd.f32 %v875_v21, %v800_v28  ;;  %v300_v8 = vmul.f32 0.375, %v1925_v7  ;;  %v348_v18 = vadd.f32 %v297_v60, %v1853_v37 }
  0xa0   : > { %v987_v62 = vadd.f32 %v876_v5, %v799_v48  ;;  %v460_v16 = vadd.f32 %v400_v49, %v1952_v4  ;;  %v461_v41 = vadd.f32 %v401_v27, %v1957_v45  ;;  %v1990_v51 = vmul.f32 0.125, %v1979_v26 }
  0xa1   : > { %1276 = vst [vmem:[%s1547_s17 + $0x108] sm:$0xff] %v1225_v11  ;;  %v1227_v22 = vadd.f32 %v1114_v12, %v988_v35  ;;  %v402_v54 = vadd.f32 %v348_v18, %v300_v8  ;;  %v1994_v1 = vmul.f32 0.125, %v1983_v39  ;;  %v301_v7 = vmul.f32 0.375, %v1945_v34 }
  0xa2   : > { %v1226_v15 = vadd.f32 %v1115_v63, %v987_v62  ;;  %v511_v37 = vmul.f32 0.125, %v460_v16  ;;  %v512_v60 = vmul.f32 0.125, %v461_v41  ;;  %v562_v24 = vmul.f32 0.375, %v460_v16 }
  0xa3   : > { %1278 = vst [vmem:[%s1547_s17 + $0x118] sm:$0x1] %v1227_v22  ;;  %v563_v40 = vmul.f32 0.375, %v461_v41  ;;  %v462_v25 = vadd.f32 %v402_v54, %v1974_v3  ;;  %v302_v23 = vmul.f32 0.375, %v194_v20  ;;  %v349_v44 = vadd.f32 %v298_v6, %v1867_v19 }
  0xa4   : > { %1277 = vst [vmem:[%s1547_s17 + $0x110] sm:$0xff] %v1226_v15  ;;  %v689_v32 = vrot.slane %v562_v24, 1  ;;  %v877_v33 = vrot.slane %v562_v24, 2  ;;  %v1116_v38 = vrot.slane %v511_v37, 3  ;;  %v1117_v59 = vrot.slane %v512_v60, 3 }
  0xa5   : > { %v690_v56 = vrot.slane %v563_v40, 1  ;;  %v878_v34 = vrot.slane %v563_v40, 2  ;;  %v513_v47 = vmul.f32 0.125, %v462_v25  ;;  %v564_v30 = vmul.f32 0.375, %v462_v25 }
  0xa6   : > { %v1118_v17 = vsel %vm1055_vm2, %v1116_v38, %v1117_v59  ;;  %v350_v43 = vadd.f32 %v299_v57, %v1873_v14  ;;  %v403_v53 = vadd.f32 %v349_v44, %v301_v7  ;;  %v2007_v20 = vmul.f32 0.125, %v2001_v9 }
  0xa7   : > { %v691_v19 = vsel %vm628_vm0, %v689_v32, %v690_v56  ;;  %v879_v58 = vsel %vm816_vm1, %v877_v33, %v878_v34  ;;  %v692_v55 = vrot.slane %v564_v30, 1  ;;  %v880_v6 = vrot.slane %v564_v30, 2  ;;  %v199_v32 = vld [vmem:[%s1470_s13 + $0x198] sm:$0xff] }
  0xa8   : > { %v801_v42 = vadd.f32 %v691_v19, %v511_v37  ;;  %v1119_v50 = vrot.slane %v513_v47, 3  ;;  %v404_v0 = vadd.f32 %v350_v43, %v302_v23  ;;  %v463_v21 = vadd.f32 %v403_v53, %v1990_v51  ;;  %v201_v19 = vld [vmem:[%s1470_s13 + $0x1a8] sm:$0xf] }
  0xa9   : > { %v693_v12 = vsel %vm628_vm0, %v690_v56, %v692_v55  ;;  %v881_v46 = vsel %vm816_vm1, %v878_v34, %v880_v6  ;;  %v803_v14 = vadd.f32 %v692_v55, %v513_v47  ;;  %v303_v57 = vmul.f32 0.375, %v1960_v10 }
  0xaa   : > { %v989_v61 = vadd.f32 %v879_v58, %v801_v42  ;;  %v802_v2 = vadd.f32 %v693_v12, %v512_v60  ;;  %v1120_v52 = vsel %vm1055_vm2, %v1117_v59, %v1119_v50  ;;  %v464_v5 = vadd.f32 %v404_v0, %v1994_v1 }
  0xab   : > { %v991_v28 = vadd.f32 %v880_v6, %v803_v14  ;;  %v514_v48 = vmul.f32 0.125, %v463_v21  ;;  %v565_v63 = vmul.f32 0.375, %v463_v21  ;;  %v351_v49 = vadd.f32 %v300_v8, %v1896_v13 }
  0xac   : > { %v1228_v27 = vadd.f32 %v1118_v17, %v989_v61  ;;  %v990_v11 = vadd.f32 %v881_v46, %v802_v2  ;;  %v515_v35 = vmul.f32 0.125, %v464_v5  ;;  %v566_v18 = vmul.f32 0.375, %v464_v5 }
  0xad   : > { %v1230_v62 = vadd.f32 %v1119_v50, %v991_v28  ;;  %v694_v10 = vrot.slane %v565_v63, 1  ;;  %v882_v16 = vrot.slane %v565_v63, 2  ;;  %v1121_v41 = vrot.slane %v514_v48, 3 }
  0xae   : > { %1279 = vst [vmem:[%s1547_s17 + $0x120] sm:$0xff] %v1228_v27  ;;  %v1229_v22 = vadd.f32 %v1120_v52, %v990_v11  ;;  %v695_v54 = vrot.slane %v566_v18, 1  ;;  %v883_v15 = vrot.slane %v566_v18, 2  ;;  %v1122_v37 = vrot.slane %v515_v35, 3 }
  0xaf   : > { %1281 = vst [vmem:[%s1547_s17 + $0x130] sm:$0x1] %v1230_v62  ;;  %v405_v60 = vadd.f32 %v351_v49, %v303_v57  ;;  %v304_v13 = vmul.f32 0.375, %v1979_v26  ;;  %v2022_v8 = vmul.f32 0.375, %v1983_v39  ;;  %v352_v24 = vadd.f32 %v301_v7, %v1911_v29  ;;  %v200_v26 = vld [vmem:[%s1470_s13 + $0x1a0] sm:$0xff] }
  0xb0   : > { %1280 = vst [vmem:[%s1547_s17 + $0x128] sm:$0xff] %v1229_v22  ;;  %v696_v40 = vsel %vm628_vm0, %v694_v10, %v695_v54  ;;  %v884_v25 = vsel %vm816_vm1, %v882_v16, %v883_v15  ;;  %v1123_v44 = vsel %vm1055_vm2, %v1121_v41, %v1122_v37  ;;  %v353_v33 = vadd.f32 %v302_v23, %v1914_v31 }
  0xb1   : > { %v804_v38 = vadd.f32 %v696_v40, %v514_v48  ;;  %v465_v59 = vadd.f32 %v405_v60, %v2007_v20  ;;  %v406_v56 = vadd.f32 %v352_v24, %v304_v13  ;;  %v415_v39 = vmul.f32 0.125, %v199_v32  ;;  %v202_v60 = vld [vmem:[%s1470_s13 + $0x1b0] sm:$0xff]  ;;  %v203_v24 = vld [vmem:[%s1470_s13 + $0x1b8] sm:$0xff] }
  0xb2   : > { %v407_v34 = vadd.f32 %v353_v33, %v2022_v8  ;;  %v416_v29 = vmul.f32 0.125, %v200_v26  ;;  %v306_v7 = vmul.f32 0.375, %v2001_v9  ;;  %v354_v47 = vadd.f32 %v303_v57, %v1934_v36 }
  0xb3   : > { %v992_v30 = vadd.f32 %v884_v25, %v804_v38  ;;  %v516_v17 = vmul.f32 0.125, %v465_v59  ;;  %v567_v43 = vmul.f32 0.375, %v465_v59  ;;  %v466_v53 = vadd.f32 %v415_v39, %v406_v56 }
  0xb4   : > { %v467_v31 = vadd.f32 %v416_v29, %v407_v34  ;;  %v408_v23 = vadd.f32 %v354_v47, %v306_v7  ;;  %v417_v58 = vmul.f32 0.125, %v201_v19  ;;  %v307_v55 = vmul.f32 0.375, %v199_v32 }
  0xb5   : > { %v1231_v6 = vadd.f32 %v1123_v44, %v992_v30  ;;  %v697_v42 = vrot.slane %v567_v43, 1  ;;  %v885_v50 = vrot.slane %v567_v43, 2  ;;  %v1124_v0 = vrot.slane %v516_v17, 3 }
  0xb6   : > { %v517_v21 = vmul.f32 0.125, %v466_v53  ;;  %v518_v12 = vmul.f32 0.125, %v467_v31  ;;  %v568_v46 = vmul.f32 0.375, %v466_v53  ;;  %v569_v9 = vmul.f32 0.375, %v467_v31  ;;  %v204_v53 = vld [vmem:[%s1470_s13 + $0x1c0] sm:$0xf] }
  0xb7   : > { %1282 = vst [vmem:[%s1547_s17 + $0x138] sm:$0xff] %v1231_v6  ;;  %v698_v36 = vsel %vm628_vm0, %v695_v54, %v697_v42  ;;  %v886_v14 = vsel %vm816_vm1, %v883_v15, %v885_v50  ;;  %v1125_v57 = vsel %vm1055_vm2, %v1122_v37, %v1124_v0  ;;  %v806_v61 = vadd.f32 %v697_v42, %v516_v17 }
  0xb8   : > { %v805_v2 = vadd.f32 %v698_v36, %v515_v35  ;;  %v699_v52 = vrot.slane %v568_v46, 1  ;;  %v700_v5 = vrot.slane %v569_v9, 1  ;;  %v887_v28 = vrot.slane %v568_v46, 2  ;;  %v205_v46 = vld [vmem:[%s1470_s13 + $0x1c8] sm:$0xff] }
  0xb9   : > { %v994_v48 = vadd.f32 %v885_v50, %v806_v61  ;;  %v888_v63 = vrot.slane %v569_v9, 2  ;;  %v1126_v49 = vrot.slane %v517_v21, 3  ;;  %v1127_v27 = vrot.slane %v518_v12, 3 }
  0xba   : > { %v993_v11 = vadd.f32 %v886_v14, %v805_v2  ;;  %v701_v18 = vsel %vm628_vm0, %v699_v52, %v700_v5  ;;  %v468_v62 = vadd.f32 %v417_v58, %v408_v23  ;;  %v308_v10 = vmul.f32 0.375, %v200_v26 }
  0xbb   : > { %v1233_v16 = vadd.f32 %v1124_v0, %v994_v48  ;;  %v807_v41 = vadd.f32 %v701_v18, %v517_v21  ;;  %v889_v35 = vsel %vm816_vm1, %v887_v28, %v888_v63  ;;  %v1128_v22 = vsel %vm1055_vm2, %v1126_v49, %v1127_v27 }
  0xbc   : > { %v1232_v54 = vadd.f32 %v1125_v57, %v993_v11  ;;  %v519_v15 = vmul.f32 0.125, %v468_v62  ;;  %v570_v37 = vmul.f32 0.375, %v468_v62  ;;  %v355_v40 = vadd.f32 %v304_v13, %v1952_v4 }
  0xbd   : > { %1284 = vst [vmem:[%s1547_s17 + $0x148] sm:$0x1] %v1233_v16  ;;  %v995_v25 = vadd.f32 %v889_v35, %v807_v41  ;;  %v356_v44 = vadd.f32 %v2022_v8, %v1957_v45  ;;  %v418_v32 = vmul.f32 0.125, %v202_v60  ;;  %v419_v33 = vmul.f32 0.125, %v203_v24 }
  0xbe   : > { %1283 = vst [vmem:[%s1547_s17 + $0x140] sm:$0xff] %v1232_v54  ;;  %v702_v38 = vrot.slane %v570_v37, 1  ;;  %v890_v59 = vrot.slane %v570_v37, 2  ;;  %v1129_v26 = vrot.slane %v519_v15, 3  ;;  %v409_v56 = vadd.f32 %v355_v40, %v307_v55 }
  0xbf   : > { %v1234_v39 = vadd.f32 %v1128_v22, %v995_v25  ;;  %v410_v34 = vadd.f32 %v356_v44, %v308_v10  ;;  %v309_v29 = vmul.f32 0.375, %v201_v19  ;;  %v357_v47 = vadd.f32 %v306_v7, %v1974_v3 }
  0xc0   : > { %v703_v4 = vsel %vm628_vm0, %v700_v5, %v702_v38  ;;  %v891_v13 = vsel %vm816_vm1, %v888_v63, %v890_v59  ;;  %v1130_v45 = vsel %vm1055_vm2, %v1127_v27, %v1129_v26  ;;  %v809_v8 = vadd.f32 %v702_v38, %v519_v15  ;;  %v206_v5 = vld [vmem:[%s1470_s13 + $0x1d0] sm:$0xff]  ;;  %v207_v15 = vld [vmem:[%s1470_s13 + $0x1d8] sm:$0xf] }
  0xc1   : > { %1285 = vst [vmem:[%s1547_s17 + $0x150] sm:$0xff] %v1234_v39  ;;  %v808_v30 = vadd.f32 %v703_v4, %v518_v12  ;;  %v469_v17 = vadd.f32 %v418_v32, %v409_v56  ;;  %v470_v43 = vadd.f32 %v419_v33, %v410_v34  ;;  %v411_v31 = vadd.f32 %v357_v47, %v309_v29 }
  0xc2   : > { %v997_v23 = vadd.f32 %v890_v59, %v809_v8  ;;  %v420_v58 = vmul.f32 0.125, %v204_v53  ;;  %v358_v19 = vadd.f32 %v307_v55, %v1990_v51  ;;  %v359_v3 = vadd.f32 %v308_v10, %v1994_v1 }
  0xc3   : > { %v996_v7 = vadd.f32 %v891_v13, %v808_v30  ;;  %v520_v6 = vmul.f32 0.125, %v469_v17  ;;  %v521_v42 = vmul.f32 0.125, %v470_v43  ;;  %v571_v50 = vmul.f32 0.375, %v469_v17 }
  0xc4   : > { %v1236_v0 = vadd.f32 %v1129_v26, %v997_v23  ;;  %v572_v21 = vmul.f32 0.375, %v470_v43  ;;  %v471_v12 = vadd.f32 %v420_v58, %v411_v31  ;;  %v361_v9 = vmul.f32 0.375, %v202_v60 }
  0xc5   : > { %v1235_v36 = vadd.f32 %v1130_v45, %v996_v7  ;;  %v704_v14 = vrot.slane %v571_v50, 1  ;;  %v892_v57 = vrot.slane %v571_v50, 2  ;;  %v1131_v61 = vrot.slane %v520_v6, 3 }
  0xc6   : > { %1287 = vst [vmem:[%s1547_s17 + $0x160] sm:$0x1] %v1236_v0  ;;  %v705_v2 = vrot.slane %v572_v21, 1  ;;  %v893_v51 = vrot.slane %v572_v21, 2  ;;  %v1132_v55 = vrot.slane %v521_v42, 3  ;;  %v522_v1 = vmul.f32 0.125, %v471_v12 }
  0xc7   : > { %1286 = vst [vmem:[%s1547_s17 + $0x158] sm:$0xff] %v1235_v36  ;;  %v573_v52 = vmul.f32 0.375, %v471_v12  ;;  %v362_v28 = vmul.f32 0.375, %v203_v24  ;;  %v412_v48 = vadd.f32 %v361_v9, %v358_v19  ;;  %v421_v63 = vmul.f32 0.125, %v205_v46 }
  0xc8   : > { %v706_v49 = vsel %vm628_vm0, %v704_v14, %v705_v2  ;;  %v894_v27 = vsel %vm816_vm1, %v892_v57, %v893_v51  ;;  %v1133_v11 = vsel %vm1055_vm2, %v1131_v61, %v1132_v55  ;;  %v1134_v18 = vrot.slane %v522_v1, 3 }
  0xc9   : > { %v810_v62 = vadd.f32 %v706_v49, %v520_v6  ;;  %v707_v10 = vrot.slane %v573_v52, 1  ;;  %v895_v16 = vrot.slane %v573_v52, 2  ;;  %v413_v41 = vadd.f32 %v362_v28, %v359_v3 }
  0xca   : > { %v1135_v35 = vsel %vm1055_vm2, %v1132_v55, %v1134_v18  ;;  %v422_v22 = vmul.f32 0.125, %v206_v5  ;;  %v472_v54 = vadd.f32 %v421_v63, %v412_v48  ;;  %v360_v37 = vadd.f32 %v309_v29, %v2007_v20 }
  0xcb   : > { %v998_v60 = vadd.f32 %v894_v27, %v810_v62  ;;  %v708_v24 = vsel %vm628_vm0, %v705_v2, %v707_v10  ;;  %v896_v40 = vsel %vm816_vm1, %v893_v51, %v895_v16  ;;  %v812_v25 = vadd.f32 %v707_v10, %v522_v1 }
  0xcc   : > { %v811_v44 = vadd.f32 %v708_v24, %v521_v42  ;;  %v473_v32 = vadd.f32 %v422_v22, %v413_v41  ;;  %v523_v33 = vmul.f32 0.125, %v472_v54  ;;  %v574_v38 = vmul.f32 0.375, %v472_v54 }
  0xcd   : > { %v1237_v59 = vadd.f32 %v1133_v11, %v998_v60  ;;  %v1000_v26 = vadd.f32 %v895_v16, %v812_v25  ;;  %v363_v56 = vmul.f32 0.375, %v204_v53  ;;  %v423_v39 = vmul.f32 0.125, %v207_v15 }
  0xce   : > { %v999_v34 = vadd.f32 %v896_v40, %v811_v44  ;;  %v524_v47 = vmul.f32 0.125, %v473_v32  ;;  %v575_v20 = vmul.f32 0.375, %v473_v32  ;;  %v709_v29 = vrot.slane %v574_v38, 1 }
  0xcf   : > { %1288 = vst [vmem:[%s1547_s17 + $0x168] sm:$0xff] %v1237_v59  ;;  %v1239_v4 = vadd.f32 %v1134_v18, %v1000_v26  ;;  %v897_v13 = vrot.slane %v574_v38, 2  ;;  %v1136_v45 = vrot.slane %v523_v33, 3  ;;  %v414_v8 = vadd.f32 %v363_v56, %v360_v37 }
  0xd0   : > { %v1238_v30 = vadd.f32 %v1135_v35, %v999_v34  ;;  %v710_v17 = vrot.slane %v575_v20, 1  ;;  %v898_v43 = vrot.slane %v575_v20, 2  ;;  %v1137_v31 = vrot.slane %v524_v47, 3 }
  0xd1   : > { %1290 = vst [vmem:[%s1547_s17 + $0x178] sm:$0x1] %v1239_v4  ;;  %v474_v23 = vadd.f32 %v423_v39, %v414_v8 }
  0xd2   : > { %1289 = vst [vmem:[%s1547_s17 + $0x170] sm:$0xff] %v1238_v30  ;;  %v711_v53 = vsel %vm628_vm0, %v709_v29, %v710_v17  ;;  %v899_v58 = vsel %vm816_vm1, %v897_v13, %v898_v43  ;;  %v1138_v6 = vsel %vm1055_vm2, %v1136_v45, %v1137_v31 }
  0xd3   : > { %v813_v19 = vadd.f32 %v711_v53, %v523_v33  ;;  %v525_v3 = vmul.f32 0.125, %v474_v23  ;;  %v576_v7 = vmul.f32 0.375, %v474_v23 }
  0xd5   : > { %v1001_v42 = vadd.f32 %v899_v58, %v813_v19  ;;  %v712_v50 = vrot.slane %v576_v7, 1  ;;  %v900_v0 = vrot.slane %v576_v7, 2  ;;  %v1139_v21 = vrot.slane %v525_v3, 3 }
  0xd7   : > { %v1240_v12 = vadd.f32 %v1138_v6, %v1001_v42  ;;  %v713_v46 = vsel %vm628_vm0, %v710_v17, %v712_v50  ;;  %v901_v9 = vsel %vm816_vm1, %v898_v43, %v900_v0  ;;  %v815_v14 = vadd.f32 %v712_v50, %v525_v3 }
  0xd8   : > { %v814_v36 = vadd.f32 %v713_v46, %v524_v47  ;;  %v1140_v57 = vsel %vm1055_vm2, %v1137_v31, %v1139_v21 }
  0xd9   : > { %1291 = vst [vmem:[%s1547_s17 + $0x180] sm:$0xff] %v1240_v12  ;;  %v1003_v2 = vadd.f32 %v900_v0, %v815_v14 }
  0xda   : > { %v1002_v61 = vadd.f32 %v901_v9, %v814_v36 }
  0xdb   : > { %v1242_v55 = vadd.f32 %v1139_v21, %v1003_v2 }
  0xdc   : > { %v1241_v51 = vadd.f32 %v1140_v57, %v1002_v61 }
  0xdd   : > { %1293 = vst [vmem:[%s1547_s17 + $0x190] sm:$0x1] %v1242_v55 }
  0xde   : > { %1292 = vst [vmem:[%s1547_s17 + $0x188] sm:$0xff] %v1241_v51 }
  0xdf PF: > { %s11_s8 = sadd.s32 1, %s1434_s8   ;;  %s2094_s6 = smov %s1430_s7 }
  0xe0   : > { %p8_p5 = scmp.ge.s32.totalorder %s11_s8, 4   ;;  %s2095_s7 = smov %s2097_s9 }
  0xe2   :  { %10 = sbr.rel (!%p8_p5) target bundleno = 2 (0x2), region = 54 }

// kernel: _lambda_.17
= control target key start
LH: loop header
LB: loop body
LE: loop exit
PB: predicated region body
PF: predicated region fallthrough
CT: control target
= control target key end

     0   :  { %s2341_s12 = smov 0   ;;  %s2343_s13 = smov 0   ;;  %s2744_s0 = inlined_call_operand.vmem [shape: bf16[512,1152], index: 0, kind: input, shape index: {}]   ;;  %s2745_s1 = inlined_call_operand.vmem [shape: bf16[1152,128], index: 1, kind: input, shape index: {}]   ;;  %s2746_s2 = inlined_call_operand.vmem [shape: f32[1,128], index: 2, kind: input, shape index: {}]   ;;  %s2747_s3 = inlined_call_operand.vmem [shape: f32[512,128], index: 3, kind: output, shape index: {}]  }
   0x1   :  { %s2345_s14 = smov 0   ;;  %s2347_s15 = smov 0  }
   0x2   :  { %s2349_s16 = smov 0   ;;  %s2351_s17 = smov 0  }
   0x3   :  { %s2353_s18 = smov 0  }
   0x4 LB: > { %s25_s19 = sadd.s32 1, %s2310_s16  ;;  %s32_s20 = sadd.s32 1, %s2314_s17  ;;  %s2318_s18 = sphi %s2353_s18, %s13_s18   ;;  %s2314_s17 = sphi %s2351_s17, %s2753_s17   ;;  %s2310_s16 = sphi %s2349_s16, %s2752_s16   ;;  %s2306_s15 = sphi %s2347_s15, %s2751_s15   ;;  %s2302_s14 = sphi %s2345_s14, %s2750_s14   ;;  %s2298_s13 = sphi %s2343_s13, %s2749_s13   ;;  %s2294_s12 = sphi %s2341_s12, %s2748_s12  }
   0x5   : > { %p26_p0 = scmp.ge.s32.totalorder %s25_s19, 3  ;;  %p48_p1 = scmp.ne.s32.totalorder %s2298_s13, %s2294_s12 }
   0x6   : > { %p49_p2 = scmp.eq.s32.totalorder %s2318_s18, 0  ;;  %s41_s24 = sadd.s32 1, %s2298_s13 }
   0x7   : > { %s2755_s19 = smov (%p26_p0, %s25_s19), 0  ;;  %s2757_s20 = smov (!%p26_p0, %s32_s20), %s2314_s17 }
   0x8   : > { %p50_p3 = por %p49_p2, %p48_p1  ;;  %p34_p4 = scmp.ge.s32.totalorder %s2757_s20, 2 }
   0x9   : > { %s37_s21 = ssub.s32 %s2310_s16, %s2755_s19  ;;  %p1767_p6 = scmp.ge.s32.totalorder %s2318_s18, 6 }
   0xa   : > { %s2759_s20 = smov (%p34_p4, %s2757_s20), 0 }
   0xb   : > { %s36_s22 = ssub.s32 %s2314_s17, %s2759_s20  ;;  %162 = sbr.rel (%p1767_p6) target bundleno = 64 (0x40), region = 20 }
   0xc   : > { %s38_s23 = sor.u32 %s37_s21, %s36_s22 }
   0xd   : > { %p39_p5 = scmp.eq.s32.totalorder %s38_s23, 0 }
   0xf   : > { %s2392_s25 = scalar_select %p39_p5, %s2298_s13, %s41_s24  }
  0x12   : > { %165 = sbr.rel (!%p50_p3) target bundleno = 64 (0x40), region = 24  ;;  %s167_s26 = sand.u32 (%p50_p3), 1, %s2298_s13  }
  0x13   : > { %s171_s27 = smul.u32 (%p50_p3), 3, %s2310_s16 }
  0x14   : > { %s2116_s28 = smul.u32 (%p50_p3), 384, %s167_s26 }
  0x15   : > { %s2117_s29 = smul.u32 (%p50_p3), 288, %s2314_s17 }
  0x16   : > { %s2406_s8 = scalar_lea.vmem (%p50_p3), [#allocation3], %s2116_s28 }
  0x17   : > { %s173_s30 = sadd.s32 (%p50_p3), %s2117_s29, %s171_s27 }
  0x18   : > { %s1770_s4 = sshll.u32 (%p50_p3), %s173_s30, 2 }
  0x19   : > { %s2401_s7 = scalar_lea.vmem %s2744_s0, %s1770_s4 }
  0x1a   : > { %v190_v0 = vld [vmem:[%s2401_s7] sm:$0xff]  ;;  %v194_v2 = vld [vmem:[%s2401_s7 + $0x48] sm:$0xff]  ;;  %v198_v4 = vld [vmem:[%s2401_s7 + $0x90] sm:$0xff] }
  0x1b   : > { %v192_v1 = vld [vmem:[%s2401_s7 + $0x24] sm:$0xff]  ;;  %191 = vst [vmem:[%s2406_s8] sm:$0xff] %v190_v0  ;;  %195 = vst [vmem:[%s2406_s8 + $0x18] sm:$0xff] %v194_v2  ;;  %v196_v3 = vld [vmem:[%s2401_s7 + $0x6c] sm:$0xff] }
  0x1c   : > { %193 = vst [vmem:[%s2406_s8 + $0xc] sm:$0xff] %v192_v1  ;;  %v200_v5 = vld [vmem:[%s2401_s7 + $0xb4] sm:$0xff]  ;;  %197 = vst [vmem:[%s2406_s8 + $0x24] sm:$0xff] %v196_v3  ;;  %v204_v7 = vld [vmem:[%s2401_s7 + $0xfc] sm:$0xff] }
  0x1d   : > { %199 = vst [vmem:[%s2406_s8 + $0x30] sm:$0xff] %v198_v4  ;;  %201 = vst [vmem:[%s2406_s8 + $0x3c] sm:$0xff] %v200_v5  ;;  %v202_v6 = vld [vmem:[%s2401_s7 + $0xd8] sm:$0xff]  ;;  %v206_v8 = vld [vmem:[%s2401_s7 + $0x120] sm:$0xff] }
  0x1e   : > { %203 = vst [vmem:[%s2406_s8 + $0x48] sm:$0xff] %v202_v6  ;;  %205 = vst [vmem:[%s2406_s8 + $0x54] sm:$0xff] %v204_v7  ;;  %v208_v9 = vld [vmem:[%s2401_s7 + $0x144] sm:$0xff]  ;;  %v212_v11 = vld [vmem:[%s2401_s7 + $0x18c] sm:$0xff] }
  0x1f   : > { %207 = vst [vmem:[%s2406_s8 + $0x60] sm:$0xff] %v206_v8  ;;  %v210_v10 = vld [vmem:[%s2401_s7 + $0x168] sm:$0xff]  ;;  %209 = vst [vmem:[%s2406_s8 + $0x6c] sm:$0xff] %v208_v9  ;;  %v214_v12 = vld [vmem:[%s2401_s7 + $0x1b0] sm:$0xff] }
  0x20   : > { %211 = vst [vmem:[%s2406_s8 + $0x78] sm:$0xff] %v210_v10  ;;  %213 = vst [vmem:[%s2406_s8 + $0x84] sm:$0xff] %v212_v11  ;;  %v216_v13 = vld [vmem:[%s2401_s7 + $0x1d4] sm:$0xff]  ;;  %v220_v15 = vld [vmem:[%s2401_s7 + $0x21c] sm:$0xff] }
  0x21   : > { %v218_v14 = vld [vmem:[%s2401_s7 + $0x1f8] sm:$0xff]  ;;  %215 = vst [vmem:[%s2406_s8 + $0x90] sm:$0xff] %v214_v12  ;;  %217 = vst [vmem:[%s2406_s8 + $0x9c] sm:$0xff] %v216_v13  ;;  %v222_v16 = vld [vmem:[%s2401_s7 + $0x240] sm:$0xff] }
  0x22   : > { %219 = vst [vmem:[%s2406_s8 + $0xa8] sm:$0xff] %v218_v14  ;;  %v224_v17 = vld [vmem:[%s2401_s7 + $0x264] sm:$0xff]  ;;  %221 = vst [vmem:[%s2406_s8 + $0xb4] sm:$0xff] %v220_v15  ;;  %v228_v19 = vld [vmem:[%s2401_s7 + $0x2ac] sm:$0xff] }
  0x23   : > { %223 = vst [vmem:[%s2406_s8 + $0xc0] sm:$0xff] %v222_v16  ;;  %225 = vst [vmem:[%s2406_s8 + $0xcc] sm:$0xff] %v224_v17  ;;  %v226_v18 = vld [vmem:[%s2401_s7 + $0x288] sm:$0xff]  ;;  %v230_v20 = vld [vmem:[%s2401_s7 + $0x2d0] sm:$0xff] }
  0x24   : > { %227 = vst [vmem:[%s2406_s8 + $0xd8] sm:$0xff] %v226_v18  ;;  %229 = vst [vmem:[%s2406_s8 + $0xe4] sm:$0xff] %v228_v19  ;;  %v232_v21 = vld [vmem:[%s2401_s7 + $0x2f4] sm:$0xff]  ;;  %v236_v23 = vld [vmem:[%s2401_s7 + $0x33c] sm:$0xff] }
  0x25   : > { %231 = vst [vmem:[%s2406_s8 + $0xf0] sm:$0xff] %v230_v20  ;;  %v234_v22 = vld [vmem:[%s2401_s7 + $0x318] sm:$0xff]  ;;  %233 = vst [vmem:[%s2406_s8 + $0xfc] sm:$0xff] %v232_v21  ;;  %v238_v24 = vld [vmem:[%s2401_s7 + $0x360] sm:$0xff] }
  0x26   : > { %235 = vst [vmem:[%s2406_s8 + $0x108] sm:$0xff] %v234_v22  ;;  %237 = vst [vmem:[%s2406_s8 + $0x114] sm:$0xff] %v236_v23  ;;  %v240_v25 = vld [vmem:[%s2401_s7 + $0x384] sm:$0xff]  ;;  %v244_v27 = vld [vmem:[%s2401_s7 + $0x3cc] sm:$0xff] }
  0x27   : > { %v242_v26 = vld [vmem:[%s2401_s7 + $0x3a8] sm:$0xff]  ;;  %239 = vst [vmem:[%s2406_s8 + $0x120] sm:$0xff] %v238_v24  ;;  %241 = vst [vmem:[%s2406_s8 + $0x12c] sm:$0xff] %v240_v25  ;;  %v246_v28 = vld [vmem:[%s2401_s7 + $0x3f0] sm:$0xff] }
  0x28   : > { %243 = vst [vmem:[%s2406_s8 + $0x138] sm:$0xff] %v242_v26  ;;  %v248_v29 = vld [vmem:[%s2401_s7 + $0x414] sm:$0xff]  ;;  %245 = vst [vmem:[%s2406_s8 + $0x144] sm:$0xff] %v244_v27  ;;  %v252_v31 = vld [vmem:[%s2401_s7 + $0x45c] sm:$0xff] }
  0x29   : > { %247 = vst [vmem:[%s2406_s8 + $0x150] sm:$0xff] %v246_v28  ;;  %249 = vst [vmem:[%s2406_s8 + $0x15c] sm:$0xff] %v248_v29  ;;  %v250_v30 = vld [vmem:[%s2401_s7 + $0x438] sm:$0xff]  ;;  %v1771_v32 = vld [vmem:[%s2401_s7 + $0x8] sm:$0xf] }
  0x2a   : > { %251 = vst [vmem:[%s2406_s8 + $0x168] sm:$0xff] %v250_v30  ;;  %253 = vst [vmem:[%s2406_s8 + $0x174] sm:$0xff] %v252_v31  ;;  %v1773_v33 = vld [vmem:[%s2401_s7 + $0x2c] sm:$0xf]  ;;  %v1775_v34 = vld [vmem:[%s2401_s7 + $0x50] sm:$0xf] }
  0x2b   : > { %1772 = vst [vmem:[%s2406_s8 + $0x8] sm:$0xf] %v1771_v32  ;;  %v1777_v35 = vld [vmem:[%s2401_s7 + $0x74] sm:$0xf]  ;;  %1774 = vst [vmem:[%s2406_s8 + $0x14] sm:$0xf] %v1773_v33 }
  0x2c   : > { %1776 = vst [vmem:[%s2406_s8 + $0x20] sm:$0xf] %v1775_v34  ;;  %1778 = vst [vmem:[%s2406_s8 + $0x2c] sm:$0xf] %v1777_v35  ;;  %v1779_v36 = vld [vmem:[%s2401_s7 + $0x98] sm:$0xf] }
  0x2d   : > { %v1781_v37 = vld [vmem:[%s2401_s7 + $0xbc] sm:$0xf]  ;;  %v1783_v38 = vld [vmem:[%s2401_s7 + $0xe0] sm:$0xf]  ;;  %1780 = vst [vmem:[%s2406_s8 + $0x38] sm:$0xf] %v1779_v36 }
  0x2e   : > { %1782 = vst [vmem:[%s2406_s8 + $0x44] sm:$0xf] %v1781_v37  ;;  %1784 = vst [vmem:[%s2406_s8 + $0x50] sm:$0xf] %v1783_v38  ;;  %v1785_v39 = vld [vmem:[%s2401_s7 + $0x104] sm:$0xf] }
  0x2f   : > { %v1787_v40 = vld [vmem:[%s2401_s7 + $0x128] sm:$0xf]  ;;  %v1789_v41 = vld [vmem:[%s2401_s7 + $0x14c] sm:$0xf]  ;;  %1786 = vst [vmem:[%s2406_s8 + $0x5c] sm:$0xf] %v1785_v39 }
  0x30   : > { %1788 = vst [vmem:[%s2406_s8 + $0x68] sm:$0xf] %v1787_v40  ;;  %1790 = vst [vmem:[%s2406_s8 + $0x74] sm:$0xf] %v1789_v41  ;;  %v1791_v42 = vld [vmem:[%s2401_s7 + $0x170] sm:$0xf] }
  0x31   : > { %v1793_v43 = vld [vmem:[%s2401_s7 + $0x194] sm:$0xf]  ;;  %v1795_v44 = vld [vmem:[%s2401_s7 + $0x1b8] sm:$0xf]  ;;  %1792 = vst [vmem:[%s2406_s8 + $0x80] sm:$0xf] %v1791_v42 }
  0x32   : > { %1794 = vst [vmem:[%s2406_s8 + $0x8c] sm:$0xf] %v1793_v43  ;;  %1796 = vst [vmem:[%s2406_s8 + $0x98] sm:$0xf] %v1795_v44  ;;  %v1797_v45 = vld [vmem:[%s2401_s7 + $0x1dc] sm:$0xf] }
  0x33   : > { %v1799_v46 = vld [vmem:[%s2401_s7 + $0x200] sm:$0xf]  ;;  %v1801_v47 = vld [vmem:[%s2401_s7 + $0x224] sm:$0xf]  ;;  %1798 = vst [vmem:[%s2406_s8 + $0xa4] sm:$0xf] %v1797_v45 }
  0x34   : > { %1800 = vst [vmem:[%s2406_s8 + $0xb0] sm:$0xf] %v1799_v46  ;;  %1802 = vst [vmem:[%s2406_s8 + $0xbc] sm:$0xf] %v1801_v47  ;;  %v1803_v48 = vld [vmem:[%s2401_s7 + $0x248] sm:$0xf] }
  0x35   : > { %v1805_v49 = vld [vmem:[%s2401_s7 + $0x26c] sm:$0xf]  ;;  %v1807_v50 = vld [vmem:[%s2401_s7 + $0x290] sm:$0xf]  ;;  %1804 = vst [vmem:[%s2406_s8 + $0xc8] sm:$0xf] %v1803_v48 }
  0x36   : > { %1806 = vst [vmem:[%s2406_s8 + $0xd4] sm:$0xf] %v1805_v49  ;;  %1808 = vst [vmem:[%s2406_s8 + $0xe0] sm:$0xf] %v1807_v50  ;;  %v1809_v51 = vld [vmem:[%s2401_s7 + $0x2b4] sm:$0xf] }
  0x37   : > { %v1811_v52 = vld [vmem:[%s2401_s7 + $0x2d8] sm:$0xf]  ;;  %v1813_v53 = vld [vmem:[%s2401_s7 + $0x2fc] sm:$0xf]  ;;  %1810 = vst [vmem:[%s2406_s8 + $0xec] sm:$0xf] %v1809_v51 }
  0x38   : > { %1812 = vst [vmem:[%s2406_s8 + $0xf8] sm:$0xf] %v1811_v52  ;;  %1814 = vst [vmem:[%s2406_s8 + $0x104] sm:$0xf] %v1813_v53  ;;  %v1815_v54 = vld [vmem:[%s2401_s7 + $0x320] sm:$0xf] }
  0x39   : > { %v1817_v55 = vld [vmem:[%s2401_s7 + $0x344] sm:$0xf]  ;;  %v1819_v56 = vld [vmem:[%s2401_s7 + $0x368] sm:$0xf]  ;;  %1816 = vst [vmem:[%s2406_s8 + $0x110] sm:$0xf] %v1815_v54 }
  0x3a   : > { %1818 = vst [vmem:[%s2406_s8 + $0x11c] sm:$0xf] %v1817_v55  ;;  %1820 = vst [vmem:[%s2406_s8 + $0x128] sm:$0xf] %v1819_v56  ;;  %v1821_v57 = vld [vmem:[%s2401_s7 + $0x38c] sm:$0xf] }
  0x3b   : > { %v1823_v58 = vld [vmem:[%s2401_s7 + $0x3b0] sm:$0xf]  ;;  %v1825_v59 = vld [vmem:[%s2401_s7 + $0x3d4] sm:$0xf]  ;;  %1822 = vst [vmem:[%s2406_s8 + $0x134] sm:$0xf] %v1821_v57 }
  0x3c   : > { %1824 = vst [vmem:[%s2406_s8 + $0x140] sm:$0xf] %v1823_v58  ;;  %1826 = vst [vmem:[%s2406_s8 + $0x14c] sm:$0xf] %v1825_v59  ;;  %v1827_v60 = vld [vmem:[%s2401_s7 + $0x3f8] sm:$0xf] }
  0x3d   : > { %v1829_v61 = vld [vmem:[%s2401_s7 + $0x41c] sm:$0xf]  ;;  %v1831_v62 = vld [vmem:[%s2401_s7 + $0x440] sm:$0xf]  ;;  %1828 = vst [vmem:[%s2406_s8 + $0x158] sm:$0xf] %v1827_v60 }
  0x3e   : > { %1830 = vst [vmem:[%s2406_s8 + $0x164] sm:$0xf] %v1829_v61  ;;  %1832 = vst [vmem:[%s2406_s8 + $0x170] sm:$0xf] %v1831_v62  ;;  %v1833_v63 = vld [vmem:[%s2401_s7 + $0x464] sm:$0xf] }
  0x3f   : > { %1834 = vst [vmem:[%s2406_s8 + $0x17c] sm:$0xf] %v1833_v63 }
  0x40 PF: > { %p1835_p7 = scmp.ge.s32.totalorder %s2318_s18, 1  ;;  %p341_p8 = scmp.lt.s32.totalorder %s2318_s18, 7 }
  0x42   : > { %p342_p9 = pnand %p1835_p7, %p341_p8 }
  0x43   : > { %s348_s9 = sand.u32 (!%p342_p9), 1, %s2294_s12   ;;  %s387_s10 = smul.u32 (!%p342_p9), 48, %s2302_s14 }
  0x44   : > { %345 = sbr.rel (%p342_p9) target bundleno = 487 (0x1e7), region = 54  ;;  %s1837_s21 = sshll.u32 (!%p342_p9), %s2306_s15, 5 }
  0x45   : > { %s2118_s11 = smul.u32 (!%p342_p9), 384, %s348_s9  ;;  %p388_p10 = scmp.lt.s32.totalorder (!%p342_p9), %s387_s10, 143 }
  0x46   : > { %p400_p11 = scmp.lt.s32.totalorder (!%p342_p9), %s1837_s21, 63  ;;  %p1839_p12 = scmp.ne.s32.totalorder (!%p342_p9), %s2302_s14, 0 }
  0x47   : > { %s2548_s12 = scalar_lea.vmem (!%p342_p9), [#allocation3], %s2118_s11 }
  0x4b   : > { %s2761_s10 = smov (!%p388_p10, %s387_s10), 143  ;;  %s2763_s21 = smov (!%p400_p11, %s1837_s21), 63 }
  0x4c   : > { %s1836_s22 = sshll.u32 %s2761_s10, 2  ;;  %s1838_s27 = sshll.u32 %s2763_s21, 3  ;;  %v2320_v0 = vmov (!%p1839_p12), 0.0  }
  0x4d   : > { %s2541_s26 = scalar_lea.vmem %s2745_s1, %s1836_s22  ;;  %s2546_s30 = scalar_lea.vmem %s2747_s3, %s1838_s27  ;;  %413 = vst [vmem:[#allocation2] sm:$0xff] (!%p1839_p12), %v2320_v0  ;;  %414 = vst [vmem:[#allocation2 + $0x8] sm:$0xff] (!%p1839_p12), %v2320_v0 }
  0x4e   : > { %412 = sbr.rel (%p1839_p12) target bundleno = 93 (0x5d), region = 62  ;;  %415 = vst [vmem:[#allocation2 + $0x10] sm:$0xff] (!%p1839_p12), %v2320_v0  ;;  %416 = vst [vmem:[#allocation2 + $0x18] sm:$0xff] (!%p1839_p12), %v2320_v0 }
  0x4f   : > { %417 = vst [vmem:[#allocation2 + $0x20] sm:$0xff] (!%p1839_p12), %v2320_v0  ;;  %418 = vst [vmem:[#allocation2 + $0x28] sm:$0xff] (!%p1839_p12), %v2320_v0 }
  0x50   : > { %419 = vst [vmem:[#allocation2 + $0x30] sm:$0xff] (!%p1839_p12), %v2320_v0  ;;  %420 = vst [vmem:[#allocation2 + $0x38] sm:$0xff] (!%p1839_p12), %v2320_v0 }
  0x51   : > { %421 = vst [vmem:[#allocation2 + $0x40] sm:$0xff] (!%p1839_p12), %v2320_v0  ;;  %422 = vst [vmem:[#allocation2 + $0x48] sm:$0xff] (!%p1839_p12), %v2320_v0 }
  0x52   : > { %423 = vst [vmem:[#allocation2 + $0x50] sm:$0xff] (!%p1839_p12), %v2320_v0  ;;  %424 = vst [vmem:[#allocation2 + $0x58] sm:$0xff] (!%p1839_p12), %v2320_v0 }
  0x53   : > { %425 = vst [vmem:[#allocation2 + $0x60] sm:$0xff] (!%p1839_p12), %v2320_v0  ;;  %426 = vst [vmem:[#allocation2 + $0x68] sm:$0xff] (!%p1839_p12), %v2320_v0 }
  0x54   : > { %427 = vst [vmem:[#allocation2 + $0x70] sm:$0xff] (!%p1839_p12), %v2320_v0  ;;  %428 = vst [vmem:[#allocation2 + $0x78] sm:$0xff] (!%p1839_p12), %v2320_v0 }
  0x55   : > { %429 = vst [vmem:[#allocation2 + $0x80] sm:$0xff] %v2320_v0  ;;  %430 = vst [vmem:[#allocation2 + $0x88] sm:$0xff] %v2320_v0 }
  0x56   : > { %431 = vst [vmem:[#allocation2 + $0x90] sm:$0xff] %v2320_v0  ;;  %432 = vst [vmem:[#allocation2 + $0x98] sm:$0xff] %v2320_v0 }
  0x57   : > { %433 = vst [vmem:[#allocation2 + $0xa0] sm:$0xff] %v2320_v0  ;;  %434 = vst [vmem:[#allocation2 + $0xa8] sm:$0xff] %v2320_v0 }
  0x58   : > { %435 = vst [vmem:[#allocation2 + $0xb0] sm:$0xff] %v2320_v0  ;;  %436 = vst [vmem:[#allocation2 + $0xb8] sm:$0xff] %v2320_v0 }
  0x59   : > { %437 = vst [vmem:[#allocation2 + $0xc0] sm:$0xff] %v2320_v0  ;;  %438 = vst [vmem:[#allocation2 + $0xc8] sm:$0xff] %v2320_v0 }
  0x5a   : > { %439 = vst [vmem:[#allocation2 + $0xd0] sm:$0xff] %v2320_v0  ;;  %440 = vst [vmem:[#allocation2 + $0xd8] sm:$0xff] %v2320_v0 }
  0x5b   : > { %441 = vst [vmem:[#allocation2 + $0xe0] sm:$0xff] %v2320_v0  ;;  %442 = vst [vmem:[#allocation2 + $0xe8] sm:$0xff] %v2320_v0 }
  0x5c   : > { %443 = vst [vmem:[#allocation2 + $0xf0] sm:$0xff] %v2320_v0  ;;  %444 = vst [vmem:[#allocation2 + $0xf8] sm:$0xff] %v2320_v0 }
  0x5d PF: > { %v2176_v1 = vld [vmem:[%s2541_s26 + $0x40] sm:$0xff]   ;;  %v2178_v3 = vld [vmem:[%s2541_s26 + $0x48] sm:$0xff]   ;;  %v2180_v5 = vld [vmem:[%s2541_s26 + $0x50] sm:$0xff]   ;;  %p1912_p13 = scmp.ne.s32.totalorder %s2302_s14, 2 }
  0x5e   : > { %v2177_v2 = vld [vmem:[%s2541_s26] sm:$0xff]   ;;  %1916 = vmatprep.subr.bf16.mxu0 %v2176_v1  ;;  %2100 = vmatprep.subr.bf16.mxu1 %v2176_v1  ;;  %v2179_v4 = vld [vmem:[%s2541_s26 + $0x8] sm:$0xff]   ;;  %v2181_v6 = vld [vmem:[%s2541_s26 + $0x10] sm:$0xff]  }
  0x5f   : > { %1917 = vmatpush3.bf16.msra.mxu0 %v2177_v2  ;;  %2108 = vmatpush3.bf16.msra.mxu1 %v2177_v2  ;;  %v2182_v7 = vld [vmem:[%s2541_s26 + $0x58] sm:$0xff]   ;;  %v2184_v9 = vld [vmem:[%s2541_s26 + $0x60] sm:$0xff]   ;;  %v2186_v11 = vld [vmem:[%s2541_s26 + $0x68] sm:$0xff]  }
  0x60   : > { %1918 = vmatprep.subr.bf16.mxu0 %v2178_v3  ;;  %2101 = vmatprep.subr.bf16.mxu1 %v2178_v3  ;;  %v2183_v8 = vld [vmem:[%s2541_s26 + $0x18] sm:$0xff]   ;;  %v2185_v10 = vld [vmem:[%s2541_s26 + $0x20] sm:$0xff]   ;;  %v2187_v14 = vld [vmem:[%s2541_s26 + $0x28] sm:$0xff]  }
  0x61   : > { %v2194_v12 = vld [vmem:[%s2548_s12 + $0x4] ss:$12 sps:$4 sm:$0xff]   ;;  %v2188_v15 = vld [vmem:[%s2541_s26 + $0x70] sm:$0xff]   ;;  %v2198_v19 = vld [vmem:[%s2541_s26 + $0x80] sm:$0xff]  }
  0x62   : > { %v2197_v13 = vld [vmem:[%s2548_s12 + $0x124] ss:$12 sps:$4 sm:$0xff]   ;;  %1021 = vmatprep.mubr.bf16.mxu0 %v2194_v12  ;;  %v2189_v16 = vld [vmem:[%s2541_s26 + $0x30] sm:$0xff]   ;;  %v2208_v29 = vld [vmem:[%s2548_s12 + $0x34] ss:$12 sps:$4 sm:$0xff]  }
  0x63   : > { %1919 = vmatpush3.bf16.msra.mxu0 %v2179_v4  ;;  %2109 = vmatpush3.bf16.msra.mxu1 %v2179_v4  ;;  %v2190_v17 = vld [vmem:[%s2541_s26 + $0x78] sm:$0xff]   ;;  %v2192_v20 = vld [vmem:[%s2548_s12] ss:$12 sps:$4 sm:$0xff]   ;;  %v2200_v22 = vld [vmem:[%s2548_s12 + $0x1c] ss:$12 sps:$4 sm:$0xff]  }
  0x64   : > { %1920 = vmatprep.subr.bf16.mxu0 %v2180_v5  ;;  %2102 = vmatprep.subr.bf16.mxu1 %v2180_v5  ;;  %v2191_v18 = vld [vmem:[%s2541_s26 + $0x38] sm:$0xff]   ;;  %v2195_v21 = vld [vmem:[%s2548_s12 + $0x120] ss:$12 sps:$4 sm:$0xff]   ;;  %v2202_v24 = vld [vmem:[%s2548_s12 + $0x13c] ss:$12 sps:$4 sm:$0xff]  }
  0x65   : > { %1117 = vmatprep.mubr.bf16.mxu1 %v2197_v13  ;;  %v2199_v23 = vld [vmem:[%s2541_s26 + $0x88] sm:$0xff]   ;;  %v2206_v26 = vld [vmem:[%s2541_s26 + $0x90] sm:$0xff]   ;;  %v2207_v28 = vld [vmem:[%s2541_s26 + $0x98] sm:$0xff]  }
  0x66   : > { %v2204_v25 = vld [vmem:[%s2548_s12 + $0x18] ss:$12 sps:$4 sm:$0xff]   ;;  %v2210_v30 = vld [vmem:[%s2548_s12 + $0x154] ss:$12 sps:$4 sm:$0xff]   ;;  %v2212_v32 = vld [vmem:[%s2548_s12 + $0x30] ss:$12 sps:$4 sm:$0xff]  }
  0x67   : > { %1921 = vmatpush3.bf16.msra.mxu0 %v2181_v6  ;;  %2110 = vmatpush3.bf16.msra.mxu1 %v2181_v6  ;;  %v2205_v27 = vld [vmem:[%s2548_s12 + $0x138] ss:$12 sps:$4 sm:$0xff]   ;;  %v2213_v33 = vld [vmem:[%s2548_s12 + $0x150] ss:$12 sps:$4 sm:$0xff]   ;;  %v2222_v37 = vld [vmem:[%s2541_s26 + $0xb0] sm:$0xff]  }
  0x68   : > { %1922 = vmatprep.subr.bf16.mxu0 %v2182_v7  ;;  %2103 = vmatprep.subr.bf16.mxu1 %v2182_v7  ;;  %v2214_v31 = vld [vmem:[%s2541_s26 + $0xa0] sm:$0xff]   ;;  %v2215_v34 = vld [vmem:[%s2541_s26 + $0xa8] sm:$0xff]   ;;  %v2220_v38 = vld [vmem:[%s2548_s12 + $0x48] ss:$12 sps:$4 sm:$0xff]  }
  0x69   : > { %v2216_v35 = vld [vmem:[%s2548_s12 + $0x4c] ss:$12 sps:$4 sm:$0xff]   ;;  %v2221_v39 = vld [vmem:[%s2548_s12 + $0x168] ss:$12 sps:$4 sm:$0xff]   ;;  %v2224_v40 = vld [vmem:[%s2548_s12 + $0x64] ss:$12 sps:$4 sm:$0xff]  }
  0x6a   : > { %v2218_v36 = vld [vmem:[%s2548_s12 + $0x16c] ss:$12 sps:$4 sm:$0xff]   ;;  %v2223_v41 = vld [vmem:[%s2541_s26 + $0xb8] sm:$0xff]   ;;  %v2229_v45 = vld [vmem:[%s2548_s12 + $0x7c] ss:$12 sps:$4 sm:$0xff]  }
  0x6b   : > { %1923 = vmatpush3.bf16.msra.mxu0 %v2183_v8  ;;  %2111 = vmatpush3.bf16.msra.mxu1 %v2183_v8  ;;  %v2226_v42 = vld [vmem:[%s2548_s12 + $0x8] ss:$12 sps:$4 sm:$0xff]   ;;  %v2227_v43 = vld [vmem:[%s2548_s12 + $0x60] ss:$12 sps:$4 sm:$0xff]   ;;  %v2231_v46 = vld [vmem:[%s2548_s12 + $0x38] ss:$12 sps:$4 sm:$0xff]  }
  0x6c   : > { %1924 = vmatprep.subr.bf16.mxu0 %v2184_v9  ;;  %2104 = vmatprep.subr.bf16.mxu1 %v2184_v9  ;;  %v2228_v44 = vld [vmem:[%s2548_s12 + $0x20] ss:$12 sps:$4 sm:$0xff]   ;;  %v2232_v47 = vld [vmem:[%s2548_s12 + $0x78] ss:$12 sps:$4 sm:$0xff]   ;;  %v2233_v48 = vld [vmem:[%s2548_s12 + $0x50] ss:$12 sps:$4 sm:$0xff]  }
  0x6d   : > { %v2234_v49 = vld [vmem:[%s2548_s12 + $0x94] ss:$12 sps:$4 sm:$0xff]   ;;  %v2237_v51 = vld [vmem:[%s2548_s12 + $0x90] ss:$12 sps:$4 sm:$0xff]   ;;  %v2239_v53 = vld [vmem:[%s2548_s12 + $0xac] ss:$12 sps:$4 sm:$0xff]  }
  0x6e   : > { %v2236_v50 = vld [vmem:[%s2548_s12 + $0x68] ss:$12 sps:$4 sm:$0xff]   ;;  %v2238_v52 = vld [vmem:[%s2548_s12 + $0x80] ss:$12 sps:$4 sm:$0xff]   ;;  %v2241_v54 = vld [vmem:[%s2548_s12 + $0x98] ss:$12 sps:$4 sm:$0xff]  }
  0x6f   : > { %1925 = vmatpush3.bf16.msra.mxu0 %v2185_v10  ;;  %2112 = vmatpush3.bf16.msra.mxu1 %v2185_v10  ;;  %v2242_v55 = vld [vmem:[%s2548_s12 + $0xa8] ss:$12 sps:$4 sm:$0xff]   ;;  %v2243_v56 = vld [vmem:[%s2548_s12 + $0xb0] ss:$12 sps:$4 sm:$0xff]   ;;  %v2247_v59 = vld [vmem:[%s2548_s12 + $0xc0] ss:$12 sps:$4 sm:$0xff]  }
  0x70   : > { %1926 = vmatprep.subr.bf16.mxu0 %v2186_v11  ;;  %2105 = vmatprep.subr.bf16.mxu1 %v2186_v11  ;;  %v2244_v57 = vld [vmem:[%s2548_s12 + $0xc4] ss:$12 sps:$4 sm:$0xff]   ;;  %v2246_v58 = vld [vmem:[%s2548_s12 + $0xc8] ss:$12 sps:$4 sm:$0xff]   ;;  %v2248_v60 = vld [vmem:[%s2548_s12 + $0xe0] ss:$12 sps:$4 sm:$0xff]  }
  0x71   : > { %v2249_v61 = vld [vmem:[%s2548_s12 + $0xdc] ss:$12 sps:$4 sm:$0xff]   ;;  %v2251_v62 = vld [vmem:[%s2548_s12 + $0xf8] ss:$12 sps:$4 sm:$0xff]   ;;  %v2254_v1 = vld [vmem:[%s2548_s12 + $0xf4] ss:$12 sps:$4 sm:$0xff]  }
  0x72   : > { %v2252_v63 = vld [vmem:[%s2548_s12 + $0xd8] ss:$12 sps:$4 sm:$0xff]   ;;  %v2253_v0 = vld [vmem:[%s2548_s12 + $0x110] ss:$12 sps:$4 sm:$0xff]   ;;  %v2256_v2 = vld [vmem:[%s2548_s12 + $0x128] ss:$12 sps:$4 sm:$0xff]  }
  0x73   : > { %1927 = vmatpush3.bf16.msra.mxu0 %v2187_v14  ;;  %2113 = vmatpush3.bf16.msra.mxu1 %v2187_v14  ;;  %v2257_v3 = vld [vmem:[%s2548_s12 + $0xf0] ss:$12 sps:$4 sm:$0xff]   ;;  %v2258_v4 = vld [vmem:[%s2548_s12 + $0x140] ss:$12 sps:$4 sm:$0xff]   ;;  %v2261_v6 = vld [vmem:[%s2548_s12 + $0x158] ss:$12 sps:$4 sm:$0xff]  }
  0x74   : > { %1928 = vmatprep.subr.bf16.mxu0 %v2188_v15  ;;  %2106 = vmatprep.subr.bf16.mxu1 %v2188_v15  ;;  %v2259_v5 = vld [vmem:[%s2548_s12 + $0x10c] ss:$12 sps:$4 sm:$0xff]   ;;  %v2262_v7 = vld [vmem:[%s2548_s12 + $0x108] ss:$12 sps:$4 sm:$0xff]   ;;  %v2263_v8 = vld [vmem:[%s2548_s12 + $0x170] ss:$12 sps:$4 sm:$0xff]  }
  0x77   : > { %1929 = vmatpush3.bf16.msra.mxu0 %v2189_v16  ;;  %2114 = vmatpush3.bf16.msra.mxu1 %v2189_v16 }
  0x78   : > { %1930 = vmatprep.subr.bf16.mxu0 %v2190_v17  ;;  %2107 = vmatprep.subr.bf16.mxu1 %v2190_v17 }
  0x7b   : > { %1931 = vmatpush3.bf16.msra.mxu0 %v2191_v18  ;;  %2115 = vmatpush3.bf16.msra.mxu1 %v2191_v18 }
  0x7c   : > { %2052 = vmatprep.subr.bf16.mxu1 %v2198_v19 }
  0x7e   : > { %1022 = vmatmul.mubr.bf16.vlgmr.msra.gmra.mrb[0].mxu0 %v2192_v20  ;;  %1118 = vmatmul.mubr.bf16.vlgmr.msra.gmra.mrb[0].mxu1 %v2195_v21 }
  0x7f   : > { %2053 = vmatpush3.bf16.msra.mxu1 %v2198_v19  ;;  %1029 = vmatprep.mubr.bf16.mxu0 %v2200_v22 }
  0x80   : > { %2054 = vmatprep.subr.bf16.mxu1 %v2199_v23  ;;  %1125 = vmatprep.mubr.bf16.mxu1 %v2202_v24 }
  0x83   : > { %2055 = vmatpush3.bf16.msra.mxu1 %v2199_v23 }
  0x84   : > { %2056 = vmatprep.subr.bf16.mxu1 %v2206_v26 }
  0x86   : > { %1030 = vmatmul.mubr.bf16.gmra.mrb[4].mxu0 %v2204_v25  ;;  %1126 = vmatmul.mubr.bf16.gmra.mrb[4].mxu1 %v2205_v27 }
  0x87   : > { %2057 = vmatpush3.bf16.msra.mxu1 %v2206_v26  ;;  %1037 = vmatprep.mubr.bf16.mxu0 %v2208_v29 }
  0x88   : > { %2058 = vmatprep.subr.bf16.mxu1 %v2207_v28  ;;  %1133 = vmatprep.mubr.bf16.mxu1 %v2210_v30 }
  0x8b   : > { %2059 = vmatpush3.bf16.msra.mxu1 %v2207_v28 }
  0x8c   : > { %2060 = vmatprep.subr.bf16.mxu1 %v2214_v31 }
  0x8e   : > { %1038 = vmatmul.mubr.bf16.gmra.mrb[8].mxu0 %v2212_v32  ;;  %1134 = vmatmul.mubr.bf16.gmra.mrb[8].mxu1 %v2213_v33 }
  0x8f   : > { %2061 = vmatpush3.bf16.msra.mxu1 %v2214_v31  ;;  %1045 = vmatprep.mubr.bf16.mxu0 %v2216_v35 }
  0x90   : > { %2062 = vmatprep.subr.bf16.mxu1 %v2215_v34  ;;  %1141 = vmatprep.mubr.bf16.mxu1 %v2218_v36 }
  0x93   : > { %2063 = vmatpush3.bf16.msra.mxu1 %v2215_v34 }
  0x94   : > { %2064 = vmatprep.subr.bf16.mxu1 %v2222_v37 }
  0x96   : > { %1046 = vmatmul.mubr.bf16.gmra.mrb[12].mxu0 %v2220_v38  ;;  %1142 = vmatmul.mubr.bf16.gmra.mrb[12].mxu1 %v2221_v39 }
  0x97   : > { %2065 = vmatpush3.bf16.msra.mxu1 %v2222_v37  ;;  %1053 = vmatprep.mubr.bf16.mxu0 %v2224_v40 }
  0x98   : > { %2066 = vmatprep.subr.bf16.mxu1 %v2223_v41  ;;  %2068 = vmatprep.mubr.bf16.mxu1 %v2226_v42 }
  0x9b   : > { %2067 = vmatpush3.bf16.msra.mxu1 %v2223_v41 }
  0x9e   : > { %1054 = vmatmul.mubr.bf16.gmra.mrb[16].mxu0 %v2227_v43  ;;  %2069 = vmatmul.mubr.bf16.vlgmr.msra.gmra.mrb[16].mxu1 %v2228_v44 }
  0x9f   : > { %1061 = vmatprep.mubr.bf16.mxu0 %v2229_v45  ;;  %2072 = vmatprep.mubr.bf16.mxu1 %v2231_v46 }
  0xa6   : > { %1062 = vmatmul.mubr.bf16.gmra.mrb[20].mxu0 %v2232_v47  ;;  %2073 = vmatmul.mubr.bf16.gmra.mrb[20].mxu1 %v2233_v48 }
  0xa7   : > { %1069 = vmatprep.mubr.bf16.mxu0 %v2234_v49  ;;  %2076 = vmatprep.mubr.bf16.mxu1 %v2236_v50 }
  0xae   : > { %1070 = vmatmul.mubr.bf16.gmra.mrb[24].mxu0 %v2237_v51  ;;  %2077 = vmatmul.mubr.bf16.gmra.mrb[24].mxu1 %v2238_v52 }
  0xaf   : > { %1077 = vmatprep.mubr.bf16.mxu0 %v2239_v53  ;;  %2080 = vmatprep.mubr.bf16.mxu1 %v2241_v54 }
  0xb6   : > { %1078 = vmatmul.mubr.bf16.gmra.mrb[28].mxu0 %v2242_v55  ;;  %2081 = vmatmul.mubr.bf16.gmra.mrb[28].mxu1 %v2243_v56 }
  0xb7   : > { %1085 = vmatprep.mubr.bf16.mxu0 %v2244_v57  ;;  %2084 = vmatprep.mubr.bf16.mxu1 %v2246_v58  ;;  %v447_v58 = vld [vmem:[#allocation2 + $0x10] sm:$0xff] }
  0xbe   : > { %1086 = vmatmul.mubr.bf16.gmra.mrb[32].mxu0 %v2247_v59  ;;  %2085 = vmatmul.mubr.bf16.gmra.mrb[32].mxu1 %v2248_v60 }
  0xbf   : > { %1093 = vmatprep.mubr.bf16.mxu0 %v2249_v61  ;;  %2088 = vmatprep.mubr.bf16.mxu1 %v2251_v62  ;;  %v445_v62 = vld [vmem:[#allocation2] sm:$0xff] }
  0xc6   : > { %1094 = vmatmul.mubr.bf16.gmra.mrb[36].mxu0 %v2252_v63  ;;  %2089 = vmatmul.mubr.bf16.gmra.mrb[36].mxu1 %v2253_v0 }
  0xc7   : > { %1101 = vmatprep.mubr.bf16.mxu0 %v2254_v1  ;;  %2092 = vmatprep.mubr.bf16.mxu1 %v2256_v2 }
  0xce   : > { %1102 = vmatmul.mubr.bf16.gmra.mrb[40].mxu0 %v2257_v3  ;;  %2093 = vmatmul.mubr.bf16.gmra.mrb[40].mxu1 %v2258_v4  ;;  %v448_v3 = vld [vmem:[#allocation2 + $0x18] sm:$0xff] }
  0xcf   : > { %1109 = vmatprep.mubr.bf16.mxu0 %v2259_v5  ;;  %2096 = vmatprep.mubr.bf16.mxu1 %v2261_v6 }
  0xd6   : > { %1110 = vmatmul.mubr.bf16.gmra.mrb[44].mxu0 %v2262_v7  ;;  %2097 = vmatmul.mubr.bf16.gmra.mrb[44].mxu1 %v2263_v8  ;;  %v446_v8 = vld [vmem:[#allocation2 + $0x8] sm:$0xff] }
 0x151   : > { %v1932_v9 = vpop.f32.mrb[0].mxu0  ;;  %v2004_v10 = vpop.f32.mrb[0].mxu1 }
 0x152   : > { %v1933_v11 = vpop.f32.mrb[1].mxu0  ;;  %v2005_v12 = vpop.f32.mrb[1].mxu1 }
 0x153   : > { %v1934_v13 = vadd.f32 %v1933_v11, %v1932_v9  ;;  %v2623_v14 = vadd.f32 %v2005_v12, %v2004_v10  ;;  %v1935_v15 = vpop.f32.mrb[2].mxu0  ;;  %v2007_v16 = vpop.f32.mrb[2].mxu1 }
 0x154   : > { %v1936_v17 = vpop.f32.mrb[3].mxu0  ;;  %v2008_v18 = vpop.f32.mrb[3].mxu1 }
 0x155   : > { %v1937_v19 = vadd.f32 %v1936_v17, %v1935_v15  ;;  %v2625_v20 = vadd.f32 %v2008_v18, %v2007_v16  ;;  %v451_v18 = vld [vmem:[#allocation2 + $0x30] sm:$0xff] }
 0x159   : > { %v1938_v21 = vpop.f32.mrb[4].mxu0  ;;  %v2010_v22 = vpop.f32.mrb[4].mxu1 }
 0x15a   : > { %v1939_v23 = vpop.f32.mrb[5].mxu0  ;;  %v2011_v24 = vpop.f32.mrb[5].mxu1 }
 0x15b   : > { %v1940_v25 = vadd.f32 %v1939_v23, %v1938_v21  ;;  %v2627_v26 = vadd.f32 %v2011_v24, %v2010_v22  ;;  %v1941_v27 = vpop.f32.mrb[6].mxu0  ;;  %v2013_v28 = vpop.f32.mrb[6].mxu1  ;;  %v449_v23 = vld [vmem:[#allocation2 + $0x20] sm:$0xff] }
 0x15c   : > { %v1942_v29 = vpop.f32.mrb[7].mxu0  ;;  %v2014_v30 = vpop.f32.mrb[7].mxu1 }
 0x15d   : > { %v1943_v31 = vadd.f32 %v1942_v29, %v1941_v27  ;;  %v2629_v32 = vadd.f32 %v2014_v30, %v2013_v28  ;;  %v452_v29 = vld [vmem:[#allocation2 + $0x38] sm:$0xff] }
 0x161   : > { %v1944_v33 = vpop.f32.mrb[8].mxu0  ;;  %v2016_v34 = vpop.f32.mrb[8].mxu1 }
 0x162   : > { %v1945_v35 = vpop.f32.mrb[9].mxu0  ;;  %v2017_v36 = vpop.f32.mrb[9].mxu1 }
 0x163   : > { %v1946_v37 = vadd.f32 %v1945_v35, %v1944_v33  ;;  %v2631_v38 = vadd.f32 %v2017_v36, %v2016_v34  ;;  %v1947_v39 = vpop.f32.mrb[10].mxu0  ;;  %v2019_v40 = vpop.f32.mrb[10].mxu1  ;;  %v450_v34 = vld [vmem:[#allocation2 + $0x28] sm:$0xff] }
 0x164   : > { %v1948_v41 = vpop.f32.mrb[11].mxu0  ;;  %v2020_v42 = vpop.f32.mrb[11].mxu1 }
 0x165   : > { %v1949_v43 = vadd.f32 %v1948_v41, %v1947_v39  ;;  %v2633_v44 = vadd.f32 %v2020_v42, %v2019_v40 }
 0x169   : > { %v1950_v45 = vpop.f32.mrb[12].mxu0  ;;  %v2022_v46 = vpop.f32.mrb[12].mxu1 }
 0x16a   : > { %v1951_v47 = vpop.f32.mrb[13].mxu0  ;;  %v2023_v48 = vpop.f32.mrb[13].mxu1 }
 0x16b   : > { %v1952_v49 = vadd.f32 %v1951_v47, %v1950_v45  ;;  %v2635_v50 = vadd.f32 %v2023_v48, %v2022_v46  ;;  %v1953_v51 = vpop.f32.mrb[14].mxu0  ;;  %v2025_v52 = vpop.f32.mrb[14].mxu1  ;;  %v455_v46 = vld [vmem:[#allocation2 + $0x50] sm:$0xff] }
 0x16c   : > { %v1954_v53 = vpop.f32.mrb[15].mxu0  ;;  %v2026_v54 = vpop.f32.mrb[15].mxu1 }
 0x16d   : > { %v1955_v55 = vadd.f32 %v1954_v53, %v1953_v51  ;;  %v2637_v56 = vadd.f32 %v2026_v54, %v2025_v52 }
 0x171   : > { %v1956_v57 = vpop.f32.mrb[16].mxu0  ;;  %v2070_v59 = vpop.f32.mrb[16].mxu1 }
 0x172   : > { %v1193_v60 = vadd.f32 %v2070_v59, %v1940_v25  ;;  %v1957_v61 = vpop.f32.mrb[17].mxu0  ;;  %v1184_v63 = vpop.f32.mrb[17].mxu1 }
 0x173   : > { %v1958_v0 = vadd.f32 %v1957_v61, %v1956_v57  ;;  %v1185_v1 = vadd.f32 %v1934_v13, %v1184_v63  ;;  %v1959_v2 = vpop.f32.mrb[18].mxu0  ;;  %v2071_v4 = vpop.f32.mrb[18].mxu1 }
 0x174   : > { %v1313_v5 = vadd.f32 %v1193_v60, %v447_v58  ;;  %v1196_v6 = vadd.f32 %v2071_v4, %v1943_v31  ;;  %v1960_v7 = vpop.f32.mrb[19].mxu0  ;;  %v1187_v9 = vpop.f32.mrb[19].mxu1  ;;  %v454_v60 = vld [vmem:[#allocation2 + $0x48] sm:$0xff] }
 0x175   : > { %v1311_v10 = vadd.f32 %v1185_v1, %v445_v62  ;;  %v1961_v11 = vadd.f32 %v1960_v7, %v1959_v2  ;;  %v1188_v12 = vadd.f32 %v1937_v19, %v1187_v9 }
 0x176   : > { %1345 = vst [vmem:[#allocation2 + $0x10] sm:$0xff] %v1313_v5  ;;  %v1314_v15 = vadd.f32 %v1196_v6, %v448_v3  ;;  %v457_v6 = vld [vmem:[#allocation2 + $0x60] sm:$0xff] }
 0x177   : > { %1343 = vst [vmem:[#allocation2] sm:$0xff] %v1311_v10  ;;  %v1312_v16 = vadd.f32 %v1188_v12, %v446_v8 }
 0x178   : > { %1346 = vst [vmem:[#allocation2 + $0x18] sm:$0xff] %v1314_v15  ;;  %v459_v15 = vld [vmem:[#allocation2 + $0x70] sm:$0xff] }
 0x179   : > { %1344 = vst [vmem:[#allocation2 + $0x8] sm:$0xff] %v1312_v16  ;;  %v1962_v17 = vpop.f32.mrb[20].mxu0  ;;  %v2074_v13 = vpop.f32.mrb[20].mxu1 }
 0x17a   : > { %v1209_v21 = vadd.f32 %v2074_v13, %v1952_v49  ;;  %v1963_v22 = vpop.f32.mrb[21].mxu0  ;;  %v1200_v24 = vpop.f32.mrb[21].mxu1  ;;  %v453_v49 = vld [vmem:[#allocation2 + $0x40] sm:$0xff] }
 0x17b   : > { %v1964_v25 = vadd.f32 %v1963_v22, %v1962_v17  ;;  %v1201_v27 = vadd.f32 %v1946_v37, %v1200_v24  ;;  %v1965_v28 = vpop.f32.mrb[22].mxu0  ;;  %v2075_v30 = vpop.f32.mrb[22].mxu1  ;;  %v458_v17 = vld [vmem:[#allocation2 + $0x68] sm:$0xff] }
 0x17c   : > { %v1317_v31 = vadd.f32 %v1209_v21, %v451_v18  ;;  %v1212_v19 = vadd.f32 %v2075_v30, %v1955_v55  ;;  %v1966_v33 = vpop.f32.mrb[23].mxu0  ;;  %v1203_v35 = vpop.f32.mrb[23].mxu1  ;;  %v456_v55 = vld [vmem:[#allocation2 + $0x58] sm:$0xff] }
 0x17d   : > { %v1315_v36 = vadd.f32 %v1201_v27, %v449_v23  ;;  %v1967_v39 = vadd.f32 %v1966_v33, %v1965_v28  ;;  %v1204_v40 = vadd.f32 %v1949_v43, %v1203_v35  ;;  %v460_v23 = vld [vmem:[#allocation2 + $0x78] sm:$0xff] }
 0x17e   : > { %1349 = vst [vmem:[#allocation2 + $0x30] sm:$0xff] %v1317_v31  ;;  %v1318_v41 = vadd.f32 %v1212_v19, %v452_v29 }
 0x17f   : > { %1347 = vst [vmem:[#allocation2 + $0x20] sm:$0xff] %v1315_v36  ;;  %v1316_v42 = vadd.f32 %v1204_v40, %v450_v34  ;;  %v461_v36 = vld [vmem:[#allocation2 + $0x80] sm:$0xff] }
 0x180   : > { %1350 = vst [vmem:[#allocation2 + $0x38] sm:$0xff] %v1318_v41 }
 0x181   : > { %1348 = vst [vmem:[#allocation2 + $0x28] sm:$0xff] %v1316_v42  ;;  %v1968_v45 = vpop.f32.mrb[24].mxu0  ;;  %v2078_v37 = vpop.f32.mrb[24].mxu1 }
 0x182   : > { %v1225_v47 = vadd.f32 %v2078_v37, %v1964_v25  ;;  %v1969_v48 = vpop.f32.mrb[25].mxu0  ;;  %v1216_v51 = vpop.f32.mrb[25].mxu1 }
 0x183   : > { %v1970_v52 = vadd.f32 %v1969_v48, %v1968_v45  ;;  %v1217_v53 = vadd.f32 %v1958_v0, %v1216_v51  ;;  %v1971_v54 = vpop.f32.mrb[26].mxu0  ;;  %v2079_v57 = vpop.f32.mrb[26].mxu1  ;;  %v462_v45 = vld [vmem:[#allocation2 + $0x88] sm:$0xff] }
 0x184   : > { %v1321_v58 = vadd.f32 %v1225_v47, %v455_v46  ;;  %v1228_v43 = vadd.f32 %v2079_v57, %v1967_v39  ;;  %v1972_v59 = vpop.f32.mrb[27].mxu0  ;;  %v1219_v61 = vpop.f32.mrb[27].mxu1  ;;  %v463_v57 = vld [vmem:[#allocation2 + $0x90] sm:$0xff] }
 0x185   : > { %v1319_v62 = vadd.f32 %v1217_v53, %v453_v49  ;;  %v1973_v63 = vadd.f32 %v1972_v59, %v1971_v54  ;;  %v1220_v1 = vadd.f32 %v1961_v11, %v1219_v61  ;;  %v464_v61 = vld [vmem:[#allocation2 + $0x98] sm:$0xff] }
 0x186   : > { %1353 = vst [vmem:[#allocation2 + $0x50] sm:$0xff] %v1321_v58  ;;  %v1322_v2 = vadd.f32 %v1228_v43, %v456_v55 }
 0x187   : > { %1351 = vst [vmem:[#allocation2 + $0x40] sm:$0xff] %v1319_v62  ;;  %v1320_v3 = vadd.f32 %v1220_v1, %v454_v60 }
 0x188   : > { %1354 = vst [vmem:[#allocation2 + $0x58] sm:$0xff] %v1322_v2 }
 0x189   : > { %1352 = vst [vmem:[#allocation2 + $0x48] sm:$0xff] %v1320_v3  ;;  %v1974_v4 = vpop.f32.mrb[28].mxu0  ;;  %v2082_v5 = vpop.f32.mrb[28].mxu1  ;;  %v471_v3 = vld [vmem:[#allocation2 + $0xd0] sm:$0xff] }
 0x18a   : > { %v1975_v0 = vpop.f32.mrb[29].mxu0  ;;  %v1232_v7 = vpop.f32.mrb[29].mxu1 }
 0x18b   : > { %v1976_v8 = vadd.f32 %v1975_v0, %v1974_v4  ;;  %v1233_v9 = vadd.f32 %v1970_v52, %v1232_v7  ;;  %v1977_v10 = vpop.f32.mrb[30].mxu0  ;;  %v2083_v12 = vpop.f32.mrb[30].mxu1 }
 0x18c   : > { %v1978_v16 = vpop.f32.mrb[31].mxu0  ;;  %v1235_v18 = vpop.f32.mrb[31].mxu1 }
 0x18d   : > { %v1241_v11 = vadd.f32 %v2082_v5, %v1976_v8  ;;  %v1323_v13 = vadd.f32 %v1233_v9, %v457_v6  ;;  %v1979_v21 = vadd.f32 %v1978_v16, %v1977_v10  ;;  %v1236_v22 = vadd.f32 %v1973_v63, %v1235_v18  ;;  %v469_v6 = vld [vmem:[#allocation2 + $0xc0] sm:$0xff] }
 0x18f   : > { %v1325_v24 = vadd.f32 %v1241_v11, %v459_v15  ;;  %1355 = vst [vmem:[#allocation2 + $0x60] sm:$0xff] %v1323_v13  ;;  %v1244_v25 = vadd.f32 %v2083_v12, %v1979_v21  ;;  %v1324_v27 = vadd.f32 %v1236_v22, %v458_v17  ;;  %v472_v12 = vld [vmem:[#allocation2 + $0xd8] sm:$0xff]  ;;  %v465_v17 = vld [vmem:[#allocation2 + $0xa0] sm:$0xff]  ;;  %v470_v13 = vld [vmem:[#allocation2 + $0xc8] sm:$0xff] }
 0x191   : > { %1357 = vst [vmem:[#allocation2 + $0x70] sm:$0xff] %v1325_v24  ;;  %v1326_v28 = vadd.f32 %v1244_v25, %v460_v23  ;;  %1356 = vst [vmem:[#allocation2 + $0x68] sm:$0xff] %v1324_v27  ;;  %v1980_v29 = vpop.f32.mrb[32].mxu0  ;;  %v2086_v30 = vpop.f32.mrb[32].mxu1  ;;  %v466_v27 = vld [vmem:[#allocation2 + $0xa8] sm:$0xff] }
 0x192   : > { %v1981_v31 = vpop.f32.mrb[33].mxu0  ;;  %v1248_v19 = vpop.f32.mrb[33].mxu1 }
 0x193   : > { %1358 = vst [vmem:[#allocation2 + $0x78] sm:$0xff] %v1326_v28  ;;  %v1982_v33 = vadd.f32 %v1981_v31, %v1980_v29  ;;  %v1983_v34 = vpop.f32.mrb[34].mxu0  ;;  %v2087_v35 = vpop.f32.mrb[34].mxu1  ;;  %v475_v31 = vld [vmem:[#allocation2 + $0xf0] sm:$0xff] }
 0x194   : > { %v1984_v39 = vpop.f32.mrb[35].mxu0  ;;  %v1251_v40 = vpop.f32.mrb[35].mxu1 }
 0x195   : > { %v1249_v41 = vadd.f32 %v1982_v33, %v1248_v19  ;;  %v1985_v42 = vadd.f32 %v1984_v39, %v1983_v34 }
 0x197   : > { %v1327_v46 = vadd.f32 %v1249_v41, %v461_v36  ;;  %v1252_v37 = vadd.f32 %v1985_v42, %v1251_v40  ;;  %v476_v41 = vld [vmem:[#allocation2 + $0xf8] sm:$0xff] }
 0x199   : > { %1359 = vst [vmem:[#allocation2 + $0x80] sm:$0xff] %v1327_v46  ;;  %v1328_v47 = vadd.f32 %v1252_v37, %v462_v45  ;;  %v1986_v48 = vpop.f32.mrb[36].mxu0  ;;  %v2639_v49 = vpop.f32.mrb[36].mxu1  ;;  %v467_v46 = vld [vmem:[#allocation2 + $0xb0] sm:$0xff] }
 0x19a   : > { %v1987_v51 = vpop.f32.mrb[37].mxu0  ;;  %v1264_v52 = vpop.f32.mrb[37].mxu1 }
 0x19b   : > { %1360 = vst [vmem:[#allocation2 + $0x88] sm:$0xff] %v1328_v47  ;;  %v1988_v53 = vadd.f32 %v1987_v51, %v1986_v48  ;;  %v1989_v54 = vpop.f32.mrb[38].mxu0  ;;  %v2641_v55 = vpop.f32.mrb[38].mxu1  ;;  %v474_v48 = vld [vmem:[#allocation2 + $0xe8] sm:$0xff] }
 0x19c   : > { %v1990_v58 = vpop.f32.mrb[39].mxu0  ;;  %v1267_v43 = vpop.f32.mrb[39].mxu1 }
 0x19d   : > { %v1257_v59 = vadd.f32 %v2086_v30, %v1988_v53  ;;  %v1991_v60 = vadd.f32 %v1990_v58, %v1989_v54  ;;  %v468_v58 = vld [vmem:[#allocation2 + $0xb8] sm:$0xff] }
 0x19f   : > { %v1329_v62 = vadd.f32 %v1257_v59, %v463_v57  ;;  %v1260_v63 = vadd.f32 %v2087_v35, %v1991_v60  ;;  %v473_v35 = vld [vmem:[#allocation2 + $0xe0] sm:$0xff]  ;;  %v1380_v60 = vld [vmem:[#allocation2 + $0x8] sm:$0xff] (!%p1912_p13) }
 0x1a1   : > { %1361 = vst [vmem:[#allocation2 + $0x90] sm:$0xff] %v1329_v62  ;;  %v1330_v1 = vadd.f32 %v1260_v63, %v464_v61  ;;  %v1992_v2 = vpop.f32.mrb[40].mxu0  ;;  %v2094_v4 = vpop.f32.mrb[40].mxu1  ;;  %v1412_v62 = vmul.f32 (!%p1912_p13), 0.083333336, %v1380_v60  ;;  %v1381_v63 = vld [vmem:[#allocation2 + $0x10] sm:$0xff] (!%p1912_p13) }
 0x1a2   : > { %v1289_v5 = vadd.f32 %v2094_v4, %v2627_v26  ;;  %v1993_v0 = vpop.f32.mrb[41].mxu0  ;;  %v1280_v7 = vpop.f32.mrb[41].mxu1  ;;  %v1384_v4 = vld [vmem:[#allocation2 + $0x28] sm:$0xff] (!%p1912_p13) }
 0x1a3   : > { %1362 = vst [vmem:[#allocation2 + $0x98] sm:$0xff] %v1330_v1  ;;  %v1994_v8 = vadd.f32 %v1993_v0, %v1992_v2  ;;  %v1281_v9 = vadd.f32 %v2623_v14, %v1280_v7  ;;  %v1995_v10 = vpop.f32.mrb[42].mxu0  ;;  %v2095_v15 = vpop.f32.mrb[42].mxu1  ;;  %v1413_v1 = vmul.f32 (!%p1912_p13), 0.083333336, %v1381_v63 }
 0x1a4   : > { %v1337_v16 = vadd.f32 %v1289_v5, %v471_v3  ;;  %v1292_v18 = vadd.f32 %v2095_v15, %v2629_v32  ;;  %v1996_v11 = vpop.f32.mrb[43].mxu0  ;;  %v1283_v21 = vpop.f32.mrb[43].mxu1  ;;  %v1383_v3 = vld [vmem:[#allocation2 + $0x20] sm:$0xff] (!%p1912_p13)  ;;  %v1416_v7 = vmul.f32 (!%p1912_p13), 0.083333336, %v1384_v4 }
 0x1a5   : > { %v1265_v22 = vadd.f32 %v1994_v8, %v1264_v52  ;;  %v1335_v23 = vadd.f32 %v1281_v9, %v469_v6  ;;  %v1997_v26 = vadd.f32 %v1996_v11, %v1995_v10  ;;  %v1284_v24 = vadd.f32 %v2625_v20, %v1283_v21  ;;  %v1385_v8 = vld [vmem:[#allocation2 + $0x30] sm:$0xff] (!%p1912_p13)  ;;  %v1386_v9 = vld [vmem:[#allocation2 + $0x38] sm:$0xff] (!%p1912_p13) }
 0x1a6   : > { %1369 = vst [vmem:[#allocation2 + $0xd0] sm:$0xff] %v1337_v16  ;;  %v1338_v25 = vadd.f32 %v1292_v18, %v472_v12  ;;  %v1415_v6 = vmul.f32 (!%p1912_p13), 0.083333336, %v1383_v3  ;;  %v1417_v15 = vmul.f32 (!%p1912_p13), 0.083333336, %v1385_v8 }
 0x1a7   : > { %v1331_v28 = vadd.f32 %v1265_v22, %v465_v17  ;;  %1367 = vst [vmem:[#allocation2 + $0xc0] sm:$0xff] %v1335_v23  ;;  %v1268_v14 = vadd.f32 %v1997_v26, %v1267_v43  ;;  %v1336_v29 = vadd.f32 %v1284_v24, %v470_v13  ;;  %v1418_v16 = vmul.f32 (!%p1912_p13), 0.083333336, %v1386_v9  ;;  %v1387_v24 = vld [vmem:[#allocation2 + $0x40] sm:$0xff] (!%p1912_p13) }
 0x1a8   : > { %1370 = vst [vmem:[#allocation2 + $0xd8] sm:$0xff] %v1338_v25 }
 0x1a9   : > { %1363 = vst [vmem:[#allocation2 + $0xa0] sm:$0xff] %v1331_v28  ;;  %v1332_v30 = vadd.f32 %v1268_v14, %v466_v27  ;;  %1368 = vst [vmem:[#allocation2 + $0xc8] sm:$0xff] %v1336_v29  ;;  %v1998_v32 = vpop.f32.mrb[44].mxu0  ;;  %v2098_v19 = vpop.f32.mrb[44].mxu1  ;;  %v1388_v29 = vld [vmem:[#allocation2 + $0x48] sm:$0xff] (!%p1912_p13) }
 0x1aa   : > { %v1305_v33 = vadd.f32 %v2098_v19, %v2635_v50  ;;  %v1999_v34 = vpop.f32.mrb[45].mxu0  ;;  %v1296_v36 = vpop.f32.mrb[45].mxu1 }
 0x1ab   : > { %1364 = vst [vmem:[#allocation2 + $0xa8] sm:$0xff] %v1332_v30  ;;  %v2000_v20 = vadd.f32 %v1999_v34, %v1998_v32  ;;  %v1297_v39 = vadd.f32 %v2631_v38, %v1296_v36  ;;  %v2001_v40 = vpop.f32.mrb[46].mxu0  ;;  %v2099_v42 = vpop.f32.mrb[46].mxu1  ;;  %v1389_v30 = vld [vmem:[#allocation2 + $0x50] sm:$0xff] (!%p1912_p13)  ;;  %v1419_v36 = vmul.f32 (!%p1912_p13), 0.083333336, %v1387_v24 }
 0x1ac   : > { %v1341_v45 = vadd.f32 %v1305_v33, %v475_v31  ;;  %v1308_v37 = vadd.f32 %v2099_v42, %v2637_v56  ;;  %v2002_v47 = vpop.f32.mrb[47].mxu0  ;;  %v1299_v51 = vpop.f32.mrb[47].mxu1 }
 0x1ad   : > { %v1273_v52 = vadd.f32 %v2639_v49, %v2000_v20  ;;  %v1339_v50 = vadd.f32 %v1297_v39, %v473_v35  ;;  %v2003_v53 = vadd.f32 %v2002_v47, %v2001_v40  ;;  %v1300_v54 = vadd.f32 %v2633_v44, %v1299_v51  ;;  %1378 = sbr.rel (%p1912_p13) target bundleno = 487 (0x1e7), region = 66  ;;  %v1379_v49 = vld [vmem:[#allocation2] sm:$0xff] (!%p1912_p13)  ;;  %v2657_v44 = vld [vmem:[%s2746_s2] ss:$0 sm:$0xff] (!%p1912_p13) }
 0x1ae   : > { %1373 = vst [vmem:[#allocation2 + $0xf0] sm:$0xff] %v1341_v45  ;;  %v1342_v57 = vadd.f32 %v1308_v37, %v476_v41  ;;  %v1411_v61 = vmul.f32 (!%p1912_p13), 0.083333336, %v1379_v49  ;;  %v1451_v0 = vadd.f32 (!%p1912_p13), %v2657_v44, %v1412_v62  ;;  %v1452_v10 = vadd.f32 (!%p1912_p13), %v2657_v44, %v1413_v1  ;;  %v1395_v49 = vld [vmem:[#allocation2 + $0x80] sm:$0xff] (!%p1912_p13) }
 0x1af   : > { %v1333_v38 = vadd.f32 %v1273_v52, %v467_v46  ;;  %1371 = vst [vmem:[#allocation2 + $0xe0] sm:$0xff] %v1339_v50  ;;  %v1276_v43 = vadd.f32 %v2641_v55, %v2003_v53  ;;  %v1340_v59 = vadd.f32 %v1300_v54, %v474_v48  ;;  %v1382_v55 = vld [vmem:[#allocation2 + $0x18] sm:$0xff] (!%p1912_p13)  ;;  %v1454_v23 = vadd.f32 (!%p1912_p13), %v2657_v44, %v1415_v6  ;;  %v1391_v53 = vld [vmem:[#allocation2 + $0x60] sm:$0xff] (!%p1912_p13)  ;;  %v1392_v54 = vld [vmem:[#allocation2 + $0x68] sm:$0xff] (!%p1912_p13) }
 0x1b0   : > { %1374 = vst [vmem:[#allocation2 + $0xf8] sm:$0xff] %v1342_v57  ;;  %v1414_v2 = vmul.f32 (!%p1912_p13), 0.083333336, %v1382_v55  ;;  %v1450_v5 = vadd.f32 (!%p1912_p13), %v2657_v44, %v1411_v61  ;;  %vm1483_vm1 = vcmp.ge.f32.partialorder (!%p1912_p13), %v1451_v0, 0.0  ;;  %v1515_v18 = vmul.f32 (!%p1912_p13), 0.2, %v1451_v0 }
 0x1b1   : > { %1365 = vst [vmem:[#allocation2 + $0xb0] sm:$0xff] %v1333_v38  ;;  %v1334_v56 = vadd.f32 %v1276_v43, %v468_v58  ;;  %1372 = vst [vmem:[#allocation2 + $0xe8] sm:$0xff] %v1340_v59  ;;  %vm1484_vm2 = vcmp.ge.f32.partialorder (!%p1912_p13), %v1452_v10, 0.0  ;;  %v1516_v11 = vmul.f32 (!%p1912_p13), 0.2, %v1452_v10  ;;  %v1455_v26 = vadd.f32 (!%p1912_p13), %v2657_v44, %v1416_v7  ;;  %v1390_v50 = vld [vmem:[#allocation2 + $0x58] sm:$0xff] (!%p1912_p13) }
 0x1b2   : > { %v1453_v12 = vadd.f32 (!%p1912_p13), %v2657_v44, %v1414_v2  ;;  %vm1482_vm0 = vcmp.ge.f32.partialorder (!%p1912_p13), %v1450_v5, 0.0  ;;  %v1514_v17 = vmul.f32 (!%p1912_p13), 0.2, %v1450_v5  ;;  %v1547_v22 = vsel (!%p1912_p13), %vm1483_vm1, %v1451_v0, %v1515_v18  ;;  %v1393_v38 = vld [vmem:[#allocation2 + $0x70] sm:$0xff] (!%p1912_p13) }
 0x1b3   : > { %1366 = vst [vmem:[#allocation2 + $0xb8] sm:$0xff] %v1334_v56  ;;  %v1579_v27 = vmul.f32 (!%p1912_p13), 1.4142135, %v1547_v22  ;;  %v1548_v28 = vsel (!%p1912_p13), %vm1484_vm2, %v1452_v10, %v1516_v11  ;;  %vm1486_vm4 = vcmp.ge.f32.partialorder (!%p1912_p13), %v1454_v23, 0.0  ;;  %vm1487_vm5 = vcmp.ge.f32.partialorder (!%p1912_p13), %v1455_v26, 0.0  ;;  %v1394_v56 = vld [vmem:[#allocation2 + $0x78] sm:$0xff] (!%p1912_p13) }
 0x1b4   : > { %vm1485_vm3 = vcmp.ge.f32.partialorder %v1453_v12, 0.0  ;;  %v1517_v13 = vmul.f32 0.2, %v1453_v12  ;;  %v1546_v21 = vsel %vm1482_vm0, %v1450_v5, %v1514_v17  ;;  %v1580_v32 = vmul.f32 1.4142135, %v1548_v28  ;;  %v1396_v22 = vld [vmem:[#allocation2 + $0x88] sm:$0xff] }
 0x1b5   : > { %v1578_v25 = vmul.f32 1.4142135, %v1546_v21  ;;  %1611 = vst [vmem:[%s2546_s30 + $0x8] sm:$0xff] %v1579_v27  ;;  %v1518_v19 = vmul.f32 0.2, %v1454_v23  ;;  %v1456_v34 = vadd.f32 %v2657_v44, %v1417_v15  ;;  %v1457_v35 = vadd.f32 %v2657_v44, %v1418_v16  ;;  %v1397_v27 = vld [vmem:[#allocation2 + $0x90] sm:$0xff] }
 0x1b6   : > { %v1549_v14 = vsel %vm1485_vm3, %v1453_v12, %v1517_v13  ;;  %v1519_v33 = vmul.f32 0.2, %v1455_v26  ;;  %1612 = vst [vmem:[%s2546_s30 + $0x10] sm:$0xff] %v1580_v32  ;;  %v1420_v20 = vmul.f32 0.083333336, %v1388_v29  ;;  %v1458_v37 = vadd.f32 %v2657_v44, %v1419_v36  ;;  %v1398_v28 = vld [vmem:[#allocation2 + $0x98] sm:$0xff] }
 0x1b7   : > { %v1581_v31 = vmul.f32 1.4142135, %v1549_v14  ;;  %1610 = vst [vmem:[%s2546_s30] sm:$0xff] %v1578_v25  ;;  %v1421_v39 = vmul.f32 0.083333336, %v1389_v30  ;;  %v1550_v40 = vsel %vm1486_vm4, %v1454_v23, %v1518_v19  ;;  %vm1488_vm6 = vcmp.ge.f32.partialorder %v1456_v34, 0.0  ;;  %v1399_v14 = vld [vmem:[#allocation2 + $0xa0] sm:$0xff] }
 0x1b8   : > { %v1551_v41 = vsel %vm1487_vm5, %v1455_v26, %v1519_v33  ;;  %v1520_v42 = vmul.f32 0.2, %v1456_v34  ;;  %v1582_v45 = vmul.f32 1.4142135, %v1550_v40  ;;  %vm1489_vm7 = vcmp.ge.f32.partialorder %v1457_v35, 0.0 }
 0x1b9   : > { %1613 = vst [vmem:[%s2546_s30 + $0x18] sm:$0xff] %v1581_v31  ;;  %v1583_v46 = vmul.f32 1.4142135, %v1551_v41  ;;  %v1521_v48 = vmul.f32 0.2, %v1457_v35  ;;  %v1459_v51 = vadd.f32 %v2657_v44, %v1420_v20  ;;  %v1460_v52 = vadd.f32 %v2657_v44, %v1421_v39  ;;  %v1400_v31 = vld [vmem:[#allocation2 + $0xa8] sm:$0xff] }
 0x1ba   : > { %v1552_v47 = vsel %vm1488_vm6, %v1456_v34, %v1520_v42  ;;  %1614 = vst [vmem:[%s2546_s30 + $0x20] sm:$0xff] %v1582_v45  ;;  %vm1490_vm8 = vcmp.ge.f32.partialorder %v1458_v37, 0.0  ;;  %v1522_v58 = vmul.f32 0.2, %v1458_v37  ;;  %v1422_v63 = vmul.f32 0.083333336, %v1390_v50 }
 0x1bb   : > { %1615 = vst [vmem:[%s2546_s30 + $0x28] sm:$0xff] %v1583_v46  ;;  %v1584_v57 = vmul.f32 1.4142135, %v1552_v47  ;;  %v1553_v43 = vsel %vm1489_vm7, %v1457_v35, %v1521_v48  ;;  %vm1491_vm9 = vcmp.ge.f32.partialorder %v1459_v51, 0.0  ;;  %v1523_v59 = vmul.f32 0.2, %v1459_v51 }
 0x1bc   : > { %vm1492_vm10 = vcmp.ge.f32.partialorder %v1460_v52, 0.0  ;;  %v1585_v60 = vmul.f32 1.4142135, %v1553_v43  ;;  %v1554_v61 = vsel %vm1490_vm8, %v1458_v37, %v1522_v58  ;;  %v1524_v62 = vmul.f32 0.2, %v1460_v52  ;;  %v1401_v50 = vld [vmem:[#allocation2 + $0xb0] sm:$0xff] }
 0x1bd   : > { %1616 = vst [vmem:[%s2546_s30 + $0x30] sm:$0xff] %v1584_v57  ;;  %v1586_v55 = vmul.f32 1.4142135, %v1554_v61  ;;  %v1555_v1 = vsel %vm1491_vm9, %v1459_v51, %v1523_v59  ;;  %v1423_v2 = vmul.f32 0.083333336, %v1391_v53  ;;  %v1461_v0 = vadd.f32 %v2657_v44, %v1422_v63  ;;  %v1402_v57 = vld [vmem:[#allocation2 + $0xb8] sm:$0xff] }
 0x1be   : > { %v1424_v3 = vmul.f32 0.083333336, %v1392_v54  ;;  %1617 = vst [vmem:[%s2546_s30 + $0x38] sm:$0xff] %v1585_v60  ;;  %v1587_v4 = vmul.f32 1.4142135, %v1555_v1  ;;  %v1556_v5 = vsel %vm1492_vm10, %v1460_v52, %v1524_v62  ;;  %v1403_v58 = vld [vmem:[#allocation2 + $0xc0] sm:$0xff] }
 0x1bf   : > { %v1425_v6 = vmul.f32 0.083333336, %v1393_v38  ;;  %1618 = vst [vmem:[%s2546_s30 + $0x40] sm:$0xff] %v1586_v55  ;;  %v1588_v7 = vmul.f32 1.4142135, %v1556_v5  ;;  %v1462_v8 = vadd.f32 %v2657_v44, %v1423_v2  ;;  %vm1493_vm11 = vcmp.ge.f32.partialorder %v1461_v0, 0.0 }
 0x1c0   : > { %v1463_v9 = vadd.f32 %v2657_v44, %v1424_v3  ;;  %v1426_v10 = vmul.f32 0.083333336, %v1394_v56  ;;  %1619 = vst [vmem:[%s2546_s30 + $0x48] sm:$0xff] %v1587_v4  ;;  %v1525_v12 = vmul.f32 0.2, %v1461_v0  ;;  %v1404_v60 = vld [vmem:[#allocation2 + $0xc8] sm:$0xff] }
 0x1c1   : > { %v1464_v15 = vadd.f32 %v2657_v44, %v1425_v6  ;;  %v1427_v16 = vmul.f32 0.083333336, %v1395_v49  ;;  %1620 = vst [vmem:[%s2546_s30 + $0x50] sm:$0xff] %v1588_v7  ;;  %vm1494_vm12 = vcmp.ge.f32.partialorder %v1462_v8, 0.0  ;;  %v1526_v17 = vmul.f32 0.2, %v1462_v8 }
 0x1c2   : > { %vm1495_vm13 = vcmp.ge.f32.partialorder %v1463_v9, 0.0  ;;  %v1527_v18 = vmul.f32 0.2, %v1463_v9  ;;  %v1557_v11 = vsel %vm1493_vm11, %v1461_v0, %v1525_v12  ;;  %v1465_v21 = vadd.f32 %v2657_v44, %v1426_v10  ;;  %v1405_v61 = vld [vmem:[#allocation2 + $0xd0] sm:$0xff]  ;;  %v1406_v62 = vld [vmem:[#allocation2 + $0xd8] sm:$0xff]  ;;  %v1407_v3 = vld [vmem:[#allocation2 + $0xe0] sm:$0xff] }
 0x1c3   : > { %vm1496_vm14 = vcmp.ge.f32.partialorder %v1464_v15, 0.0  ;;  %v1528_v13 = vmul.f32 0.2, %v1464_v15  ;;  %v1589_v23 = vmul.f32 1.4142135, %v1557_v11  ;;  %v1558_v26 = vsel %vm1494_vm12, %v1462_v8, %v1526_v17  ;;  %v1408_v4 = vld [vmem:[#allocation2 + $0xe8] sm:$0xff] }
 0x1c4   : > { %v1559_v24 = vsel %vm1495_vm13, %v1463_v9, %v1527_v18  ;;  %v1466_v25 = vadd.f32 %v2657_v44, %v1427_v16  ;;  %v1590_v29 = vmul.f32 1.4142135, %v1558_v26  ;;  %vm1497_vm15 = vcmp.ge.f32.partialorder %v1465_v21, 0.0 }
 0x1c5   : > { %v1591_v30 = vmul.f32 1.4142135, %v1559_v24  ;;  %v1560_v32 = vsel %vm1496_vm14, %v1464_v15, %v1528_v13  ;;  %1621 = vst [vmem:[%s2546_s30 + $0x58] sm:$0xff] %v1589_v23  ;;  %v1529_v33 = vmul.f32 0.2, %v1465_v21 }
 0x1c6   : > { %v1592_v19 = vmul.f32 1.4142135, %v1560_v32  ;;  %vm1498_vm0 = vcmp.ge.f32.partialorder %v1466_v25, 0.0  ;;  %1622 = vst [vmem:[%s2546_s30 + $0x60] sm:$0xff] %v1590_v29  ;;  %v1530_v34 = vmul.f32 0.2, %v1466_v25 }
 0x1c7   : > { %1623 = vst [vmem:[%s2546_s30 + $0x68] sm:$0xff] %v1591_v30  ;;  %v1428_v35 = vmul.f32 0.083333336, %v1396_v22  ;;  %v1429_v36 = vmul.f32 0.083333336, %v1397_v27  ;;  %v1561_v20 = vsel %vm1497_vm15, %v1465_v21, %v1529_v33 }
 0x1c8   : > { %1624 = vst [vmem:[%s2546_s30 + $0x70] sm:$0xff] %v1592_v19  ;;  %v1430_v39 = vmul.f32 0.083333336, %v1398_v28  ;;  %v1431_v40 = vmul.f32 0.083333336, %v1399_v14  ;;  %v1562_v45 = vsel %vm1498_vm0, %v1466_v25, %v1530_v34 }
 0x1c9   : > { %v1432_v41 = vmul.f32 0.083333336, %v1400_v31  ;;  %v1593_v42 = vmul.f32 1.4142135, %v1561_v20  ;;  %v1467_v46 = vadd.f32 %v2657_v44, %v1428_v35  ;;  %v1468_v37 = vadd.f32 %v2657_v44, %v1429_v36 }
 0x1ca   : > { %v1594_v47 = vmul.f32 1.4142135, %v1562_v45  ;;  %v1469_v48 = vadd.f32 %v2657_v44, %v1430_v39  ;;  %v1470_v51 = vadd.f32 %v2657_v44, %v1431_v40  ;;  %v1433_v7 = vmul.f32 0.083333336, %v1401_v50  ;;  %v1409_v40 = vld [vmem:[#allocation2 + $0xf0] sm:$0xff] }
 0x1cb   : > { %v1471_v52 = vadd.f32 %v2657_v44, %v1432_v41  ;;  %1625 = vst [vmem:[%s2546_s30 + $0x78] sm:$0xff] %v1593_v42  ;;  %vm1499_vm1 = vcmp.ge.f32.partialorder %v1467_v46, 0.0  ;;  %v1531_v53 = vmul.f32 0.2, %v1467_v46  ;;  %vm1500_vm2 = vcmp.ge.f32.partialorder %v1468_v37, 0.0  ;;  %v1410_v41 = vld [vmem:[#allocation2 + $0xf8] sm:$0xff] }
 0x1cc   : > { %v1532_v54 = vmul.f32 0.2, %v1468_v37  ;;  %1626 = vst [vmem:[%s2546_s30 + $0x80] sm:$0xff] %v1594_v47  ;;  %vm1501_vm3 = vcmp.ge.f32.partialorder %v1469_v48, 0.0  ;;  %v1533_v38 = vmul.f32 0.2, %v1469_v48  ;;  %v1472_v12 = vadd.f32 %v2657_v44, %v1433_v7 }
 0x1cd   : > { %vm1502_vm4 = vcmp.ge.f32.partialorder %v1470_v51, 0.0  ;;  %v1534_v43 = vmul.f32 0.2, %v1470_v51  ;;  %v1563_v59 = vsel %vm1499_vm1, %v1467_v46, %v1531_v53  ;;  %vm1503_vm5 = vcmp.ge.f32.partialorder %v1471_v52, 0.0 }
 0x1ce   : > { %v1564_v56 = vsel %vm1500_vm2, %v1468_v37, %v1532_v54  ;;  %v1535_v49 = vmul.f32 0.2, %v1471_v52  ;;  %v1595_v63 = vmul.f32 1.4142135, %v1563_v59  ;;  %v1565_v1 = vsel %vm1501_vm3, %v1469_v48, %v1533_v38 }
 0x1cf   : > { %v1596_v55 = vmul.f32 1.4142135, %v1564_v56  ;;  %v1566_v2 = vsel %vm1502_vm4, %v1470_v51, %v1534_v43  ;;  %v1597_v5 = vmul.f32 1.4142135, %v1565_v1  ;;  %v1434_v9 = vmul.f32 0.083333336, %v1402_v57 }
 0x1d0   : > { %v1598_v0 = vmul.f32 1.4142135, %v1566_v2  ;;  %v1567_v6 = vsel %vm1503_vm5, %v1471_v52, %v1535_v49  ;;  %1627 = vst [vmem:[%s2546_s30 + $0x88] sm:$0xff] %v1595_v63  ;;  %v1435_v10 = vmul.f32 0.083333336, %v1403_v58  ;;  %vm1504_vm6 = vcmp.ge.f32.partialorder %v1472_v12, 0.0 }
 0x1d1   : > { %1628 = vst [vmem:[%s2546_s30 + $0x90] sm:$0xff] %v1596_v55  ;;  %v1599_v8 = vmul.f32 1.4142135, %v1567_v6  ;;  %1629 = vst [vmem:[%s2546_s30 + $0x98] sm:$0xff] %v1597_v5  ;;  %v1436_v15 = vmul.f32 0.083333336, %v1404_v60  ;;  %v1473_v18 = vadd.f32 %v2657_v44, %v1434_v9 }
 0x1d2   : > { %1630 = vst [vmem:[%s2546_s30 + $0xa0] sm:$0xff] %v1598_v0  ;;  %v1437_v16 = vmul.f32 0.083333336, %v1405_v61  ;;  %v1438_v17 = vmul.f32 0.083333336, %v1406_v62  ;;  %v1474_v11 = vadd.f32 %v2657_v44, %v1435_v10 }
 0x1d3   : > { %1631 = vst [vmem:[%s2546_s30 + $0xa8] sm:$0xff] %v1599_v8  ;;  %v1439_v13 = vmul.f32 0.083333336, %v1407_v3  ;;  %v1440_v21 = vmul.f32 0.083333336, %v1408_v4  ;;  %v1475_v23 = vadd.f32 %v2657_v44, %v1436_v15  ;;  %vm1505_vm7 = vcmp.ge.f32.partialorder %v1473_v18, 0.0 }
 0x1d4   : > { %v1536_v22 = vmul.f32 0.2, %v1472_v12  ;;  %v1476_v26 = vadd.f32 %v2657_v44, %v1437_v16  ;;  %v1537_v24 = vmul.f32 0.2, %v1473_v18  ;;  %vm1506_vm8 = vcmp.ge.f32.partialorder %v1474_v11, 0.0 }
 0x1d5   : > { %v1538_v25 = vmul.f32 0.2, %v1474_v11  ;;  %vm1507_vm9 = vcmp.ge.f32.partialorder %v1475_v23, 0.0  ;;  %v1539_v28 = vmul.f32 0.2, %v1475_v23  ;;  %v1477_v34 = vadd.f32 %v2657_v44, %v1438_v17 }
 0x1d6   : > { %v1568_v27 = vsel %vm1504_vm6, %v1472_v12, %v1536_v22  ;;  %vm1508_vm10 = vcmp.ge.f32.partialorder %v1476_v26, 0.0  ;;  %v1569_v29 = vsel %vm1505_vm7, %v1473_v18, %v1537_v24  ;;  %v1540_v32 = vmul.f32 0.2, %v1476_v26 }
 0x1d7   : > { %v1600_v14 = vmul.f32 1.4142135, %v1568_v27  ;;  %v1570_v30 = vsel %vm1506_vm8, %v1474_v11, %v1538_v25  ;;  %v1601_v31 = vmul.f32 1.4142135, %v1569_v29  ;;  %v1571_v33 = vsel %vm1507_vm9, %v1475_v23, %v1539_v28 }
 0x1d8   : > { %v1602_v19 = vmul.f32 1.4142135, %v1570_v30  ;;  %v1603_v35 = vmul.f32 1.4142135, %v1571_v33  ;;  %v1572_v36 = vsel %vm1508_vm10, %v1476_v26, %v1540_v32  ;;  %v1478_v20 = vadd.f32 %v2657_v44, %v1439_v13 }
 0x1d9   : > { %1632 = vst [vmem:[%s2546_s30 + $0xb0] sm:$0xff] %v1600_v14  ;;  %v1479_v39 = vadd.f32 %v2657_v44, %v1440_v21  ;;  %1633 = vst [vmem:[%s2546_s30 + $0xb8] sm:$0xff] %v1601_v31  ;;  %v1604_v42 = vmul.f32 1.4142135, %v1572_v36  ;;  %vm1509_vm11 = vcmp.ge.f32.partialorder %v1477_v34, 0.0 }
 0x1da   : > { %1634 = vst [vmem:[%s2546_s30 + $0xc0] sm:$0xff] %v1602_v19  ;;  %v1541_v45 = vmul.f32 0.2, %v1477_v34  ;;  %1635 = vst [vmem:[%s2546_s30 + $0xc8] sm:$0xff] %v1603_v35  ;;  %vm1510_vm12 = vcmp.ge.f32.partialorder %v1478_v20, 0.0 }
 0x1db   : > { %v1542_v46 = vmul.f32 0.2, %v1478_v20  ;;  %vm1511_vm13 = vcmp.ge.f32.partialorder %v1479_v39, 0.0  ;;  %v1543_v37 = vmul.f32 0.2, %v1479_v39  ;;  %1636 = vst [vmem:[%s2546_s30 + $0xd0] sm:$0xff] %v1604_v42 }
 0x1dc   : > { %v1573_v47 = vsel %vm1509_vm11, %v1477_v34, %v1541_v45  ;;  %v1441_v48 = vmul.f32 0.083333336, %v1409_v40  ;;  %v1442_v51 = vmul.f32 0.083333336, %v1410_v41 }
 0x1dd   : > { %v1605_v52 = vmul.f32 1.4142135, %v1573_v47  ;;  %v1574_v50 = vsel %vm1510_vm12, %v1478_v20, %v1542_v46  ;;  %v1575_v53 = vsel %vm1511_vm13, %v1479_v39, %v1543_v37 }
 0x1de   : > { %v1606_v54 = vmul.f32 1.4142135, %v1574_v50  ;;  %v1607_v57 = vmul.f32 1.4142135, %v1575_v53  ;;  %v1480_v58 = vadd.f32 %v2657_v44, %v1441_v48  ;;  %v1481_v38 = vadd.f32 %v2657_v44, %v1442_v51 }
 0x1df   : > { %1637 = vst [vmem:[%s2546_s30 + $0xd8] sm:$0xff] %v1605_v52 }
 0x1e0   : > { %1638 = vst [vmem:[%s2546_s30 + $0xe0] sm:$0xff] %v1606_v54  ;;  %1639 = vst [vmem:[%s2546_s30 + $0xe8] sm:$0xff] %v1607_v57  ;;  %vm1512_vm14 = vcmp.ge.f32.partialorder %v1480_v58, 0.0  ;;  %v1544_v43 = vmul.f32 0.2, %v1480_v58  ;;  %vm1513_vm15 = vcmp.ge.f32.partialorder %v1481_v38, 0.0 }
 0x1e1   : > { %v1545_v59 = vmul.f32 0.2, %v1481_v38 }
 0x1e2   : > { %v1576_v56 = vsel %vm1512_vm14, %v1480_v58, %v1544_v43 }
 0x1e3   : > { %v1577_v49 = vsel %vm1513_vm15, %v1481_v38, %v1545_v59  ;;  %v1608_v60 = vmul.f32 1.4142135, %v1576_v56 }
 0x1e4   : > { %v1609_v61 = vmul.f32 1.4142135, %v1577_v49 }
 0x1e5   : > { %1640 = vst [vmem:[%s2546_s30 + $0xf0] sm:$0xff] %v1608_v60 }
 0x1e6   : > { %1641 = vst [vmem:[%s2546_s30 + $0xf8] sm:$0xff] %v1609_v61 }
 0x1e7 PF: > { %s13_s18 = sadd.s32 1, %s2318_s18   ;;  %s2748_s12 = smov %s2298_s13 }
 0x1e8   : > { %p10_p0 = scmp.ge.s32.totalorder %s13_s18, 8   ;;  %s2749_s13 = smov %s2392_s25 }
 0x1e9   : > { %s2750_s14 = smov %s2310_s16  ;;  %s2751_s15 = smov %s2314_s17 }
 0x1ea   : > { %s2752_s16 = smov %s2755_s19  ;;  %s2753_s17 = smov %s2759_s20 }
 0x1eb   :  { %12 = sbr.rel (!%p10_p0) target bundleno = 4 (0x4), region = 113 }

// kernel: _lambda_.16
= control target key start
LH: loop header
LB: loop body
LE: loop exit
PB: predicated region body
PF: predicated region fallthrough
CT: control target
= control target key end

     0   :  { %s602_s1 = inlined_call_operand.vmem [shape: bf16[128,128], index: 1, kind: input, shape index: {}]   ;;  %s603_s0 = inlined_call_operand.vmem [shape: bf16[128,128], index: 0, kind: input, shape index: {}]   ;;  %s604_s2 = inlined_call_operand.vmem [shape: f32[1,128], index: 2, kind: input, shape index: {}]   ;;  %s605_s3 = inlined_call_operand.vmem [shape: f32[128,128], index: 3, kind: output, shape index: {}]  }
   0x1   :  { %v467_v0 = vld [vmem:[%s602_s1] sm:$0xff]   ;;  %v468_v1 = vld [vmem:[%s602_s1 + $0x8] sm:$0xff]   ;;  %v469_v2 = vld [vmem:[%s602_s1 + $0x10] sm:$0xff]  }
   0x2   :  { %419 = vmatprep.subr.bf16.mxu0 %v467_v0  ;;  %451 = vmatprep.subr.bf16.mxu1 %v467_v0  ;;  %v470_v3 = vld [vmem:[%s602_s1 + $0x18] sm:$0xff]   ;;  %v475_v4 = vld [vmem:[%s603_s0] sm:$0xff]   ;;  %v472_v7 = vld [vmem:[%s602_s1 + $0x28] sm:$0xff]  }
   0x3   :  { %420 = vmatpush3.bf16.msra.mxu0 %v467_v0  ;;  %459 = vmatpush3.bf16.msra.mxu1 %v467_v0  ;;  %v476_v5 = vld [vmem:[%s603_s0 + $0x20] sm:$0xff]   ;;  %v473_v8 = vld [vmem:[%s602_s1 + $0x30] sm:$0xff]   ;;  %v474_v9 = vld [vmem:[%s602_s1 + $0x38] sm:$0xff]  }
   0x4   :  { %421 = vmatprep.subr.bf16.mxu0 %v468_v1  ;;  %452 = vmatprep.subr.bf16.mxu1 %v468_v1  ;;  %v471_v6 = vld [vmem:[%s602_s1 + $0x20] sm:$0xff]   ;;  %v477_v10 = vld [vmem:[%s603_s0 + $0x8] sm:$0xff]   ;;  %v479_v12 = vld [vmem:[%s603_s0 + $0x10] sm:$0xff]  }
   0x5   :  { %435 = vmatprep.mubr.bf16.mxu0 %v475_v4  ;;  %443 = vmatprep.mubr.bf16.mxu1 %v476_v5  ;;  %v478_v11 = vld [vmem:[%s603_s0 + $0x28] sm:$0xff]   ;;  %v480_v13 = vld [vmem:[%s603_s0 + $0x30] sm:$0xff]   ;;  %v481_v14 = vld [vmem:[%s603_s0 + $0x18] sm:$0xff]  }
   0x6   :  { %v482_v15 = vld [vmem:[%s603_s0 + $0x38] sm:$0xff]   ;;  %v402_v17 = vld [vmem:[%s604_s2] ss:$0 sm:$0xff] }
   0x7   :  { %422 = vmatpush3.bf16.msra.mxu0 %v468_v1  ;;  %460 = vmatpush3.bf16.msra.mxu1 %v468_v1 }
   0x8   :  { %423 = vmatprep.subr.bf16.mxu0 %v469_v2  ;;  %453 = vmatprep.subr.bf16.mxu1 %v469_v2 }
   0xb   :  { %424 = vmatpush3.bf16.msra.mxu0 %v469_v2  ;;  %461 = vmatpush3.bf16.msra.mxu1 %v469_v2 }
   0xc   :  { %425 = vmatprep.subr.bf16.mxu0 %v470_v3  ;;  %454 = vmatprep.subr.bf16.mxu1 %v470_v3 }
   0xf   :  { %426 = vmatpush3.bf16.msra.mxu0 %v470_v3  ;;  %462 = vmatpush3.bf16.msra.mxu1 %v470_v3 }
  0x10   :  { %427 = vmatprep.subr.bf16.mxu0 %v471_v6  ;;  %455 = vmatprep.subr.bf16.mxu1 %v471_v6 }
  0x13   :  { %428 = vmatpush3.bf16.msra.mxu0 %v471_v6  ;;  %463 = vmatpush3.bf16.msra.mxu1 %v471_v6 }
  0x14   :  { %429 = vmatprep.subr.bf16.mxu0 %v472_v7  ;;  %456 = vmatprep.subr.bf16.mxu1 %v472_v7 }
  0x17   :  { %430 = vmatpush3.bf16.msra.mxu0 %v472_v7  ;;  %464 = vmatpush3.bf16.msra.mxu1 %v472_v7 }
  0x18   :  { %431 = vmatprep.subr.bf16.mxu0 %v473_v8  ;;  %457 = vmatprep.subr.bf16.mxu1 %v473_v8 }
  0x1b   :  { %432 = vmatpush3.bf16.msra.mxu0 %v473_v8  ;;  %465 = vmatpush3.bf16.msra.mxu1 %v473_v8 }
  0x1c   :  { %433 = vmatprep.subr.bf16.mxu0 %v474_v9  ;;  %458 = vmatprep.subr.bf16.mxu1 %v474_v9 }
  0x1f   :  { %434 = vmatpush3.bf16.msra.mxu0 %v474_v9  ;;  %466 = vmatpush3.bf16.msra.mxu1 %v474_v9 }
  0x22   :  { %436 = vmatmul.mubr.bf16.vlgmr.msra.gmra.mrb[0].mxu0 %v477_v10  ;;  %444 = vmatmul.mubr.bf16.vlgmr.msra.gmra.mrb[0].mxu1 %v478_v11 }
  0x23   :  { %439 = vmatprep.mubr.bf16.mxu0 %v479_v12  ;;  %447 = vmatprep.mubr.bf16.mxu1 %v480_v13 }
  0x2a   :  { %440 = vmatmul.mubr.bf16.gmra.mrb[4].mxu0 %v481_v14  ;;  %448 = vmatmul.mubr.bf16.gmra.mrb[4].mxu1 %v482_v15 }
  0xf5   :  { %v437_v16 = vpop.f32.mrb[0].mxu0  ;;  %v445_v18 = vpop.f32.mrb[0].mxu1 }
  0xf6   :  { %v329_v19 = vmul.f32 0.25, %v437_v16  ;;  %v337_v20 = vmul.f32 0.25, %v445_v18  ;;  %v213_v21 = vpop.f32.mrb[1].mxu0  ;;  %v245_v22 = vpop.f32.mrb[1].mxu1 }
  0xf7   :  { %v327_v23 = vmul.f32 0.25, %v213_v21  ;;  %v335_v24 = vmul.f32 0.25, %v245_v22  ;;  %v438_v25 = vpop.f32.mrb[2].mxu0  ;;  %v446_v26 = vpop.f32.mrb[2].mxu1 }
  0xf8   :  { %v352_v27 = vadd.f32 %v402_v17, %v329_v19  ;;  %v360_v28 = vadd.f32 %v402_v17, %v337_v20  ;;  %v330_v29 = vmul.f32 0.25, %v438_v25  ;;  %v338_v30 = vmul.f32 0.25, %v446_v26  ;;  %v216_v31 = vpop.f32.mrb[3].mxu0  ;;  %v248_v32 = vpop.f32.mrb[3].mxu1 }
  0xf9   :  { %v350_v33 = vadd.f32 %v402_v17, %v327_v23  ;;  %v358_v34 = vadd.f32 %v402_v17, %v335_v24  ;;  %v328_v35 = vmul.f32 0.25, %v216_v31  ;;  %v336_v36 = vmul.f32 0.25, %v248_v32 }
  0xfa   :  { %368 = vst [vmem:[%s605_s3 + $0x10] sm:$0xff] %v352_v27  ;;  %376 = vst [vmem:[%s605_s3 + $0x50] sm:$0xff] %v360_v28  ;;  %v353_v37 = vadd.f32 %v402_v17, %v330_v29  ;;  %v361_v38 = vadd.f32 %v402_v17, %v338_v30 }
  0xfb   :  { %366 = vst [vmem:[%s605_s3] sm:$0xff] %v350_v33  ;;  %374 = vst [vmem:[%s605_s3 + $0x40] sm:$0xff] %v358_v34  ;;  %v351_v39 = vadd.f32 %v402_v17, %v328_v35  ;;  %v359_v40 = vadd.f32 %v402_v17, %v336_v36 }
  0xfc   :  { %369 = vst [vmem:[%s605_s3 + $0x18] sm:$0xff] %v353_v37  ;;  %377 = vst [vmem:[%s605_s3 + $0x58] sm:$0xff] %v361_v38 }
  0xfd   :  { %367 = vst [vmem:[%s605_s3 + $0x8] sm:$0xff] %v351_v39  ;;  %375 = vst [vmem:[%s605_s3 + $0x48] sm:$0xff] %v359_v40  ;;  %v441_v41 = vpop.f32.mrb[4].mxu0  ;;  %v449_v42 = vpop.f32.mrb[4].mxu1 }
  0xfe   :  { %v333_v43 = vmul.f32 0.25, %v441_v41  ;;  %v341_v44 = vmul.f32 0.25, %v449_v42  ;;  %v229_v45 = vpop.f32.mrb[5].mxu0  ;;  %v261_v46 = vpop.f32.mrb[5].mxu1 }
  0xff   :  { %v331_v47 = vmul.f32 0.25, %v229_v45  ;;  %v339_v48 = vmul.f32 0.25, %v261_v46  ;;  %v442_v49 = vpop.f32.mrb[6].mxu0  ;;  %v450_v50 = vpop.f32.mrb[6].mxu1 }
 0x100   :  { %v356_v51 = vadd.f32 %v402_v17, %v333_v43  ;;  %v364_v52 = vadd.f32 %v402_v17, %v341_v44  ;;  %v334_v53 = vmul.f32 0.25, %v442_v49  ;;  %v342_v54 = vmul.f32 0.25, %v450_v50  ;;  %v232_v55 = vpop.f32.mrb[7].mxu0  ;;  %v264_v56 = vpop.f32.mrb[7].mxu1 }
 0x101   :  { %v354_v57 = vadd.f32 %v402_v17, %v331_v47  ;;  %v362_v58 = vadd.f32 %v402_v17, %v339_v48  ;;  %v332_v59 = vmul.f32 0.25, %v232_v55  ;;  %v340_v60 = vmul.f32 0.25, %v264_v56 }
 0x102   :  { %372 = vst [vmem:[%s605_s3 + $0x30] sm:$0xff] %v356_v51  ;;  %380 = vst [vmem:[%s605_s3 + $0x70] sm:$0xff] %v364_v52  ;;  %v357_v61 = vadd.f32 %v402_v17, %v334_v53  ;;  %v365_v62 = vadd.f32 %v402_v17, %v342_v54 }
 0x103   :  { %370 = vst [vmem:[%s605_s3 + $0x20] sm:$0xff] %v354_v57  ;;  %378 = vst [vmem:[%s605_s3 + $0x60] sm:$0xff] %v362_v58  ;;  %v355_v63 = vadd.f32 %v402_v17, %v332_v59  ;;  %v363_v0 = vadd.f32 %v402_v17, %v340_v60 }
 0x104   :  { %373 = vst [vmem:[%s605_s3 + $0x38] sm:$0xff] %v357_v61  ;;  %381 = vst [vmem:[%s605_s3 + $0x78] sm:$0xff] %v365_v62 }
 0x105   :  { %371 = vst [vmem:[%s605_s3 + $0x28] sm:$0xff] %v355_v63  ;;  %379 = vst [vmem:[%s605_s3 + $0x68] sm:$0xff] %v363_v0 }

// kernel: _lambda_.19
= control target key start
LH: loop header
LB: loop body
LE: loop exit
PB: predicated region body
PF: predicated region fallthrough
CT: control target
= control target key end

     0   :  { %s1712_s15 = smov 0   ;;  %s1714_s16 = smov 0   ;;  %s2018_s0 = inlined_call_operand.vmem [shape: bf16[128,1152], index: 0, kind: input, shape index: {}]   ;;  %s2019_s1 = inlined_call_operand.vmem [shape: bf16[1152,128], index: 1, kind: input, shape index: {}]   ;;  %s2020_s2 = inlined_call_operand.vmem [shape: f32[1,128], index: 2, kind: input, shape index: {}]   ;;  %s2021_s3 = inlined_call_operand.vmem [shape: f32[128,128], index: 3, kind: input, shape index: {}]   ;;  %s2022_s4 = inlined_call_operand.vmem [shape: f32[128,128], index: 4, kind: output, shape index: {}]  }
   0x1   :  { %s1716_s17 = smov 0   ;;  %s1718_s18 = smov 0  }
   0x2   :  { %s1720_s19 = smov 0  }
   0x3 LB: > { %s26_s20 = sadd.s32 1, %s1680_s18  ;;  %p49_p1 = scmp.ne.s32.totalorder %s1672_s16, %s1668_s15  ;;  %s1684_s19 = sphi %s1720_s19, %s14_s19   ;;  %s1680_s18 = sphi %s1718_s18, %s2026_s18   ;;  %s1676_s17 = sphi %s1716_s17, %s2025_s17   ;;  %s1672_s16 = sphi %s1714_s16, %s2024_s16   ;;  %s1668_s15 = sphi %s1712_s15, %s2023_s15  }
   0x4   : > { %p27_p0 = scmp.ge.s32.totalorder %s26_s20, 3  ;;  %p50_p2 = scmp.eq.s32.totalorder %s1684_s19, 0 }
   0x5   : > { %s42_s22 = sadd.s32 1, %s1672_s16  ;;  %p1343_p5 = scmp.ge.s32.totalorder %s1684_s19, 3 }
   0x6   : > { %s2028_s20 = smov (%p27_p0, %s26_s20), 0  ;;  %p51_p3 = por %p50_p2, %p49_p1 }
   0x7   : > { %s38_s21 = ssub.s32 %s1680_s18, %s2028_s20  ;;  %203 = sbr.rel (%p1343_p5) target bundleno = 37 (0x25), region = 24 }
   0x8   : > { %p40_p4 = scmp.eq.s32.totalorder %s38_s21, 0 }
   0xa   : > { %s1747_s23 = scalar_select %p40_p4, %s1672_s16, %s42_s22  }
   0xe   : > { %206 = sbr.rel (!%p51_p3) target bundleno = 37 (0x25), region = 28  ;;  %s208_s24 = sand.u32 (%p51_p3), 1, %s1672_s16  }
   0xf   : > { %s1434_s25 = smul.u32 (%p51_p3), 12, %s1680_s18 }
  0x10   : > { %s1547_s26 = smul.u32 (%p51_p3), 192, %s208_s24 }
  0x11   : > { %s1755_s29 = scalar_lea.vmem (%p51_p3), %s2018_s0, %s1434_s25 }
  0x12   : > { %v231_v0 = vld [vmem:[%s1755_s29] sm:$0xff] (%p51_p3)  ;;  %v235_v2 = vld [vmem:[%s1755_s29 + $0x48] sm:$0xff] (%p51_p3)  ;;  %s1760_s30 = scalar_lea.vmem (%p51_p3), [#allocation3], %s1547_s26  ;;  %v239_v4 = vld [vmem:[%s1755_s29 + $0x90] sm:$0xff] (%p51_p3) }
  0x13   : > { %v233_v1 = vld [vmem:[%s1755_s29 + $0x24] sm:$0xff] (%p51_p3)  ;;  %232 = vst [vmem:[%s1760_s30] sm:$0xff] (%p51_p3), %v231_v0  ;;  %236 = vst [vmem:[%s1760_s30 + $0x18] sm:$0xff] (%p51_p3), %v235_v2  ;;  %v237_v3 = vld [vmem:[%s1755_s29 + $0x6c] sm:$0xff] (%p51_p3) }
  0x14   : > { %234 = vst [vmem:[%s1760_s30 + $0xc] sm:$0xff] (%p51_p3), %v233_v1  ;;  %v241_v5 = vld [vmem:[%s1755_s29 + $0xb4] sm:$0xff] (%p51_p3)  ;;  %238 = vst [vmem:[%s1760_s30 + $0x24] sm:$0xff] (%p51_p3), %v237_v3  ;;  %v245_v7 = vld [vmem:[%s1755_s29 + $0xfc] sm:$0xff] (%p51_p3) }
  0x15   : > { %240 = vst [vmem:[%s1760_s30 + $0x30] sm:$0xff] %v239_v4  ;;  %242 = vst [vmem:[%s1760_s30 + $0x3c] sm:$0xff] %v241_v5  ;;  %v243_v6 = vld [vmem:[%s1755_s29 + $0xd8] sm:$0xff]  ;;  %v247_v8 = vld [vmem:[%s1755_s29 + $0x120] sm:$0xff] }
  0x16   : > { %244 = vst [vmem:[%s1760_s30 + $0x48] sm:$0xff] %v243_v6  ;;  %246 = vst [vmem:[%s1760_s30 + $0x54] sm:$0xff] %v245_v7  ;;  %v249_v9 = vld [vmem:[%s1755_s29 + $0x144] sm:$0xff]  ;;  %v253_v11 = vld [vmem:[%s1755_s29 + $0x18c] sm:$0xff] }
  0x17   : > { %248 = vst [vmem:[%s1760_s30 + $0x60] sm:$0xff] %v247_v8  ;;  %v251_v10 = vld [vmem:[%s1755_s29 + $0x168] sm:$0xff]  ;;  %250 = vst [vmem:[%s1760_s30 + $0x6c] sm:$0xff] %v249_v9  ;;  %v255_v12 = vld [vmem:[%s1755_s29 + $0x1b0] sm:$0xff] }
  0x18   : > { %252 = vst [vmem:[%s1760_s30 + $0x78] sm:$0xff] %v251_v10  ;;  %254 = vst [vmem:[%s1760_s30 + $0x84] sm:$0xff] %v253_v11  ;;  %v257_v13 = vld [vmem:[%s1755_s29 + $0x1d4] sm:$0xff]  ;;  %v261_v15 = vld [vmem:[%s1755_s29 + $0x21c] sm:$0xff] }
  0x19   : > { %v259_v14 = vld [vmem:[%s1755_s29 + $0x1f8] sm:$0xff]  ;;  %256 = vst [vmem:[%s1760_s30 + $0x90] sm:$0xff] %v255_v12  ;;  %258 = vst [vmem:[%s1760_s30 + $0x9c] sm:$0xff] %v257_v13  ;;  %v1345_v16 = vld [vmem:[%s1755_s29 + $0x8] sm:$0xf] }
  0x1a   : > { %260 = vst [vmem:[%s1760_s30 + $0xa8] sm:$0xff] %v259_v14  ;;  %v1347_v17 = vld [vmem:[%s1755_s29 + $0x2c] sm:$0xf]  ;;  %262 = vst [vmem:[%s1760_s30 + $0xb4] sm:$0xff] %v261_v15  ;;  %v1349_v18 = vld [vmem:[%s1755_s29 + $0x50] sm:$0xf] }
  0x1b   : > { %1346 = vst [vmem:[%s1760_s30 + $0x8] sm:$0xf] %v1345_v16  ;;  %1348 = vst [vmem:[%s1760_s30 + $0x14] sm:$0xf] %v1347_v17  ;;  %v1351_v19 = vld [vmem:[%s1755_s29 + $0x74] sm:$0xf] }
  0x1c   : > { %v1353_v20 = vld [vmem:[%s1755_s29 + $0x98] sm:$0xf]  ;;  %1350 = vst [vmem:[%s1760_s30 + $0x20] sm:$0xf] %v1349_v18  ;;  %1352 = vst [vmem:[%s1760_s30 + $0x2c] sm:$0xf] %v1351_v19 }
  0x1d   : > { %1354 = vst [vmem:[%s1760_s30 + $0x38] sm:$0xf] %v1353_v20  ;;  %v1355_v21 = vld [vmem:[%s1755_s29 + $0xbc] sm:$0xf]  ;;  %v1357_v22 = vld [vmem:[%s1755_s29 + $0xe0] sm:$0xf] }
  0x1e   : > { %v1359_v23 = vld [vmem:[%s1755_s29 + $0x104] sm:$0xf]  ;;  %1356 = vst [vmem:[%s1760_s30 + $0x44] sm:$0xf] %v1355_v21  ;;  %1358 = vst [vmem:[%s1760_s30 + $0x50] sm:$0xf] %v1357_v22 }
  0x1f   : > { %1360 = vst [vmem:[%s1760_s30 + $0x5c] sm:$0xf] %v1359_v23  ;;  %v1361_v24 = vld [vmem:[%s1755_s29 + $0x128] sm:$0xf]  ;;  %v1363_v25 = vld [vmem:[%s1755_s29 + $0x14c] sm:$0xf] }
  0x20   : > { %v1365_v26 = vld [vmem:[%s1755_s29 + $0x170] sm:$0xf]  ;;  %1362 = vst [vmem:[%s1760_s30 + $0x68] sm:$0xf] %v1361_v24  ;;  %1364 = vst [vmem:[%s1760_s30 + $0x74] sm:$0xf] %v1363_v25 }
  0x21   : > { %1366 = vst [vmem:[%s1760_s30 + $0x80] sm:$0xf] %v1365_v26  ;;  %v1367_v27 = vld [vmem:[%s1755_s29 + $0x194] sm:$0xf]  ;;  %v1369_v28 = vld [vmem:[%s1755_s29 + $0x1b8] sm:$0xf] }
  0x22   : > { %v1371_v29 = vld [vmem:[%s1755_s29 + $0x1dc] sm:$0xf]  ;;  %1368 = vst [vmem:[%s1760_s30 + $0x8c] sm:$0xf] %v1367_v27  ;;  %1370 = vst [vmem:[%s1760_s30 + $0x98] sm:$0xf] %v1369_v28 }
  0x23   : > { %1372 = vst [vmem:[%s1760_s30 + $0xa4] sm:$0xf] %v1371_v29  ;;  %v1373_v30 = vld [vmem:[%s1755_s29 + $0x200] sm:$0xf]  ;;  %v1375_v31 = vld [vmem:[%s1755_s29 + $0x224] sm:$0xf] }
  0x24   : > { %1374 = vst [vmem:[%s1760_s30 + $0xb0] sm:$0xf] %v1373_v30  ;;  %1376 = vst [vmem:[%s1760_s30 + $0xbc] sm:$0xf] %v1375_v31 }
  0x25 PF: > { %p1377_p6 = scmp.ge.s32.totalorder %s1684_s19, 1  ;;  %p318_p7 = scmp.lt.s32.totalorder %s1684_s19, 4 }
  0x27   : > { %p319_p8 = pnand %p1377_p6, %p318_p7 }
  0x28   : > { %s325_s5 = sand.u32 (!%p319_p8), 1, %s1668_s15   ;;  %s374_s6 = smul.u32 (!%p319_p8), 48, %s1676_s17 }
  0x29   : > { %322 = sbr.rel (%p319_p8) target bundleno = 395 (0x18b), region = 58  ;;  %p1379_p10 = scmp.ne.s32.totalorder (!%p319_p8), %s1676_s17, 0 }
  0x2a   : > { %s1548_s7 = smul.u32 (!%p319_p8), 192, %s325_s5  ;;  %p375_p9 = scmp.lt.s32.totalorder (!%p319_p8), %s374_s6, 143 }
  0x2c   : > { %s1832_s12 = scalar_lea.vmem (!%p319_p8), [#allocation3], %s1548_s7 }
  0x30   : > { %s2030_s6 = smov (!%p375_p9, %s374_s6), 143  ;;  %408 = sbr.rel (%p1379_p10) target bundleno = 58 (0x3a), region = 66 }
  0x31   : > { %s1378_s8 = sshll.u32 %s2030_s6, 2  ;;  %v1686_v32 = vmov (!%p1379_p10), 0.0  }
  0x32   : > { %s1830_s11 = scalar_lea.vmem %s2019_s1, %s1378_s8  ;;  %409 = vst [vmem:[#allocation2] sm:$0xff] (!%p1379_p10), %v1686_v32  ;;  %410 = vst [vmem:[#allocation2 + $0x8] sm:$0xff] (!%p1379_p10), %v1686_v32 }
  0x33   : > { %411 = vst [vmem:[#allocation2 + $0x10] sm:$0xff] (!%p1379_p10), %v1686_v32  ;;  %412 = vst [vmem:[#allocation2 + $0x18] sm:$0xff] (!%p1379_p10), %v1686_v32 }
  0x34   : > { %413 = vst [vmem:[#allocation2 + $0x20] sm:$0xff] (!%p1379_p10), %v1686_v32  ;;  %414 = vst [vmem:[#allocation2 + $0x28] sm:$0xff] (!%p1379_p10), %v1686_v32 }
  0x35   : > { %415 = vst [vmem:[#allocation2 + $0x30] sm:$0xff] (!%p1379_p10), %v1686_v32  ;;  %416 = vst [vmem:[#allocation2 + $0x38] sm:$0xff] (!%p1379_p10), %v1686_v32 }
  0x36   : > { %417 = vst [vmem:[#allocation2 + $0x40] sm:$0xff] (!%p1379_p10), %v1686_v32  ;;  %418 = vst [vmem:[#allocation2 + $0x48] sm:$0xff] (!%p1379_p10), %v1686_v32 }
  0x37   : > { %419 = vst [vmem:[#allocation2 + $0x50] sm:$0xff] %v1686_v32  ;;  %420 = vst [vmem:[#allocation2 + $0x58] sm:$0xff] %v1686_v32 }
  0x38   : > { %421 = vst [vmem:[#allocation2 + $0x60] sm:$0xff] %v1686_v32  ;;  %422 = vst [vmem:[#allocation2 + $0x68] sm:$0xff] %v1686_v32 }
  0x39   : > { %423 = vst [vmem:[#allocation2 + $0x70] sm:$0xff] %v1686_v32  ;;  %424 = vst [vmem:[#allocation2 + $0x78] sm:$0xff] %v1686_v32 }
  0x3a PF: > { %v1590_v33 = vld [vmem:[%s1830_s11 + $0x40] sm:$0xff]   ;;  %v1593_v36 = vld [vmem:[%s1830_s11 + $0x48] sm:$0xff]   ;;  %v1596_v39 = vld [vmem:[%s1830_s11 + $0x50] sm:$0xff]   ;;  %p1428_p11 = scmp.ne.s32.totalorder %s1676_s17, 2 }
  0x3b   : > { %v1591_v34 = vld [vmem:[%s1830_s11] sm:$0xff]   ;;  %1435 = vmatprep.subr.bf16.mxu0 %v1590_v33  ;;  %v1594_v37 = vld [vmem:[%s1830_s11 + $0x8] sm:$0xff]   ;;  %v1597_v40 = vld [vmem:[%s1830_s11 + $0x10] sm:$0xff]  }
  0x3c   : > { %v1592_v35 = vld [vmem:[%s1830_s11 + $0x80] sm:$0xff]   ;;  %1436 = vmatpush3.bf16.msra.mxu0 %v1591_v34  ;;  %v1595_v38 = vld [vmem:[%s1830_s11 + $0x88] sm:$0xff]   ;;  %v1598_v41 = vld [vmem:[%s1830_s11 + $0x90] sm:$0xff]  }
  0x3d   : > { %1515 = vmatprep.subr.bf16.mxu1 %v1592_v35  ;;  %1437 = vmatprep.subr.bf16.mxu0 %v1593_v36  ;;  %v1599_v42 = vld [vmem:[%s1830_s11 + $0x58] sm:$0xff]   ;;  %v1602_v45 = vld [vmem:[%s1830_s11 + $0x60] sm:$0xff]   ;;  %v1605_v48 = vld [vmem:[%s1830_s11 + $0x68] sm:$0xff]  }
  0x3e   : > { %1516 = vmatpush3.bf16.msra.mxu1 %v1592_v35  ;;  %v1600_v43 = vld [vmem:[%s1830_s11 + $0x18] sm:$0xff]   ;;  %v1604_v46 = vld [vmem:[%s1830_s11 + $0xa0] sm:$0xff]   ;;  %v1607_v49 = vld [vmem:[%s1830_s11 + $0xa8] sm:$0xff]  }
  0x3f   : > { %1517 = vmatprep.subr.bf16.mxu1 %v1595_v38  ;;  %v1601_v44 = vld [vmem:[%s1830_s11 + $0x98] sm:$0xff]   ;;  %v1603_v47 = vld [vmem:[%s1830_s11 + $0x20] sm:$0xff]   ;;  %v1606_v50 = vld [vmem:[%s1830_s11 + $0x28] sm:$0xff]  }
  0x40   : > { %1438 = vmatpush3.bf16.msra.mxu0 %v1594_v37  ;;  %v1608_v51 = vld [vmem:[%s1830_s11 + $0x70] sm:$0xff]   ;;  %v1611_v54 = vld [vmem:[%s1830_s11 + $0x78] sm:$0xff]   ;;  %v1625_v62 = vld [vmem:[%s1832_s12 + $0x38] ss:$12 sps:$4 sm:$0xff]  }
  0x41   : > { %1439 = vmatprep.subr.bf16.mxu0 %v1596_v39  ;;  %v1609_v52 = vld [vmem:[%s1830_s11 + $0x30] sm:$0xff]   ;;  %v1613_v55 = vld [vmem:[%s1830_s11 + $0xb8] sm:$0xff]   ;;  %v1621_v63 = vld [vmem:[%s1832_s12 + $0x18] ss:$12 sps:$4 sm:$0xff]  }
  0x42   : > { %1518 = vmatpush3.bf16.msra.mxu1 %v1595_v38  ;;  %v1610_v53 = vld [vmem:[%s1830_s11 + $0xb0] sm:$0xff]   ;;  %v1616_v56 = vld [vmem:[%s1832_s12 + $0x4] ss:$12 sps:$4 sm:$0xff]   ;;  %v1622_v0 = vld [vmem:[%s1832_s12 + $0x34] ss:$12 sps:$4 sm:$0xff]  }
  0x43   : > { %1519 = vmatprep.subr.bf16.mxu1 %v1598_v41  ;;  %v1617_v57 = vld [vmem:[%s1832_s12 + $0x8] ss:$12 sps:$4 sm:$0xff]   ;;  %825 = vmatprep.mubr.bf16.mxu0 %v1616_v56  ;;  %v1614_v59 = vld [vmem:[%s1832_s12] ss:$12 sps:$4 sm:$0xff]   ;;  %v1626_v1 = vld [vmem:[%s1832_s12 + $0x50] ss:$12 sps:$4 sm:$0xff]  }
  0x44   : > { %1440 = vmatpush3.bf16.msra.mxu0 %v1597_v40  ;;  %v1612_v58 = vld [vmem:[%s1830_s11 + $0x38] sm:$0xff]   ;;  %1531 = vmatprep.mubr.bf16.mxu1 %v1617_v57  ;;  %v1619_v60 = vld [vmem:[%s1832_s12 + $0x1c] ss:$12 sps:$4 sm:$0xff]   ;;  %v1618_v61 = vld [vmem:[%s1832_s12 + $0x20] ss:$12 sps:$4 sm:$0xff]  }
  0x45   : > { %1441 = vmatprep.subr.bf16.mxu0 %v1599_v42  ;;  %v1633_v2 = vld [vmem:[%s1832_s12 + $0x68] ss:$12 sps:$4 sm:$0xff]   ;;  %v1624_v3 = vld [vmem:[%s1832_s12 + $0x30] ss:$12 sps:$4 sm:$0xff]   ;;  %v1627_v4 = vld [vmem:[%s1832_s12 + $0x4c] ss:$12 sps:$4 sm:$0xff]  }
  0x46   : > { %1520 = vmatpush3.bf16.msra.mxu1 %v1598_v41  ;;  %v1634_v5 = vld [vmem:[%s1832_s12 + $0x80] ss:$12 sps:$4 sm:$0xff]   ;;  %v1641_v6 = vld [vmem:[%s1832_s12 + $0x98] ss:$12 sps:$4 sm:$0xff]   ;;  %v1629_v7 = vld [vmem:[%s1832_s12 + $0x48] ss:$12 sps:$4 sm:$0xff]  }
  0x47   : > { %1521 = vmatprep.subr.bf16.mxu1 %v1601_v44  ;;  %v1630_v8 = vld [vmem:[%s1832_s12 + $0x64] ss:$12 sps:$4 sm:$0xff]   ;;  %v1632_v10 = vld [vmem:[%s1832_s12 + $0x60] ss:$12 sps:$4 sm:$0xff]   ;;  %v1635_v11 = vld [vmem:[%s1832_s12 + $0x7c] ss:$12 sps:$4 sm:$0xff]  }
  0x48   : > { %1442 = vmatpush3.bf16.msra.mxu0 %v1600_v43  ;;  %v1642_v9 = vld [vmem:[%s1832_s12 + $0xb0] ss:$12 sps:$4 sm:$0xff]   ;;  %v1637_v12 = vld [vmem:[%s1832_s12 + $0x78] ss:$12 sps:$4 sm:$0xff]   ;;  %v1638_v13 = vld [vmem:[%s1832_s12 + $0x94] ss:$12 sps:$4 sm:$0xff]  }
  0x49   : > { %1443 = vmatprep.subr.bf16.mxu0 %v1602_v45  ;;  %v1640_v14 = vld [vmem:[%s1832_s12 + $0x90] ss:$12 sps:$4 sm:$0xff]   ;;  %v1643_v15 = vld [vmem:[%s1832_s12 + $0xac] ss:$12 sps:$4 sm:$0xff]   ;;  %v1645_v16 = vld [vmem:[%s1832_s12 + $0xa8] ss:$12 sps:$4 sm:$0xff]  }
  0x4a   : > { %1522 = vmatpush3.bf16.msra.mxu1 %v1601_v44  ;;  %v425_v23 = vld [vmem:[#allocation2] sm:$0xff]  ;;  %v426_v28 = vld [vmem:[#allocation2 + $0x8] sm:$0xff]  ;;  %v427_v38 = vld [vmem:[#allocation2 + $0x10] sm:$0xff] }
  0x4b   : > { %1523 = vmatprep.subr.bf16.mxu1 %v1604_v46  ;;  %v428_v44 = vld [vmem:[#allocation2 + $0x18] sm:$0xff] }
  0x4c   : > { %1444 = vmatpush3.bf16.msra.mxu0 %v1603_v47 }
  0x4d   : > { %1445 = vmatprep.subr.bf16.mxu0 %v1605_v48 }
  0x4e   : > { %1524 = vmatpush3.bf16.msra.mxu1 %v1604_v46 }
  0x4f   : > { %1525 = vmatprep.subr.bf16.mxu1 %v1607_v49 }
  0x50   : > { %1446 = vmatpush3.bf16.msra.mxu0 %v1606_v50 }
  0x51   : > { %1447 = vmatprep.subr.bf16.mxu0 %v1608_v51 }
  0x52   : > { %1526 = vmatpush3.bf16.msra.mxu1 %v1607_v49 }
  0x53   : > { %1527 = vmatprep.subr.bf16.mxu1 %v1610_v53 }
  0x54   : > { %1448 = vmatpush3.bf16.msra.mxu0 %v1609_v52 }
  0x55   : > { %1449 = vmatprep.subr.bf16.mxu0 %v1611_v54 }
  0x56   : > { %1528 = vmatpush3.bf16.msra.mxu1 %v1610_v53 }
  0x57   : > { %1529 = vmatprep.subr.bf16.mxu1 %v1613_v55 }
  0x58   : > { %1450 = vmatpush3.bf16.msra.mxu0 %v1612_v58 }
  0x5a   : > { %1530 = vmatpush3.bf16.msra.mxu1 %v1613_v55  ;;  %v429_v55 = vld [vmem:[#allocation2 + $0x20] sm:$0xff] }
  0x5b   : > { %826 = vmatmul.mubr.bf16.vlgmr.msra.gmra.mrb[0].mxu0 %v1614_v59 }
  0x5c   : > { %833 = vmatprep.mubr.bf16.mxu0 %v1619_v60  ;;  %v430_v60 = vld [vmem:[#allocation2 + $0x28] sm:$0xff] }
  0x5d   : > { %1532 = vmatmul.mubr.bf16.vlgmr.msra.gmra.mrb[0].mxu1 %v1618_v61 }
  0x5e   : > { %1535 = vmatprep.mubr.bf16.mxu1 %v1625_v62 }
  0x63   : > { %834 = vmatmul.mubr.bf16.gmra.mrb[4].mxu0 %v1621_v63 }
  0x64   : > { %841 = vmatprep.mubr.bf16.mxu0 %v1622_v0 }
  0x65   : > { %1536 = vmatmul.mubr.bf16.gmra.mrb[4].mxu1 %v1626_v1 }
  0x66   : > { %1539 = vmatprep.mubr.bf16.mxu1 %v1633_v2 }
  0x6b   : > { %842 = vmatmul.mubr.bf16.gmra.mrb[8].mxu0 %v1624_v3 }
  0x6c   : > { %849 = vmatprep.mubr.bf16.mxu0 %v1627_v4 }
  0x6d   : > { %1540 = vmatmul.mubr.bf16.gmra.mrb[8].mxu1 %v1634_v5 }
  0x6e   : > { %1543 = vmatprep.mubr.bf16.mxu1 %v1641_v6  ;;  %v431_v6 = vld [vmem:[#allocation2 + $0x30] sm:$0xff] }
  0x73   : > { %850 = vmatmul.mubr.bf16.gmra.mrb[12].mxu0 %v1629_v7 }
  0x74   : > { %857 = vmatprep.mubr.bf16.mxu0 %v1630_v8 }
  0x75   : > { %1544 = vmatmul.mubr.bf16.gmra.mrb[12].mxu1 %v1642_v9 }
  0x7b   : > { %858 = vmatmul.mubr.bf16.gmra.mrb[16].mxu0 %v1632_v10 }
  0x7c   : > { %865 = vmatprep.mubr.bf16.mxu0 %v1635_v11 }
  0x83   : > { %866 = vmatmul.mubr.bf16.gmra.mrb[20].mxu0 %v1637_v12  ;;  %v432_v12 = vld [vmem:[#allocation2 + $0x38] sm:$0xff] }
  0x84   : > { %873 = vmatprep.mubr.bf16.mxu0 %v1638_v13 }
  0x8b   : > { %874 = vmatmul.mubr.bf16.gmra.mrb[24].mxu0 %v1640_v14 }
  0x8c   : > { %881 = vmatprep.mubr.bf16.mxu0 %v1643_v15 }
  0x93   : > { %882 = vmatmul.mubr.bf16.gmra.mrb[28].mxu0 %v1645_v16 }
 0x12e   : > { %v1451_v17 = vpop.f32.mrb[0].mxu0 }
 0x12f   : > { %v1452_v18 = vpop.f32.mrb[1].mxu0 }
 0x130   : > { %v1453_v19 = vadd.f32 %v1452_v18, %v1451_v17  ;;  %v1454_v20 = vpop.f32.mrb[2].mxu0  ;;  %v1533_v21 = vpop.f32.mrb[0].mxu1 }
 0x131   : > { %v1455_v22 = vpop.f32.mrb[3].mxu0  ;;  %v924_v24 = vpop.f32.mrb[1].mxu1 }
 0x132   : > { %v1456_v25 = vadd.f32 %v1455_v22, %v1454_v20  ;;  %v925_v26 = vadd.f32 %v1453_v19, %v924_v24  ;;  %v1534_v27 = vpop.f32.mrb[2].mxu1  ;;  %v433_v22 = vld [vmem:[#allocation2 + $0x40] sm:$0xff] }
 0x133   : > { %v927_v29 = vpop.f32.mrb[3].mxu1 }
 0x134   : > { %v987_v30 = vadd.f32 %v925_v26, %v425_v23  ;;  %v928_v31 = vadd.f32 %v1456_v25, %v927_v29  ;;  %v434_v25 = vld [vmem:[#allocation2 + $0x48] sm:$0xff] }
 0x136   : > { %1003 = vst [vmem:[#allocation2] sm:$0xff] %v987_v30  ;;  %v988_v32 = vadd.f32 %v928_v31, %v426_v28  ;;  %v1457_v33 = vpop.f32.mrb[4].mxu0 }
 0x137   : > { %v1458_v34 = vpop.f32.mrb[5].mxu0 }
 0x138   : > { %1004 = vst [vmem:[#allocation2 + $0x8] sm:$0xff] %v988_v32  ;;  %v1459_v35 = vadd.f32 %v1458_v34, %v1457_v33  ;;  %v1460_v36 = vpop.f32.mrb[6].mxu0  ;;  %v1537_v37 = vpop.f32.mrb[4].mxu1  ;;  %v435_v33 = vld [vmem:[#allocation2 + $0x50] sm:$0xff] }
 0x139   : > { %v1461_v39 = vpop.f32.mrb[7].mxu0  ;;  %v940_v40 = vpop.f32.mrb[5].mxu1 }
 0x13a   : > { %v933_v41 = vadd.f32 %v1533_v21, %v1459_v35  ;;  %v1462_v42 = vadd.f32 %v1461_v39, %v1460_v36  ;;  %v1538_v43 = vpop.f32.mrb[6].mxu1 }
 0x13b   : > { %v943_v45 = vpop.f32.mrb[7].mxu1 }
 0x13c   : > { %v989_v46 = vadd.f32 %v933_v41, %v427_v38  ;;  %v936_v47 = vadd.f32 %v1534_v27, %v1462_v42 }
 0x13e   : > { %1005 = vst [vmem:[#allocation2 + $0x10] sm:$0xff] %v989_v46  ;;  %v990_v48 = vadd.f32 %v936_v47, %v428_v44  ;;  %v1463_v49 = vpop.f32.mrb[8].mxu0  ;;  %v437_v46 = vld [vmem:[#allocation2 + $0x60] sm:$0xff] }
 0x13f   : > { %v1464_v50 = vpop.f32.mrb[9].mxu0 }
 0x140   : > { %1006 = vst [vmem:[#allocation2 + $0x18] sm:$0xff] %v990_v48  ;;  %v1465_v51 = vadd.f32 %v1464_v50, %v1463_v49  ;;  %v1466_v52 = vpop.f32.mrb[10].mxu0  ;;  %v1541_v53 = vpop.f32.mrb[8].mxu1  ;;  %v438_v49 = vld [vmem:[#allocation2 + $0x68] sm:$0xff] }
 0x141   : > { %v1467_v54 = vpop.f32.mrb[11].mxu0  ;;  %v956_v56 = vpop.f32.mrb[9].mxu1 }
 0x142   : > { %v1468_v57 = vadd.f32 %v1467_v54, %v1466_v52  ;;  %v941_v58 = vadd.f32 %v1465_v51, %v940_v40  ;;  %v1542_v59 = vpop.f32.mrb[10].mxu1 }
 0x143   : > { %v959_v61 = vpop.f32.mrb[11].mxu1 }
 0x144   : > { %v991_v62 = vadd.f32 %v941_v58, %v429_v55  ;;  %v944_v63 = vadd.f32 %v1468_v57, %v943_v45  ;;  %v439_v57 = vld [vmem:[#allocation2 + $0x70] sm:$0xff] }
 0x146   : > { %1007 = vst [vmem:[#allocation2 + $0x20] sm:$0xff] %v991_v62  ;;  %v992_v0 = vadd.f32 %v944_v63, %v430_v60  ;;  %v1469_v1 = vpop.f32.mrb[12].mxu0 }
 0x147   : > { %v1470_v2 = vpop.f32.mrb[13].mxu0 }
 0x148   : > { %1008 = vst [vmem:[#allocation2 + $0x28] sm:$0xff] %v992_v0  ;;  %v1471_v3 = vadd.f32 %v1470_v2, %v1469_v1  ;;  %v1472_v4 = vpop.f32.mrb[14].mxu0  ;;  %v1545_v5 = vpop.f32.mrb[12].mxu1  ;;  %v1023_v1 = vld [vmem:[#allocation2] sm:$0xff] (!%p1428_p11)  ;;  %v1887_v2 = vld [vmem:[%s2020_s2] ss:$0 sm:$0xff] (!%p1428_p11) }
 0x149   : > { %v1473_v7 = vpop.f32.mrb[15].mxu0  ;;  %v972_v8 = vpop.f32.mrb[13].mxu1 }
 0x14a   : > { %v949_v9 = vadd.f32 %v1537_v37, %v1471_v3  ;;  %v1474_v10 = vadd.f32 %v1473_v7, %v1472_v4  ;;  %v1546_v11 = vpop.f32.mrb[14].mxu1  ;;  %v436_v37 = vld [vmem:[#allocation2 + $0x58] sm:$0xff]  ;;  %v1039_v3 = vmul.f32 (!%p1428_p11), 0.083333336, %v1023_v1  ;;  %v1024_v4 = vld [vmem:[#allocation2 + $0x8] sm:$0xff] (!%p1428_p11) }
 0x14b   : > { %v975_v13 = vpop.f32.mrb[15].mxu1 }
 0x14c   : > { %v993_v14 = vadd.f32 %v949_v9, %v431_v6  ;;  %v952_v15 = vadd.f32 %v1538_v43, %v1474_v10  ;;  %v1025_v6 = vld [vmem:[#allocation2 + $0x10] sm:$0xff] (!%p1428_p11)  ;;  %v1062_v9 = vadd.f32 (!%p1428_p11), %v1887_v2, %v1039_v3 }
 0x14d   : > { %v1041_v7 = vmul.f32 (!%p1428_p11), 0.083333336, %v1025_v6 }
 0x14e   : > { %1009 = vst [vmem:[#allocation2 + $0x30] sm:$0xff] %v993_v14  ;;  %v994_v16 = vadd.f32 %v952_v15, %v432_v12  ;;  %v1475_v17 = vpop.f32.mrb[16].mxu0  ;;  %vm1078_vm0 = vcmp.ge.f32.partialorder (!%p1428_p11), %v1062_v9, 0.0 }
 0x14f   : > { %v1476_v18 = vpop.f32.mrb[17].mxu0  ;;  %v1028_v15 = vld [vmem:[#allocation2 + $0x28] sm:$0xff] (!%p1428_p11) }
 0x150   : > { %1010 = vst [vmem:[#allocation2 + $0x38] sm:$0xff] %v994_v16  ;;  %v1477_v19 = vadd.f32 %v1476_v18, %v1475_v17  ;;  %v1478_v20 = vpop.f32.mrb[18].mxu0  ;;  %v1094_v16 = vmul.f32 (!%p1428_p11), 0.2, %v1062_v9  ;;  %v1044_v18 = vmul.f32 (!%p1428_p11), 0.083333336, %v1028_v15 }
 0x151   : > { %v1479_v21 = vpop.f32.mrb[19].mxu0 }
 0x152   : > { %v1480_v23 = vadd.f32 %v1479_v21, %v1478_v20  ;;  %v957_v24 = vadd.f32 %v1477_v19, %v956_v56  ;;  %v1110_v21 = vsel (!%p1428_p11), %vm1078_vm0, %v1062_v9, %v1094_v16 }
 0x154   : > { %v995_v26 = vadd.f32 %v957_v24, %v433_v22  ;;  %v960_v27 = vadd.f32 %v1480_v23, %v959_v61  ;;  %v440_v61 = vld [vmem:[#allocation2 + $0x78] sm:$0xff]  ;;  %v1143_v23 = vld [vmem:[%s2021_s3 + $0x8] sm:$0xff] (!%p1428_p11) }
 0x155   : > { %v1142_v22 = vld [vmem:[%s2021_s3] sm:$0xff] (!%p1428_p11) }
 0x156   : > { %1011 = vst [vmem:[#allocation2 + $0x40] sm:$0xff] %v995_v26  ;;  %v996_v28 = vadd.f32 %v960_v27, %v434_v25  ;;  %v1481_v29 = vpop.f32.mrb[20].mxu0  ;;  %v1126_v26 = vmul.f32 (!%p1428_p11), 1.4142135, %v1110_v21 }
 0x157   : > { %v1482_v30 = vpop.f32.mrb[21].mxu0 }
 0x158   : > { %1012 = vst [vmem:[#allocation2 + $0x48] sm:$0xff] %v996_v28  ;;  %v1483_v31 = vadd.f32 %v1482_v30, %v1481_v29  ;;  %v1484_v32 = vpop.f32.mrb[22].mxu0  ;;  %v1144_v29 = vld [vmem:[%s2021_s3 + $0x10] sm:$0xff] (!%p1428_p11)  ;;  %v1145_v30 = vld [vmem:[%s2021_s3 + $0x18] sm:$0xff] (!%p1428_p11) }
 0x159   : > { %v1485_v34 = vpop.f32.mrb[23].mxu0 }
 0x15a   : > { %v965_v35 = vadd.f32 %v1541_v53, %v1483_v31  ;;  %v1486_v36 = vadd.f32 %v1485_v34, %v1484_v32  ;;  %v1067_v31 = vadd.f32 (!%p1428_p11), %v1887_v2, %v1044_v18  ;;  %v1029_v32 = vld [vmem:[#allocation2 + $0x30] sm:$0xff] (!%p1428_p11) }
 0x15c   : > { %v997_v38 = vadd.f32 %v965_v35, %v435_v33  ;;  %v968_v39 = vadd.f32 %v1542_v59, %v1486_v36  ;;  %v1030_v36 = vld [vmem:[#allocation2 + $0x38] sm:$0xff] (!%p1428_p11)  ;;  %vm1083_vm5 = vcmp.ge.f32.partialorder (!%p1428_p11), %v1067_v31, 0.0 }
 0x15e   : > { %1013 = vst [vmem:[#allocation2 + $0x50] sm:$0xff] %v997_v38  ;;  %v998_v40 = vadd.f32 %v968_v39, %v436_v37  ;;  %v1487_v41 = vpop.f32.mrb[24].mxu0  ;;  %v1158_v37 = vadd.f32 (!%p1428_p11), %v1142_v22, %v1126_v26  ;;  %v1152_v26 = vld [vmem:[%s2021_s3 + $0x50] sm:$0xff] (!%p1428_p11) }
 0x15f   : > { %v1488_v42 = vpop.f32.mrb[25].mxu0 }
 0x160   : > { %1014 = vst [vmem:[#allocation2 + $0x58] sm:$0xff] %v998_v40  ;;  %v1489_v43 = vadd.f32 %v1488_v42, %v1487_v41  ;;  %v1490_v44 = vpop.f32.mrb[26].mxu0  ;;  %v1146_v40 = vld [vmem:[%s2021_s3 + $0x20] sm:$0xff] (!%p1428_p11) }
 0x161   : > { %v1491_v45 = vpop.f32.mrb[27].mxu0 }
 0x162   : > { %v1492_v47 = vadd.f32 %v1491_v45, %v1490_v44  ;;  %v973_v48 = vadd.f32 %v1489_v43, %v972_v8  ;;  %v1026_v8 = vld [vmem:[#allocation2 + $0x18] sm:$0xff] (!%p1428_p11)  ;;  %v1099_v43 = vmul.f32 (!%p1428_p11), 0.2, %v1067_v31  ;;  %v1147_v44 = vld [vmem:[%s2021_s3 + $0x28] sm:$0xff] (!%p1428_p11)  ;;  %v1045_v45 = vmul.f32 (!%p1428_p11), 0.083333336, %v1029_v32 }
 0x163   : > { %v1042_v10 = vmul.f32 (!%p1428_p11), 0.083333336, %v1026_v8 }
 0x164   : > { %v999_v50 = vadd.f32 %v973_v48, %v437_v46  ;;  %v976_v51 = vadd.f32 %v1492_v47, %v975_v13  ;;  %v1064_v13 = vadd.f32 (!%p1428_p11), %v1887_v2, %v1041_v7  ;;  %v1031_v46 = vld [vmem:[#allocation2 + $0x40] sm:$0xff] (!%p1428_p11)  ;;  %v1174_v47 = vmul.f32 (!%p1428_p11), 0.70710677, %v1158_v37 }
 0x165   : > { %v1065_v17 = vadd.f32 (!%p1428_p11), %v1887_v2, %v1042_v10 }
 0x166   : > { %1015 = vst [vmem:[#allocation2 + $0x60] sm:$0xff] %v999_v50  ;;  %v1000_v52 = vadd.f32 %v976_v51, %v438_v49  ;;  %v1493_v53 = vpop.f32.mrb[28].mxu0  ;;  %vm1080_vm2 = vcmp.ge.f32.partialorder (!%p1428_p11), %v1064_v13, 0.0  ;;  %v1096_v20 = vmul.f32 (!%p1428_p11), 0.2, %v1064_v13  ;;  %v1032_v51 = vld [vmem:[#allocation2 + $0x48] sm:$0xff] (!%p1428_p11)  ;;  %1190 = vst [vmem:[%s2022_s4] sm:$0xff] (!%p1428_p11), %v1174_v47 }
 0x167   : > { %v1494_v54 = vpop.f32.mrb[29].mxu0  ;;  %vm1081_vm3 = vcmp.ge.f32.partialorder (!%p1428_p11), %v1065_v17, 0.0  ;;  %v1097_v24 = vmul.f32 (!%p1428_p11), 0.2, %v1065_v17  ;;  %v1046_v50 = vmul.f32 (!%p1428_p11), 0.083333336, %v1030_v36 }
 0x168   : > { %1016 = vst [vmem:[#allocation2 + $0x68] sm:$0xff] %v1000_v52  ;;  %v1495_v55 = vadd.f32 %v1494_v54, %v1493_v53  ;;  %v1496_v56 = vpop.f32.mrb[30].mxu0  ;;  %v1112_v28 = vsel (!%p1428_p11), %vm1080_vm2, %v1064_v13, %v1096_v20  ;;  %v1033_v52 = vld [vmem:[#allocation2 + $0x50] sm:$0xff] (!%p1428_p11) }
 0x169   : > { %v1497_v58 = vpop.f32.mrb[31].mxu0  ;;  %v1128_v34 = vmul.f32 (!%p1428_p11), 1.4142135, %v1112_v28  ;;  %v1113_v35 = vsel (!%p1428_p11), %vm1081_vm3, %v1065_v17, %v1097_v24  ;;  %v1049_v1 = vmul.f32 (!%p1428_p11), 0.083333336, %v1033_v52  ;;  %v1151_v24 = vld [vmem:[%s2021_s3 + $0x48] sm:$0xff] (!%p1428_p11) }
 0x16a   : > { %v981_v59 = vadd.f32 %v1545_v5, %v1495_v55  ;;  %v1498_v60 = vadd.f32 %v1497_v58, %v1496_v56  ;;  %1022 = sbr.rel (%p1428_p11) target bundleno = 395 (0x18b), region = 70  ;;  %v1040_v5 = vmul.f32 (!%p1428_p11), 0.083333336, %v1024_v4  ;;  %v1129_v38 = vmul.f32 (!%p1428_p11), 1.4142135, %v1113_v35 }
 0x16b   : > { %v1160_v42 = vadd.f32 (!%p1428_p11), %v1144_v29, %v1128_v34  ;;  %v1115_v56 = vsel (!%p1428_p11), %vm1083_vm5, %v1067_v31, %v1099_v43  ;;  %v1072_v13 = vadd.f32 (!%p1428_p11), %v1887_v2, %v1049_v1 }
 0x16c   : > { %v1001_v62 = vadd.f32 %v981_v59, %v439_v57  ;;  %v984_v63 = vadd.f32 %v1546_v11, %v1498_v60  ;;  %v1027_v11 = vld [vmem:[#allocation2 + $0x20] sm:$0xff] (!%p1428_p11)  ;;  %v1063_v12 = vadd.f32 (!%p1428_p11), %v1887_v2, %v1040_v5  ;;  %v1161_v48 = vadd.f32 (!%p1428_p11), %v1145_v30, %v1129_v38 }
 0x16d   : > { %v1043_v14 = vmul.f32 (!%p1428_p11), 0.083333336, %v1027_v11  ;;  %v1176_v54 = vmul.f32 (!%p1428_p11), 0.70710677, %v1160_v42  ;;  %v1131_v58 = vmul.f32 (!%p1428_p11), 1.4142135, %v1115_v56  ;;  %v1068_v59 = vadd.f32 (!%p1428_p11), %v1887_v2, %v1045_v45 }
 0x16e   : > { %1017 = vst [vmem:[#allocation2 + $0x70] sm:$0xff] %v1001_v62  ;;  %v1002_v0 = vadd.f32 %v984_v63, %v440_v61  ;;  %vm1079_vm1 = vcmp.ge.f32.partialorder (!%p1428_p11), %v1063_v12, 0.0  ;;  %v1095_v19 = vmul.f32 (!%p1428_p11), 0.2, %v1063_v12  ;;  %v1177_v57 = vmul.f32 (!%p1428_p11), 0.70710677, %v1161_v48 }
 0x16f   : > { %v1066_v25 = vadd.f32 (!%p1428_p11), %v1887_v2, %v1043_v14  ;;  %v1069_v60 = vadd.f32 (!%p1428_p11), %v1887_v2, %v1046_v50  ;;  %v1034_v61 = vld [vmem:[#allocation2 + $0x58] sm:$0xff] (!%p1428_p11)  ;;  %1192 = vst [vmem:[%s2022_s4 + $0x10] sm:$0xff] (!%p1428_p11), %v1176_v54  ;;  %v1047_v63 = vmul.f32 (!%p1428_p11), 0.083333336, %v1031_v46  ;;  %v1163_v3 = vadd.f32 (!%p1428_p11), %v1147_v44, %v1131_v58  ;;  %v1148_v11 = vld [vmem:[%s2021_s3 + $0x30] sm:$0xff] (!%p1428_p11)  ;;  %v1035_v18 = vld [vmem:[#allocation2 + $0x60] sm:$0xff] (!%p1428_p11) }
 0x170   : > { %1018 = vst [vmem:[#allocation2 + $0x78] sm:$0xff] %v1002_v0  ;;  %v1111_v27 = vsel (!%p1428_p11), %vm1079_vm1, %v1063_v12, %v1095_v19  ;;  %v1048_v0 = vmul.f32 (!%p1428_p11), 0.083333336, %v1032_v51  ;;  %1193 = vst [vmem:[%s2022_s4 + $0x18] sm:$0xff] (!%p1428_p11), %v1177_v57  ;;  %vm1084_vm6 = vcmp.ge.f32.partialorder (!%p1428_p11), %v1068_v59, 0.0  ;;  %v1149_v12 = vld [vmem:[%s2021_s3 + $0x38] sm:$0xff] (!%p1428_p11) }
 0x171   : > { %v1127_v33 = vmul.f32 1.4142135, %v1111_v27  ;;  %vm1082_vm4 = vcmp.ge.f32.partialorder %v1066_v25, 0.0  ;;  %v1098_v39 = vmul.f32 0.2, %v1066_v25  ;;  %vm1085_vm7 = vcmp.ge.f32.partialorder %v1069_v60, 0.0 }
 0x172   : > { %v1100_v4 = vmul.f32 0.2, %v1068_v59  ;;  %v1101_v5 = vmul.f32 0.2, %v1069_v60  ;;  %v1070_v7 = vadd.f32 %v1887_v2, %v1047_v63  ;;  %v1071_v8 = vadd.f32 %v1887_v2, %v1048_v0  ;;  %v1036_v32 = vld [vmem:[#allocation2 + $0x68] sm:$0xff] }
 0x173   : > { %v1159_v41 = vadd.f32 %v1143_v23, %v1127_v33  ;;  %v1114_v49 = vsel %vm1082_vm4, %v1066_v25, %v1098_v39  ;;  %v1179_v9 = vmul.f32 0.70710677, %v1163_v3  ;;  %v1050_v14 = vmul.f32 0.083333336, %v1034_v61  ;;  %v1150_v23 = vld [vmem:[%s2021_s3 + $0x40] sm:$0xff] }
 0x174   : > { %v1130_v55 = vmul.f32 1.4142135, %v1114_v49  ;;  %v1116_v10 = vsel %vm1084_vm6, %v1068_v59, %v1100_v4  ;;  %v1117_v16 = vsel %vm1085_vm7, %v1069_v60, %v1101_v5  ;;  %vm1086_vm8 = vcmp.ge.f32.partialorder %v1070_v7, 0.0  ;;  %v1153_v49 = vld [vmem:[%s2021_s3 + $0x58] sm:$0xff]  ;;  %v1154_v61 = vld [vmem:[%s2021_s3 + $0x60] sm:$0xff]  ;;  %v1156_v5 = vld [vmem:[%s2021_s3 + $0x70] sm:$0xff] }
 0x175   : > { %v1175_v53 = vmul.f32 0.70710677, %v1159_v41  ;;  %v1132_v15 = vmul.f32 1.4142135, %v1116_v10  ;;  %v1102_v17 = vmul.f32 0.2, %v1070_v7  ;;  %v1073_v27 = vadd.f32 %v1887_v2, %v1050_v14 }
 0x176   : > { %v1162_v62 = vadd.f32 %v1146_v40, %v1130_v55  ;;  %1195 = vst [vmem:[%s2022_s4 + $0x28] sm:$0xff] %v1179_v9  ;;  %v1133_v19 = vmul.f32 1.4142135, %v1117_v16  ;;  %vm1087_vm9 = vcmp.ge.f32.partialorder %v1071_v8, 0.0  ;;  %v1103_v20 = vmul.f32 0.2, %v1071_v8 }
 0x177   : > { %1191 = vst [vmem:[%s2022_s4 + $0x8] sm:$0xff] %v1175_v53  ;;  %vm1088_vm10 = vcmp.ge.f32.partialorder %v1072_v13, 0.0  ;;  %v1164_v21 = vadd.f32 %v1148_v11, %v1132_v15  ;;  %v1118_v22 = vsel %vm1086_vm8, %v1070_v7, %v1102_v17  ;;  %v1104_v25 = vmul.f32 0.2, %v1072_v13  ;;  %v1037_v33 = vld [vmem:[#allocation2 + $0x70] sm:$0xff]  ;;  %v1038_v37 = vld [vmem:[#allocation2 + $0x78] sm:$0xff] }
 0x178   : > { %v1178_v6 = vmul.f32 0.70710677, %v1162_v62  ;;  %v1165_v28 = vadd.f32 %v1149_v12, %v1133_v19  ;;  %v1134_v29 = vmul.f32 1.4142135, %v1118_v22  ;;  %v1119_v30 = vsel %vm1087_vm9, %v1071_v8, %v1103_v20  ;;  %v1157_v10 = vld [vmem:[%s2021_s3 + $0x78] sm:$0xff] }
 0x179   : > { %v1051_v31 = vmul.f32 0.083333336, %v1035_v18  ;;  %v1180_v34 = vmul.f32 0.70710677, %v1164_v21  ;;  %v1135_v35 = vmul.f32 1.4142135, %v1119_v30  ;;  %v1120_v36 = vsel %vm1088_vm10, %v1072_v13, %v1104_v25 }
 0x17a   : > { %1194 = vst [vmem:[%s2022_s4 + $0x20] sm:$0xff] %v1178_v6  ;;  %vm1089_vm11 = vcmp.ge.f32.partialorder %v1073_v27, 0.0  ;;  %v1181_v38 = vmul.f32 0.70710677, %v1165_v28  ;;  %v1166_v39 = vadd.f32 %v1150_v23, %v1134_v29  ;;  %v1136_v40 = vmul.f32 1.4142135, %v1120_v36 }
 0x17b   : > { %v1105_v41 = vmul.f32 0.2, %v1073_v27  ;;  %1196 = vst [vmem:[%s2022_s4 + $0x30] sm:$0xff] %v1180_v34  ;;  %v1167_v42 = vadd.f32 %v1151_v24, %v1135_v35  ;;  %v1074_v43 = vadd.f32 %v1887_v2, %v1051_v31  ;;  %v1052_v44 = vmul.f32 0.083333336, %v1036_v32 }
 0x17c   : > { %v1053_v45 = vmul.f32 0.083333336, %v1037_v33  ;;  %1197 = vst [vmem:[%s2022_s4 + $0x38] sm:$0xff] %v1181_v38  ;;  %v1182_v46 = vmul.f32 0.70710677, %v1166_v39  ;;  %v1168_v47 = vadd.f32 %v1152_v26, %v1136_v40 }
 0x17d   : > { %v1121_v48 = vsel %vm1089_vm11, %v1073_v27, %v1105_v41  ;;  %v1054_v50 = vmul.f32 0.083333336, %v1038_v37  ;;  %v1183_v51 = vmul.f32 0.70710677, %v1167_v42  ;;  %vm1090_vm12 = vcmp.ge.f32.partialorder %v1074_v43, 0.0 }
 0x17e   : > { %v1137_v52 = vmul.f32 1.4142135, %v1121_v48  ;;  %v1075_v53 = vadd.f32 %v1887_v2, %v1052_v44  ;;  %1198 = vst [vmem:[%s2022_s4 + $0x40] sm:$0xff] %v1182_v46  ;;  %v1184_v54 = vmul.f32 0.70710677, %v1168_v47  ;;  %v1076_v56 = vadd.f32 %v1887_v2, %v1053_v45 }
 0x17f   : > { %v1106_v55 = vmul.f32 0.2, %v1074_v43  ;;  %v1077_v57 = vadd.f32 %v1887_v2, %v1054_v50  ;;  %1199 = vst [vmem:[%s2022_s4 + $0x48] sm:$0xff] %v1183_v51  ;;  %v1155_v2 = vld [vmem:[%s2021_s3 + $0x68] sm:$0xff] }
 0x180   : > { %v1169_v58 = vadd.f32 %v1153_v49, %v1137_v52  ;;  %vm1091_vm13 = vcmp.ge.f32.partialorder %v1075_v53, 0.0  ;;  %v1107_v59 = vmul.f32 0.2, %v1075_v53  ;;  %1200 = vst [vmem:[%s2022_s4 + $0x50] sm:$0xff] %v1184_v54  ;;  %vm1092_vm14 = vcmp.ge.f32.partialorder %v1076_v56, 0.0 }
 0x181   : > { %v1122_v60 = vsel %vm1090_vm12, %v1074_v43, %v1106_v55  ;;  %v1108_v62 = vmul.f32 0.2, %v1076_v56  ;;  %vm1093_vm15 = vcmp.ge.f32.partialorder %v1077_v57, 0.0  ;;  %v1109_v3 = vmul.f32 0.2, %v1077_v57 }
 0x182   : > { %v1185_v63 = vmul.f32 0.70710677, %v1169_v58  ;;  %v1138_v0 = vmul.f32 1.4142135, %v1122_v60  ;;  %v1123_v1 = vsel %vm1091_vm13, %v1075_v53, %v1107_v59 }
 0x183   : > { %v1139_v4 = vmul.f32 1.4142135, %v1123_v1  ;;  %v1124_v6 = vsel %vm1092_vm14, %v1076_v56, %v1108_v62  ;;  %v1125_v9 = vsel %vm1093_vm15, %v1077_v57, %v1109_v3 }
 0x184   : > { %1201 = vst [vmem:[%s2022_s4 + $0x58] sm:$0xff] %v1185_v63  ;;  %v1170_v7 = vadd.f32 %v1154_v61, %v1138_v0  ;;  %v1140_v8 = vmul.f32 1.4142135, %v1124_v6  ;;  %v1141_v12 = vmul.f32 1.4142135, %v1125_v9 }
 0x185   : > { %v1171_v11 = vadd.f32 %v1155_v2, %v1139_v4 }
 0x186   : > { %v1186_v13 = vmul.f32 0.70710677, %v1170_v7  ;;  %v1172_v14 = vadd.f32 %v1156_v5, %v1140_v8  ;;  %v1173_v16 = vadd.f32 %v1157_v10, %v1141_v12 }
 0x187   : > { %v1187_v15 = vmul.f32 0.70710677, %v1171_v11 }
 0x188   : > { %1202 = vst [vmem:[%s2022_s4 + $0x60] sm:$0xff] %v1186_v13  ;;  %v1188_v17 = vmul.f32 0.70710677, %v1172_v14  ;;  %v1189_v18 = vmul.f32 0.70710677, %v1173_v16 }
 0x189   : > { %1203 = vst [vmem:[%s2022_s4 + $0x68] sm:$0xff] %v1187_v15 }
 0x18a   : > { %1204 = vst [vmem:[%s2022_s4 + $0x70] sm:$0xff] %v1188_v17  ;;  %1205 = vst [vmem:[%s2022_s4 + $0x78] sm:$0xff] %v1189_v18 }
 0x18b PF: > { %s14_s19 = sadd.s32 1, %s1684_s19   ;;  %s2023_s15 = smov %s1672_s16 }
 0x18c   : > { %p11_p12 = scmp.ge.s32.totalorder %s14_s19, 5   ;;  %s2024_s16 = smov %s1747_s23 }
 0x18d   : > { %s2025_s17 = smov %s1680_s18  ;;  %s2026_s18 = smov %s2028_s20 }
 0x18e   :  { %13 = sbr.rel (!%p11_p12) target bundleno = 3 (0x3), region = 120 }

// kernel: _lambda_.15
= control target key start
LH: loop header
LB: loop body
LE: loop exit
PB: predicated region body
PF: predicated region fallthrough
CT: control target
= control target key end

     0   :  { %s1179_s6 = smov 0   ;;  %s1181_s7 = smov 0   ;;  %s1667_s0 = inlined_call_operand.vmem [shape: f32[2,18,18,128], index: 0, kind: input, shape index: {}]   ;;  %s1668_s1 = inlined_call_operand.vmem [shape: f32[2,15,15,128], index: 1, kind: output, shape index: {}]  }
   0x1   :  { %s1183_s8 = smov 0  }
   0x2 LB: > { %s23_s9 = sadd.s32 1, %s1163_s7  ;;  %p1114_p0 = scmp.ge.s32.totalorder %s1167_s8, 1  ;;  %s1167_s8 = sphi %s1183_s8, %s11_s8   ;;  %s1163_s7 = sphi %s1181_s7, %s1670_s7   ;;  %s1159_s6 = sphi %s1179_s6, %s1669_s6  }
   0x3   : > { %p25_p1 = scmp.ge.s32.totalorder %s23_s9, 2  ;;  %p106_p2 = scmp.lt.s32.totalorder %s1167_s8, 3 }
   0x5   : > { %s1672_s9 = smov (%p25_p1, %s23_s9), 0  ;;  %p107_p3 = pnand %p1114_p0, %p106_p2 }
   0x6   : > { %p132_p4 = scmp.lt.s32.totalorder (!%p107_p3), %s1159_s6, 1  ;;  %vm529_vm0 = vcmask (!%p107_p3), 1046528   ;;  %vm665_vm1 = vcmask (!%p107_p3), 1045504   ;;  %vm861_vm2 = vcmask (!%p107_p3), 1044480  }
   0x7   : > { %110 = sbr.rel (%p107_p3) target bundleno = 181 (0xb5), region = 24 }
   0xe   : > { %s1674_s6 = smov (!%p132_p4, %s1159_s6), 1 }
   0xf   : > { %s1119_s10 = smul.u32 432, %s1674_s6 }
  0x10   : > { %s1120_s14 = smul.u32 240, %s1674_s6 }
  0x11   : > { %s1203_s13 = scalar_lea.vmem %s1667_s0, %s1119_s10 }
  0x12   : > { %v148_v0 = vld [vmem:[%s1203_s13] sm:$0xff]  ;;  %v149_v1 = vld [vmem:[%s1203_s13 + $0x8] sm:$0xff]  ;;  %v151_v2 = vld [vmem:[%s1203_s13 + $0x18] sm:$0xff]  ;;  %s1270_s17 = scalar_lea.vmem %s1668_s1, %s1120_s14 }
  0x13   : > { %v152_v3 = vld [vmem:[%s1203_s13 + $0x20] sm:$0xff]  ;;  %v1210_v4 = vld [vmem:[%s1203_s13 + $0x30] sm:$0xff]  ;;  %v1213_v5 = vld [vmem:[%s1203_s13 + $0x38] sm:$0xff]  ;;  %v202_v6 = vmul.f32 0.125, %v148_v0  ;;  %v203_v7 = vmul.f32 0.125, %v149_v1  ;;  %v247_v8 = vmul.f32 0.375, %v151_v2 }
  0x14   : > { %v157_v9 = vld [vmem:[%s1203_s13 + $0x48] sm:$0xff]  ;;  %v158_v10 = vld [vmem:[%s1203_s13 + $0x50] sm:$0xff]  ;;  %v248_v11 = vmul.f32 0.375, %v152_v3  ;;  %v250_v12 = vmul.f32 0.375, %v1210_v4  ;;  %v251_v13 = vmul.f32 0.375, %v1213_v5  ;;  %v1220_v14 = vld [vmem:[%s1203_s13 + $0x60] sm:$0xff] }
  0x15   : > { %v1222_v15 = vmul.f32 0.125, %v157_v9  ;;  %v1224_v16 = vmul.f32 0.125, %v158_v10  ;;  %v292_v17 = vadd.f32 %v247_v8, %v202_v6  ;;  %v150_v18 = vld [vmem:[%s1203_s13 + $0x10] sm:$0x3]  ;;  %v153_v19 = vld [vmem:[%s1203_s13 + $0x28] sm:$0x3] }
  0x16   : > { %v293_v20 = vadd.f32 %v248_v11, %v203_v7  ;;  %v1229_v21 = vld [vmem:[%s1203_s13 + $0x40] sm:$0x3]  ;;  %v159_v22 = vld [vmem:[%s1203_s13 + $0x58] sm:$0x3]  ;;  %v204_v23 = vmul.f32 0.125, %v150_v18  ;;  %v249_v24 = vmul.f32 0.375, %v153_v19 }
  0x17   : > { %v340_v25 = vadd.f32 %v292_v17, %v250_v12  ;;  %v1232_v26 = vmul.f32 0.125, %v159_v22  ;;  %v252_v27 = vmul.f32 0.375, %v1229_v21  ;;  %v1236_v28 = vld [vmem:[%s1203_s13 + $0x68] sm:$0xff]  ;;  %v205_v29 = vmul.f32 0.125, %v151_v2  ;;  %v1242_v34 = vld [vmem:[%s1203_s13 + $0x70] sm:$0x3] }
  0x18   : > { %v341_v30 = vadd.f32 %v293_v20, %v251_v13  ;;  %v294_v31 = vadd.f32 %v249_v24, %v204_v23  ;;  %v206_v32 = vmul.f32 0.125, %v152_v3  ;;  %v1239_v33 = vmul.f32 0.125, %v1220_v14 }
  0x19   : > { %v394_v35 = vadd.f32 %v340_v25, %v1222_v15  ;;  %v1246_v36 = vmul.f32 0.125, %v1236_v28  ;;  %v1248_v37 = vmul.f32 0.375, %v157_v9  ;;  %v1250_v38 = vmul.f32 0.375, %v158_v10 }
  0x1a   : > { %v395_v39 = vadd.f32 %v341_v30, %v1224_v16  ;;  %v342_v40 = vadd.f32 %v294_v31, %v252_v27  ;;  %v295_v41 = vadd.f32 %v250_v12, %v205_v29  ;;  %v296_v42 = vadd.f32 %v251_v13, %v206_v32  ;;  %v163_v31 = vld [vmem:[%s1203_s13 + $0x78] sm:$0xff]  ;;  %v164_v32 = vld [vmem:[%s1203_s13 + $0x80] sm:$0xff] }
  0x1b   : > { %v439_v43 = vmul.f32 0.125, %v394_v35  ;;  %v469_v44 = vmul.f32 0.375, %v394_v35  ;;  %v207_v45 = vmul.f32 0.125, %v153_v19  ;;  %v1254_v46 = vmul.f32 0.125, %v1242_v34 }
  0x1c   : > { %v440_v47 = vmul.f32 0.125, %v395_v39  ;;  %v470_v48 = vmul.f32 0.375, %v395_v39  ;;  %v396_v49 = vadd.f32 %v342_v40, %v1232_v26  ;;  %v343_v50 = vadd.f32 %v295_v41, %v1248_v37 }
  0x1d   : > { %v530_v51 = vrot.slane %v469_v44, 1  ;;  %v666_v52 = vrot.slane %v469_v44, 2  ;;  %v862_v53 = vrot.slane %v439_v43, 3  ;;  %v344_v54 = vadd.f32 %v296_v42, %v1250_v38 }
  0x1e   : > { %v531_v55 = vrot.slane %v470_v48, 1  ;;  %v667_v56 = vrot.slane %v470_v48, 2  ;;  %v863_v57 = vrot.slane %v440_v47, 3  ;;  %v635_v58 = vmul.f32 0.375, %v396_v49 }
  0x1f   : > { %v801_v59 = vmul.f32 0.125, %v396_v49  ;;  %v397_v60 = vadd.f32 %v343_v50, %v1239_v33  ;;  %v398_v61 = vadd.f32 %v344_v54, %v1246_v36  ;;  %v255_v62 = vmul.f32 0.375, %v159_v22 }
  0x20   : > { %v532_v63 = vsel %vm529_vm0, %v530_v51, %v531_v55  ;;  %v668_v0 = vsel %vm665_vm1, %v666_v52, %v667_v56  ;;  %v864_v1 = vsel %vm861_vm2, %v862_v53, %v863_v57  ;;  %v606_v2 = vadd.f32 %v531_v55, %v440_v47  ;;  %v165_v47 = vld [vmem:[%s1203_s13 + $0x88] sm:$0x3]  ;;  %v1290_v55 = vld [vmem:[%s1203_s13 + $0x90] sm:$0xff] }
  0x21   : > { %v605_v3 = vadd.f32 %v532_v63, %v439_v43  ;;  %v669_v6 = vrot.slane %v635_v58, 2  ;;  %v865_v7 = vrot.slane %v801_v59, 3  ;;  %v441_v8 = vmul.f32 0.125, %v397_v60  ;;  %v1298_v59 = vld [vmem:[%s1203_s13 + $0x98] sm:$0xff] }
  0x22   : > { %v442_v9 = vmul.f32 0.125, %v398_v61  ;;  %v471_v10 = vmul.f32 0.375, %v397_v60  ;;  %v472_v11 = vmul.f32 0.375, %v398_v61  ;;  %v297_v12 = vadd.f32 %v252_v27, %v207_v45 }
  0x23   : > { %v771_v13 = vadd.f32 %v668_v0, %v605_v3  ;;  %v670_v17 = vsel %vm665_vm1, %v667_v56, %v669_v6  ;;  %v866_v18 = vsel %vm861_vm2, %v863_v57, %v865_v7  ;;  %v867_v19 = vrot.slane %v441_v8, 3 }
  0x24   : > { %v772_v20 = vadd.f32 %v670_v17, %v606_v2  ;;  %v533_v22 = vrot.slane %v471_v10, 1  ;;  %v534_v23 = vrot.slane %v472_v11, 1  ;;  %v671_v24 = vrot.slane %v471_v10, 2 }
  0x25   : > { %v967_v25 = vadd.f32 %v864_v1, %v771_v13  ;;  %v672_v27 = vrot.slane %v472_v11, 2  ;;  %v868_v29 = vrot.slane %v442_v9, 3  ;;  %v345_v30 = vadd.f32 %v297_v12, %v255_v62 }
  0x26   : > { %v968_v35 = vadd.f32 %v866_v18, %v772_v20  ;;  %v535_v39 = vsel %vm529_vm0, %v533_v22, %v534_v23  ;;  %v608_v40 = vadd.f32 %v534_v23, %v442_v9  ;;  %v208_v41 = vmul.f32 0.125, %v1210_v4 }
  0x27   : > { %997 = vst [vmem:[%s1270_s17] sm:$0xff] %v967_v25  ;;  %v607_v42 = vadd.f32 %v535_v39, %v441_v8  ;;  %v673_v43 = vsel %vm665_vm1, %v671_v24, %v672_v27  ;;  %v869_v44 = vsel %vm861_vm2, %v867_v19, %v868_v29  ;;  %v399_v45 = vadd.f32 %v345_v30, %v1254_v46 }
  0x28   : > { %998 = vst [vmem:[%s1270_s17 + $0x8] sm:$0x7f] %v968_v35  ;;  %v209_v48 = vmul.f32 0.125, %v1213_v5  ;;  %v1283_v49 = vmul.f32 0.125, %v163_v31  ;;  %v1285_v50 = vmul.f32 0.125, %v164_v32  ;;  %v256_v4 = vmul.f32 0.375, %v1220_v14 }
  0x29   : > { %v773_v51 = vadd.f32 %v673_v43, %v607_v42  ;;  %v636_v52 = vmul.f32 0.375, %v399_v45  ;;  %v802_v53 = vmul.f32 0.125, %v399_v45  ;;  %v257_v54 = vmul.f32 0.375, %v1236_v28 }
  0x2a   : > { %v298_v56 = vadd.f32 %v1248_v37, %v208_v41  ;;  %v299_v57 = vadd.f32 %v1250_v38, %v209_v48  ;;  %v210_v5 = vmul.f32 0.125, %v1229_v21  ;;  %v1295_v58 = vmul.f32 0.125, %v165_v47  ;;  %v1305_v37 = vld [vmem:[%s1203_s13 + $0xa0] sm:$0x3] }
  0x2b   : > { %v969_v14 = vadd.f32 %v869_v44, %v773_v51  ;;  %v674_v60 = vrot.slane %v636_v52, 2  ;;  %v870_v61 = vrot.slane %v802_v53, 3  ;;  %v258_v63 = vmul.f32 0.375, %v1242_v34 }
  0x2c   : > { %v346_v0 = vadd.f32 %v298_v56, %v256_v4  ;;  %v347_v28 = vadd.f32 %v299_v57, %v257_v54  ;;  %v300_v1 = vadd.f32 %v255_v62, %v210_v5  ;;  %v1302_v2 = vmul.f32 0.125, %v1290_v55 }
  0x2d   : > { %999 = vst [vmem:[%s1270_s17 + $0x10] sm:$0xff] %v969_v14  ;;  %v675_v21 = vsel %vm665_vm1, %v672_v27, %v674_v60  ;;  %v871_v38 = vsel %vm861_vm2, %v868_v29, %v870_v61  ;;  %v1311_v3 = vmul.f32 0.125, %v1298_v59  ;;  %v1313_v6 = vmul.f32 0.375, %v163_v31  ;;  %v169_v61 = vld [vmem:[%s1203_s13 + $0xa8] sm:$0xff] }
  0x2e   : > { %v774_v7 = vadd.f32 %v675_v21, %v608_v40  ;;  %v400_v34 = vadd.f32 %v346_v0, %v1283_v49  ;;  %v401_v62 = vadd.f32 %v347_v28, %v1285_v50  ;;  %v348_v8 = vadd.f32 %v300_v1, %v258_v63 }
  0x2f   : > { %v1317_v9 = vmul.f32 0.375, %v164_v32  ;;  %v301_v10 = vadd.f32 %v256_v4, %v1222_v15  ;;  %v302_v11 = vadd.f32 %v257_v54, %v1224_v16  ;;  %v1322_v12 = vmul.f32 0.125, %v1305_v37 }
  0x30   : > { %v970_v13 = vadd.f32 %v871_v38, %v774_v7  ;;  %v443_v17 = vmul.f32 0.125, %v400_v34  ;;  %v444_v18 = vmul.f32 0.125, %v401_v62  ;;  %v473_v19 = vmul.f32 0.375, %v400_v34  ;;  %v170_v38 = vld [vmem:[%s1203_s13 + $0xb0] sm:$0xff] }
  0x31   : > { %v474_v20 = vmul.f32 0.375, %v401_v62  ;;  %v402_v22 = vadd.f32 %v348_v8, %v1295_v58  ;;  %v349_v23 = vadd.f32 %v301_v10, %v1313_v6  ;;  %v350_v24 = vadd.f32 %v302_v11, %v1317_v9 }
  0x32   : > { %1000 = vst [vmem:[%s1270_s17 + $0x18] sm:$0x7f] %v970_v13  ;;  %v536_v25 = vrot.slane %v473_v19, 1  ;;  %v676_v27 = vrot.slane %v473_v19, 2  ;;  %v872_v15 = vrot.slane %v443_v17, 3  ;;  %v873_v29 = vrot.slane %v444_v18, 3 }
  0x33   : > { %v537_v16 = vrot.slane %v474_v20, 1  ;;  %v677_v30 = vrot.slane %v474_v20, 2  ;;  %v637_v31 = vmul.f32 0.375, %v402_v22  ;;  %v803_v32 = vmul.f32 0.125, %v402_v22  ;;  %v1343_v13 = vld [vmem:[%s1203_s13 + $0xb8] sm:$0x3] }
  0x34   : > { %v874_v35 = vsel %vm861_vm2, %v872_v15, %v873_v29  ;;  %v403_v39 = vadd.f32 %v349_v23, %v1302_v2  ;;  %v404_v40 = vadd.f32 %v350_v24, %v1311_v3  ;;  %v261_v41 = vmul.f32 0.375, %v165_v47 }
  0x35   : > { %v538_v42 = vsel %vm529_vm0, %v536_v25, %v537_v16  ;;  %v678_v43 = vsel %vm665_vm1, %v676_v27, %v677_v30  ;;  %v610_v44 = vadd.f32 %v537_v16, %v444_v18  ;;  %v679_v45 = vrot.slane %v637_v31, 2  ;;  %v1358_v27 = vld [vmem:[%s1203_s13 + $0xc0] sm:$0xff]  ;;  %v1364_v31 = vld [vmem:[%s1203_s13 + $0xc8] sm:$0xff] }
  0x36   : > { %v609_v48 = vadd.f32 %v538_v42, %v443_v17  ;;  %v875_v4 = vrot.slane %v803_v32, 3  ;;  %v445_v51 = vmul.f32 0.125, %v403_v39  ;;  %v446_v52 = vmul.f32 0.125, %v404_v40 }
  0x37   : > { %v680_v53 = vsel %vm665_vm1, %v677_v30, %v679_v45  ;;  %v475_v54 = vmul.f32 0.375, %v403_v39  ;;  %v476_v56 = vmul.f32 0.375, %v404_v40  ;;  %v303_v57 = vadd.f32 %v258_v63, %v1232_v26 }
  0x38   : > { %v775_v5 = vadd.f32 %v678_v43, %v609_v48  ;;  %v776_v47 = vadd.f32 %v680_v53, %v610_v44  ;;  %v876_v14 = vsel %vm861_vm2, %v873_v29, %v875_v4  ;;  %v877_v60 = vrot.slane %v445_v51, 3 }
  0x39   : > { %v539_v0 = vrot.slane %v475_v54, 1  ;;  %v540_v28 = vrot.slane %v476_v56, 1  ;;  %v681_v1 = vrot.slane %v475_v54, 2  ;;  %v682_v21 = vrot.slane %v476_v56, 2 }
  0x3a   : > { %v971_v7 = vadd.f32 %v874_v35, %v775_v5  ;;  %v972_v34 = vadd.f32 %v876_v14, %v776_v47  ;;  %v878_v62 = vrot.slane %v446_v52, 3  ;;  %v351_v8 = vadd.f32 %v303_v57, %v261_v41  ;;  %v1387_v57 = vld [vmem:[%s1203_s13 + $0xd0] sm:$0x3] }
  0x3b   : > { %v541_v26 = vsel %vm529_vm0, %v539_v0, %v540_v28  ;;  %v683_v63 = vsel %vm665_vm1, %v681_v1, %v682_v21  ;;  %v612_v10 = vadd.f32 %v540_v28, %v446_v52  ;;  %v1340_v11 = vmul.f32 0.125, %v169_v61 }
  0x3c   : > { %1001 = vst [vmem:[%s1270_s17 + $0x20] sm:$0xff] %v971_v7  ;;  %1002 = vst [vmem:[%s1270_s17 + $0x28] sm:$0x7f] %v972_v34  ;;  %v611_v17 = vadd.f32 %v541_v26, %v445_v51  ;;  %v879_v18 = vsel %vm861_vm2, %v877_v60, %v878_v62  ;;  %v405_v19 = vadd.f32 %v351_v8, %v1322_v12  ;;  %v1349_v20 = vmul.f32 0.125, %v170_v38 }
  0x3d   : > { %v262_v22 = vmul.f32 0.375, %v1290_v55  ;;  %v263_v23 = vmul.f32 0.375, %v1298_v59  ;;  %v304_v24 = vadd.f32 %v1313_v6, %v1239_v33  ;;  %v305_v25 = vadd.f32 %v1317_v9, %v1246_v36 }
  0x3e   : > { %v777_v15 = vadd.f32 %v683_v63, %v611_v17  ;;  %v638_v29 = vmul.f32 0.375, %v405_v19  ;;  %v804_v16 = vmul.f32 0.125, %v405_v19  ;;  %v1361_v30 = vmul.f32 0.125, %v1343_v13 }
  0x3f   : > { %v352_v55 = vadd.f32 %v304_v24, %v262_v22  ;;  %v353_v32 = vadd.f32 %v305_v25, %v263_v23  ;;  %v264_v59 = vmul.f32 0.375, %v1305_v37  ;;  %v306_v33 = vadd.f32 %v261_v41, %v1254_v46  ;;  %v176_v24 = vld [vmem:[%s1203_s13 + $0xe0] sm:$0xff] }
  0x40   : > { %v973_v6 = vadd.f32 %v879_v18, %v777_v15  ;;  %v684_v35 = vrot.slane %v638_v29, 2  ;;  %v880_v36 = vrot.slane %v804_v16, 3  ;;  %v1369_v9 = vmul.f32 0.125, %v1358_v27 }
  0x41   : > { %v406_v39 = vadd.f32 %v352_v55, %v1340_v11  ;;  %v407_v40 = vadd.f32 %v353_v32, %v1349_v20  ;;  %v354_v42 = vadd.f32 %v306_v33, %v264_v59  ;;  %v1374_v43 = vmul.f32 0.125, %v1364_v31 }
  0x42   : > { %1003 = vst [vmem:[%s1270_s17 + $0x30] sm:$0xff] %v973_v6  ;;  %v685_v37 = vsel %vm665_vm1, %v682_v21, %v684_v35  ;;  %v881_v46 = vsel %vm861_vm2, %v878_v62, %v880_v36  ;;  %v1379_v41 = vmul.f32 0.375, %v169_v61  ;;  %v1381_v44 = vmul.f32 0.375, %v170_v38 }
  0x43   : > { %v778_v45 = vadd.f32 %v685_v37, %v612_v10  ;;  %v447_v48 = vmul.f32 0.125, %v406_v39  ;;  %v448_v4 = vmul.f32 0.125, %v407_v40  ;;  %v477_v51 = vmul.f32 0.375, %v406_v39 }
  0x44   : > { %v478_v52 = vmul.f32 0.375, %v407_v40  ;;  %v408_v53 = vadd.f32 %v354_v42, %v1361_v30  ;;  %v307_v54 = vadd.f32 %v262_v22, %v1283_v49  ;;  %v308_v56 = vadd.f32 %v263_v23, %v1285_v50  ;;  %v1396_v50 = vld [vmem:[%s1203_s13 + $0xd8] sm:$0xff] }
  0x45   : > { %v974_v5 = vadd.f32 %v881_v46, %v778_v45  ;;  %v542_v47 = vrot.slane %v477_v51, 1  ;;  %v686_v14 = vrot.slane %v477_v51, 2  ;;  %v882_v60 = vrot.slane %v447_v48, 3  ;;  %v1417_v51 = vld [vmem:[%s1203_s13 + $0xe8] sm:$0x3] }
  0x46   : > { %v543_v61 = vrot.slane %v478_v52, 1  ;;  %v687_v0 = vrot.slane %v478_v52, 2  ;;  %v883_v28 = vrot.slane %v448_v4, 3  ;;  %v639_v1 = vmul.f32 0.375, %v408_v53 }
  0x47   : > { %1004 = vst [vmem:[%s1270_s17 + $0x38] sm:$0x7f] %v974_v5  ;;  %v805_v21 = vmul.f32 0.125, %v408_v53  ;;  %v355_v38 = vadd.f32 %v307_v54, %v1379_v41  ;;  %v356_v49 = vadd.f32 %v308_v56, %v1381_v44  ;;  %v1393_v7 = vmul.f32 0.125, %v1387_v57 }
  0x48   : > { %v544_v34 = vsel %vm529_vm0, %v542_v47, %v543_v61  ;;  %v688_v62 = vsel %vm665_vm1, %v686_v14, %v687_v0  ;;  %v884_v8 = vsel %vm861_vm2, %v882_v60, %v883_v28  ;;  %v614_v26 = vadd.f32 %v543_v61, %v448_v4  ;;  %v1427_v61 = vld [vmem:[%s1203_s13 + $0xf0] sm:$0xff] }
  0x49   : > { %v613_v63 = vadd.f32 %v544_v34, %v447_v48  ;;  %v689_v10 = vrot.slane %v639_v1, 2  ;;  %v885_v17 = vrot.slane %v805_v21, 3  ;;  %v409_v18 = vadd.f32 %v355_v38, %v1369_v9 }
  0x4a   : > { %v410_v19 = vadd.f32 %v356_v49, %v1374_v43  ;;  %v267_v22 = vmul.f32 0.375, %v1343_v13  ;;  %v309_v23 = vadd.f32 %v264_v59, %v1295_v58  ;;  %v1407_v25 = vmul.f32 0.125, %v1396_v50 }
  0x4b   : > { %v779_v15 = vadd.f32 %v688_v62, %v613_v63  ;;  %v690_v29 = vsel %vm665_vm1, %v687_v0, %v689_v10  ;;  %v886_v16 = vsel %vm861_vm2, %v883_v28, %v885_v17  ;;  %v449_v55 = vmul.f32 0.125, %v409_v18 }
  0x4c   : > { %v780_v32 = vadd.f32 %v690_v29, %v614_v26  ;;  %v450_v33 = vmul.f32 0.125, %v410_v19  ;;  %v479_v6 = vmul.f32 0.375, %v409_v18  ;;  %v480_v35 = vmul.f32 0.375, %v410_v19 }
  0x4d   : > { %v975_v13 = vadd.f32 %v884_v8, %v779_v15  ;;  %v887_v36 = vrot.slane %v449_v55, 3  ;;  %v357_v58 = vadd.f32 %v309_v23, %v267_v22  ;;  %v1411_v59 = vmul.f32 0.125, %v176_v24 }
  0x4e   : > { %v976_v39 = vadd.f32 %v886_v16, %v780_v32  ;;  %v545_v40 = vrot.slane %v479_v6, 1  ;;  %v546_v42 = vrot.slane %v480_v35, 1  ;;  %v691_v37 = vrot.slane %v479_v6, 2  ;;  %v1453_v32 = vld [vmem:[%s1203_s13 + $0x100] sm:$0x3] }
  0x4f   : > { %1005 = vst [vmem:[%s1270_s17 + $0x40] sm:$0xff] %v975_v13  ;;  %v692_v46 = vrot.slane %v480_v35, 2  ;;  %v888_v45 = vrot.slane %v450_v33, 3  ;;  %v411_v48 = vadd.f32 %v357_v58, %v1393_v7  ;;  %v268_v4 = vmul.f32 0.375, %v1358_v27 }
  0x50   : > { %1006 = vst [vmem:[%s1270_s17 + $0x48] sm:$0x7f] %v976_v39  ;;  %v547_v52 = vsel %vm529_vm0, %v545_v40, %v546_v42  ;;  %v616_v53 = vadd.f32 %v546_v42, %v450_v33  ;;  %v269_v54 = vmul.f32 0.375, %v1364_v31  ;;  %v310_v56 = vadd.f32 %v1379_v41, %v1302_v2  ;;  %v1435_v31 = vld [vmem:[%s1203_s13 + $0xf8] sm:$0xff] }
  0x51   : > { %v615_v5 = vadd.f32 %v547_v52, %v449_v55  ;;  %v693_v47 = vsel %vm665_vm1, %v691_v37, %v692_v46  ;;  %v889_v14 = vsel %vm861_vm2, %v887_v36, %v888_v45  ;;  %v640_v60 = vmul.f32 0.375, %v411_v48 }
  0x52   : > { %v806_v27 = vmul.f32 0.125, %v411_v48  ;;  %v311_v0 = vadd.f32 %v1381_v44, %v1311_v3  ;;  %v358_v28 = vadd.f32 %v310_v56, %v268_v4  ;;  %v1432_v1 = vmul.f32 0.125, %v1417_v51  ;;  %v1468_v56 = vld [vmem:[%s1203_s13 + $0x110] sm:$0xff] }
  0x53   : > { %v781_v21 = vadd.f32 %v693_v47, %v615_v5  ;;  %v694_v2 = vrot.slane %v640_v60, 2  ;;  %v270_v41 = vmul.f32 0.375, %v1387_v57  ;;  %v312_v38 = vadd.f32 %v267_v22, %v1322_v12 }
  0x54   : > { %v890_v49 = vrot.slane %v806_v27, 3  ;;  %v359_v34 = vadd.f32 %v311_v0, %v269_v54  ;;  %v412_v62 = vadd.f32 %v358_v28, %v1407_v25  ;;  %v1441_v8 = vmul.f32 0.125, %v1427_v61 }
  0x55   : > { %v977_v3 = vadd.f32 %v889_v14, %v781_v21  ;;  %v695_v44 = vsel %vm665_vm1, %v692_v46, %v694_v2  ;;  %v360_v26 = vadd.f32 %v312_v38, %v270_v41  ;;  %v1445_v63 = vmul.f32 0.125, %v1435_v31 }
  0x56   : > { %v782_v10 = vadd.f32 %v695_v44, %v616_v53  ;;  %v891_v57 = vsel %vm861_vm2, %v888_v45, %v890_v49  ;;  %v413_v12 = vadd.f32 %v359_v34, %v1411_v59  ;;  %v451_v17 = vmul.f32 0.125, %v412_v62  ;;  %v1465_v53 = vld [vmem:[%s1203_s13 + $0x108] sm:$0xff] }
  0x57   : > { %1007 = vst [vmem:[%s1270_s17 + $0x50] sm:$0xff] %v977_v3  ;;  %v481_v18 = vmul.f32 0.375, %v412_v62  ;;  %v414_v19 = vadd.f32 %v360_v26, %v1432_v1  ;;  %v271_v22 = vmul.f32 0.375, %v1396_v50  ;;  %v272_v23 = vmul.f32 0.375, %v176_v24 }
  0x58   : > { %v978_v15 = vadd.f32 %v891_v57, %v782_v10  ;;  %v452_v29 = vmul.f32 0.125, %v413_v12  ;;  %v482_v16 = vmul.f32 0.375, %v413_v12  ;;  %v892_v55 = vrot.slane %v451_v17, 3  ;;  %v1492_v57 = vld [vmem:[%s1203_s13 + $0x118] sm:$0x3] }
  0x59   : > { %v548_v33 = vrot.slane %v481_v18, 1  ;;  %v696_v6 = vrot.slane %v481_v18, 2  ;;  %v641_v35 = vmul.f32 0.375, %v414_v19  ;;  %v807_v13 = vmul.f32 0.125, %v414_v19 }
  0x5a   : > { %1008 = vst [vmem:[%s1270_s17 + $0x58] sm:$0x7f] %v978_v15  ;;  %v549_v36 = vrot.slane %v482_v16, 1  ;;  %v697_v58 = vrot.slane %v482_v16, 2  ;;  %v893_v39 = vrot.slane %v452_v29, 3  ;;  %v313_v40 = vadd.f32 %v268_v4, %v1340_v11 }
  0x5b   : > { %v699_v50 = vrot.slane %v641_v35, 2  ;;  %v895_v24 = vrot.slane %v807_v13, 3  ;;  %v314_v42 = vadd.f32 %v269_v54, %v1349_v20  ;;  %v1459_v37 = vmul.f32 0.125, %v1453_v32 }
  0x5c   : > { %v550_v46 = vsel %vm529_vm0, %v548_v33, %v549_v36  ;;  %v698_v45 = vsel %vm665_vm1, %v696_v6, %v697_v58  ;;  %v894_v48 = vsel %vm861_vm2, %v892_v55, %v893_v39  ;;  %v618_v52 = vadd.f32 %v549_v36, %v452_v29 }
  0x5d   : > { %v617_v5 = vadd.f32 %v550_v46, %v451_v17  ;;  %v700_v11 = vsel %vm665_vm1, %v697_v58, %v699_v50  ;;  %v896_v4 = vsel %vm861_vm2, %v893_v39, %v895_v24  ;;  %v361_v20 = vadd.f32 %v313_v40, %v271_v22 }
  0x5e   : > { %v784_v54 = vadd.f32 %v700_v11, %v618_v52  ;;  %v362_v47 = vadd.f32 %v314_v42, %v272_v23  ;;  %v273_v14 = vmul.f32 0.375, %v1417_v51  ;;  %v315_v60 = vadd.f32 %v270_v41, %v1361_v30  ;;  %v185_v42 = vld [vmem:[%s1203_s13 + $0x128] sm:$0xff] }
  0x5f   : > { %v783_v27 = vadd.f32 %v698_v45, %v617_v5  ;;  %v415_v0 = vadd.f32 %v361_v20, %v1441_v8  ;;  %v1476_v28 = vmul.f32 0.125, %v1465_v53  ;;  %v1479_v21 = vmul.f32 0.125, %v1468_v56 }
  0x60   : > { %v980_v2 = vadd.f32 %v896_v4, %v784_v54  ;;  %v416_v38 = vadd.f32 %v362_v47, %v1445_v63  ;;  %v363_v49 = vadd.f32 %v315_v60, %v273_v14  ;;  %v1483_v34 = vmul.f32 0.375, %v1427_v61 }
  0x61   : > { %v979_v51 = vadd.f32 %v894_v48, %v783_v27  ;;  %v453_v30 = vmul.f32 0.125, %v415_v0  ;;  %v483_v41 = vmul.f32 0.375, %v415_v0  ;;  %v1486_v62 = vmul.f32 0.375, %v1435_v31 }
  0x62   : > { %1010 = vst [vmem:[%s1270_s17 + $0x68] sm:$0x7f] %v980_v2  ;;  %v454_v3 = vmul.f32 0.125, %v416_v38  ;;  %v484_v44 = vmul.f32 0.375, %v416_v38  ;;  %v417_v26 = vadd.f32 %v363_v49, %v1459_v37  ;;  %v316_v10 = vadd.f32 %v271_v22, %v1369_v9  ;;  %v1502_v22 = vld [vmem:[%s1203_s13 + $0x120] sm:$0xff] }
  0x63   : > { %1009 = vst [vmem:[%s1270_s17 + $0x60] sm:$0xff] %v979_v51  ;;  %v551_v12 = vrot.slane %v483_v41, 1  ;;  %v701_v61 = vrot.slane %v483_v41, 2  ;;  %v897_v17 = vrot.slane %v453_v30, 3  ;;  %v317_v18 = vadd.f32 %v272_v23, %v1374_v43  ;;  %v1523_v41 = vld [vmem:[%s1203_s13 + $0x130] sm:$0x3] }
  0x64   : > { %v552_v19 = vrot.slane %v484_v44, 1  ;;  %v702_v15 = vrot.slane %v484_v44, 2  ;;  %v898_v31 = vrot.slane %v454_v3, 3  ;;  %v642_v29 = vmul.f32 0.375, %v417_v26 }
  0x65   : > { %v808_v16 = vmul.f32 0.125, %v417_v26  ;;  %v364_v55 = vadd.f32 %v316_v10, %v1483_v34  ;;  %v365_v33 = vadd.f32 %v317_v18, %v1486_v62  ;;  %v1499_v9 = vmul.f32 0.125, %v1492_v57 }
  0x66   : > { %v553_v6 = vsel %vm529_vm0, %v551_v12, %v552_v19  ;;  %v703_v35 = vsel %vm665_vm1, %v701_v61, %v702_v15  ;;  %v899_v43 = vsel %vm861_vm2, %v897_v17, %v898_v31  ;;  %v620_v23 = vadd.f32 %v552_v19, %v454_v3  ;;  %v1533_v19 = vld [vmem:[%s1203_s13 + $0x138] sm:$0xff] }
  0x67   : > { %v619_v13 = vadd.f32 %v553_v6, %v453_v30  ;;  %v704_v36 = vrot.slane %v642_v29, 2  ;;  %v900_v58 = vrot.slane %v808_v16, 3  ;;  %v418_v39 = vadd.f32 %v364_v55, %v1476_v28 }
  0x68   : > { %v419_v40 = vadd.f32 %v365_v33, %v1479_v21  ;;  %v276_v50 = vmul.f32 0.375, %v1453_v32  ;;  %v318_v24 = vadd.f32 %v273_v14, %v1393_v7  ;;  %v1513_v46 = vmul.f32 0.125, %v1502_v22 }
  0x69   : > { %v785_v45 = vadd.f32 %v703_v35, %v619_v13  ;;  %v705_v48 = vsel %vm665_vm1, %v702_v15, %v704_v36  ;;  %v901_v52 = vsel %vm861_vm2, %v898_v31, %v900_v58  ;;  %v455_v5 = vmul.f32 0.125, %v418_v39 }
  0x6a   : > { %v786_v11 = vadd.f32 %v705_v48, %v620_v23  ;;  %v456_v4 = vmul.f32 0.125, %v419_v40  ;;  %v485_v20 = vmul.f32 0.375, %v418_v39  ;;  %v486_v54 = vmul.f32 0.375, %v419_v40 }
  0x6b   : > { %v981_v32 = vadd.f32 %v899_v43, %v785_v45  ;;  %v902_v47 = vrot.slane %v455_v5, 3  ;;  %v366_v7 = vadd.f32 %v318_v24, %v276_v50  ;;  %v1517_v14 = vmul.f32 0.125, %v185_v42 }
  0x6c   : > { %v982_v60 = vadd.f32 %v901_v52, %v786_v11  ;;  %v554_v27 = vrot.slane %v485_v20, 1  ;;  %v555_v0 = vrot.slane %v486_v54, 1  ;;  %v706_v2 = vrot.slane %v485_v20, 2  ;;  %v1559_v11 = vld [vmem:[%s1203_s13 + $0x148] sm:$0x3] }
  0x6d   : > { %1011 = vst [vmem:[%s1270_s17 + $0x70] sm:$0xff] %v981_v32  ;;  %v707_v38 = vrot.slane %v486_v54, 2  ;;  %v903_v49 = vrot.slane %v456_v4, 3  ;;  %v420_v51 = vadd.f32 %v366_v7, %v1499_v9  ;;  %v277_v30 = vmul.f32 0.375, %v1465_v53 }
  0x6e   : > { %1012 = vst [vmem:[%s1270_s17 + $0x78] sm:$0x7f] %v982_v60  ;;  %v556_v3 = vsel %vm529_vm0, %v554_v27, %v555_v0  ;;  %v622_v44 = vadd.f32 %v555_v0, %v456_v4  ;;  %v278_v26 = vmul.f32 0.375, %v1468_v56  ;;  %v319_v10 = vadd.f32 %v1483_v34, %v1407_v25  ;;  %v1541_v56 = vld [vmem:[%s1203_s13 + $0x140] sm:$0xff] }
  0x6f   : > { %v621_v12 = vadd.f32 %v556_v3, %v455_v5  ;;  %v708_v61 = vsel %vm665_vm1, %v706_v2, %v707_v38  ;;  %v904_v17 = vsel %vm861_vm2, %v902_v47, %v903_v49  ;;  %v643_v18 = vmul.f32 0.375, %v420_v51 }
  0x70   : > { %v809_v53 = vmul.f32 0.125, %v420_v51  ;;  %v320_v15 = vadd.f32 %v1486_v62, %v1411_v59  ;;  %v367_v31 = vadd.f32 %v319_v10, %v277_v30  ;;  %v1538_v29 = vmul.f32 0.125, %v1523_v41  ;;  %v1572_v10 = vld [vmem:[%s1203_s13 + $0x158] sm:$0xff] }
  0x71   : > { %v787_v16 = vadd.f32 %v708_v61, %v621_v12  ;;  %v709_v25 = vrot.slane %v643_v18, 2  ;;  %v279_v34 = vmul.f32 0.375, %v1492_v57  ;;  %v321_v55 = vadd.f32 %v276_v50, %v1432_v1 }
  0x72   : > { %v905_v33 = vrot.slane %v809_v53, 3  ;;  %v368_v6 = vadd.f32 %v320_v15, %v278_v26  ;;  %v421_v35 = vadd.f32 %v367_v31, %v1513_v46  ;;  %v1547_v43 = vmul.f32 0.125, %v1533_v19 }
  0x73   : > { %v983_v59 = vadd.f32 %v904_v17, %v787_v16  ;;  %v710_v62 = vsel %vm665_vm1, %v707_v38, %v709_v25  ;;  %v369_v23 = vadd.f32 %v321_v55, %v279_v34  ;;  %v1551_v13 = vmul.f32 0.125, %v1541_v56 }
  0x74   : > { %v788_v36 = vadd.f32 %v710_v62, %v622_v44  ;;  %v906_v57 = vsel %vm861_vm2, %v903_v49, %v905_v33  ;;  %v422_v1 = vadd.f32 %v368_v6, %v1517_v14  ;;  %v457_v58 = vmul.f32 0.125, %v421_v35  ;;  %v190_v44 = vld [vmem:[%s1203_s13 + $0x150] sm:$0xff] }
  0x75   : > { %1013 = vst [vmem:[%s1270_s17 + $0x80] sm:$0xff] %v983_v59  ;;  %v487_v39 = vmul.f32 0.375, %v421_v35  ;;  %v423_v40 = vadd.f32 %v369_v23, %v1538_v29  ;;  %v280_v50 = vmul.f32 0.375, %v1502_v22  ;;  %v281_v24 = vmul.f32 0.375, %v185_v42 }
  0x76   : > { %v984_v45 = vadd.f32 %v906_v57, %v788_v36  ;;  %v458_v48 = vmul.f32 0.125, %v422_v1  ;;  %v488_v52 = vmul.f32 0.375, %v422_v1  ;;  %v907_v5 = vrot.slane %v457_v58, 3  ;;  %v1591_v57 = vld [vmem:[%s1203_s13 + $0x160] sm:$0x3] }
  0x77   : > { %v557_v4 = vrot.slane %v487_v39, 1  ;;  %v711_v20 = vrot.slane %v487_v39, 2  ;;  %v644_v54 = vmul.f32 0.375, %v423_v40  ;;  %v810_v32 = vmul.f32 0.125, %v423_v40 }
  0x78   : > { %1014 = vst [vmem:[%s1270_s17 + $0x88] sm:$0x7f] %v984_v45  ;;  %v558_v47 = vrot.slane %v488_v52, 1  ;;  %v712_v7 = vrot.slane %v488_v52, 2  ;;  %v908_v60 = vrot.slane %v458_v48, 3  ;;  %v322_v27 = vadd.f32 %v277_v30, %v1441_v8 }
  0x79   : > { %v714_v22 = vrot.slane %v644_v54, 2  ;;  %v910_v42 = vrot.slane %v810_v32, 3  ;;  %v323_v0 = vadd.f32 %v278_v26, %v1445_v63  ;;  %v1565_v2 = vmul.f32 0.125, %v1559_v11 }
  0x7a   : > { %v559_v38 = vsel %vm529_vm0, %v557_v4, %v558_v47  ;;  %v713_v49 = vsel %vm665_vm1, %v711_v20, %v712_v7  ;;  %v909_v51 = vsel %vm861_vm2, %v907_v5, %v908_v60  ;;  %v624_v3 = vadd.f32 %v558_v47, %v458_v48 }
  0x7b   : > { %v623_v12 = vadd.f32 %v559_v38, %v457_v58  ;;  %v715_v8 = vsel %vm665_vm1, %v712_v7, %v714_v22  ;;  %v911_v30 = vsel %vm861_vm2, %v908_v60, %v910_v42  ;;  %v370_v61 = vadd.f32 %v322_v27, %v280_v50 }
  0x7c   : > { %v790_v63 = vadd.f32 %v715_v8, %v624_v3  ;;  %v371_v26 = vadd.f32 %v323_v0, %v281_v24  ;;  %v282_v17 = vmul.f32 0.375, %v1523_v41  ;;  %v324_v18 = vadd.f32 %v279_v34, %v1459_v37 }
  0x7d   : > { %v789_v53 = vadd.f32 %v713_v49, %v623_v12  ;;  %v424_v15 = vadd.f32 %v370_v61, %v1547_v43  ;;  %v1579_v31 = vmul.f32 0.125, %v190_v44  ;;  %v1582_v16 = vmul.f32 0.125, %v1572_v10 }
  0x7e   : > { %v986_v25 = vadd.f32 %v911_v30, %v790_v63  ;;  %v425_v55 = vadd.f32 %v371_v26, %v1551_v13  ;;  %v372_v33 = vadd.f32 %v324_v18, %v282_v17  ;;  %v283_v6 = vmul.f32 0.375, %v1533_v19 }
  0x7f   : > { %v985_v35 = vadd.f32 %v909_v51, %v789_v53  ;;  %v459_v41 = vmul.f32 0.125, %v424_v15  ;;  %v489_v59 = vmul.f32 0.375, %v424_v15  ;;  %v284_v37 = vmul.f32 0.375, %v1541_v56 }
  0x80   : > { %1016 = vst [vmem:[%s1270_s17 + $0x98] sm:$0x7f] %v986_v25  ;;  %v460_v34 = vmul.f32 0.125, %v425_v55  ;;  %v490_v62 = vmul.f32 0.375, %v425_v55  ;;  %v426_v23 = vadd.f32 %v372_v33, %v1565_v2  ;;  %v325_v36 = vadd.f32 %v280_v50, %v1476_v28  ;;  %v193_v55 = vld [vmem:[%s1203_s13 + $0x168] sm:$0xff] }
  0x81   : > { %1015 = vst [vmem:[%s1270_s17 + $0x90] sm:$0xff] %v985_v35  ;;  %v560_v1 = vrot.slane %v489_v59, 1  ;;  %v716_v58 = vrot.slane %v489_v59, 2  ;;  %v912_v39 = vrot.slane %v459_v41, 3  ;;  %v326_v19 = vadd.f32 %v281_v24, %v1479_v21 }
  0x82   : > { %v561_v40 = vrot.slane %v490_v62, 1  ;;  %v717_v45 = vrot.slane %v490_v62, 2  ;;  %v913_v48 = vrot.slane %v460_v34, 3  ;;  %v645_v52 = vmul.f32 0.375, %v426_v23 }
  0x83   : > { %v811_v56 = vmul.f32 0.125, %v426_v23  ;;  %v373_v5 = vadd.f32 %v325_v36, %v283_v6  ;;  %v374_v4 = vadd.f32 %v326_v19, %v284_v37  ;;  %v1596_v20 = vmul.f32 0.125, %v1591_v57 }
  0x84   : > { %v562_v28 = vsel %vm529_vm0, %v560_v1, %v561_v40  ;;  %v718_v50 = vsel %vm665_vm1, %v716_v58, %v717_v45  ;;  %v914_v54 = vsel %vm861_vm2, %v912_v39, %v913_v48  ;;  %v626_v32 = vadd.f32 %v561_v40, %v460_v34  ;;  %v194_v1 = vld [vmem:[%s1203_s13 + $0x170] sm:$0xff] }
  0x85   : > { %v625_v47 = vadd.f32 %v562_v28, %v459_v41  ;;  %v719_v7 = vrot.slane %v645_v52, 2  ;;  %v915_v21 = vrot.slane %v811_v56, 3  ;;  %v427_v24 = vadd.f32 %v373_v5, %v1579_v31 }
  0x86   : > { %v428_v60 = vadd.f32 %v374_v4, %v1582_v16  ;;  %v285_v27 = vmul.f32 0.375, %v1559_v11  ;;  %v327_v22 = vadd.f32 %v282_v17, %v1499_v9  ;;  %v286_v42 = vmul.f32 0.375, %v190_v44 }
  0x87   : > { %v791_v0 = vadd.f32 %v718_v50, %v625_v47  ;;  %v720_v38 = vsel %vm665_vm1, %v717_v45, %v719_v7  ;;  %v916_v49 = vsel %vm861_vm2, %v913_v48, %v915_v21  ;;  %v461_v51 = vmul.f32 0.125, %v427_v24  ;;  %v195_v45 = vld [vmem:[%s1203_s13 + $0x178] sm:$0x3] }
  0x88   : > { %v792_v3 = vadd.f32 %v720_v38, %v626_v32  ;;  %v462_v12 = vmul.f32 0.125, %v428_v60  ;;  %v491_v8 = vmul.f32 0.375, %v427_v24  ;;  %v492_v30 = vmul.f32 0.375, %v428_v60 }
  0x89   : > { %v987_v61 = vadd.f32 %v914_v54, %v791_v0  ;;  %v917_v63 = vrot.slane %v461_v51, 3  ;;  %v375_v26 = vadd.f32 %v327_v22, %v285_v27  ;;  %v287_v11 = vmul.f32 0.375, %v1572_v10 }
  0x8a   : > { %v988_v9 = vadd.f32 %v916_v49, %v792_v3  ;;  %v563_v44 = vrot.slane %v491_v8, 1  ;;  %v564_v17 = vrot.slane %v492_v30, 1  ;;  %v721_v18 = vrot.slane %v491_v8, 2 }
  0x8b   : > { %1017 = vst [vmem:[%s1270_s17 + $0xa0] sm:$0xff] %v987_v61  ;;  %v722_v53 = vrot.slane %v492_v30, 2  ;;  %v918_v15 = vrot.slane %v462_v12, 3  ;;  %v429_v25 = vadd.f32 %v375_v26, %v1596_v20  ;;  %v328_v33 = vadd.f32 %v283_v6, %v1513_v46 }
  0x8c   : > { %1018 = vst [vmem:[%s1270_s17 + $0xa8] sm:$0x7f] %v988_v9  ;;  %v565_v35 = vsel %vm529_vm0, %v563_v44, %v564_v17  ;;  %v628_v41 = vadd.f32 %v564_v17, %v462_v12  ;;  %v329_v10 = vadd.f32 %v284_v37, %v1517_v14  ;;  %v385_v59 = vmul.f32 0.125, %v193_v55 }
  0x8d   : > { %v627_v34 = vadd.f32 %v565_v35, %v461_v51  ;;  %v723_v62 = vsel %vm665_vm1, %v721_v18, %v722_v53  ;;  %v919_v23 = vsel %vm861_vm2, %v917_v63, %v918_v15  ;;  %v646_v36 = vmul.f32 0.375, %v429_v25  ;;  %v198_v35 = vld [vmem:[%s1203_s13 + $0x190] sm:$0x3] }
  0x8e   : > { %v812_v58 = vmul.f32 0.125, %v429_v25  ;;  %v376_v39 = vadd.f32 %v328_v33, %v286_v42  ;;  %v377_v19 = vadd.f32 %v329_v10, %v287_v11  ;;  %v386_v40 = vmul.f32 0.125, %v194_v1 }
  0x8f   : > { %v793_v46 = vadd.f32 %v723_v62, %v627_v34  ;;  %v724_v6 = vrot.slane %v646_v36, 2  ;;  %v288_v48 = vmul.f32 0.375, %v1591_v57  ;;  %v330_v14 = vadd.f32 %v285_v27, %v1538_v29 }
  0x90   : > { %v920_v37 = vrot.slane %v812_v58, 3  ;;  %v430_v52 = vadd.f32 %v385_v59, %v376_v39  ;;  %v431_v56 = vadd.f32 %v386_v40, %v377_v19  ;;  %v387_v5 = vmul.f32 0.125, %v195_v45 }
  0x91   : > { %v989_v4 = vadd.f32 %v919_v23, %v793_v46  ;;  %v725_v28 = vsel %vm665_vm1, %v722_v53, %v724_v6  ;;  %v378_v50 = vadd.f32 %v330_v14, %v288_v48  ;;  %v289_v54 = vmul.f32 0.375, %v193_v55  ;;  %v196_v53 = vld [vmem:[%s1203_s13 + $0x180] sm:$0xff] }
  0x92   : > { %v794_v32 = vadd.f32 %v725_v28, %v628_v41  ;;  %v921_v47 = vsel %vm861_vm2, %v918_v15, %v920_v37  ;;  %v463_v7 = vmul.f32 0.125, %v430_v52  ;;  %v464_v21 = vmul.f32 0.125, %v431_v56  ;;  %v197_v15 = vld [vmem:[%s1203_s13 + $0x188] sm:$0xff]  ;;  %v199_v37 = vld [vmem:[%s1203_s13 + $0x198] sm:$0xff] }
  0x93   : > { %1019 = vst [vmem:[%s1270_s17 + $0xb0] sm:$0xff] %v989_v4  ;;  %v493_v24 = vmul.f32 0.375, %v430_v52  ;;  %v494_v57 = vmul.f32 0.375, %v431_v56  ;;  %v432_v60 = vadd.f32 %v387_v5, %v378_v50  ;;  %v290_v29 = vmul.f32 0.375, %v194_v1  ;;  %v200_v52 = vld [vmem:[%s1203_s13 + $0x1a0] sm:$0xff] }
  0x94   : > { %v990_v27 = vadd.f32 %v921_v47, %v794_v32  ;;  %v922_v22 = vrot.slane %v463_v7, 3  ;;  %v923_v0 = vrot.slane %v464_v21, 3  ;;  %v331_v38 = vadd.f32 %v286_v42, %v1547_v43 }
  0x95   : > { %v566_v49 = vrot.slane %v493_v24, 1  ;;  %v567_v51 = vrot.slane %v494_v57, 1  ;;  %v726_v3 = vrot.slane %v493_v24, 2  ;;  %v727_v12 = vrot.slane %v494_v57, 2 }
  0x96   : > { %1020 = vst [vmem:[%s1270_s17 + $0xb8] sm:$0x7f] %v990_v27  ;;  %v924_v8 = vsel %vm861_vm2, %v922_v22, %v923_v0  ;;  %v647_v30 = vmul.f32 0.375, %v432_v60  ;;  %v813_v61 = vmul.f32 0.125, %v432_v60  ;;  %v332_v63 = vadd.f32 %v287_v11, %v1551_v13  ;;  %v201_v60 = vld [vmem:[%s1203_s13 + $0x1a8] sm:$0x3] }
  0x97   : > { %v568_v26 = vsel %vm529_vm0, %v566_v49, %v567_v51  ;;  %v728_v9 = vsel %vm665_vm1, %v726_v3, %v727_v12  ;;  %v630_v44 = vadd.f32 %v567_v51, %v464_v21  ;;  %v379_v43 = vadd.f32 %v331_v38, %v289_v54 }
  0x98   : > { %v629_v42 = vadd.f32 %v568_v26, %v463_v7  ;;  %v729_v17 = vrot.slane %v647_v30, 2  ;;  %v925_v18 = vrot.slane %v813_v61, 3  ;;  %v380_v25 = vadd.f32 %v332_v63, %v290_v29 }
  0x99   : > { %v388_v55 = vmul.f32 0.125, %v196_v53  ;;  %v389_v33 = vmul.f32 0.125, %v197_v15  ;;  %v291_v41 = vmul.f32 0.375, %v195_v45  ;;  %v333_v10 = vadd.f32 %v288_v48, %v1565_v2 }
  0x9a   : > { %v795_v59 = vadd.f32 %v728_v9, %v629_v42  ;;  %v730_v13 = vsel %vm665_vm1, %v727_v12, %v729_v17  ;;  %v926_v11 = vsel %vm861_vm2, %v923_v0, %v925_v18  ;;  %v390_v34 = vmul.f32 0.125, %v198_v35 }
  0x9b   : > { %v796_v62 = vadd.f32 %v730_v13, %v630_v44  ;;  %v433_v23 = vadd.f32 %v388_v55, %v379_v43  ;;  %v434_v36 = vadd.f32 %v389_v33, %v380_v25  ;;  %v381_v1 = vadd.f32 %v333_v10, %v291_v41 }
  0x9c   : > { %v991_v58 = vadd.f32 %v924_v8, %v795_v59  ;;  %v334_v39 = vadd.f32 %v289_v54, %v1579_v31  ;;  %v335_v19 = vadd.f32 %v290_v29, %v1582_v16  ;;  %v337_v2 = vmul.f32 0.375, %v196_v53 }
  0x9d   : > { %v992_v40 = vadd.f32 %v926_v11, %v796_v62  ;;  %v465_v46 = vmul.f32 0.125, %v433_v23  ;;  %v466_v6 = vmul.f32 0.125, %v434_v36  ;;  %v495_v45 = vmul.f32 0.375, %v433_v23 }
  0x9e   : > { %1021 = vst [vmem:[%s1270_s17 + $0xc0] sm:$0xff] %v991_v58  ;;  %v496_v48 = vmul.f32 0.375, %v434_v36  ;;  %v435_v14 = vadd.f32 %v390_v34, %v381_v1  ;;  %v338_v56 = vmul.f32 0.375, %v197_v15  ;;  %v382_v5 = vadd.f32 %v337_v2, %v334_v39 }
  0x9f   : > { %1022 = vst [vmem:[%s1270_s17 + $0xc8] sm:$0x7f] %v992_v40  ;;  %v569_v4 = vrot.slane %v495_v45, 1  ;;  %v731_v28 = vrot.slane %v495_v45, 2  ;;  %v927_v50 = vrot.slane %v465_v46, 3  ;;  %v928_v31 = vrot.slane %v466_v6, 3 }
  0xa0   : > { %v570_v54 = vrot.slane %v496_v48, 1  ;;  %v732_v16 = vrot.slane %v496_v48, 2  ;;  %v648_v32 = vmul.f32 0.375, %v435_v14  ;;  %v814_v47 = vmul.f32 0.125, %v435_v14 }
  0xa1   : > { %v929_v7 = vsel %vm861_vm2, %v927_v50, %v928_v31  ;;  %v383_v21 = vadd.f32 %v338_v56, %v335_v19  ;;  %v391_v24 = vmul.f32 0.125, %v199_v37  ;;  %v392_v57 = vmul.f32 0.125, %v200_v52 }
  0xa2   : > { %v571_v29 = vsel %vm529_vm0, %v569_v4, %v570_v54  ;;  %v733_v27 = vsel %vm665_vm1, %v731_v28, %v732_v16  ;;  %v632_v22 = vadd.f32 %v570_v54, %v466_v6  ;;  %v734_v0 = vrot.slane %v648_v32, 2 }
  0xa3   : > { %v631_v38 = vadd.f32 %v571_v29, %v465_v46  ;;  %v930_v49 = vrot.slane %v814_v47, 3  ;;  %v436_v51 = vadd.f32 %v391_v24, %v382_v5  ;;  %v437_v3 = vadd.f32 %v392_v57, %v383_v21 }
  0xa4   : > { %v735_v12 = vsel %vm665_vm1, %v732_v16, %v734_v0  ;;  %v336_v8 = vadd.f32 %v291_v41, %v1596_v20  ;;  %v339_v30 = vmul.f32 0.375, %v198_v35  ;;  %v393_v61 = vmul.f32 0.125, %v201_v60 }
  0xa5   : > { %v797_v63 = vadd.f32 %v733_v27, %v631_v38  ;;  %v798_v26 = vadd.f32 %v735_v12, %v632_v22  ;;  %v931_v9 = vsel %vm861_vm2, %v928_v31, %v930_v49  ;;  %v467_v44 = vmul.f32 0.125, %v436_v51 }
  0xa6   : > { %v468_v43 = vmul.f32 0.125, %v437_v3  ;;  %v497_v42 = vmul.f32 0.375, %v436_v51  ;;  %v498_v17 = vmul.f32 0.375, %v437_v3  ;;  %v384_v18 = vadd.f32 %v339_v30, %v336_v8 }
  0xa7   : > { %v993_v53 = vadd.f32 %v929_v7, %v797_v63  ;;  %v994_v15 = vadd.f32 %v931_v9, %v798_v26  ;;  %v932_v25 = vrot.slane %v467_v44, 3 }
  0xa8   : > { %v572_v55 = vrot.slane %v497_v42, 1  ;;  %v573_v33 = vrot.slane %v498_v17, 1  ;;  %v736_v10 = vrot.slane %v497_v42, 2  ;;  %v737_v20 = vrot.slane %v498_v17, 2 }
  0xa9   : > { %1023 = vst [vmem:[%s1270_s17 + $0xd0] sm:$0xff] %v993_v53  ;;  %1024 = vst [vmem:[%s1270_s17 + $0xd8] sm:$0x7f] %v994_v15  ;;  %v933_v35 = vrot.slane %v468_v43, 3  ;;  %v438_v41 = vadd.f32 %v393_v61, %v384_v18 }
  0xaa   : > { %v574_v59 = vsel %vm529_vm0, %v572_v55, %v573_v33  ;;  %v738_v13 = vsel %vm665_vm1, %v736_v10, %v737_v20  ;;  %v634_v36 = vadd.f32 %v573_v33, %v468_v43 }
  0xab   : > { %v633_v11 = vadd.f32 %v574_v59, %v467_v44  ;;  %v649_v34 = vmul.f32 0.375, %v438_v41  ;;  %v815_v62 = vmul.f32 0.125, %v438_v41  ;;  %v934_v23 = vsel %vm861_vm2, %v932_v25, %v933_v35 }
  0xad   : > { %v799_v1 = vadd.f32 %v738_v13, %v633_v11  ;;  %v739_v58 = vrot.slane %v649_v34, 2  ;;  %v935_v39 = vrot.slane %v815_v62, 3 }
  0xaf   : > { %v995_v19 = vadd.f32 %v934_v23, %v799_v1  ;;  %v740_v2 = vsel %vm665_vm1, %v737_v20, %v739_v58  ;;  %v936_v40 = vsel %vm861_vm2, %v933_v35, %v935_v39 }
  0xb0   : > { %v800_v46 = vadd.f32 %v740_v2, %v634_v36 }
  0xb1   : > { %1025 = vst [vmem:[%s1270_s17 + $0xe0] sm:$0xff] %v995_v19 }
  0xb2   : > { %v996_v6 = vadd.f32 %v936_v40, %v800_v46 }
  0xb4   : > { %1026 = vst [vmem:[%s1270_s17 + $0xe8] sm:$0x7f] %v996_v6 }
  0xb5 PF: > { %s11_s8 = sadd.s32 1, %s1167_s8   ;;  %s1669_s6 = smov %s1163_s7 }
  0xb6   : > { %p8_p5 = scmp.ge.s32.totalorder %s11_s8, 4   ;;  %s1670_s7 = smov %s1672_s9 }
  0xb8   :  { %10 = sbr.rel (!%p8_p5) target bundleno = 2 (0x2), region = 54 }

// kernel: _lambda_.23
= control target key start
LH: loop header
LB: loop body
LE: loop exit
PB: predicated region body
PF: predicated region fallthrough
CT: control target
= control target key end

     0   :  { %s704_s6 = smov 0   ;;  %s706_s7 = smov 0   ;;  %s886_s0 = inlined_call_operand.vmem [shape: f32[2,12,12,128], index: 0, kind: input, shape index: {}]   ;;  %s887_s1 = inlined_call_operand.vmem [shape: f32[2,9,9,128], index: 1, kind: output, shape index: {}]  }
   0x1   :  { %s708_s8 = smov 0  }
   0x2 LB: > { %s23_s9 = sadd.s32 1, %s688_s7  ;;  %p639_p0 = scmp.ge.s32.totalorder %s692_s8, 1  ;;  %s692_s8 = sphi %s708_s8, %s11_s8   ;;  %s688_s7 = sphi %s706_s7, %s889_s7   ;;  %s684_s6 = sphi %s704_s6, %s888_s6  }
   0x3   : > { %p25_p1 = scmp.ge.s32.totalorder %s23_s9, 2  ;;  %p106_p2 = scmp.lt.s32.totalorder %s692_s8, 3 }
   0x5   : > { %s891_s9 = smov (%p25_p1, %s23_s9), 0  ;;  %p107_p3 = pnand %p639_p0, %p106_p2 }
   0x6   : > { %p132_p4 = scmp.lt.s32.totalorder (!%p107_p3), %s684_s6, 1  ;;  %vm324_vm0 = vcmask (!%p107_p3), 1046528   ;;  %vm388_vm1 = vcmask (!%p107_p3), 1045504   ;;  %vm470_vm2 = vcmask (!%p107_p3), 1044480  }
   0x7   : > { %110 = sbr.rel (%p107_p3) target bundleno = 96 (0x60), region = 24 }
   0xe   : > { %s893_s6 = smov (!%p132_p4, %s684_s6), 1 }
   0xf   : > { %s644_s10 = smul.u32 192, %s893_s6 }
  0x10   : > { %s645_s14 = smul.u32 144, %s893_s6 }
  0x11   : > { %s728_s13 = scalar_lea.vmem %s886_s0, %s644_s10 }
  0x12   : > { %v148_v0 = vld [vmem:[%s728_s13] sm:$0xff]  ;;  %v149_v1 = vld [vmem:[%s728_s13 + $0x8] sm:$0xf]  ;;  %v150_v2 = vld [vmem:[%s728_s13 + $0x10] sm:$0xff]  ;;  %s778_s17 = scalar_lea.vmem %s887_s1, %s645_s14 }
  0x13   : > { %v151_v3 = vld [vmem:[%s728_s13 + $0x18] sm:$0xf]  ;;  %v152_v4 = vld [vmem:[%s728_s13 + $0x20] sm:$0xff]  ;;  %v153_v5 = vld [vmem:[%s728_s13 + $0x28] sm:$0xf]  ;;  %v172_v6 = vmul.f32 0.125, %v148_v0 }
  0x14   : > { %v154_v7 = vld [vmem:[%s728_s13 + $0x30] sm:$0xff]  ;;  %v155_v8 = vld [vmem:[%s728_s13 + $0x38] sm:$0xf]  ;;  %v173_v9 = vmul.f32 0.125, %v149_v1  ;;  %v190_v10 = vmul.f32 0.375, %v150_v2  ;;  %v191_v11 = vmul.f32 0.375, %v151_v3 }
  0x15   : > { %v738_v12 = vmul.f32 0.125, %v154_v7  ;;  %v740_v13 = vmul.f32 0.125, %v155_v8  ;;  %v192_v14 = vmul.f32 0.375, %v152_v4  ;;  %v193_v15 = vmul.f32 0.375, %v153_v5  ;;  %v156_v16 = vld [vmem:[%s728_s13 + $0x40] sm:$0xff]  ;;  %v744_v17 = vld [vmem:[%s728_s13 + $0x50] sm:$0xff] }
  0x16   : > { %v208_v18 = vadd.f32 %v190_v10, %v172_v6  ;;  %v209_v19 = vadd.f32 %v191_v11, %v173_v9  ;;  %v157_v20 = vld [vmem:[%s728_s13 + $0x48] sm:$0xf]  ;;  %v174_v21 = vmul.f32 0.125, %v150_v2  ;;  %v175_v22 = vmul.f32 0.125, %v151_v3  ;;  %v748_v23 = vld [vmem:[%s728_s13 + $0x58] sm:$0xf] }
  0x17   : > { %v750_v24 = vmul.f32 0.125, %v156_v16  ;;  %v752_v25 = vmul.f32 0.125, %v157_v20  ;;  %v194_v26 = vmul.f32 0.375, %v154_v7  ;;  %v195_v27 = vmul.f32 0.375, %v155_v8 }
  0x18   : > { %v228_v28 = vadd.f32 %v208_v18, %v192_v14  ;;  %v229_v29 = vadd.f32 %v209_v19, %v193_v15  ;;  %v210_v30 = vadd.f32 %v192_v14, %v174_v21  ;;  %v211_v31 = vadd.f32 %v193_v15, %v175_v22  ;;  %v161_v19 = vld [vmem:[%s728_s13 + $0x68] sm:$0xf] }
  0x19   : > { %v176_v32 = vmul.f32 0.125, %v152_v4  ;;  %v177_v33 = vmul.f32 0.125, %v153_v5  ;;  %v755_v34 = vmul.f32 0.125, %v744_v17  ;;  %v758_v35 = vmul.f32 0.125, %v748_v23  ;;  %v160_v4 = vld [vmem:[%s728_s13 + $0x60] sm:$0xff] }
  0x1a   : > { %v252_v36 = vadd.f32 %v228_v28, %v738_v12  ;;  %v253_v37 = vadd.f32 %v229_v29, %v740_v13  ;;  %v230_v38 = vadd.f32 %v210_v30, %v194_v26  ;;  %v231_v39 = vadd.f32 %v211_v31, %v195_v27 }
  0x1b   : > { %v762_v40 = vmul.f32 0.375, %v156_v16  ;;  %v764_v41 = vmul.f32 0.375, %v157_v20  ;;  %v212_v42 = vadd.f32 %v194_v26, %v176_v32  ;;  %v213_v43 = vadd.f32 %v195_v27, %v177_v33 }
  0x1c   : > { %v270_v44 = vmul.f32 0.125, %v252_v36  ;;  %v271_v45 = vmul.f32 0.125, %v253_v37  ;;  %v288_v46 = vmul.f32 0.375, %v252_v36  ;;  %v289_v47 = vmul.f32 0.375, %v253_v37 }
  0x1d   : > { %v254_v48 = vadd.f32 %v230_v38, %v750_v24  ;;  %v255_v49 = vadd.f32 %v231_v39, %v752_v25  ;;  %v232_v50 = vadd.f32 %v212_v42, %v762_v40  ;;  %v233_v51 = vadd.f32 %v213_v43, %v764_v41 }
  0x1e   : > { %v325_v52 = vrot.slane %v288_v46, 1  ;;  %v326_v53 = vrot.slane %v289_v47, 1  ;;  %v389_v54 = vrot.slane %v288_v46, 2  ;;  %v390_v55 = vrot.slane %v289_v47, 2 }
  0x1f   : > { %v471_v56 = vrot.slane %v270_v44, 3  ;;  %v472_v57 = vrot.slane %v271_v45, 3  ;;  %v272_v58 = vmul.f32 0.125, %v254_v48  ;;  %v273_v59 = vmul.f32 0.125, %v255_v49 }
  0x20   : > { %v327_v60 = vsel %vm324_vm0, %v325_v52, %v326_v53  ;;  %v391_v61 = vsel %vm388_vm1, %v389_v54, %v390_v55  ;;  %v371_v62 = vadd.f32 %v326_v53, %v271_v45  ;;  %v290_v63 = vmul.f32 0.375, %v254_v48  ;;  %v162_v48 = vld [vmem:[%s728_s13 + $0x70] sm:$0xff]  ;;  %v163_v52 = vld [vmem:[%s728_s13 + $0x78] sm:$0xf] }
  0x21   : > { %v370_v0 = vadd.f32 %v327_v60, %v270_v44  ;;  %v473_v1 = vsel %vm470_vm2, %v471_v56, %v472_v57  ;;  %v291_v2 = vmul.f32 0.375, %v255_v49  ;;  %v474_v3 = vrot.slane %v272_v58, 3  ;;  %v808_v60 = vld [vmem:[%s728_s13 + $0x80] sm:$0xff] }
  0x22   : > { %v435_v5 = vadd.f32 %v390_v55, %v371_v62  ;;  %v328_v6 = vrot.slane %v290_v63, 1  ;;  %v392_v7 = vrot.slane %v290_v63, 2  ;;  %v475_v8 = vrot.slane %v273_v59, 3 }
  0x23   : > { %v434_v9 = vadd.f32 %v391_v61, %v370_v0  ;;  %v329_v10 = vrot.slane %v291_v2, 1  ;;  %v393_v11 = vrot.slane %v291_v2, 2  ;;  %v256_v14 = vadd.f32 %v232_v50, %v755_v34 }
  0x24   : > { %v517_v15 = vadd.f32 %v472_v57, %v435_v5  ;;  %v476_v16 = vsel %vm470_vm2, %v474_v3, %v475_v8  ;;  %v257_v18 = vadd.f32 %v233_v51, %v758_v35  ;;  %v784_v20 = vmul.f32 0.125, %v160_v4 }
  0x25   : > { %v516_v21 = vadd.f32 %v473_v1, %v434_v9  ;;  %v330_v22 = vsel %vm324_vm0, %v328_v6, %v329_v10  ;;  %v394_v26 = vsel %vm388_vm1, %v392_v7, %v393_v11  ;;  %v373_v27 = vadd.f32 %v329_v10, %v273_v59 }
  0x26   : > { %535 = vst [vmem:[%s778_s17 + $0x8] sm:$0x1] %v517_v15  ;;  %v372_v28 = vadd.f32 %v330_v22, %v272_v58  ;;  %v274_v29 = vmul.f32 0.125, %v256_v14  ;;  %v275_v30 = vmul.f32 0.125, %v257_v18  ;;  %v292_v31 = vmul.f32 0.375, %v256_v14 }
  0x27   : > { %534 = vst [vmem:[%s778_s17] sm:$0xff] %v516_v21  ;;  %v437_v32 = vadd.f32 %v393_v11, %v373_v27  ;;  %v293_v33 = vmul.f32 0.375, %v257_v18  ;;  %v790_v36 = vmul.f32 0.125, %v161_v19  ;;  %v198_v37 = vmul.f32 0.375, %v744_v17 }
  0x28   : > { %v436_v38 = vadd.f32 %v394_v26, %v372_v28  ;;  %v331_v39 = vrot.slane %v292_v31, 1  ;;  %v395_v42 = vrot.slane %v292_v31, 2  ;;  %v477_v43 = vrot.slane %v274_v29, 3 }
  0x29   : > { %v519_v44 = vadd.f32 %v475_v8, %v437_v32  ;;  %v332_v45 = vrot.slane %v293_v33, 1  ;;  %v396_v46 = vrot.slane %v293_v33, 2  ;;  %v478_v47 = vrot.slane %v275_v30, 3 }
  0x2a   : > { %v518_v49 = vadd.f32 %v476_v16, %v436_v38  ;;  %v199_v50 = vmul.f32 0.375, %v748_v23  ;;  %v214_v51 = vadd.f32 %v762_v40, %v738_v12  ;;  %v215_v17 = vadd.f32 %v764_v41, %v740_v13  ;;  %v811_v12 = vld [vmem:[%s728_s13 + $0x88] sm:$0xf] }
  0x2b   : > { %537 = vst [vmem:[%s778_s17 + $0x18] sm:$0x1] %v519_v44  ;;  %v333_v53 = vsel %vm324_vm0, %v331_v39, %v332_v45  ;;  %v397_v54 = vsel %vm388_vm1, %v395_v42, %v396_v46  ;;  %v479_v55 = vsel %vm470_vm2, %v477_v43, %v478_v47  ;;  %v375_v56 = vadd.f32 %v332_v45, %v275_v30 }
  0x2c   : > { %536 = vst [vmem:[%s778_s17 + $0x10] sm:$0xff] %v518_v49  ;;  %v374_v57 = vadd.f32 %v333_v53, %v274_v29  ;;  %v234_v58 = vadd.f32 %v214_v51, %v198_v37  ;;  %v235_v59 = vadd.f32 %v215_v17, %v199_v50  ;;  %v805_v23 = vmul.f32 0.125, %v162_v48 }
  0x2d   : > { %v439_v13 = vadd.f32 %v396_v46, %v375_v56  ;;  %v813_v40 = vmul.f32 0.125, %v163_v52  ;;  %v200_v41 = vmul.f32 0.375, %v160_v4  ;;  %v201_v61 = vmul.f32 0.375, %v161_v19 }
  0x2e   : > { %v438_v62 = vadd.f32 %v397_v54, %v374_v57  ;;  %v258_v63 = vadd.f32 %v234_v58, %v784_v20  ;;  %v259_v0 = vadd.f32 %v235_v59, %v790_v36  ;;  %v216_v1 = vadd.f32 %v198_v37, %v750_v24 }
  0x2f   : > { %v521_v2 = vadd.f32 %v478_v47, %v439_v13  ;;  %v217_v3 = vadd.f32 %v199_v50, %v752_v25  ;;  %v820_v5 = vmul.f32 0.125, %v808_v60  ;;  %v823_v6 = vmul.f32 0.125, %v811_v12 }
  0x30   : > { %v520_v7 = vadd.f32 %v479_v55, %v438_v62  ;;  %v276_v4 = vmul.f32 0.125, %v258_v63  ;;  %v277_v8 = vmul.f32 0.125, %v259_v0  ;;  %v294_v9 = vmul.f32 0.375, %v258_v63 }
  0x31   : > { %539 = vst [vmem:[%s778_s17 + $0x28] sm:$0x1] %v521_v2  ;;  %v295_v10 = vmul.f32 0.375, %v259_v0  ;;  %v236_v11 = vadd.f32 %v216_v1, %v200_v41  ;;  %v237_v14 = vadd.f32 %v217_v3, %v201_v61  ;;  %v202_v15 = vmul.f32 0.375, %v162_v48 }
  0x32   : > { %538 = vst [vmem:[%s778_s17 + $0x20] sm:$0xff] %v520_v7  ;;  %v334_v24 = vrot.slane %v294_v9, 1  ;;  %v398_v16 = vrot.slane %v294_v9, 2  ;;  %v480_v18 = vrot.slane %v276_v4, 3  ;;  %v481_v25 = vrot.slane %v277_v8, 3 }
  0x33   : > { %v335_v19 = vrot.slane %v295_v10, 1  ;;  %v399_v21 = vrot.slane %v295_v10, 2  ;;  %v260_v22 = vadd.f32 %v236_v11, %v805_v23  ;;  %v261_v26 = vadd.f32 %v237_v14, %v813_v40 }
  0x34   : > { %v482_v27 = vsel %vm470_vm2, %v480_v18, %v481_v25  ;;  %v203_v28 = vmul.f32 0.375, %v163_v52  ;;  %v218_v29 = vadd.f32 %v200_v41, %v755_v34  ;;  %v219_v30 = vadd.f32 %v201_v61, %v758_v35 }
  0x35   : > { %v336_v31 = vsel %vm324_vm0, %v334_v24, %v335_v19  ;;  %v400_v32 = vsel %vm388_vm1, %v398_v16, %v399_v21  ;;  %v377_v33 = vadd.f32 %v335_v19, %v277_v8  ;;  %v278_v37 = vmul.f32 0.125, %v260_v22  ;;  %v166_v24 = vld [vmem:[%s728_s13 + $0x90] sm:$0xff]  ;;  %v167_v19 = vld [vmem:[%s728_s13 + $0x98] sm:$0xf] }
  0x36   : > { %v376_v38 = vadd.f32 %v336_v31, %v276_v4  ;;  %v279_v39 = vmul.f32 0.125, %v261_v26  ;;  %v296_v42 = vmul.f32 0.375, %v260_v22  ;;  %v297_v43 = vmul.f32 0.375, %v261_v26 }
  0x37   : > { %v441_v44 = vadd.f32 %v399_v21, %v377_v33  ;;  %v483_v45 = vrot.slane %v278_v37, 3  ;;  %v238_v46 = vadd.f32 %v218_v29, %v202_v15  ;;  %v239_v47 = vadd.f32 %v219_v30, %v203_v28  ;;  %v168_v33 = vld [vmem:[%s728_s13 + $0xa0] sm:$0xff] }
  0x38   : > { %v440_v48 = vadd.f32 %v400_v32, %v376_v38  ;;  %v337_v49 = vrot.slane %v296_v42, 1  ;;  %v338_v34 = vrot.slane %v297_v43, 1  ;;  %v401_v35 = vrot.slane %v296_v42, 2 }
  0x39   : > { %v523_v50 = vadd.f32 %v481_v25, %v441_v44  ;;  %v402_v51 = vrot.slane %v297_v43, 2  ;;  %v484_v17 = vrot.slane %v279_v39, 3  ;;  %v262_v52 = vadd.f32 %v238_v46, %v820_v5  ;;  %v169_v46 = vld [vmem:[%s728_s13 + $0xa8] sm:$0xf] }
  0x3a   : > { %v522_v53 = vadd.f32 %v482_v27, %v440_v48  ;;  %v339_v54 = vsel %vm324_vm0, %v337_v49, %v338_v34  ;;  %v379_v55 = vadd.f32 %v338_v34, %v279_v39  ;;  %v263_v56 = vadd.f32 %v239_v47, %v823_v6 }
  0x3b   : > { %541 = vst [vmem:[%s778_s17 + $0x38] sm:$0x1] %v523_v50  ;;  %v378_v57 = vadd.f32 %v339_v54, %v278_v37  ;;  %v403_v58 = vsel %vm388_vm1, %v401_v35, %v402_v51  ;;  %v485_v59 = vsel %vm470_vm2, %v483_v45, %v484_v17  ;;  %v280_v13 = vmul.f32 0.125, %v262_v52 }
  0x3c   : > { %540 = vst [vmem:[%s778_s17 + $0x30] sm:$0xff] %v522_v53  ;;  %v443_v41 = vadd.f32 %v402_v51, %v379_v55  ;;  %v281_v61 = vmul.f32 0.125, %v263_v56  ;;  %v298_v62 = vmul.f32 0.375, %v262_v52  ;;  %v299_v63 = vmul.f32 0.375, %v263_v56 }
  0x3d   : > { %v442_v0 = vadd.f32 %v403_v58, %v378_v57  ;;  %v486_v1 = vrot.slane %v280_v13, 3  ;;  %v204_v2 = vmul.f32 0.375, %v808_v60  ;;  %v205_v3 = vmul.f32 0.375, %v811_v12 }
  0x3e   : > { %v525_v7 = vadd.f32 %v484_v17, %v443_v41  ;;  %v340_v4 = vrot.slane %v298_v62, 1  ;;  %v341_v8 = vrot.slane %v299_v63, 1  ;;  %v404_v9 = vrot.slane %v298_v62, 2 }
  0x3f   : > { %v524_v10 = vadd.f32 %v485_v59, %v442_v0  ;;  %v405_v11 = vrot.slane %v299_v63, 2  ;;  %v487_v14 = vrot.slane %v281_v61, 3  ;;  %v220_v16 = vadd.f32 %v202_v15, %v784_v20 }
  0x40   : > { %543 = vst [vmem:[%s778_s17 + $0x48] sm:$0x1] %v525_v7  ;;  %v342_v18 = vsel %vm324_vm0, %v340_v4, %v341_v8  ;;  %v381_v25 = vadd.f32 %v341_v8, %v281_v61  ;;  %v221_v60 = vadd.f32 %v203_v28, %v790_v36  ;;  %v246_v12 = vmul.f32 0.125, %v166_v24 }
  0x41   : > { %542 = vst [vmem:[%s778_s17 + $0x40] sm:$0xff] %v524_v10  ;;  %v380_v21 = vadd.f32 %v342_v18, %v280_v13  ;;  %v406_v22 = vsel %vm388_vm1, %v404_v9, %v405_v11  ;;  %v488_v26 = vsel %vm470_vm2, %v486_v1, %v487_v14  ;;  %v240_v27 = vadd.f32 %v220_v16, %v204_v2 }
  0x42   : > { %v445_v29 = vadd.f32 %v405_v11, %v381_v25  ;;  %v241_v30 = vadd.f32 %v221_v60, %v205_v3  ;;  %v247_v20 = vmul.f32 0.125, %v167_v19  ;;  %v206_v15 = vmul.f32 0.375, %v166_v24  ;;  %v171_v11 = vld [vmem:[%s728_s13 + $0xb8] sm:$0xf] }
  0x43   : > { %v444_v31 = vadd.f32 %v406_v22, %v380_v21  ;;  %v264_v32 = vadd.f32 %v246_v12, %v240_v27  ;;  %v207_v37 = vmul.f32 0.375, %v167_v19  ;;  %v222_v36 = vadd.f32 %v204_v2, %v805_v23  ;;  %v170_v2 = vld [vmem:[%s728_s13 + $0xb0] sm:$0xff] }
  0x44   : > { %v527_v28 = vadd.f32 %v487_v14, %v445_v29  ;;  %v265_v38 = vadd.f32 %v247_v20, %v241_v30  ;;  %v223_v39 = vadd.f32 %v205_v3, %v813_v40  ;;  %v248_v42 = vmul.f32 0.125, %v168_v33 }
  0x45   : > { %v526_v43 = vadd.f32 %v488_v26, %v444_v31  ;;  %v282_v44 = vmul.f32 0.125, %v264_v32  ;;  %v300_v45 = vmul.f32 0.375, %v264_v32  ;;  %v242_v47 = vadd.f32 %v222_v36, %v206_v15 }
  0x46   : > { %545 = vst [vmem:[%s778_s17 + $0x58] sm:$0x1] %v527_v28  ;;  %v283_v48 = vmul.f32 0.125, %v265_v38  ;;  %v301_v49 = vmul.f32 0.375, %v265_v38  ;;  %v243_v34 = vadd.f32 %v223_v39, %v207_v37  ;;  %v249_v35 = vmul.f32 0.125, %v169_v46 }
  0x47   : > { %544 = vst [vmem:[%s778_s17 + $0x50] sm:$0xff] %v526_v43  ;;  %v343_v50 = vrot.slane %v300_v45, 1  ;;  %v407_v51 = vrot.slane %v300_v45, 2  ;;  %v489_v17 = vrot.slane %v282_v44, 3  ;;  %v266_v23 = vadd.f32 %v248_v42, %v242_v47 }
  0x48   : > { %v344_v52 = vrot.slane %v301_v49, 1  ;;  %v408_v53 = vrot.slane %v301_v49, 2  ;;  %v490_v40 = vrot.slane %v283_v48, 3  ;;  %v267_v54 = vadd.f32 %v249_v35, %v243_v34 }
  0x49   : > { %v284_v55 = vmul.f32 0.125, %v266_v23  ;;  %v302_v56 = vmul.f32 0.375, %v266_v23  ;;  %v224_v57 = vadd.f32 %v206_v15, %v820_v5  ;;  %v225_v58 = vadd.f32 %v207_v37, %v823_v6 }
  0x4a   : > { %v345_v59 = vsel %vm324_vm0, %v343_v50, %v344_v52  ;;  %v409_v13 = vsel %vm388_vm1, %v407_v51, %v408_v53  ;;  %v491_v41 = vsel %vm470_vm2, %v489_v17, %v490_v40  ;;  %v383_v61 = vadd.f32 %v344_v52, %v283_v48 }
  0x4b   : > { %v382_v62 = vadd.f32 %v345_v59, %v282_v44  ;;  %v285_v63 = vmul.f32 0.125, %v267_v54  ;;  %v303_v0 = vmul.f32 0.375, %v267_v54  ;;  %v346_v1 = vrot.slane %v302_v56, 1 }
  0x4c   : > { %v447_v3 = vadd.f32 %v408_v53, %v383_v61  ;;  %v410_v7 = vrot.slane %v302_v56, 2  ;;  %v492_v4 = vrot.slane %v284_v55, 3  ;;  %v226_v5 = vmul.f32 0.375, %v168_v33 }
  0x4d   : > { %v446_v8 = vadd.f32 %v409_v13, %v382_v62  ;;  %v347_v6 = vrot.slane %v303_v0, 1  ;;  %v411_v9 = vrot.slane %v303_v0, 2  ;;  %v493_v10 = vrot.slane %v285_v63, 3 }
  0x4e   : > { %v529_v14 = vadd.f32 %v490_v40, %v447_v3  ;;  %v227_v24 = vmul.f32 0.375, %v169_v46  ;;  %v244_v16 = vadd.f32 %v226_v5, %v224_v57  ;;  %v250_v18 = vmul.f32 0.125, %v170_v2 }
  0x4f   : > { %v528_v25 = vadd.f32 %v491_v41, %v446_v8  ;;  %v348_v19 = vsel %vm324_vm0, %v346_v1, %v347_v6  ;;  %v412_v60 = vsel %vm388_vm1, %v410_v7, %v411_v9  ;;  %v385_v21 = vadd.f32 %v347_v6, %v285_v63 }
  0x50   : > { %547 = vst [vmem:[%s778_s17 + $0x68] sm:$0x1] %v529_v14  ;;  %v384_v12 = vadd.f32 %v348_v19, %v284_v55  ;;  %v245_v22 = vadd.f32 %v227_v24, %v225_v58  ;;  %v251_v26 = vmul.f32 0.125, %v171_v11  ;;  %v494_v27 = vsel %vm470_vm2, %v492_v4, %v493_v10 }
  0x51   : > { %546 = vst [vmem:[%s778_s17 + $0x60] sm:$0xff] %v528_v25  ;;  %v268_v29 = vadd.f32 %v250_v18, %v244_v16  ;;  %v449_v20 = vadd.f32 %v411_v9, %v385_v21 }
  0x52   : > { %v448_v30 = vadd.f32 %v412_v60, %v384_v12  ;;  %v269_v15 = vadd.f32 %v251_v26, %v245_v22 }
  0x53   : > { %v286_v31 = vmul.f32 0.125, %v268_v29  ;;  %v304_v32 = vmul.f32 0.375, %v268_v29  ;;  %v531_v37 = vadd.f32 %v493_v10, %v449_v20 }
  0x54   : > { %v530_v33 = vadd.f32 %v494_v27, %v448_v30  ;;  %v287_v36 = vmul.f32 0.125, %v269_v15  ;;  %v305_v28 = vmul.f32 0.375, %v269_v15 }
  0x55   : > { %v349_v38 = vrot.slane %v304_v32, 1  ;;  %v413_v39 = vrot.slane %v304_v32, 2  ;;  %549 = vst [vmem:[%s778_s17 + $0x78] sm:$0x1] %v531_v37  ;;  %v495_v44 = vrot.slane %v286_v31, 3 }
  0x56   : > { %548 = vst [vmem:[%s778_s17 + $0x70] sm:$0xff] %v530_v33  ;;  %v350_v42 = vrot.slane %v305_v28, 1  ;;  %v414_v43 = vrot.slane %v305_v28, 2  ;;  %v496_v45 = vrot.slane %v287_v36, 3 }
  0x58   : > { %v351_v46 = vsel %vm324_vm0, %v349_v38, %v350_v42  ;;  %v415_v47 = vsel %vm388_vm1, %v413_v39, %v414_v43  ;;  %v387_v48 = vadd.f32 %v350_v42, %v287_v36  ;;  %v497_v34 = vsel %vm470_vm2, %v495_v44, %v496_v45 }
  0x59   : > { %v386_v49 = vadd.f32 %v351_v46, %v286_v31 }
  0x5a   : > { %v451_v35 = vadd.f32 %v414_v43, %v387_v48 }
  0x5b   : > { %v450_v50 = vadd.f32 %v415_v47, %v386_v49 }
  0x5c   : > { %v533_v51 = vadd.f32 %v496_v45, %v451_v35 }
  0x5d   : > { %v532_v17 = vadd.f32 %v497_v34, %v450_v50 }
  0x5e   : > { %551 = vst [vmem:[%s778_s17 + $0x88] sm:$0x1] %v533_v51 }
  0x5f   : > { %550 = vst [vmem:[%s778_s17 + $0x80] sm:$0xff] %v532_v17 }
  0x60 PF: > { %s11_s8 = sadd.s32 1, %s692_s8   ;;  %s888_s6 = smov %s688_s7 }
  0x61   : > { %p8_p5 = scmp.ge.s32.totalorder %s11_s8, 4   ;;  %s889_s7 = smov %s891_s9 }
  0x63   :  { %10 = sbr.rel (!%p8_p5) target bundleno = 2 (0x2), region = 54 }

// kernel: _lambda_.22
= control target key start
LH: loop header
LB: loop body
LE: loop exit
PB: predicated region body
PF: predicated region fallthrough
CT: control target
= control target key end

     0   :  { %s1580_s12 = smov 0   ;;  %s1582_s13 = smov 0   ;;  %s1836_s0 = inlined_call_operand.vmem [shape: bf16[128,1152], index: 0, kind: input, shape index: {}]   ;;  %s1837_s1 = inlined_call_operand.vmem [shape: bf16[1152,128], index: 1, kind: input, shape index: {}]   ;;  %s1838_s2 = inlined_call_operand.vmem [shape: f32[1,128], index: 2, kind: input, shape index: {}]   ;;  %s1839_s3 = inlined_call_operand.vmem [shape: f32[128,128], index: 3, kind: output, shape index: {}]  }
   0x1   :  { %s1584_s14 = smov 0   ;;  %s1586_s15 = smov 0  }
   0x2   :  { %s1588_s16 = smov 0  }
   0x3 LB: > { %s25_s17 = sadd.s32 1, %s1553_s15  ;;  %p48_p1 = scmp.ne.s32.totalorder %s1545_s13, %s1541_s12  ;;  %s1557_s16 = sphi %s1588_s16, %s13_s16   ;;  %s1553_s15 = sphi %s1586_s15, %s1843_s15   ;;  %s1549_s14 = sphi %s1584_s14, %s1842_s14   ;;  %s1545_s13 = sphi %s1582_s13, %s1841_s13   ;;  %s1541_s12 = sphi %s1580_s12, %s1840_s12  }
   0x4   : > { %p26_p0 = scmp.ge.s32.totalorder %s25_s17, 3  ;;  %p49_p2 = scmp.eq.s32.totalorder %s1557_s16, 0 }
   0x5   : > { %s41_s19 = sadd.s32 1, %s1545_s13  ;;  %p1216_p5 = scmp.ge.s32.totalorder %s1557_s16, 3 }
   0x6   : > { %s1845_s17 = smov (%p26_p0, %s25_s17), 0  ;;  %p50_p3 = por %p49_p2, %p48_p1 }
   0x7   : > { %s37_s18 = ssub.s32 %s1553_s15, %s1845_s17  ;;  %162 = sbr.rel (%p1216_p5) target bundleno = 37 (0x25), region = 20 }
   0x8   : > { %p39_p4 = scmp.eq.s32.totalorder %s37_s18, 0 }
   0xa   : > { %s1615_s20 = scalar_select %p39_p4, %s1545_s13, %s41_s19  }
   0xe   : > { %165 = sbr.rel (!%p50_p3) target bundleno = 37 (0x25), region = 24  ;;  %s167_s21 = sand.u32 (%p50_p3), 1, %s1545_s13  }
   0xf   : > { %s1307_s22 = smul.u32 (%p50_p3), 12, %s1553_s15 }
  0x10   : > { %s1420_s23 = smul.u32 (%p50_p3), 192, %s167_s21 }
  0x11   : > { %s1623_s26 = scalar_lea.vmem (%p50_p3), %s1836_s0, %s1307_s22 }
  0x12   : > { %v190_v0 = vld [vmem:[%s1623_s26] sm:$0xff] (%p50_p3)  ;;  %v194_v2 = vld [vmem:[%s1623_s26 + $0x48] sm:$0xff] (%p50_p3)  ;;  %s1628_s27 = scalar_lea.vmem (%p50_p3), [#allocation3], %s1420_s23  ;;  %v198_v4 = vld [vmem:[%s1623_s26 + $0x90] sm:$0xff] (%p50_p3) }
  0x13   : > { %v192_v1 = vld [vmem:[%s1623_s26 + $0x24] sm:$0xff] (%p50_p3)  ;;  %191 = vst [vmem:[%s1628_s27] sm:$0xff] (%p50_p3), %v190_v0  ;;  %195 = vst [vmem:[%s1628_s27 + $0x18] sm:$0xff] (%p50_p3), %v194_v2  ;;  %v196_v3 = vld [vmem:[%s1623_s26 + $0x6c] sm:$0xff] (%p50_p3) }
  0x14   : > { %193 = vst [vmem:[%s1628_s27 + $0xc] sm:$0xff] (%p50_p3), %v192_v1  ;;  %v200_v5 = vld [vmem:[%s1623_s26 + $0xb4] sm:$0xff] (%p50_p3)  ;;  %197 = vst [vmem:[%s1628_s27 + $0x24] sm:$0xff] (%p50_p3), %v196_v3  ;;  %v204_v7 = vld [vmem:[%s1623_s26 + $0xfc] sm:$0xff] (%p50_p3) }
  0x15   : > { %199 = vst [vmem:[%s1628_s27 + $0x30] sm:$0xff] %v198_v4  ;;  %201 = vst [vmem:[%s1628_s27 + $0x3c] sm:$0xff] %v200_v5  ;;  %v202_v6 = vld [vmem:[%s1623_s26 + $0xd8] sm:$0xff]  ;;  %v206_v8 = vld [vmem:[%s1623_s26 + $0x120] sm:$0xff] }
  0x16   : > { %203 = vst [vmem:[%s1628_s27 + $0x48] sm:$0xff] %v202_v6  ;;  %205 = vst [vmem:[%s1628_s27 + $0x54] sm:$0xff] %v204_v7  ;;  %v208_v9 = vld [vmem:[%s1623_s26 + $0x144] sm:$0xff]  ;;  %v212_v11 = vld [vmem:[%s1623_s26 + $0x18c] sm:$0xff] }
  0x17   : > { %207 = vst [vmem:[%s1628_s27 + $0x60] sm:$0xff] %v206_v8  ;;  %v210_v10 = vld [vmem:[%s1623_s26 + $0x168] sm:$0xff]  ;;  %209 = vst [vmem:[%s1628_s27 + $0x6c] sm:$0xff] %v208_v9  ;;  %v214_v12 = vld [vmem:[%s1623_s26 + $0x1b0] sm:$0xff] }
  0x18   : > { %211 = vst [vmem:[%s1628_s27 + $0x78] sm:$0xff] %v210_v10  ;;  %213 = vst [vmem:[%s1628_s27 + $0x84] sm:$0xff] %v212_v11  ;;  %v216_v13 = vld [vmem:[%s1623_s26 + $0x1d4] sm:$0xff]  ;;  %v220_v15 = vld [vmem:[%s1623_s26 + $0x21c] sm:$0xff] }
  0x19   : > { %v218_v14 = vld [vmem:[%s1623_s26 + $0x1f8] sm:$0xff]  ;;  %215 = vst [vmem:[%s1628_s27 + $0x90] sm:$0xff] %v214_v12  ;;  %217 = vst [vmem:[%s1628_s27 + $0x9c] sm:$0xff] %v216_v13  ;;  %v1218_v16 = vld [vmem:[%s1623_s26 + $0x8] sm:$0xf] }
  0x1a   : > { %219 = vst [vmem:[%s1628_s27 + $0xa8] sm:$0xff] %v218_v14  ;;  %v1220_v17 = vld [vmem:[%s1623_s26 + $0x2c] sm:$0xf]  ;;  %221 = vst [vmem:[%s1628_s27 + $0xb4] sm:$0xff] %v220_v15  ;;  %v1222_v18 = vld [vmem:[%s1623_s26 + $0x50] sm:$0xf] }
  0x1b   : > { %1219 = vst [vmem:[%s1628_s27 + $0x8] sm:$0xf] %v1218_v16  ;;  %1221 = vst [vmem:[%s1628_s27 + $0x14] sm:$0xf] %v1220_v17  ;;  %v1224_v19 = vld [vmem:[%s1623_s26 + $0x74] sm:$0xf] }
  0x1c   : > { %v1226_v20 = vld [vmem:[%s1623_s26 + $0x98] sm:$0xf]  ;;  %1223 = vst [vmem:[%s1628_s27 + $0x20] sm:$0xf] %v1222_v18  ;;  %1225 = vst [vmem:[%s1628_s27 + $0x2c] sm:$0xf] %v1224_v19 }
  0x1d   : > { %1227 = vst [vmem:[%s1628_s27 + $0x38] sm:$0xf] %v1226_v20  ;;  %v1228_v21 = vld [vmem:[%s1623_s26 + $0xbc] sm:$0xf]  ;;  %v1230_v22 = vld [vmem:[%s1623_s26 + $0xe0] sm:$0xf] }
  0x1e   : > { %v1232_v23 = vld [vmem:[%s1623_s26 + $0x104] sm:$0xf]  ;;  %1229 = vst [vmem:[%s1628_s27 + $0x44] sm:$0xf] %v1228_v21  ;;  %1231 = vst [vmem:[%s1628_s27 + $0x50] sm:$0xf] %v1230_v22 }
  0x1f   : > { %1233 = vst [vmem:[%s1628_s27 + $0x5c] sm:$0xf] %v1232_v23  ;;  %v1234_v24 = vld [vmem:[%s1623_s26 + $0x128] sm:$0xf]  ;;  %v1236_v25 = vld [vmem:[%s1623_s26 + $0x14c] sm:$0xf] }
  0x20   : > { %v1238_v26 = vld [vmem:[%s1623_s26 + $0x170] sm:$0xf]  ;;  %1235 = vst [vmem:[%s1628_s27 + $0x68] sm:$0xf] %v1234_v24  ;;  %1237 = vst [vmem:[%s1628_s27 + $0x74] sm:$0xf] %v1236_v25 }
  0x21   : > { %1239 = vst [vmem:[%s1628_s27 + $0x80] sm:$0xf] %v1238_v26  ;;  %v1240_v27 = vld [vmem:[%s1623_s26 + $0x194] sm:$0xf]  ;;  %v1242_v28 = vld [vmem:[%s1623_s26 + $0x1b8] sm:$0xf] }
  0x22   : > { %v1244_v29 = vld [vmem:[%s1623_s26 + $0x1dc] sm:$0xf]  ;;  %1241 = vst [vmem:[%s1628_s27 + $0x8c] sm:$0xf] %v1240_v27  ;;  %1243 = vst [vmem:[%s1628_s27 + $0x98] sm:$0xf] %v1242_v28 }
  0x23   : > { %1245 = vst [vmem:[%s1628_s27 + $0xa4] sm:$0xf] %v1244_v29  ;;  %v1246_v30 = vld [vmem:[%s1623_s26 + $0x200] sm:$0xf]  ;;  %v1248_v31 = vld [vmem:[%s1623_s26 + $0x224] sm:$0xf] }
  0x24   : > { %1247 = vst [vmem:[%s1628_s27 + $0xb0] sm:$0xf] %v1246_v30  ;;  %1249 = vst [vmem:[%s1628_s27 + $0xbc] sm:$0xf] %v1248_v31 }
  0x25 PF: > { %p1250_p6 = scmp.ge.s32.totalorder %s1557_s16, 1  ;;  %p277_p7 = scmp.lt.s32.totalorder %s1557_s16, 4 }
  0x27   : > { %p278_p8 = pnand %p1250_p6, %p277_p7 }
  0x28   : > { %s284_s28 = sand.u32 (!%p278_p8), 1, %s1541_s12   ;;  %s323_s29 = smul.u32 (!%p278_p8), 48, %s1549_s14 }
  0x29   : > { %281 = sbr.rel (%p278_p8) target bundleno = 386 (0x182), region = 54  ;;  %p1252_p10 = scmp.ne.s32.totalorder (!%p278_p8), %s1549_s14, 0 }
  0x2a   : > { %s1421_s30 = smul.u32 (!%p278_p8), 192, %s284_s28  ;;  %p324_p9 = scmp.lt.s32.totalorder (!%p278_p8), %s323_s29, 143 }
  0x2c   : > { %s1700_s8 = scalar_lea.vmem (!%p278_p8), [#allocation3], %s1421_s30 }
  0x30   : > { %s1847_s29 = smov (!%p324_p9, %s323_s29), 143  ;;  %348 = sbr.rel (%p1252_p10) target bundleno = 58 (0x3a), region = 62 }
  0x31   : > { %s1251_s4 = sshll.u32 %s1847_s29, 2  ;;  %v1559_v32 = vmov (!%p1252_p10), 0.0  }
  0x32   : > { %s1698_s7 = scalar_lea.vmem %s1837_s1, %s1251_s4  ;;  %349 = vst [vmem:[#allocation2] sm:$0xff] (!%p1252_p10), %v1559_v32  ;;  %350 = vst [vmem:[#allocation2 + $0x8] sm:$0xff] (!%p1252_p10), %v1559_v32 }
  0x33   : > { %351 = vst [vmem:[#allocation2 + $0x10] sm:$0xff] (!%p1252_p10), %v1559_v32  ;;  %352 = vst [vmem:[#allocation2 + $0x18] sm:$0xff] (!%p1252_p10), %v1559_v32 }
  0x34   : > { %353 = vst [vmem:[#allocation2 + $0x20] sm:$0xff] (!%p1252_p10), %v1559_v32  ;;  %354 = vst [vmem:[#allocation2 + $0x28] sm:$0xff] (!%p1252_p10), %v1559_v32 }
  0x35   : > { %355 = vst [vmem:[#allocation2 + $0x30] sm:$0xff] (!%p1252_p10), %v1559_v32  ;;  %356 = vst [vmem:[#allocation2 + $0x38] sm:$0xff] (!%p1252_p10), %v1559_v32 }
  0x36   : > { %357 = vst [vmem:[#allocation2 + $0x40] sm:$0xff] (!%p1252_p10), %v1559_v32  ;;  %358 = vst [vmem:[#allocation2 + $0x48] sm:$0xff] (!%p1252_p10), %v1559_v32 }
  0x37   : > { %359 = vst [vmem:[#allocation2 + $0x50] sm:$0xff] %v1559_v32  ;;  %360 = vst [vmem:[#allocation2 + $0x58] sm:$0xff] %v1559_v32 }
  0x38   : > { %361 = vst [vmem:[#allocation2 + $0x60] sm:$0xff] %v1559_v32  ;;  %362 = vst [vmem:[#allocation2 + $0x68] sm:$0xff] %v1559_v32 }
  0x39   : > { %363 = vst [vmem:[#allocation2 + $0x70] sm:$0xff] %v1559_v32  ;;  %364 = vst [vmem:[#allocation2 + $0x78] sm:$0xff] %v1559_v32 }
  0x3a PF: > { %v1463_v33 = vld [vmem:[%s1698_s7 + $0x40] sm:$0xff]   ;;  %v1466_v36 = vld [vmem:[%s1698_s7 + $0x48] sm:$0xff]   ;;  %v1469_v39 = vld [vmem:[%s1698_s7 + $0x50] sm:$0xff]   ;;  %p1301_p11 = scmp.ne.s32.totalorder %s1549_s14, 2 }
  0x3b   : > { %v1464_v34 = vld [vmem:[%s1698_s7] sm:$0xff]   ;;  %1308 = vmatprep.subr.bf16.mxu0 %v1463_v33  ;;  %v1467_v37 = vld [vmem:[%s1698_s7 + $0x8] sm:$0xff]   ;;  %v1470_v40 = vld [vmem:[%s1698_s7 + $0x10] sm:$0xff]  }
  0x3c   : > { %v1465_v35 = vld [vmem:[%s1698_s7 + $0x80] sm:$0xff]   ;;  %1309 = vmatpush3.bf16.msra.mxu0 %v1464_v34  ;;  %v1468_v38 = vld [vmem:[%s1698_s7 + $0x88] sm:$0xff]   ;;  %v1471_v41 = vld [vmem:[%s1698_s7 + $0x90] sm:$0xff]  }
  0x3d   : > { %1388 = vmatprep.subr.bf16.mxu1 %v1465_v35  ;;  %1310 = vmatprep.subr.bf16.mxu0 %v1466_v36  ;;  %v1472_v42 = vld [vmem:[%s1698_s7 + $0x58] sm:$0xff]   ;;  %v1475_v45 = vld [vmem:[%s1698_s7 + $0x60] sm:$0xff]   ;;  %v1478_v48 = vld [vmem:[%s1698_s7 + $0x68] sm:$0xff]  }
  0x3e   : > { %1389 = vmatpush3.bf16.msra.mxu1 %v1465_v35  ;;  %v1473_v43 = vld [vmem:[%s1698_s7 + $0x18] sm:$0xff]   ;;  %v1477_v46 = vld [vmem:[%s1698_s7 + $0xa0] sm:$0xff]   ;;  %v1480_v49 = vld [vmem:[%s1698_s7 + $0xa8] sm:$0xff]  }
  0x3f   : > { %1390 = vmatprep.subr.bf16.mxu1 %v1468_v38  ;;  %v1474_v44 = vld [vmem:[%s1698_s7 + $0x98] sm:$0xff]   ;;  %v1476_v47 = vld [vmem:[%s1698_s7 + $0x20] sm:$0xff]   ;;  %v1479_v50 = vld [vmem:[%s1698_s7 + $0x28] sm:$0xff]  }
  0x40   : > { %1311 = vmatpush3.bf16.msra.mxu0 %v1467_v37  ;;  %v1481_v51 = vld [vmem:[%s1698_s7 + $0x70] sm:$0xff]   ;;  %v1484_v54 = vld [vmem:[%s1698_s7 + $0x78] sm:$0xff]   ;;  %v1498_v62 = vld [vmem:[%s1700_s8 + $0x38] ss:$12 sps:$4 sm:$0xff]  }
  0x41   : > { %1312 = vmatprep.subr.bf16.mxu0 %v1469_v39  ;;  %v1482_v52 = vld [vmem:[%s1698_s7 + $0x30] sm:$0xff]   ;;  %v1486_v55 = vld [vmem:[%s1698_s7 + $0xb8] sm:$0xff]   ;;  %v1494_v63 = vld [vmem:[%s1700_s8 + $0x18] ss:$12 sps:$4 sm:$0xff]  }
  0x42   : > { %1391 = vmatpush3.bf16.msra.mxu1 %v1468_v38  ;;  %v1483_v53 = vld [vmem:[%s1698_s7 + $0xb0] sm:$0xff]   ;;  %v1489_v56 = vld [vmem:[%s1700_s8 + $0x4] ss:$12 sps:$4 sm:$0xff]   ;;  %v1495_v0 = vld [vmem:[%s1700_s8 + $0x34] ss:$12 sps:$4 sm:$0xff]  }
  0x43   : > { %1392 = vmatprep.subr.bf16.mxu1 %v1471_v41  ;;  %v1490_v57 = vld [vmem:[%s1700_s8 + $0x8] ss:$12 sps:$4 sm:$0xff]   ;;  %765 = vmatprep.mubr.bf16.mxu0 %v1489_v56  ;;  %v1487_v59 = vld [vmem:[%s1700_s8] ss:$12 sps:$4 sm:$0xff]   ;;  %v1499_v1 = vld [vmem:[%s1700_s8 + $0x50] ss:$12 sps:$4 sm:$0xff]  }
  0x44   : > { %1313 = vmatpush3.bf16.msra.mxu0 %v1470_v40  ;;  %v1485_v58 = vld [vmem:[%s1698_s7 + $0x38] sm:$0xff]   ;;  %1404 = vmatprep.mubr.bf16.mxu1 %v1490_v57  ;;  %v1492_v60 = vld [vmem:[%s1700_s8 + $0x1c] ss:$12 sps:$4 sm:$0xff]   ;;  %v1491_v61 = vld [vmem:[%s1700_s8 + $0x20] ss:$12 sps:$4 sm:$0xff]  }
  0x45   : > { %1314 = vmatprep.subr.bf16.mxu0 %v1472_v42  ;;  %v1506_v2 = vld [vmem:[%s1700_s8 + $0x68] ss:$12 sps:$4 sm:$0xff]   ;;  %v1497_v3 = vld [vmem:[%s1700_s8 + $0x30] ss:$12 sps:$4 sm:$0xff]   ;;  %v1500_v4 = vld [vmem:[%s1700_s8 + $0x4c] ss:$12 sps:$4 sm:$0xff]  }
  0x46   : > { %1393 = vmatpush3.bf16.msra.mxu1 %v1471_v41  ;;  %v1507_v5 = vld [vmem:[%s1700_s8 + $0x80] ss:$12 sps:$4 sm:$0xff]   ;;  %v1514_v6 = vld [vmem:[%s1700_s8 + $0x98] ss:$12 sps:$4 sm:$0xff]   ;;  %v1502_v7 = vld [vmem:[%s1700_s8 + $0x48] ss:$12 sps:$4 sm:$0xff]  }
  0x47   : > { %1394 = vmatprep.subr.bf16.mxu1 %v1474_v44  ;;  %v1503_v8 = vld [vmem:[%s1700_s8 + $0x64] ss:$12 sps:$4 sm:$0xff]   ;;  %v1505_v10 = vld [vmem:[%s1700_s8 + $0x60] ss:$12 sps:$4 sm:$0xff]   ;;  %v1508_v11 = vld [vmem:[%s1700_s8 + $0x7c] ss:$12 sps:$4 sm:$0xff]  }
  0x48   : > { %1315 = vmatpush3.bf16.msra.mxu0 %v1473_v43  ;;  %v1515_v9 = vld [vmem:[%s1700_s8 + $0xb0] ss:$12 sps:$4 sm:$0xff]   ;;  %v1510_v12 = vld [vmem:[%s1700_s8 + $0x78] ss:$12 sps:$4 sm:$0xff]   ;;  %v1511_v13 = vld [vmem:[%s1700_s8 + $0x94] ss:$12 sps:$4 sm:$0xff]  }
  0x49   : > { %1316 = vmatprep.subr.bf16.mxu0 %v1475_v45  ;;  %v1513_v14 = vld [vmem:[%s1700_s8 + $0x90] ss:$12 sps:$4 sm:$0xff]   ;;  %v1516_v15 = vld [vmem:[%s1700_s8 + $0xac] ss:$12 sps:$4 sm:$0xff]   ;;  %v1518_v16 = vld [vmem:[%s1700_s8 + $0xa8] ss:$12 sps:$4 sm:$0xff]  }
  0x4a   : > { %1395 = vmatpush3.bf16.msra.mxu1 %v1474_v44  ;;  %v365_v23 = vld [vmem:[#allocation2] sm:$0xff]  ;;  %v366_v28 = vld [vmem:[#allocation2 + $0x8] sm:$0xff]  ;;  %v367_v38 = vld [vmem:[#allocation2 + $0x10] sm:$0xff] }
  0x4b   : > { %1396 = vmatprep.subr.bf16.mxu1 %v1477_v46  ;;  %v368_v44 = vld [vmem:[#allocation2 + $0x18] sm:$0xff] }
  0x4c   : > { %1317 = vmatpush3.bf16.msra.mxu0 %v1476_v47 }
  0x4d   : > { %1318 = vmatprep.subr.bf16.mxu0 %v1478_v48 }
  0x4e   : > { %1397 = vmatpush3.bf16.msra.mxu1 %v1477_v46 }
  0x4f   : > { %1398 = vmatprep.subr.bf16.mxu1 %v1480_v49 }
  0x50   : > { %1319 = vmatpush3.bf16.msra.mxu0 %v1479_v50 }
  0x51   : > { %1320 = vmatprep.subr.bf16.mxu0 %v1481_v51 }
  0x52   : > { %1399 = vmatpush3.bf16.msra.mxu1 %v1480_v49 }
  0x53   : > { %1400 = vmatprep.subr.bf16.mxu1 %v1483_v53 }
  0x54   : > { %1321 = vmatpush3.bf16.msra.mxu0 %v1482_v52 }
  0x55   : > { %1322 = vmatprep.subr.bf16.mxu0 %v1484_v54 }
  0x56   : > { %1401 = vmatpush3.bf16.msra.mxu1 %v1483_v53 }
  0x57   : > { %1402 = vmatprep.subr.bf16.mxu1 %v1486_v55 }
  0x58   : > { %1323 = vmatpush3.bf16.msra.mxu0 %v1485_v58 }
  0x5a   : > { %1403 = vmatpush3.bf16.msra.mxu1 %v1486_v55  ;;  %v369_v55 = vld [vmem:[#allocation2 + $0x20] sm:$0xff] }
  0x5b   : > { %766 = vmatmul.mubr.bf16.vlgmr.msra.gmra.mrb[0].mxu0 %v1487_v59 }
  0x5c   : > { %773 = vmatprep.mubr.bf16.mxu0 %v1492_v60  ;;  %v370_v60 = vld [vmem:[#allocation2 + $0x28] sm:$0xff] }
  0x5d   : > { %1405 = vmatmul.mubr.bf16.vlgmr.msra.gmra.mrb[0].mxu1 %v1491_v61 }
  0x5e   : > { %1408 = vmatprep.mubr.bf16.mxu1 %v1498_v62 }
  0x63   : > { %774 = vmatmul.mubr.bf16.gmra.mrb[4].mxu0 %v1494_v63 }
  0x64   : > { %781 = vmatprep.mubr.bf16.mxu0 %v1495_v0 }
  0x65   : > { %1409 = vmatmul.mubr.bf16.gmra.mrb[4].mxu1 %v1499_v1 }
  0x66   : > { %1412 = vmatprep.mubr.bf16.mxu1 %v1506_v2 }
  0x6b   : > { %782 = vmatmul.mubr.bf16.gmra.mrb[8].mxu0 %v1497_v3 }
  0x6c   : > { %789 = vmatprep.mubr.bf16.mxu0 %v1500_v4 }
  0x6d   : > { %1413 = vmatmul.mubr.bf16.gmra.mrb[8].mxu1 %v1507_v5 }
  0x6e   : > { %1416 = vmatprep.mubr.bf16.mxu1 %v1514_v6  ;;  %v371_v6 = vld [vmem:[#allocation2 + $0x30] sm:$0xff] }
  0x73   : > { %790 = vmatmul.mubr.bf16.gmra.mrb[12].mxu0 %v1502_v7 }
  0x74   : > { %797 = vmatprep.mubr.bf16.mxu0 %v1503_v8 }
  0x75   : > { %1417 = vmatmul.mubr.bf16.gmra.mrb[12].mxu1 %v1515_v9 }
  0x7b   : > { %798 = vmatmul.mubr.bf16.gmra.mrb[16].mxu0 %v1505_v10 }
  0x7c   : > { %805 = vmatprep.mubr.bf16.mxu0 %v1508_v11 }
  0x83   : > { %806 = vmatmul.mubr.bf16.gmra.mrb[20].mxu0 %v1510_v12  ;;  %v372_v12 = vld [vmem:[#allocation2 + $0x38] sm:$0xff] }
  0x84   : > { %813 = vmatprep.mubr.bf16.mxu0 %v1511_v13 }
  0x8b   : > { %814 = vmatmul.mubr.bf16.gmra.mrb[24].mxu0 %v1513_v14 }
  0x8c   : > { %821 = vmatprep.mubr.bf16.mxu0 %v1516_v15 }
  0x93   : > { %822 = vmatmul.mubr.bf16.gmra.mrb[28].mxu0 %v1518_v16 }
 0x12e   : > { %v1324_v17 = vpop.f32.mrb[0].mxu0 }
 0x12f   : > { %v1325_v18 = vpop.f32.mrb[1].mxu0 }
 0x130   : > { %v1326_v19 = vadd.f32 %v1325_v18, %v1324_v17  ;;  %v1327_v20 = vpop.f32.mrb[2].mxu0  ;;  %v1406_v21 = vpop.f32.mrb[0].mxu1 }
 0x131   : > { %v1328_v22 = vpop.f32.mrb[3].mxu0  ;;  %v864_v24 = vpop.f32.mrb[1].mxu1 }
 0x132   : > { %v1329_v25 = vadd.f32 %v1328_v22, %v1327_v20  ;;  %v865_v26 = vadd.f32 %v1326_v19, %v864_v24  ;;  %v1407_v27 = vpop.f32.mrb[2].mxu1  ;;  %v373_v22 = vld [vmem:[#allocation2 + $0x40] sm:$0xff] }
 0x133   : > { %v867_v29 = vpop.f32.mrb[3].mxu1 }
 0x134   : > { %v927_v30 = vadd.f32 %v865_v26, %v365_v23  ;;  %v868_v31 = vadd.f32 %v1329_v25, %v867_v29  ;;  %v374_v25 = vld [vmem:[#allocation2 + $0x48] sm:$0xff] }
 0x136   : > { %943 = vst [vmem:[#allocation2] sm:$0xff] %v927_v30  ;;  %v928_v32 = vadd.f32 %v868_v31, %v366_v28  ;;  %v1330_v33 = vpop.f32.mrb[4].mxu0 }
 0x137   : > { %v1331_v34 = vpop.f32.mrb[5].mxu0 }
 0x138   : > { %944 = vst [vmem:[#allocation2 + $0x8] sm:$0xff] %v928_v32  ;;  %v1332_v35 = vadd.f32 %v1331_v34, %v1330_v33  ;;  %v1333_v36 = vpop.f32.mrb[6].mxu0  ;;  %v1410_v37 = vpop.f32.mrb[4].mxu1  ;;  %v375_v33 = vld [vmem:[#allocation2 + $0x50] sm:$0xff] }
 0x139   : > { %v1334_v39 = vpop.f32.mrb[7].mxu0  ;;  %v880_v40 = vpop.f32.mrb[5].mxu1 }
 0x13a   : > { %v873_v41 = vadd.f32 %v1406_v21, %v1332_v35  ;;  %v1335_v42 = vadd.f32 %v1334_v39, %v1333_v36  ;;  %v1411_v43 = vpop.f32.mrb[6].mxu1 }
 0x13b   : > { %v883_v45 = vpop.f32.mrb[7].mxu1 }
 0x13c   : > { %v929_v46 = vadd.f32 %v873_v41, %v367_v38  ;;  %v876_v47 = vadd.f32 %v1407_v27, %v1335_v42 }
 0x13e   : > { %945 = vst [vmem:[#allocation2 + $0x10] sm:$0xff] %v929_v46  ;;  %v930_v48 = vadd.f32 %v876_v47, %v368_v44  ;;  %v1336_v49 = vpop.f32.mrb[8].mxu0  ;;  %v377_v46 = vld [vmem:[#allocation2 + $0x60] sm:$0xff] }
 0x13f   : > { %v1337_v50 = vpop.f32.mrb[9].mxu0 }
 0x140   : > { %946 = vst [vmem:[#allocation2 + $0x18] sm:$0xff] %v930_v48  ;;  %v1338_v51 = vadd.f32 %v1337_v50, %v1336_v49  ;;  %v1339_v52 = vpop.f32.mrb[10].mxu0  ;;  %v1414_v53 = vpop.f32.mrb[8].mxu1  ;;  %v378_v49 = vld [vmem:[#allocation2 + $0x68] sm:$0xff] }
 0x141   : > { %v1340_v54 = vpop.f32.mrb[11].mxu0  ;;  %v896_v56 = vpop.f32.mrb[9].mxu1 }
 0x142   : > { %v1341_v57 = vadd.f32 %v1340_v54, %v1339_v52  ;;  %v881_v58 = vadd.f32 %v1338_v51, %v880_v40  ;;  %v1415_v59 = vpop.f32.mrb[10].mxu1 }
 0x143   : > { %v899_v61 = vpop.f32.mrb[11].mxu1 }
 0x144   : > { %v931_v62 = vadd.f32 %v881_v58, %v369_v55  ;;  %v884_v63 = vadd.f32 %v1341_v57, %v883_v45  ;;  %v379_v57 = vld [vmem:[#allocation2 + $0x70] sm:$0xff] }
 0x146   : > { %947 = vst [vmem:[#allocation2 + $0x20] sm:$0xff] %v931_v62  ;;  %v932_v0 = vadd.f32 %v884_v63, %v370_v60  ;;  %v1342_v1 = vpop.f32.mrb[12].mxu0 }
 0x147   : > { %v1343_v2 = vpop.f32.mrb[13].mxu0 }
 0x148   : > { %948 = vst [vmem:[#allocation2 + $0x28] sm:$0xff] %v932_v0  ;;  %v1344_v3 = vadd.f32 %v1343_v2, %v1342_v1  ;;  %v1345_v4 = vpop.f32.mrb[14].mxu0  ;;  %v1418_v5 = vpop.f32.mrb[12].mxu1  ;;  %v963_v1 = vld [vmem:[#allocation2] sm:$0xff] (!%p1301_p11)  ;;  %v1755_v2 = vld [vmem:[%s1838_s2] ss:$0 sm:$0xff] (!%p1301_p11) }
 0x149   : > { %v1346_v7 = vpop.f32.mrb[15].mxu0  ;;  %v912_v8 = vpop.f32.mrb[13].mxu1 }
 0x14a   : > { %v889_v9 = vadd.f32 %v1410_v37, %v1344_v3  ;;  %v1347_v10 = vadd.f32 %v1346_v7, %v1345_v4  ;;  %v1419_v11 = vpop.f32.mrb[14].mxu1  ;;  %v376_v37 = vld [vmem:[#allocation2 + $0x58] sm:$0xff]  ;;  %v964_v3 = vld [vmem:[#allocation2 + $0x8] sm:$0xff] (!%p1301_p11)  ;;  %v979_v4 = vmul.f32 (!%p1301_p11), 0.058925565, %v963_v1 }
 0x14b   : > { %v915_v13 = vpop.f32.mrb[15].mxu1  ;;  %v966_v7 = vld [vmem:[#allocation2 + $0x18] sm:$0xff] (!%p1301_p11) }
 0x14c   : > { %v933_v14 = vadd.f32 %v889_v9, %v371_v6  ;;  %v892_v15 = vadd.f32 %v1411_v43, %v1347_v10  ;;  %v980_v6 = vmul.f32 (!%p1301_p11), 0.058925565, %v964_v3  ;;  %v982_v9 = vmul.f32 (!%p1301_p11), 0.058925565, %v966_v7 }
 0x14d   : > { %v967_v10 = vld [vmem:[#allocation2 + $0x20] sm:$0xff] (!%p1301_p11) }
 0x14e   : > { %949 = vst [vmem:[#allocation2 + $0x30] sm:$0xff] %v933_v14  ;;  %v934_v16 = vadd.f32 %v892_v15, %v372_v12  ;;  %v1348_v17 = vpop.f32.mrb[16].mxu0  ;;  %v1002_v12 = vadd.f32 (!%p1301_p11), %v1755_v2, %v979_v4  ;;  %v983_v14 = vmul.f32 (!%p1301_p11), 0.058925565, %v967_v10 }
 0x14f   : > { %v1349_v18 = vpop.f32.mrb[17].mxu0 }
 0x150   : > { %950 = vst [vmem:[#allocation2 + $0x38] sm:$0xff] %v934_v16  ;;  %v1350_v19 = vadd.f32 %v1349_v18, %v1348_v17  ;;  %v1351_v20 = vpop.f32.mrb[18].mxu0  ;;  %vm1018_vm0 = vcmp.ge.f32.partialorder (!%p1301_p11), %v1002_v12, 0.0 }
 0x151   : > { %v1352_v21 = vpop.f32.mrb[19].mxu0 }
 0x152   : > { %v1353_v23 = vadd.f32 %v1352_v21, %v1351_v20  ;;  %v897_v24 = vadd.f32 %v1350_v19, %v896_v56  ;;  %v1005_v19 = vadd.f32 (!%p1301_p11), %v1755_v2, %v982_v9 }
 0x154   : > { %v935_v26 = vadd.f32 %v897_v24, %v373_v22  ;;  %v900_v27 = vadd.f32 %v1353_v23, %v899_v61  ;;  %v380_v61 = vld [vmem:[#allocation2 + $0x78] sm:$0xff]  ;;  %v1034_v22 = vmul.f32 (!%p1301_p11), 0.2, %v1002_v12  ;;  %vm1021_vm3 = vcmp.ge.f32.partialorder (!%p1301_p11), %v1005_v19, 0.0 }
 0x155   : > { %v969_v16 = vld [vmem:[#allocation2 + $0x30] sm:$0xff] (!%p1301_p11) }
 0x156   : > { %951 = vst [vmem:[#allocation2 + $0x40] sm:$0xff] %v935_v26  ;;  %v936_v28 = vadd.f32 %v900_v27, %v374_v25  ;;  %v1354_v29 = vpop.f32.mrb[20].mxu0  ;;  %v985_v20 = vmul.f32 (!%p1301_p11), 0.058925565, %v969_v16  ;;  %v1037_v25 = vmul.f32 (!%p1301_p11), 0.2, %v1005_v19  ;;  %v1050_v26 = vsel (!%p1301_p11), %vm1018_vm0, %v1002_v12, %v1034_v22 }
 0x157   : > { %v1355_v30 = vpop.f32.mrb[21].mxu0  ;;  %v970_v17 = vld [vmem:[#allocation2 + $0x38] sm:$0xff] (!%p1301_p11) }
 0x158   : > { %952 = vst [vmem:[#allocation2 + $0x48] sm:$0xff] %v936_v28  ;;  %v1356_v31 = vadd.f32 %v1355_v30, %v1354_v29  ;;  %v1357_v32 = vpop.f32.mrb[22].mxu0  ;;  %v986_v21 = vmul.f32 (!%p1301_p11), 0.058925565, %v970_v17  ;;  %v1006_v28 = vadd.f32 (!%p1301_p11), %v1755_v2, %v983_v14 }
 0x159   : > { %v1358_v34 = vpop.f32.mrb[23].mxu0 }
 0x15a   : > { %v905_v35 = vadd.f32 %v1414_v53, %v1356_v31  ;;  %v1359_v36 = vadd.f32 %v1358_v34, %v1357_v32  ;;  %v1066_v31 = vmul.f32 (!%p1301_p11), 1.4142135, %v1050_v26  ;;  %v1053_v34 = vsel (!%p1301_p11), %vm1021_vm3, %v1005_v19, %v1037_v25 }
 0x15b   : > { %vm1022_vm4 = vcmp.ge.f32.partialorder (!%p1301_p11), %v1006_v28, 0.0 }
 0x15c   : > { %v937_v38 = vadd.f32 %v905_v35, %v375_v33  ;;  %v908_v39 = vadd.f32 %v1415_v59, %v1359_v36  ;;  %1082 = vst [vmem:[%s1839_s3] sm:$0xff] (!%p1301_p11), %v1066_v31 }
 0x15d   : > { %v971_v30 = vld [vmem:[#allocation2 + $0x40] sm:$0xff] (!%p1301_p11) }
 0x15e   : > { %953 = vst [vmem:[#allocation2 + $0x50] sm:$0xff] %v937_v38  ;;  %v938_v40 = vadd.f32 %v908_v39, %v376_v37  ;;  %v1360_v41 = vpop.f32.mrb[24].mxu0  ;;  %v1069_v38 = vmul.f32 (!%p1301_p11), 1.4142135, %v1053_v34  ;;  %v1038_v39 = vmul.f32 (!%p1301_p11), 0.2, %v1006_v28 }
 0x15f   : > { %v1361_v42 = vpop.f32.mrb[25].mxu0  ;;  %v972_v35 = vld [vmem:[#allocation2 + $0x48] sm:$0xff] (!%p1301_p11) }
 0x160   : > { %954 = vst [vmem:[#allocation2 + $0x58] sm:$0xff] %v938_v40  ;;  %v1362_v43 = vadd.f32 %v1361_v42, %v1360_v41  ;;  %v1363_v44 = vpop.f32.mrb[26].mxu0  ;;  %v1008_v41 = vadd.f32 (!%p1301_p11), %v1755_v2, %v985_v20  ;;  %v1009_v42 = vadd.f32 (!%p1301_p11), %v1755_v2, %v986_v21  ;;  %1085 = vst [vmem:[%s1839_s3 + $0x18] sm:$0xff] (!%p1301_p11), %v1069_v38 }
 0x161   : > { %v1364_v45 = vpop.f32.mrb[27].mxu0 }
 0x162   : > { %v1365_v47 = vadd.f32 %v1364_v45, %v1363_v44  ;;  %v913_v48 = vadd.f32 %v1362_v43, %v912_v8  ;;  %v987_v43 = vmul.f32 (!%p1301_p11), 0.058925565, %v971_v30  ;;  %v988_v44 = vmul.f32 (!%p1301_p11), 0.058925565, %v972_v35 }
 0x163   : > { %vm1024_vm6 = vcmp.ge.f32.partialorder (!%p1301_p11), %v1008_v41, 0.0  ;;  %vm1025_vm7 = vcmp.ge.f32.partialorder (!%p1301_p11), %v1009_v42, 0.0 }
 0x164   : > { %v939_v50 = vadd.f32 %v913_v48, %v377_v46  ;;  %v916_v51 = vadd.f32 %v1365_v47, %v915_v13  ;;  %v1003_v13 = vadd.f32 (!%p1301_p11), %v1755_v2, %v980_v6  ;;  %v1054_v46 = vsel (!%p1301_p11), %vm1022_vm4, %v1006_v28, %v1038_v39 }
 0x165   : > { %v973_v36 = vld [vmem:[#allocation2 + $0x50] sm:$0xff] (!%p1301_p11)  ;;  %v1040_v48 = vmul.f32 (!%p1301_p11), 0.2, %v1008_v41 }
 0x166   : > { %955 = vst [vmem:[#allocation2 + $0x60] sm:$0xff] %v939_v50  ;;  %v940_v52 = vadd.f32 %v916_v51, %v378_v49  ;;  %v1366_v53 = vpop.f32.mrb[28].mxu0  ;;  %vm1019_vm1 = vcmp.ge.f32.partialorder (!%p1301_p11), %v1003_v13, 0.0  ;;  %v1035_v23 = vmul.f32 (!%p1301_p11), 0.2, %v1003_v13  ;;  %v1010_v51 = vadd.f32 (!%p1301_p11), %v1755_v2, %v987_v43 }
 0x167   : > { %v1367_v54 = vpop.f32.mrb[29].mxu0  ;;  %v989_v45 = vmul.f32 (!%p1301_p11), 0.058925565, %v973_v36  ;;  %v1070_v49 = vmul.f32 (!%p1301_p11), 1.4142135, %v1054_v46 }
 0x168   : > { %956 = vst [vmem:[#allocation2 + $0x68] sm:$0xff] %v940_v52  ;;  %v1368_v55 = vadd.f32 %v1367_v54, %v1366_v53  ;;  %v1369_v56 = vpop.f32.mrb[30].mxu0  ;;  %v1051_v27 = vsel (!%p1301_p11), %vm1019_vm1, %v1003_v13, %v1035_v23  ;;  %v1056_v52 = vsel (!%p1301_p11), %vm1024_vm6, %v1008_v41, %v1040_v48  ;;  %v1041_v53 = vmul.f32 (!%p1301_p11), 0.2, %v1009_v42 }
 0x169   : > { %v1370_v58 = vpop.f32.mrb[31].mxu0  ;;  %v1067_v32 = vmul.f32 (!%p1301_p11), 1.4142135, %v1051_v27  ;;  %v1011_v54 = vadd.f32 (!%p1301_p11), %v1755_v2, %v988_v44  ;;  %1086 = vst [vmem:[%s1839_s3 + $0x20] sm:$0xff] (!%p1301_p11), %v1070_v49  ;;  %vm1026_vm8 = vcmp.ge.f32.partialorder (!%p1301_p11), %v1010_v51, 0.0 }
 0x16a   : > { %v921_v59 = vadd.f32 %v1418_v5, %v1368_v55  ;;  %v1371_v60 = vadd.f32 %v1370_v58, %v1369_v56  ;;  %962 = sbr.rel (%p1301_p11) target bundleno = 386 (0x182), region = 66  ;;  %v965_v5 = vld [vmem:[#allocation2 + $0x10] sm:$0xff] (!%p1301_p11)  ;;  %v1012_v55 = vadd.f32 (!%p1301_p11), %v1755_v2, %v989_v45  ;;  %v974_v56 = vld [vmem:[#allocation2 + $0x58] sm:$0xff] (!%p1301_p11)  ;;  %v1072_v58 = vmul.f32 (!%p1301_p11), 1.4142135, %v1056_v52 }
 0x16b   : > { %v981_v8 = vmul.f32 (!%p1301_p11), 0.058925565, %v965_v5  ;;  %1083 = vst [vmem:[%s1839_s3 + $0x8] sm:$0xff] (!%p1301_p11), %v1067_v32  ;;  %vm1027_vm9 = vcmp.ge.f32.partialorder (!%p1301_p11), %v1011_v54, 0.0  ;;  %v990_v6 = vmul.f32 (!%p1301_p11), 0.058925565, %v974_v56 }
 0x16c   : > { %v941_v62 = vadd.f32 %v921_v59, %v379_v57  ;;  %v924_v63 = vadd.f32 %v1419_v11, %v1371_v60  ;;  %v968_v11 = vld [vmem:[#allocation2 + $0x28] sm:$0xff] (!%p1301_p11)  ;;  %v1042_v59 = vmul.f32 (!%p1301_p11), 0.2, %v1010_v51  ;;  %vm1028_vm10 = vcmp.ge.f32.partialorder (!%p1301_p11), %v1012_v55, 0.0  ;;  %1088 = vst [vmem:[%s1839_s3 + $0x30] sm:$0xff] (!%p1301_p11), %v1072_v58 }
 0x16d   : > { %v984_v15 = vmul.f32 (!%p1301_p11), 0.058925565, %v968_v11  ;;  %v1004_v18 = vadd.f32 (!%p1301_p11), %v1755_v2, %v981_v8  ;;  %v975_v57 = vld [vmem:[#allocation2 + $0x60] sm:$0xff] (!%p1301_p11)  ;;  %v1044_v4 = vmul.f32 (!%p1301_p11), 0.2, %v1012_v55  ;;  %v1013_v12 = vadd.f32 (!%p1301_p11), %v1755_v2, %v990_v6 }
 0x16e   : > { %957 = vst [vmem:[#allocation2 + $0x70] sm:$0xff] %v941_v62  ;;  %v942_v0 = vadd.f32 %v924_v63, %v380_v61  ;;  %v1057_v61 = vsel (!%p1301_p11), %vm1025_vm7, %v1009_v42, %v1041_v53  ;;  %v1043_v62 = vmul.f32 (!%p1301_p11), 0.2, %v1011_v54  ;;  %v1058_v3 = vsel (!%p1301_p11), %vm1026_vm8, %v1010_v51, %v1042_v59 }
 0x16f   : > { %vm1020_vm2 = vcmp.ge.f32.partialorder (!%p1301_p11), %v1004_v18, 0.0  ;;  %v1036_v24 = vmul.f32 (!%p1301_p11), 0.2, %v1004_v18  ;;  %v1007_v29 = vadd.f32 (!%p1301_p11), %v1755_v2, %v984_v15  ;;  %v976_v60 = vld [vmem:[#allocation2 + $0x68] sm:$0xff] (!%p1301_p11)  ;;  %v1073_v1 = vmul.f32 (!%p1301_p11), 1.4142135, %v1057_v61 }
 0x170   : > { %958 = vst [vmem:[#allocation2 + $0x78] sm:$0xff] %v942_v0  ;;  %v1074_v5 = vmul.f32 (!%p1301_p11), 1.4142135, %v1058_v3  ;;  %v1059_v7 = vsel (!%p1301_p11), %vm1027_vm9, %v1011_v54, %v1043_v62  ;;  %v991_v8 = vmul.f32 (!%p1301_p11), 0.058925565, %v975_v57  ;;  %v1060_v11 = vsel (!%p1301_p11), %vm1028_vm10, %v1012_v55, %v1044_v4 }
 0x171   : > { %v1052_v33 = vsel %vm1020_vm2, %v1004_v18, %v1036_v24  ;;  %vm1023_vm5 = vcmp.ge.f32.partialorder %v1007_v29, 0.0  ;;  %v1039_v40 = vmul.f32 0.2, %v1007_v29  ;;  %v992_v9 = vmul.f32 0.058925565, %v976_v60  ;;  %1089 = vst [vmem:[%s1839_s3 + $0x38] sm:$0xff] %v1073_v1 }
 0x172   : > { %v1068_v37 = vmul.f32 1.4142135, %v1052_v33  ;;  %v1075_v10 = vmul.f32 1.4142135, %v1059_v7  ;;  %1090 = vst [vmem:[%s1839_s3 + $0x40] sm:$0xff] %v1074_v5  ;;  %v1014_v15 = vadd.f32 %v1755_v2, %v991_v8  ;;  %vm1029_vm11 = vcmp.ge.f32.partialorder %v1013_v12, 0.0 }
 0x173   : > { %v1055_v47 = vsel %vm1023_vm5, %v1007_v29, %v1039_v40  ;;  %v1076_v14 = vmul.f32 1.4142135, %v1060_v11  ;;  %v1015_v16 = vadd.f32 %v1755_v2, %v992_v9  ;;  %v1045_v18 = vmul.f32 0.2, %v1013_v12 }
 0x174   : > { %1084 = vst [vmem:[%s1839_s3 + $0x10] sm:$0xff] %v1068_v37  ;;  %v1071_v50 = vmul.f32 1.4142135, %v1055_v47  ;;  %1091 = vst [vmem:[%s1839_s3 + $0x48] sm:$0xff] %v1075_v10  ;;  %vm1030_vm12 = vcmp.ge.f32.partialorder %v1014_v15, 0.0 }
 0x175   : > { %v977_v63 = vld [vmem:[#allocation2 + $0x70] sm:$0xff]  ;;  %1092 = vst [vmem:[%s1839_s3 + $0x50] sm:$0xff] %v1076_v14  ;;  %v1046_v20 = vmul.f32 0.2, %v1014_v15  ;;  %vm1031_vm13 = vcmp.ge.f32.partialorder %v1015_v16, 0.0  ;;  %v1061_v22 = vsel %vm1029_vm11, %v1013_v12, %v1045_v18 }
 0x176   : > { %1087 = vst [vmem:[%s1839_s3 + $0x28] sm:$0xff] %v1071_v50  ;;  %v993_v13 = vmul.f32 0.058925565, %v977_v63  ;;  %v1047_v21 = vmul.f32 0.2, %v1015_v16 }
 0x177   : > { %v978_v0 = vld [vmem:[#allocation2 + $0x78] sm:$0xff]  ;;  %v1077_v25 = vmul.f32 1.4142135, %v1061_v22  ;;  %v1062_v26 = vsel %vm1030_vm12, %v1014_v15, %v1046_v20 }
 0x178   : > { %v994_v17 = vmul.f32 0.058925565, %v978_v0  ;;  %v1016_v19 = vadd.f32 %v1755_v2, %v993_v13  ;;  %v1063_v27 = vsel %vm1031_vm13, %v1015_v16, %v1047_v21  ;;  %v1078_v28 = vmul.f32 1.4142135, %v1062_v26 }
 0x179   : > { %v1079_v29 = vmul.f32 1.4142135, %v1063_v27  ;;  %1093 = vst [vmem:[%s1839_s3 + $0x58] sm:$0xff] %v1077_v25 }
 0x17a   : > { %vm1032_vm14 = vcmp.ge.f32.partialorder %v1016_v19, 0.0  ;;  %v1048_v23 = vmul.f32 0.2, %v1016_v19  ;;  %v1017_v24 = vadd.f32 %v1755_v2, %v994_v17  ;;  %1094 = vst [vmem:[%s1839_s3 + $0x60] sm:$0xff] %v1078_v28 }
 0x17b   : > { %1095 = vst [vmem:[%s1839_s3 + $0x68] sm:$0xff] %v1079_v29 }
 0x17c   : > { %v1064_v30 = vsel %vm1032_vm14, %v1016_v19, %v1048_v23  ;;  %vm1033_vm15 = vcmp.ge.f32.partialorder %v1017_v24, 0.0  ;;  %v1049_v32 = vmul.f32 0.2, %v1017_v24 }
 0x17d   : > { %v1080_v31 = vmul.f32 1.4142135, %v1064_v30 }
 0x17e   : > { %v1065_v2 = vsel %vm1033_vm15, %v1017_v24, %v1049_v32 }
 0x17f   : > { %1096 = vst [vmem:[%s1839_s3 + $0x70] sm:$0xff] %v1080_v31  ;;  %v1081_v33 = vmul.f32 1.4142135, %v1065_v2 }
 0x181   : > { %1097 = vst [vmem:[%s1839_s3 + $0x78] sm:$0xff] %v1081_v33 }
 0x182 PF: > { %s13_s16 = sadd.s32 1, %s1557_s16   ;;  %s1840_s12 = smov %s1545_s13 }
 0x183   : > { %p10_p12 = scmp.ge.s32.totalorder %s13_s16, 5   ;;  %s1841_s13 = smov %s1615_s20 }
 0x184   : > { %s1842_s14 = smov %s1553_s15  ;;  %s1843_s15 = smov %s1845_s17 }
 0x185   :  { %12 = sbr.rel (!%p10_p12) target bundleno = 3 (0x3), region = 113 }

// kernel: _lambda_.20
= control target key start
LH: loop header
LB: loop body
LE: loop exit
PB: predicated region body
PF: predicated region fallthrough
CT: control target
= control target key end

     0   :  { %s554_s6 = smov 0   ;;  %s556_s7 = smov 0   ;;  %s676_s0 = inlined_call_operand.vmem [shape: f32[2,10,10,128], index: 0, kind: input, shape index: {}]   ;;  %s677_s1 = inlined_call_operand.vmem [shape: f32[2,7,7,128], index: 1, kind: output, shape index: {}]  }
   0x1   :  { %s558_s8 = smov 0  }
   0x2 LB: > { %s23_s9 = sadd.s32 1, %s538_s7  ;;  %p489_p0 = scmp.ge.s32.totalorder %s542_s8, 1  ;;  %s542_s8 = sphi %s558_s8, %s11_s8   ;;  %s538_s7 = sphi %s556_s7, %s679_s7   ;;  %s534_s6 = sphi %s554_s6, %s678_s6  }
   0x3   : > { %p25_p1 = scmp.ge.s32.totalorder %s23_s9, 2  ;;  %p106_p2 = scmp.lt.s32.totalorder %s542_s8, 3 }
   0x5   : > { %s681_s9 = smov (%p25_p1, %s23_s9), 0  ;;  %p107_p3 = pnand %p489_p0, %p106_p2 }
   0x6   : > { %p132_p4 = scmp.lt.s32.totalorder (!%p107_p3), %s534_s6, 1  ;;  %vm302_vm0 = vcmask (!%p107_p3), 1045504   ;;  %vm359_vm1 = vcmask (!%p107_p3), 1044480  }
   0x7   : > { %110 = sbr.rel (%p107_p3) target bundleno = 72 (0x48), region = 24 }
   0xe   : > { %s683_s6 = smov (!%p132_p4, %s534_s6), 1 }
   0xf   : > { %s494_s10 = smul.u32 160, %s683_s6 }
  0x10   : > { %s495_s14 = smul.u32 56, %s683_s6 }
  0x11   : > { %s578_s13 = scalar_lea.vmem %s676_s0, %s494_s10 }
  0x12   : > { %v148_v0 = vld [vmem:[%s578_s13] sm:$0xff]  ;;  %v149_v1 = vld [vmem:[%s578_s13 + $0x8] sm:$0x3]  ;;  %v150_v2 = vld [vmem:[%s578_s13 + $0x10] sm:$0xff]  ;;  %s622_s17 = scalar_lea.vmem %s677_s1, %s495_s14 }
  0x13   : > { %v151_v3 = vld [vmem:[%s578_s13 + $0x18] sm:$0x3]  ;;  %v152_v4 = vld [vmem:[%s578_s13 + $0x20] sm:$0xff]  ;;  %v153_v5 = vld [vmem:[%s578_s13 + $0x28] sm:$0x3]  ;;  %v168_v6 = vmul.f32 0.125, %v148_v0 }
  0x14   : > { %v154_v7 = vld [vmem:[%s578_s13 + $0x30] sm:$0xff]  ;;  %v155_v8 = vld [vmem:[%s578_s13 + $0x38] sm:$0x3]  ;;  %v169_v9 = vmul.f32 0.125, %v149_v1  ;;  %v182_v10 = vmul.f32 0.375, %v150_v2  ;;  %v183_v11 = vmul.f32 0.375, %v151_v3 }
  0x15   : > { %v588_v12 = vmul.f32 0.125, %v154_v7  ;;  %v590_v13 = vmul.f32 0.125, %v155_v8  ;;  %v184_v14 = vmul.f32 0.375, %v152_v4  ;;  %v185_v15 = vmul.f32 0.375, %v153_v5  ;;  %v156_v16 = vld [vmem:[%s578_s13 + $0x40] sm:$0xff]  ;;  %v594_v17 = vld [vmem:[%s578_s13 + $0x50] sm:$0xff] }
  0x16   : > { %v196_v18 = vadd.f32 %v182_v10, %v168_v6  ;;  %v197_v19 = vadd.f32 %v183_v11, %v169_v9  ;;  %v157_v20 = vld [vmem:[%s578_s13 + $0x48] sm:$0x3]  ;;  %v170_v21 = vmul.f32 0.125, %v150_v2  ;;  %v171_v22 = vmul.f32 0.125, %v151_v3  ;;  %v598_v23 = vld [vmem:[%s578_s13 + $0x58] sm:$0x3] }
  0x17   : > { %v600_v24 = vmul.f32 0.125, %v156_v16  ;;  %v602_v25 = vmul.f32 0.125, %v157_v20  ;;  %v186_v26 = vmul.f32 0.375, %v154_v7  ;;  %v187_v27 = vmul.f32 0.375, %v155_v8 }
  0x18   : > { %v212_v28 = vadd.f32 %v196_v18, %v184_v14  ;;  %v213_v29 = vadd.f32 %v197_v19, %v185_v15  ;;  %v198_v30 = vadd.f32 %v184_v14, %v170_v21  ;;  %v199_v31 = vadd.f32 %v185_v15, %v171_v22  ;;  %v160_v14 = vld [vmem:[%s578_s13 + $0x60] sm:$0xff]  ;;  %v161_v15 = vld [vmem:[%s578_s13 + $0x68] sm:$0x3] }
  0x19   : > { %v172_v32 = vmul.f32 0.125, %v152_v4  ;;  %v173_v33 = vmul.f32 0.125, %v153_v5  ;;  %v605_v34 = vmul.f32 0.125, %v594_v17  ;;  %v608_v35 = vmul.f32 0.125, %v598_v23 }
  0x1a   : > { %v232_v36 = vadd.f32 %v212_v28, %v588_v12  ;;  %v233_v37 = vadd.f32 %v213_v29, %v590_v13  ;;  %v214_v38 = vadd.f32 %v198_v30, %v186_v26  ;;  %v215_v39 = vadd.f32 %v199_v31, %v187_v27 }
  0x1b   : > { %v188_v40 = vmul.f32 0.375, %v156_v16  ;;  %v189_v41 = vmul.f32 0.375, %v157_v20  ;;  %v200_v42 = vadd.f32 %v186_v26, %v172_v32  ;;  %v201_v43 = vadd.f32 %v187_v27, %v173_v33 }
  0x1c   : > { %v246_v44 = vmul.f32 0.125, %v232_v36  ;;  %v253_v45 = vmul.f32 0.375, %v232_v36  ;;  %v288_v46 = vmul.f32 0.375, %v233_v37  ;;  %v338_v47 = vmul.f32 0.125, %v233_v37 }
  0x1d   : > { %v234_v48 = vadd.f32 %v214_v38, %v600_v24  ;;  %v235_v49 = vadd.f32 %v215_v39, %v602_v25  ;;  %v216_v50 = vadd.f32 %v200_v42, %v188_v40  ;;  %v217_v51 = vadd.f32 %v201_v43, %v189_v41 }
  0x1e   : > { %v267_v52 = vrot.slane %v253_v45, 1  ;;  %v303_v53 = vrot.slane %v253_v45, 2  ;;  %v304_v54 = vrot.slane %v288_v46, 2  ;;  %v360_v55 = vrot.slane %v246_v44, 3  ;;  %v163_v46 = vld [vmem:[%s578_s13 + $0x78] sm:$0x3] }
  0x1f   : > { %v361_v56 = vrot.slane %v338_v47, 3  ;;  %v247_v57 = vmul.f32 0.125, %v234_v48  ;;  %v254_v58 = vmul.f32 0.375, %v234_v48  ;;  %v289_v59 = vmul.f32 0.375, %v235_v49 }
  0x20   : > { %v281_v60 = vadd.f32 %v267_v52, %v246_v44  ;;  %v305_v61 = vsel %vm302_vm0, %v303_v53, %v304_v54  ;;  %v339_v62 = vmul.f32 0.125, %v235_v49  ;;  %v236_v63 = vadd.f32 %v216_v50, %v605_v34  ;;  %v162_v44 = vld [vmem:[%s578_s13 + $0x70] sm:$0xff] }
  0x21   : > { %v362_v0 = vsel %vm359_vm1, %v360_v55, %v361_v56  ;;  %v268_v1 = vrot.slane %v254_v58, 1  ;;  %v306_v2 = vrot.slane %v254_v58, 2  ;;  %v307_v3 = vrot.slane %v289_v59, 2  ;;  %v164_v55 = vld [vmem:[%s578_s13 + $0x80] sm:$0xff] }
  0x22   : > { %v331_v4 = vadd.f32 %v305_v61, %v281_v60  ;;  %v363_v5 = vrot.slane %v247_v57, 3  ;;  %v364_v6 = vrot.slane %v339_v62, 3  ;;  %v237_v7 = vadd.f32 %v217_v51, %v608_v35 }
  0x23   : > { %v282_v8 = vadd.f32 %v268_v1, %v247_v57  ;;  %v308_v9 = vsel %vm302_vm0, %v306_v2, %v307_v3  ;;  %v248_v10 = vmul.f32 0.125, %v236_v63  ;;  %v255_v11 = vmul.f32 0.375, %v236_v63 }
  0x24   : > { %v388_v16 = vadd.f32 %v362_v0, %v331_v4  ;;  %v365_v18 = vsel %vm359_vm1, %v363_v5, %v364_v6  ;;  %v290_v19 = vmul.f32 0.375, %v237_v7  ;;  %v340_v20 = vmul.f32 0.125, %v237_v7 }
  0x25   : > { %v332_v21 = vadd.f32 %v308_v9, %v282_v8  ;;  %v269_v22 = vrot.slane %v255_v11, 1  ;;  %v309_v26 = vrot.slane %v255_v11, 2  ;;  %v366_v27 = vrot.slane %v248_v10, 3 }
  0x26   : > { %395 = vst [vmem:[%s622_s17] sm:$0x7f] %v388_v16  ;;  %v310_v28 = vrot.slane %v290_v19, 2  ;;  %v367_v29 = vrot.slane %v340_v20, 3  ;;  %v629_v30 = vmul.f32 0.125, %v160_v14  ;;  %v631_v31 = vmul.f32 0.125, %v161_v15 }
  0x27   : > { %v389_v32 = vadd.f32 %v365_v18, %v332_v21  ;;  %v283_v33 = vadd.f32 %v269_v22, %v248_v10  ;;  %v190_v36 = vmul.f32 0.375, %v594_v17  ;;  %v191_v37 = vmul.f32 0.375, %v598_v23  ;;  %v165_v19 = vld [vmem:[%s578_s13 + $0x88] sm:$0x3] }
  0x28   : > { %v311_v38 = vsel %vm302_vm0, %v309_v26, %v310_v28  ;;  %v368_v39 = vsel %vm359_vm1, %v366_v27, %v367_v29  ;;  %v202_v42 = vadd.f32 %v188_v40, %v588_v12  ;;  %v203_v43 = vadd.f32 %v189_v41, %v590_v13  ;;  %v166_v29 = vld [vmem:[%s578_s13 + $0x90] sm:$0xff] }
  0x29   : > { %396 = vst [vmem:[%s622_s17 + $0x8] sm:$0x7f] %v389_v32  ;;  %v333_v45 = vadd.f32 %v311_v38, %v283_v33  ;;  %v192_v47 = vmul.f32 0.375, %v160_v14  ;;  %v193_v48 = vmul.f32 0.375, %v161_v15  ;;  %v204_v17 = vadd.f32 %v190_v36, %v600_v24 }
  0x2a   : > { %v218_v49 = vadd.f32 %v202_v42, %v190_v36  ;;  %v219_v23 = vadd.f32 %v203_v43, %v191_v37  ;;  %v205_v50 = vadd.f32 %v191_v37, %v602_v25  ;;  %v226_v51 = vmul.f32 0.125, %v162_v44 }
  0x2b   : > { %v390_v52 = vadd.f32 %v368_v39, %v333_v45  ;;  %v220_v53 = vadd.f32 %v204_v17, %v192_v47  ;;  %v227_v12 = vmul.f32 0.125, %v163_v46  ;;  %v194_v40 = vmul.f32 0.375, %v162_v44  ;;  %v167_v45 = vld [vmem:[%s578_s13 + $0x98] sm:$0x3] }
  0x2c   : > { %v238_v13 = vadd.f32 %v218_v49, %v629_v30  ;;  %v239_v41 = vadd.f32 %v219_v23, %v631_v31  ;;  %v221_v54 = vadd.f32 %v205_v50, %v193_v48  ;;  %v195_v56 = vmul.f32 0.375, %v163_v46 }
  0x2d   : > { %397 = vst [vmem:[%s622_s17 + $0x10] sm:$0x7f] %v390_v52  ;;  %v240_v57 = vadd.f32 %v226_v51, %v220_v53  ;;  %v206_v24 = vadd.f32 %v192_v47, %v605_v34  ;;  %v207_v58 = vadd.f32 %v193_v48, %v608_v35  ;;  %v228_v59 = vmul.f32 0.125, %v164_v55 }
  0x2e   : > { %v249_v25 = vmul.f32 0.125, %v238_v13  ;;  %v256_v60 = vmul.f32 0.375, %v238_v13  ;;  %v291_v61 = vmul.f32 0.375, %v239_v41  ;;  %v341_v62 = vmul.f32 0.125, %v239_v41 }
  0x2f   : > { %v241_v63 = vadd.f32 %v227_v12, %v221_v54  ;;  %v250_v0 = vmul.f32 0.125, %v240_v57  ;;  %v257_v1 = vmul.f32 0.375, %v240_v57  ;;  %v222_v2 = vadd.f32 %v206_v24, %v194_v40 }
  0x30   : > { %v270_v3 = vrot.slane %v256_v60, 1  ;;  %v312_v4 = vrot.slane %v256_v60, 2  ;;  %v313_v5 = vrot.slane %v291_v61, 2  ;;  %v369_v6 = vrot.slane %v249_v25, 3 }
  0x31   : > { %v370_v7 = vrot.slane %v341_v62, 3  ;;  %v271_v8 = vrot.slane %v257_v1, 1  ;;  %v292_v9 = vmul.f32 0.375, %v241_v63  ;;  %v315_v34 = vrot.slane %v257_v1, 2 }
  0x32   : > { %v284_v35 = vadd.f32 %v270_v3, %v249_v25  ;;  %v314_v10 = vsel %vm302_vm0, %v312_v4, %v313_v5  ;;  %v342_v11 = vmul.f32 0.125, %v241_v63  ;;  %v372_v14 = vrot.slane %v250_v0, 3 }
  0x33   : > { %v371_v15 = vsel %vm359_vm1, %v369_v6, %v370_v7  ;;  %v285_v16 = vadd.f32 %v271_v8, %v250_v0  ;;  %v316_v18 = vrot.slane %v292_v9, 2  ;;  %v223_v20 = vadd.f32 %v207_v58, %v195_v56 }
  0x34   : > { %v334_v21 = vadd.f32 %v314_v10, %v284_v35  ;;  %v373_v22 = vrot.slane %v342_v11, 3  ;;  %v229_v26 = vmul.f32 0.125, %v165_v19  ;;  %v242_v27 = vadd.f32 %v228_v59, %v222_v2 }
  0x35   : > { %v317_v28 = vsel %vm302_vm0, %v315_v34, %v316_v18  ;;  %v208_v32 = vadd.f32 %v194_v40, %v629_v30  ;;  %v209_v33 = vadd.f32 %v195_v56, %v631_v31  ;;  %v210_v36 = vmul.f32 0.375, %v164_v55 }
  0x36   : > { %v391_v37 = vadd.f32 %v371_v15, %v334_v21  ;;  %v335_v38 = vadd.f32 %v317_v28, %v285_v16  ;;  %v374_v39 = vsel %vm359_vm1, %v372_v14, %v373_v22  ;;  %v243_v42 = vadd.f32 %v229_v26, %v223_v20 }
  0x37   : > { %v251_v43 = vmul.f32 0.125, %v242_v27  ;;  %v258_v44 = vmul.f32 0.375, %v242_v27  ;;  %v211_v46 = vmul.f32 0.375, %v165_v19  ;;  %v224_v47 = vadd.f32 %v210_v36, %v208_v32 }
  0x38   : > { %398 = vst [vmem:[%s622_s17 + $0x18] sm:$0x7f] %v391_v37  ;;  %v392_v48 = vadd.f32 %v374_v39, %v335_v38  ;;  %v293_v17 = vmul.f32 0.375, %v243_v42  ;;  %v343_v49 = vmul.f32 0.125, %v243_v42  ;;  %v230_v23 = vmul.f32 0.125, %v166_v29 }
  0x39   : > { %v272_v30 = vrot.slane %v258_v44, 1  ;;  %v318_v50 = vrot.slane %v258_v44, 2  ;;  %v375_v31 = vrot.slane %v251_v43, 3  ;;  %v225_v51 = vadd.f32 %v211_v46, %v209_v33 }
  0x3a   : > { %399 = vst [vmem:[%s622_s17 + $0x20] sm:$0x7f] %v392_v48  ;;  %v319_v52 = vrot.slane %v293_v17, 2  ;;  %v376_v53 = vrot.slane %v343_v49, 3  ;;  %v231_v12 = vmul.f32 0.125, %v167_v45  ;;  %v244_v40 = vadd.f32 %v230_v23, %v224_v47 }
  0x3b   : > { %v286_v13 = vadd.f32 %v272_v30, %v251_v43 }
  0x3c   : > { %v320_v41 = vsel %vm302_vm0, %v318_v50, %v319_v52  ;;  %v377_v54 = vsel %vm359_vm1, %v375_v31, %v376_v53  ;;  %v245_v55 = vadd.f32 %v231_v12, %v225_v51  ;;  %v252_v56 = vmul.f32 0.125, %v244_v40 }
  0x3d   : > { %v336_v57 = vadd.f32 %v320_v41, %v286_v13  ;;  %v259_v24 = vmul.f32 0.375, %v244_v40 }
  0x3e   : > { %v294_v58 = vmul.f32 0.375, %v245_v55  ;;  %v344_v59 = vmul.f32 0.125, %v245_v55  ;;  %v378_v25 = vrot.slane %v252_v56, 3 }
  0x3f   : > { %v393_v60 = vadd.f32 %v377_v54, %v336_v57  ;;  %v273_v61 = vrot.slane %v259_v24, 1  ;;  %v321_v62 = vrot.slane %v259_v24, 2 }
  0x40   : > { %v322_v63 = vrot.slane %v294_v58, 2  ;;  %v379_v0 = vrot.slane %v344_v59, 3 }
  0x41   : > { %400 = vst [vmem:[%s622_s17 + $0x28] sm:$0x7f] %v393_v60  ;;  %v287_v1 = vadd.f32 %v273_v61, %v252_v56 }
  0x42   : > { %v323_v2 = vsel %vm302_vm0, %v321_v62, %v322_v63  ;;  %v380_v3 = vsel %vm359_vm1, %v378_v25, %v379_v0 }
  0x43   : > { %v337_v4 = vadd.f32 %v323_v2, %v287_v1 }
  0x45   : > { %v394_v5 = vadd.f32 %v380_v3, %v337_v4 }
  0x47   : > { %401 = vst [vmem:[%s622_s17 + $0x30] sm:$0x7f] %v394_v5 }
  0x48 PF: > { %s11_s8 = sadd.s32 1, %s542_s8   ;;  %s678_s6 = smov %s538_s7 }
  0x49   : > { %p8_p5 = scmp.ge.s32.totalorder %s11_s8, 4   ;;  %s679_s7 = smov %s681_s9 }
  0x4b   :  { %10 = sbr.rel (!%p8_p5) target bundleno = 2 (0x2), region = 54 }

// kernel: _lambda_.21
= control target key start
LH: loop header
LB: loop body
LE: loop exit
PB: predicated region body
PF: predicated region fallthrough
CT: control target
= control target key end

     0   :  { %s310_s1 = inlined_call_operand.vmem [shape: bf16[128,128], index: 1, kind: input, shape index: {}]   ;;  %s311_s0 = inlined_call_operand.vmem [shape: bf16[32,128], index: 0, kind: input, shape index: {}]   ;;  %s312_s2 = inlined_call_operand.vmem [shape: f32[1,128], index: 2, kind: input, shape index: {}]   ;;  %s313_s3 = inlined_call_operand.vmem [shape: f32[32,128], index: 3, kind: output, shape index: {}]  }
   0x1   :  { %v235_v0 = vld [vmem:[%s310_s1] sm:$0xff]   ;;  %v236_v1 = vld [vmem:[%s310_s1 + $0x8] sm:$0xff]   ;;  %v237_v2 = vld [vmem:[%s310_s1 + $0x10] sm:$0xff]  }
   0x2   :  { %215 = vmatprep.subr.bf16.mxu0 %v235_v0  ;;  %v238_v3 = vld [vmem:[%s310_s1 + $0x18] sm:$0xff]   ;;  %v243_v4 = vld [vmem:[%s311_s0] sm:$0xff]   ;;  %v240_v6 = vld [vmem:[%s310_s1 + $0x28] sm:$0xff]  }
   0x3   :  { %216 = vmatpush3.bf16.msra.mxu0 %v235_v0  ;;  %231 = vmatprep.mubr.bf16.mxu0 %v243_v4  ;;  %v239_v5 = vld [vmem:[%s310_s1 + $0x20] sm:$0xff]   ;;  %v241_v7 = vld [vmem:[%s310_s1 + $0x30] sm:$0xff]   ;;  %v242_v8 = vld [vmem:[%s310_s1 + $0x38] sm:$0xff]  }
   0x4   :  { %217 = vmatprep.subr.bf16.mxu0 %v236_v1  ;;  %v244_v9 = vld [vmem:[%s311_s0 + $0x8] sm:$0xff]   ;;  %v204_v11 = vld [vmem:[%s312_s2] ss:$0 sm:$0xff] }
   0x7   :  { %218 = vmatpush3.bf16.msra.mxu0 %v236_v1 }
   0x8   :  { %219 = vmatprep.subr.bf16.mxu0 %v237_v2 }
   0xb   :  { %220 = vmatpush3.bf16.msra.mxu0 %v237_v2 }
   0xc   :  { %221 = vmatprep.subr.bf16.mxu0 %v238_v3 }
   0xf   :  { %222 = vmatpush3.bf16.msra.mxu0 %v238_v3 }
  0x10   :  { %223 = vmatprep.subr.bf16.mxu0 %v239_v5 }
  0x13   :  { %224 = vmatpush3.bf16.msra.mxu0 %v239_v5 }
  0x14   :  { %225 = vmatprep.subr.bf16.mxu0 %v240_v6 }
  0x17   :  { %226 = vmatpush3.bf16.msra.mxu0 %v240_v6 }
  0x18   :  { %227 = vmatprep.subr.bf16.mxu0 %v241_v7 }
  0x1b   :  { %228 = vmatpush3.bf16.msra.mxu0 %v241_v7 }
  0x1c   :  { %229 = vmatprep.subr.bf16.mxu0 %v242_v8 }
  0x1f   :  { %230 = vmatpush3.bf16.msra.mxu0 %v242_v8 }
  0x22   :  { %232 = vmatmul.mubr.bf16.vlgmr.msra.gmra.mrb[0].mxu0 %v244_v9 }
  0xf5   :  { %v233_v10 = vpop.f32.mrb[0].mxu0 }
  0xf6   :  { %v173_v12 = vmul.f32 0.17677669, %v233_v10  ;;  %v141_v13 = vpop.f32.mrb[1].mxu0 }
  0xf7   :  { %v171_v14 = vmul.f32 0.17677669, %v141_v13  ;;  %v234_v15 = vpop.f32.mrb[2].mxu0 }
  0xf8   :  { %v184_v16 = vadd.f32 %v204_v11, %v173_v12  ;;  %v174_v17 = vmul.f32 0.17677669, %v234_v15  ;;  %v144_v18 = vpop.f32.mrb[3].mxu0 }
  0xf9   :  { %v182_v19 = vadd.f32 %v204_v11, %v171_v14  ;;  %v172_v20 = vmul.f32 0.17677669, %v144_v18 }
  0xfa   :  { %188 = vst [vmem:[%s313_s3 + $0x10] sm:$0xff] %v184_v16  ;;  %v185_v21 = vadd.f32 %v204_v11, %v174_v17 }
  0xfb   :  { %186 = vst [vmem:[%s313_s3] sm:$0xff] %v182_v19  ;;  %v183_v22 = vadd.f32 %v204_v11, %v172_v20 }
  0xfc   :  { %189 = vst [vmem:[%s313_s3 + $0x18] sm:$0xff] %v185_v21 }
  0xfd   :  { %187 = vst [vmem:[%s313_s3 + $0x8] sm:$0xff] %v183_v22 }

// kernel: _lambda_.24
= control target key start
LH: loop header
LB: loop body
LE: loop exit
PB: predicated region body
PF: predicated region fallthrough
CT: control target
= control target key end

     0   :  { %s1148_s15 = smov 0   ;;  %s1150_s16 = smov 0   ;;  %s1276_s0 = inlined_call_operand.vmem [shape: bf16[32,1152], index: 0, kind: input, shape index: {}]   ;;  %s1277_s1 = inlined_call_operand.vmem [shape: bf16[1152,128], index: 1, kind: input, shape index: {}]   ;;  %s1278_s2 = inlined_call_operand.vmem [shape: f32[1,128], index: 2, kind: input, shape index: {}]   ;;  %s1279_s3 = inlined_call_operand.vmem [shape: f32[32,128], index: 3, kind: input, shape index: {}]   ;;  %s1280_s4 = inlined_call_operand.vmem [shape: f32[32,128], index: 4, kind: output, shape index: {}]  }
   0x1   :  { %s1152_s17 = smov 0   ;;  %s1154_s18 = smov 0  }
   0x2   :  { %s1156_s19 = smov 0  }
   0x3 LB: > { %s26_s20 = sadd.s32 1, %s1116_s18  ;;  %p49_p1 = scmp.ne.s32.totalorder %s1108_s16, %s1104_s15  ;;  %s1120_s19 = sphi %s1156_s19, %s14_s19   ;;  %s1116_s18 = sphi %s1154_s18, %s1284_s18   ;;  %s1112_s17 = sphi %s1152_s17, %s1283_s17   ;;  %s1108_s16 = sphi %s1150_s16, %s1282_s16   ;;  %s1104_s15 = sphi %s1148_s15, %s1281_s15  }
   0x4   : > { %p27_p0 = scmp.ge.s32.totalorder %s26_s20, 3  ;;  %p50_p2 = scmp.eq.s32.totalorder %s1120_s19, 0 }
   0x5   : > { %s42_s22 = sadd.s32 1, %s1108_s16  ;;  %p899_p5 = scmp.ge.s32.totalorder %s1120_s19, 3 }
   0x6   : > { %s1286_s20 = smov (%p27_p0, %s26_s20), 0  ;;  %p51_p3 = por %p50_p2, %p49_p1 }
   0x7   : > { %s38_s21 = ssub.s32 %s1116_s18, %s1286_s20  ;;  %203 = sbr.rel (%p899_p5) target bundleno = 23 (0x17), region = 24 }
   0x8   : > { %p40_p4 = scmp.eq.s32.totalorder %s38_s21, 0 }
   0xa   : > { %s1183_s23 = scalar_select %p40_p4, %s1108_s16, %s42_s22  }
   0xe   : > { %206 = sbr.rel (!%p51_p3) target bundleno = 23 (0x17), region = 28  ;;  %s208_s24 = sand.u32 (%p51_p3), 1, %s1108_s16  }
   0xf   : > { %s948_s25 = smul.u32 (%p51_p3), 12, %s1116_s18 }
  0x10   : > { %s1007_s26 = smul.u32 (%p51_p3), 48, %s208_s24 }
  0x11   : > { %s216_s29 = scalar_lea.vmem (%p51_p3), %s1276_s0, %s948_s25 }
  0x12   : > { %v231_v0 = vld [vmem:[%s216_s29] sm:$0xff] (%p51_p3)  ;;  %v235_v2 = vld [vmem:[%s216_s29 + $0x48] sm:$0xff] (%p51_p3)  ;;  %s210_s30 = scalar_lea.vmem (%p51_p3), [#allocation3], %s1007_s26  ;;  %v905_v6 = vld [vmem:[%s216_s29 + $0x50] sm:$0xf] (%p51_p3) }
  0x13   : > { %v233_v1 = vld [vmem:[%s216_s29 + $0x24] sm:$0xff] (%p51_p3)  ;;  %232 = vst [vmem:[%s210_s30] sm:$0xff] (%p51_p3), %v231_v0  ;;  %236 = vst [vmem:[%s210_s30 + $0x18] sm:$0xff] (%p51_p3), %v235_v2  ;;  %v237_v3 = vld [vmem:[%s216_s29 + $0x6c] sm:$0xff] (%p51_p3) }
  0x14   : > { %234 = vst [vmem:[%s210_s30 + $0xc] sm:$0xff] (%p51_p3), %v233_v1  ;;  %v901_v4 = vld [vmem:[%s216_s29 + $0x8] sm:$0xf] (%p51_p3)  ;;  %v903_v5 = vld [vmem:[%s216_s29 + $0x2c] sm:$0xf] (%p51_p3)  ;;  %238 = vst [vmem:[%s210_s30 + $0x24] sm:$0xff] (%p51_p3), %v237_v3 }
  0x15   : > { %902 = vst [vmem:[%s210_s30 + $0x8] sm:$0xf] %v901_v4  ;;  %904 = vst [vmem:[%s210_s30 + $0x14] sm:$0xf] %v903_v5  ;;  %v907_v7 = vld [vmem:[%s216_s29 + $0x74] sm:$0xf] }
  0x16   : > { %906 = vst [vmem:[%s210_s30 + $0x20] sm:$0xf] %v905_v6  ;;  %908 = vst [vmem:[%s210_s30 + $0x2c] sm:$0xf] %v907_v7 }
  0x17 PF: > { %p909_p6 = scmp.ge.s32.totalorder %s1120_s19, 1  ;;  %p270_p7 = scmp.lt.s32.totalorder %s1120_s19, 4 }
  0x19   : > { %p271_p8 = pnand %p909_p6, %p270_p7 }
  0x1a   : > { %s277_s5 = sand.u32 (!%p271_p8), 1, %s1104_s15   ;;  %s326_s6 = smul.u32 (!%p271_p8), 48, %s1112_s17 }
  0x1b   : > { %274 = sbr.rel (%p271_p8) target bundleno = 325 (0x145), region = 58  ;;  %p911_p10 = scmp.ne.s32.totalorder (!%p271_p8), %s1112_s17, 0 }
  0x1c   : > { %s1008_s7 = smul.u32 (!%p271_p8), 48, %s277_s5  ;;  %p327_p9 = scmp.lt.s32.totalorder (!%p271_p8), %s326_s6, 143 }
  0x1e   : > { %s1200_s12 = scalar_lea.vmem (!%p271_p8), [#allocation3], %s1008_s7 }
  0x22   : > { %s1288_s6 = smov (!%p327_p9, %s326_s6), 143  ;;  %360 = sbr.rel (%p911_p10) target bundleno = 41 (0x29), region = 66 }
  0x23   : > { %s910_s8 = sshll.u32 %s1288_s6, 2  ;;  %v1122_v8 = vmov (!%p911_p10), 0.0  }
  0x24   : > { %s1198_s11 = scalar_lea.vmem %s1277_s1, %s910_s8  ;;  %361 = vst [vmem:[#allocation2] sm:$0xff] (!%p911_p10), %v1122_v8  ;;  %362 = vst [vmem:[#allocation2 + $0x8] sm:$0xff] (!%p911_p10), %v1122_v8 }
  0x25   : > { %363 = vst [vmem:[#allocation2 + $0x10] sm:$0xff] (!%p911_p10), %v1122_v8  ;;  %364 = vst [vmem:[#allocation2 + $0x18] sm:$0xff] (!%p911_p10), %v1122_v8 }
  0x29 PF: > { %v1050_v9 = vld [vmem:[%s1198_s11 + $0x40] sm:$0xff]   ;;  %v1053_v12 = vld [vmem:[%s1198_s11 + $0x48] sm:$0xff]   ;;  %v1056_v15 = vld [vmem:[%s1198_s11 + $0x50] sm:$0xff]   ;;  %p942_p11 = scmp.ne.s32.totalorder %s1112_s17, 2 }
  0x2a   : > { %v1051_v10 = vld [vmem:[%s1198_s11] sm:$0xff]   ;;  %949 = vmatprep.subr.bf16.mxu0 %v1050_v9  ;;  %v1054_v13 = vld [vmem:[%s1198_s11 + $0x8] sm:$0xff]   ;;  %v1057_v16 = vld [vmem:[%s1198_s11 + $0x10] sm:$0xff]  }
  0x2b   : > { %v1052_v11 = vld [vmem:[%s1198_s11 + $0x80] sm:$0xff]   ;;  %950 = vmatpush3.bf16.msra.mxu0 %v1051_v10  ;;  %v1055_v14 = vld [vmem:[%s1198_s11 + $0x88] sm:$0xff]   ;;  %v1058_v17 = vld [vmem:[%s1198_s11 + $0x90] sm:$0xff]  }
  0x2c   : > { %987 = vmatprep.subr.bf16.mxu1 %v1052_v11  ;;  %951 = vmatprep.subr.bf16.mxu0 %v1053_v12  ;;  %v1059_v18 = vld [vmem:[%s1198_s11 + $0x58] sm:$0xff]   ;;  %v1062_v21 = vld [vmem:[%s1198_s11 + $0x60] sm:$0xff]   ;;  %v1065_v24 = vld [vmem:[%s1198_s11 + $0x68] sm:$0xff]  }
  0x2d   : > { %988 = vmatpush3.bf16.msra.mxu1 %v1052_v11  ;;  %v1060_v19 = vld [vmem:[%s1198_s11 + $0x18] sm:$0xff]   ;;  %v1064_v22 = vld [vmem:[%s1198_s11 + $0xa0] sm:$0xff]   ;;  %v1067_v25 = vld [vmem:[%s1198_s11 + $0xa8] sm:$0xff]  }
  0x2e   : > { %989 = vmatprep.subr.bf16.mxu1 %v1055_v14  ;;  %v1061_v20 = vld [vmem:[%s1198_s11 + $0x98] sm:$0xff]   ;;  %v1063_v23 = vld [vmem:[%s1198_s11 + $0x20] sm:$0xff]   ;;  %v1066_v26 = vld [vmem:[%s1198_s11 + $0x28] sm:$0xff]  }
  0x2f   : > { %952 = vmatpush3.bf16.msra.mxu0 %v1054_v13  ;;  %v1068_v27 = vld [vmem:[%s1198_s11 + $0x70] sm:$0xff]   ;;  %v1071_v30 = vld [vmem:[%s1198_s11 + $0x78] sm:$0xff]   ;;  %v365_v45 = vld [vmem:[#allocation2] sm:$0xff] }
  0x30   : > { %953 = vmatprep.subr.bf16.mxu0 %v1056_v15  ;;  %v1069_v28 = vld [vmem:[%s1198_s11 + $0x30] sm:$0xff]   ;;  %v1073_v31 = vld [vmem:[%s1198_s11 + $0xb8] sm:$0xff]   ;;  %v368_v63 = vld [vmem:[#allocation2 + $0x18] sm:$0xff] }
  0x31   : > { %990 = vmatpush3.bf16.msra.mxu1 %v1055_v14  ;;  %v1070_v29 = vld [vmem:[%s1198_s11 + $0xb0] sm:$0xff]   ;;  %v1076_v32 = vld [vmem:[%s1200_s12 + $0x4] ss:$12 sps:$4 sm:$0xff]   ;;  %v943_v4 = vld [vmem:[%s1278_s2] ss:$0 sm:$0xff] (!%p942_p11) }
  0x32   : > { %991 = vmatprep.subr.bf16.mxu1 %v1058_v17  ;;  %v1077_v33 = vld [vmem:[%s1200_s12 + $0x8] ss:$12 sps:$4 sm:$0xff]   ;;  %633 = vmatprep.mubr.bf16.mxu0 %v1076_v32  ;;  %v1074_v35 = vld [vmem:[%s1200_s12] ss:$12 sps:$4 sm:$0xff]   ;;  %v1081_v38 = vld [vmem:[%s1200_s12 + $0x18] ss:$12 sps:$4 sm:$0xff]  }
  0x33   : > { %954 = vmatpush3.bf16.msra.mxu0 %v1057_v16  ;;  %v1072_v34 = vld [vmem:[%s1198_s11 + $0x38] sm:$0xff]   ;;  %1003 = vmatprep.mubr.bf16.mxu1 %v1077_v33  ;;  %v1079_v36 = vld [vmem:[%s1200_s12 + $0x1c] ss:$12 sps:$4 sm:$0xff]  }
  0x34   : > { %955 = vmatprep.subr.bf16.mxu0 %v1059_v18  ;;  %v1078_v37 = vld [vmem:[%s1200_s12 + $0x20] ss:$12 sps:$4 sm:$0xff]  }
  0x35   : > { %992 = vmatpush3.bf16.msra.mxu1 %v1058_v17  ;;  %v366_v50 = vld [vmem:[#allocation2 + $0x8] sm:$0xff]  ;;  %v367_v59 = vld [vmem:[#allocation2 + $0x10] sm:$0xff] }
  0x36   : > { %993 = vmatprep.subr.bf16.mxu1 %v1061_v20 }
  0x37   : > { %956 = vmatpush3.bf16.msra.mxu0 %v1060_v19 }
  0x38   : > { %957 = vmatprep.subr.bf16.mxu0 %v1062_v21 }
  0x39   : > { %994 = vmatpush3.bf16.msra.mxu1 %v1061_v20  ;;  %v746_v20 = vld [vmem:[%s1279_s3] sm:$0xff] (!%p942_p11) }
  0x3a   : > { %995 = vmatprep.subr.bf16.mxu1 %v1064_v22 }
  0x3b   : > { %958 = vmatpush3.bf16.msra.mxu0 %v1063_v23 }
  0x3c   : > { %959 = vmatprep.subr.bf16.mxu0 %v1065_v24  ;;  %v747_v24 = vld [vmem:[%s1279_s3 + $0x8] sm:$0xff] (!%p942_p11) }
  0x3d   : > { %996 = vmatpush3.bf16.msra.mxu1 %v1064_v22 }
  0x3e   : > { %997 = vmatprep.subr.bf16.mxu1 %v1067_v25 }
  0x3f   : > { %960 = vmatpush3.bf16.msra.mxu0 %v1066_v26  ;;  %v748_v26 = vld [vmem:[%s1279_s3 + $0x10] sm:$0xff] (!%p942_p11) }
  0x40   : > { %961 = vmatprep.subr.bf16.mxu0 %v1068_v27 }
  0x41   : > { %998 = vmatpush3.bf16.msra.mxu1 %v1067_v25 }
  0x42   : > { %999 = vmatprep.subr.bf16.mxu1 %v1070_v29 }
  0x43   : > { %962 = vmatpush3.bf16.msra.mxu0 %v1069_v28 }
  0x44   : > { %963 = vmatprep.subr.bf16.mxu0 %v1071_v30  ;;  %v749_v30 = vld [vmem:[%s1279_s3 + $0x18] sm:$0xff] (!%p942_p11) }
  0x45   : > { %1000 = vmatpush3.bf16.msra.mxu1 %v1070_v29 }
  0x46   : > { %1001 = vmatprep.subr.bf16.mxu1 %v1073_v31 }
  0x47   : > { %964 = vmatpush3.bf16.msra.mxu0 %v1072_v34 }
  0x49   : > { %1002 = vmatpush3.bf16.msra.mxu1 %v1073_v31 }
  0x4a   : > { %634 = vmatmul.mubr.bf16.vlgmr.msra.gmra.mrb[0].mxu0 %v1074_v35 }
  0x4b   : > { %641 = vmatprep.mubr.bf16.mxu0 %v1079_v36 }
  0x4c   : > { %1004 = vmatmul.mubr.bf16.vlgmr.msra.gmra.mrb[0].mxu1 %v1078_v37 }
  0x52   : > { %642 = vmatmul.mubr.bf16.gmra.mrb[4].mxu0 %v1081_v38 }
 0x11d   : > { %v965_v39 = vpop.f32.mrb[0].mxu0 }
 0x11e   : > { %v966_v40 = vpop.f32.mrb[1].mxu0 }
 0x11f   : > { %v967_v41 = vadd.f32 %v966_v40, %v965_v39  ;;  %v968_v42 = vpop.f32.mrb[2].mxu0  ;;  %v1005_v43 = vpop.f32.mrb[0].mxu1 }
 0x120   : > { %v969_v44 = vpop.f32.mrb[3].mxu0  ;;  %v684_v46 = vpop.f32.mrb[1].mxu1 }
 0x121   : > { %v970_v47 = vadd.f32 %v969_v44, %v968_v42  ;;  %v685_v48 = vadd.f32 %v967_v41, %v684_v46  ;;  %v1006_v49 = vpop.f32.mrb[2].mxu1 }
 0x122   : > { %v687_v51 = vpop.f32.mrb[3].mxu1 }
 0x123   : > { %v699_v52 = vadd.f32 %v685_v48, %v365_v45  ;;  %v688_v53 = vadd.f32 %v970_v47, %v687_v51 }
 0x125   : > { %703 = vst [vmem:[#allocation2] sm:$0xff] %v699_v52  ;;  %v700_v54 = vadd.f32 %v688_v53, %v366_v50  ;;  %v971_v55 = vpop.f32.mrb[4].mxu0 }
 0x126   : > { %v972_v56 = vpop.f32.mrb[5].mxu0 }
 0x127   : > { %704 = vst [vmem:[#allocation2 + $0x8] sm:$0xff] %v700_v54  ;;  %v973_v57 = vadd.f32 %v972_v56, %v971_v55  ;;  %v974_v58 = vpop.f32.mrb[6].mxu0 }
 0x128   : > { %v975_v60 = vpop.f32.mrb[7].mxu0 }
 0x129   : > { %v693_v61 = vadd.f32 %v1005_v43, %v973_v57  ;;  %v976_v62 = vadd.f32 %v975_v60, %v974_v58  ;;  %710 = sbr.rel (%p942_p11) target bundleno = 325 (0x145), region = 70 }
 0x12b   : > { %v701_v0 = vadd.f32 %v693_v61, %v367_v59  ;;  %v696_v1 = vadd.f32 %v1006_v49, %v976_v62 }
 0x12c   : > { %v711_v3 = vld [vmem:[#allocation2] sm:$0xff] (!%p942_p11) }
 0x12d   : > { %705 = vst [vmem:[#allocation2 + $0x10] sm:$0xff] %v701_v0  ;;  %v702_v2 = vadd.f32 %v696_v1, %v368_v63  ;;  %v715_v5 = vmul.f32 (!%p942_p11), 0.058925565, %v711_v3 }
 0x12e   : > { %v712_v6 = vld [vmem:[#allocation2 + $0x8] sm:$0xff] (!%p942_p11) }
 0x12f   : > { %706 = vst [vmem:[#allocation2 + $0x18] sm:$0xff] %v702_v2  ;;  %v716_v8 = vmul.f32 (!%p942_p11), 0.058925565, %v712_v6  ;;  %v726_v11 = vadd.f32 (!%p942_p11), %v943_v4, %v715_v5 }
 0x131   : > { %v727_v13 = vadd.f32 %v943_v4, %v716_v8  ;;  %vm730_vm0 = vcmp.ge.f32.partialorder %v726_v11, 0.0  ;;  %v734_v15 = vmul.f32 0.2, %v726_v11 }
 0x133   : > { %vm731_vm1 = vcmp.ge.f32.partialorder %v727_v13, 0.0  ;;  %v735_v17 = vmul.f32 0.2, %v727_v13  ;;  %v738_v19 = vsel %vm730_vm0, %v726_v11, %v734_v15 }
 0x134   : > { %v713_v7 = vld [vmem:[#allocation2 + $0x10] sm:$0xff]  ;;  %v742_v22 = vmul.f32 1.4142135, %v738_v19 }
 0x135   : > { %v717_v9 = vmul.f32 0.058925565, %v713_v7  ;;  %v739_v23 = vsel %vm731_vm1, %v727_v13, %v735_v17 }
 0x136   : > { %v714_v10 = vld [vmem:[#allocation2 + $0x18] sm:$0xff]  ;;  %v743_v27 = vmul.f32 1.4142135, %v739_v23  ;;  %v750_v31 = vadd.f32 %v746_v20, %v742_v22 }
 0x137   : > { %v718_v12 = vmul.f32 0.058925565, %v714_v10  ;;  %v728_v14 = vadd.f32 %v943_v4, %v717_v9 }
 0x138   : > { %v751_v33 = vadd.f32 %v747_v24, %v743_v27  ;;  %v754_v35 = vmul.f32 0.70710677, %v750_v31 }
 0x139   : > { %v729_v16 = vadd.f32 %v943_v4, %v718_v12  ;;  %vm732_vm2 = vcmp.ge.f32.partialorder %v728_v14, 0.0  ;;  %v736_v18 = vmul.f32 0.2, %v728_v14 }
 0x13a   : > { %v755_v37 = vmul.f32 0.70710677, %v751_v33  ;;  %758 = vst [vmem:[%s1280_s4] sm:$0xff] %v754_v35 }
 0x13b   : > { %vm733_vm3 = vcmp.ge.f32.partialorder %v729_v16, 0.0  ;;  %v737_v21 = vmul.f32 0.2, %v729_v16  ;;  %v740_v25 = vsel %vm732_vm2, %v728_v14, %v736_v18 }
 0x13c   : > { %v744_v28 = vmul.f32 1.4142135, %v740_v25  ;;  %759 = vst [vmem:[%s1280_s4 + $0x8] sm:$0xff] %v755_v37 }
 0x13d   : > { %v741_v29 = vsel %vm733_vm3, %v729_v16, %v737_v21 }
 0x13e   : > { %v745_v32 = vmul.f32 1.4142135, %v741_v29  ;;  %v752_v34 = vadd.f32 %v748_v26, %v744_v28 }
 0x140   : > { %v753_v36 = vadd.f32 %v749_v30, %v745_v32  ;;  %v756_v38 = vmul.f32 0.70710677, %v752_v34 }
 0x142   : > { %v757_v39 = vmul.f32 0.70710677, %v753_v36  ;;  %760 = vst [vmem:[%s1280_s4 + $0x10] sm:$0xff] %v756_v38 }
 0x144   : > { %761 = vst [vmem:[%s1280_s4 + $0x18] sm:$0xff] %v757_v39 }
 0x145 PF: > { %s14_s19 = sadd.s32 1, %s1120_s19   ;;  %s1281_s15 = smov %s1108_s16 }
 0x146   : > { %p11_p12 = scmp.ge.s32.totalorder %s14_s19, 5   ;;  %s1282_s16 = smov %s1183_s23 }
 0x147   : > { %s1283_s17 = smov %s1116_s18  ;;  %s1284_s18 = smov %s1286_s20 }
 0x148   :  { %13 = sbr.rel (!%p11_p12) target bundleno = 3 (0x3), region = 120 }

// kernel: _lambda_.27
= control target key start
LH: loop header
LB: loop body
LE: loop exit
PB: predicated region body
PF: predicated region fallthrough
CT: control target
= control target key end

     0   :  { %v194_v0 = vmov 0.0   ;;  %vm195_vm0 = vmmov 0   ;;  %s249_s1 = inlined_call_operand.vmem [shape: bf16[128,128], index: 1, kind: input, shape index: {}]   ;;  %s250_s0 = inlined_call_operand.vmem [shape: bf16[8,128], index: 0, kind: input, shape index: {}]   ;;  %s251_s2 = inlined_call_operand.vmem [shape: f32[1,128], index: 2, kind: input, shape index: {}]   ;;  %s252_s3 = inlined_call_operand.vmem [shape: f32[8,128], index: 3, kind: output, shape index: {}]  }
   0x1   :  { %164 = vmatprep.subr.bf16.mxu0 %v194_v0  ;;  %v186_v1 = vld [vmem:[%s249_s1] sm:$0xff]   ;;  %180 = vmatprep.mubr.msk.bf16.mxu0 %vm195_vm0, %v194_v0  ;;  %v187_v2 = vld [vmem:[%s249_s1 + $0x8] sm:$0xff]   ;;  %v188_v3 = vld [vmem:[%s249_s1 + $0x10] sm:$0xff]  }
   0x2   :  { %165 = vmatpush3.bf16.msra.mxu0 %v186_v1  ;;  %v189_v4 = vld [vmem:[%s249_s1 + $0x18] sm:$0xff]   ;;  %v190_v5 = vld [vmem:[%s249_s1 + $0x20] sm:$0xff]   ;;  %v191_v6 = vld [vmem:[%s249_s1 + $0x28] sm:$0xff]  }
   0x3   :  { %166 = vmatprep.subr.bf16.mxu0 %v194_v0  ;;  %v192_v7 = vld [vmem:[%s249_s1 + $0x30] sm:$0xff]   ;;  %v193_v8 = vld [vmem:[%s249_s1 + $0x38] sm:$0xff]   ;;  %v21_v9 = vld [vmem:[%s250_s0] sm:$0xf] }
   0x4   :  { %v154_v11 = vld [vmem:[%s251_s2] ss:$0 sm:$0xff] }
   0x6   :  { %167 = vmatpush3.bf16.msra.mxu0 %v187_v2 }
   0x7   :  { %168 = vmatprep.subr.bf16.mxu0 %v194_v0 }
   0xa   :  { %169 = vmatpush3.bf16.msra.mxu0 %v188_v3 }
   0xb   :  { %170 = vmatprep.subr.bf16.mxu0 %v194_v0 }
   0xe   :  { %171 = vmatpush3.bf16.msra.mxu0 %v189_v4 }
   0xf   :  { %172 = vmatprep.subr.bf16.mxu0 %v194_v0 }
  0x12   :  { %173 = vmatpush3.bf16.msra.mxu0 %v190_v5 }
  0x13   :  { %174 = vmatprep.subr.bf16.mxu0 %v194_v0 }
  0x16   :  { %175 = vmatpush3.bf16.msra.mxu0 %v191_v6 }
  0x17   :  { %176 = vmatprep.subr.bf16.mxu0 %v194_v0 }
  0x1a   :  { %177 = vmatpush3.bf16.msra.mxu0 %v192_v7 }
  0x1b   :  { %178 = vmatprep.subr.bf16.mxu0 %v194_v0 }
  0x1e   :  { %179 = vmatpush3.bf16.msra.mxu0 %v193_v8 }
  0x21   :  { %181 = vmatmul.mubr.bf16.vlgmr.msra.gmra.mrb[0].mxu0 %v21_v9 }
  0xf4   :  { %v120_v10 = vpop.f32.mrb[0].mxu0 }
  0xf5   :  { %v132_v12 = vmul.f32 0.125, %v120_v10  ;;  %v182_v13 = vpop.f32.mrb[1].mxu0 }
  0xf6   :  { %v123_v14 = vpop.f32.mrb[2].mxu0 }
  0xf7   :  { %v140_v15 = vadd.f32 %v154_v11, %v132_v12  ;;  %v183_v16 = vpop.f32.mrb[3].mxu0 }
  0xf9   :  { %141 = vst [vmem:[%s252_s3] sm:$0xff] %v140_v15 }

// kernel: _lambda_.25
= control target key start
LH: loop header
LB: loop body
LE: loop exit
PB: predicated region body
PF: predicated region fallthrough
CT: control target
= control target key end

     0   :  { %s1052_s12 = smov 0   ;;  %s1054_s13 = smov 0   ;;  %s1168_s0 = inlined_call_operand.vmem [shape: bf16[32,1152], index: 0, kind: input, shape index: {}]   ;;  %s1169_s1 = inlined_call_operand.vmem [shape: bf16[1152,128], index: 1, kind: input, shape index: {}]   ;;  %s1170_s2 = inlined_call_operand.vmem [shape: f32[1,128], index: 2, kind: input, shape index: {}]   ;;  %s1171_s3 = inlined_call_operand.vmem [shape: f32[32,128], index: 3, kind: output, shape index: {}]  }
   0x1   :  { %s1056_s14 = smov 0   ;;  %s1058_s15 = smov 0  }
   0x2   :  { %s1060_s16 = smov 0  }
   0x3 LB: > { %s25_s17 = sadd.s32 1, %s1025_s15  ;;  %p48_p1 = scmp.ne.s32.totalorder %s1017_s13, %s1013_s12  ;;  %s1029_s16 = sphi %s1060_s16, %s13_s16   ;;  %s1025_s15 = sphi %s1058_s15, %s1175_s15   ;;  %s1021_s14 = sphi %s1056_s14, %s1174_s14   ;;  %s1017_s13 = sphi %s1054_s13, %s1173_s13   ;;  %s1013_s12 = sphi %s1052_s12, %s1172_s12  }
   0x4   : > { %p26_p0 = scmp.ge.s32.totalorder %s25_s17, 3  ;;  %p49_p2 = scmp.eq.s32.totalorder %s1029_s16, 0 }
   0x5   : > { %s41_s19 = sadd.s32 1, %s1017_s13  ;;  %p808_p5 = scmp.ge.s32.totalorder %s1029_s16, 3 }
   0x6   : > { %s1177_s17 = smov (%p26_p0, %s25_s17), 0  ;;  %p50_p3 = por %p49_p2, %p48_p1 }
   0x7   : > { %s37_s18 = ssub.s32 %s1025_s15, %s1177_s17  ;;  %162 = sbr.rel (%p808_p5) target bundleno = 23 (0x17), region = 20 }
   0x8   : > { %p39_p4 = scmp.eq.s32.totalorder %s37_s18, 0 }
   0xa   : > { %s1087_s20 = scalar_select %p39_p4, %s1017_s13, %s41_s19  }
   0xe   : > { %165 = sbr.rel (!%p50_p3) target bundleno = 23 (0x17), region = 24  ;;  %s167_s21 = sand.u32 (%p50_p3), 1, %s1017_s13  }
   0xf   : > { %s857_s22 = smul.u32 (%p50_p3), 12, %s1025_s15 }
  0x10   : > { %s916_s23 = smul.u32 (%p50_p3), 48, %s167_s21 }
  0x11   : > { %s175_s26 = scalar_lea.vmem (%p50_p3), %s1168_s0, %s857_s22 }
  0x12   : > { %v190_v0 = vld [vmem:[%s175_s26] sm:$0xff] (%p50_p3)  ;;  %v194_v2 = vld [vmem:[%s175_s26 + $0x48] sm:$0xff] (%p50_p3)  ;;  %s169_s27 = scalar_lea.vmem (%p50_p3), [#allocation3], %s916_s23  ;;  %v814_v6 = vld [vmem:[%s175_s26 + $0x50] sm:$0xf] (%p50_p3) }
  0x13   : > { %v192_v1 = vld [vmem:[%s175_s26 + $0x24] sm:$0xff] (%p50_p3)  ;;  %191 = vst [vmem:[%s169_s27] sm:$0xff] (%p50_p3), %v190_v0  ;;  %195 = vst [vmem:[%s169_s27 + $0x18] sm:$0xff] (%p50_p3), %v194_v2  ;;  %v196_v3 = vld [vmem:[%s175_s26 + $0x6c] sm:$0xff] (%p50_p3) }
  0x14   : > { %193 = vst [vmem:[%s169_s27 + $0xc] sm:$0xff] (%p50_p3), %v192_v1  ;;  %v810_v4 = vld [vmem:[%s175_s26 + $0x8] sm:$0xf] (%p50_p3)  ;;  %v812_v5 = vld [vmem:[%s175_s26 + $0x2c] sm:$0xf] (%p50_p3)  ;;  %197 = vst [vmem:[%s169_s27 + $0x24] sm:$0xff] (%p50_p3), %v196_v3 }
  0x15   : > { %811 = vst [vmem:[%s169_s27 + $0x8] sm:$0xf] %v810_v4  ;;  %813 = vst [vmem:[%s169_s27 + $0x14] sm:$0xf] %v812_v5  ;;  %v816_v7 = vld [vmem:[%s175_s26 + $0x74] sm:$0xf] }
  0x16   : > { %815 = vst [vmem:[%s169_s27 + $0x20] sm:$0xf] %v814_v6  ;;  %817 = vst [vmem:[%s169_s27 + $0x2c] sm:$0xf] %v816_v7 }
  0x17 PF: > { %p818_p6 = scmp.ge.s32.totalorder %s1029_s16, 1  ;;  %p229_p7 = scmp.lt.s32.totalorder %s1029_s16, 4 }
  0x19   : > { %p230_p8 = pnand %p818_p6, %p229_p7 }
  0x1a   : > { %s236_s28 = sand.u32 (!%p230_p8), 1, %s1013_s12   ;;  %s275_s29 = smul.u32 (!%p230_p8), 48, %s1021_s14 }
  0x1b   : > { %233 = sbr.rel (%p230_p8) target bundleno = 321 (0x141), region = 54  ;;  %p820_p10 = scmp.ne.s32.totalorder (!%p230_p8), %s1021_s14, 0 }
  0x1c   : > { %s917_s30 = smul.u32 (!%p230_p8), 48, %s236_s28  ;;  %p276_p9 = scmp.lt.s32.totalorder (!%p230_p8), %s275_s29, 143 }
  0x1e   : > { %s1104_s8 = scalar_lea.vmem (!%p230_p8), [#allocation3], %s917_s30 }
  0x22   : > { %s1179_s29 = smov (!%p276_p9, %s275_s29), 143  ;;  %300 = sbr.rel (%p820_p10) target bundleno = 41 (0x29), region = 62 }
  0x23   : > { %s819_s4 = sshll.u32 %s1179_s29, 2  ;;  %v1031_v8 = vmov (!%p820_p10), 0.0  }
  0x24   : > { %s1102_s7 = scalar_lea.vmem %s1169_s1, %s819_s4  ;;  %301 = vst [vmem:[#allocation2] sm:$0xff] (!%p820_p10), %v1031_v8  ;;  %302 = vst [vmem:[#allocation2 + $0x8] sm:$0xff] (!%p820_p10), %v1031_v8 }
  0x25   : > { %303 = vst [vmem:[#allocation2 + $0x10] sm:$0xff] (!%p820_p10), %v1031_v8  ;;  %304 = vst [vmem:[#allocation2 + $0x18] sm:$0xff] (!%p820_p10), %v1031_v8 }
  0x29 PF: > { %v959_v9 = vld [vmem:[%s1102_s7 + $0x40] sm:$0xff]   ;;  %v962_v12 = vld [vmem:[%s1102_s7 + $0x48] sm:$0xff]   ;;  %v965_v15 = vld [vmem:[%s1102_s7 + $0x50] sm:$0xff]   ;;  %p851_p11 = scmp.ne.s32.totalorder %s1021_s14, 2 }
  0x2a   : > { %v960_v10 = vld [vmem:[%s1102_s7] sm:$0xff]   ;;  %858 = vmatprep.subr.bf16.mxu0 %v959_v9  ;;  %v963_v13 = vld [vmem:[%s1102_s7 + $0x8] sm:$0xff]   ;;  %v966_v16 = vld [vmem:[%s1102_s7 + $0x10] sm:$0xff]  }
  0x2b   : > { %v961_v11 = vld [vmem:[%s1102_s7 + $0x80] sm:$0xff]   ;;  %859 = vmatpush3.bf16.msra.mxu0 %v960_v10  ;;  %v964_v14 = vld [vmem:[%s1102_s7 + $0x88] sm:$0xff]   ;;  %v967_v17 = vld [vmem:[%s1102_s7 + $0x90] sm:$0xff]  }
  0x2c   : > { %896 = vmatprep.subr.bf16.mxu1 %v961_v11  ;;  %860 = vmatprep.subr.bf16.mxu0 %v962_v12  ;;  %v968_v18 = vld [vmem:[%s1102_s7 + $0x58] sm:$0xff]   ;;  %v971_v21 = vld [vmem:[%s1102_s7 + $0x60] sm:$0xff]   ;;  %v974_v24 = vld [vmem:[%s1102_s7 + $0x68] sm:$0xff]  }
  0x2d   : > { %897 = vmatpush3.bf16.msra.mxu1 %v961_v11  ;;  %v969_v19 = vld [vmem:[%s1102_s7 + $0x18] sm:$0xff]   ;;  %v973_v22 = vld [vmem:[%s1102_s7 + $0xa0] sm:$0xff]   ;;  %v976_v25 = vld [vmem:[%s1102_s7 + $0xa8] sm:$0xff]  }
  0x2e   : > { %898 = vmatprep.subr.bf16.mxu1 %v964_v14  ;;  %v970_v20 = vld [vmem:[%s1102_s7 + $0x98] sm:$0xff]   ;;  %v972_v23 = vld [vmem:[%s1102_s7 + $0x20] sm:$0xff]   ;;  %v975_v26 = vld [vmem:[%s1102_s7 + $0x28] sm:$0xff]  }
  0x2f   : > { %861 = vmatpush3.bf16.msra.mxu0 %v963_v13  ;;  %v977_v27 = vld [vmem:[%s1102_s7 + $0x70] sm:$0xff]   ;;  %v980_v30 = vld [vmem:[%s1102_s7 + $0x78] sm:$0xff]   ;;  %v305_v45 = vld [vmem:[#allocation2] sm:$0xff] }
  0x30   : > { %862 = vmatprep.subr.bf16.mxu0 %v965_v15  ;;  %v978_v28 = vld [vmem:[%s1102_s7 + $0x30] sm:$0xff]   ;;  %v982_v31 = vld [vmem:[%s1102_s7 + $0xb8] sm:$0xff]   ;;  %v308_v63 = vld [vmem:[#allocation2 + $0x18] sm:$0xff] }
  0x31   : > { %899 = vmatpush3.bf16.msra.mxu1 %v964_v14  ;;  %v979_v29 = vld [vmem:[%s1102_s7 + $0xb0] sm:$0xff]   ;;  %v985_v32 = vld [vmem:[%s1104_s8 + $0x4] ss:$12 sps:$4 sm:$0xff]   ;;  %v852_v4 = vld [vmem:[%s1170_s2] ss:$0 sm:$0xff] (!%p851_p11) }
  0x32   : > { %900 = vmatprep.subr.bf16.mxu1 %v967_v17  ;;  %v986_v33 = vld [vmem:[%s1104_s8 + $0x8] ss:$12 sps:$4 sm:$0xff]   ;;  %573 = vmatprep.mubr.bf16.mxu0 %v985_v32  ;;  %v983_v35 = vld [vmem:[%s1104_s8] ss:$12 sps:$4 sm:$0xff]   ;;  %v990_v38 = vld [vmem:[%s1104_s8 + $0x18] ss:$12 sps:$4 sm:$0xff]  }
  0x33   : > { %863 = vmatpush3.bf16.msra.mxu0 %v966_v16  ;;  %v981_v34 = vld [vmem:[%s1102_s7 + $0x38] sm:$0xff]   ;;  %912 = vmatprep.mubr.bf16.mxu1 %v986_v33  ;;  %v988_v36 = vld [vmem:[%s1104_s8 + $0x1c] ss:$12 sps:$4 sm:$0xff]  }
  0x34   : > { %864 = vmatprep.subr.bf16.mxu0 %v968_v18  ;;  %v987_v37 = vld [vmem:[%s1104_s8 + $0x20] ss:$12 sps:$4 sm:$0xff]  }
  0x35   : > { %901 = vmatpush3.bf16.msra.mxu1 %v967_v17  ;;  %v306_v50 = vld [vmem:[#allocation2 + $0x8] sm:$0xff]  ;;  %v307_v59 = vld [vmem:[#allocation2 + $0x10] sm:$0xff] }
  0x36   : > { %902 = vmatprep.subr.bf16.mxu1 %v970_v20 }
  0x37   : > { %865 = vmatpush3.bf16.msra.mxu0 %v969_v19 }
  0x38   : > { %866 = vmatprep.subr.bf16.mxu0 %v971_v21 }
  0x39   : > { %903 = vmatpush3.bf16.msra.mxu1 %v970_v20 }
  0x3a   : > { %904 = vmatprep.subr.bf16.mxu1 %v973_v22 }
  0x3b   : > { %867 = vmatpush3.bf16.msra.mxu0 %v972_v23 }
  0x3c   : > { %868 = vmatprep.subr.bf16.mxu0 %v974_v24 }
  0x3d   : > { %905 = vmatpush3.bf16.msra.mxu1 %v973_v22 }
  0x3e   : > { %906 = vmatprep.subr.bf16.mxu1 %v976_v25 }
  0x3f   : > { %869 = vmatpush3.bf16.msra.mxu0 %v975_v26 }
  0x40   : > { %870 = vmatprep.subr.bf16.mxu0 %v977_v27 }
  0x41   : > { %907 = vmatpush3.bf16.msra.mxu1 %v976_v25 }
  0x42   : > { %908 = vmatprep.subr.bf16.mxu1 %v979_v29 }
  0x43   : > { %871 = vmatpush3.bf16.msra.mxu0 %v978_v28 }
  0x44   : > { %872 = vmatprep.subr.bf16.mxu0 %v980_v30 }
  0x45   : > { %909 = vmatpush3.bf16.msra.mxu1 %v979_v29 }
  0x46   : > { %910 = vmatprep.subr.bf16.mxu1 %v982_v31 }
  0x47   : > { %873 = vmatpush3.bf16.msra.mxu0 %v981_v34 }
  0x49   : > { %911 = vmatpush3.bf16.msra.mxu1 %v982_v31 }
  0x4a   : > { %574 = vmatmul.mubr.bf16.vlgmr.msra.gmra.mrb[0].mxu0 %v983_v35 }
  0x4b   : > { %581 = vmatprep.mubr.bf16.mxu0 %v988_v36 }
  0x4c   : > { %913 = vmatmul.mubr.bf16.vlgmr.msra.gmra.mrb[0].mxu1 %v987_v37 }
  0x52   : > { %582 = vmatmul.mubr.bf16.gmra.mrb[4].mxu0 %v990_v38 }
 0x11d   : > { %v874_v39 = vpop.f32.mrb[0].mxu0 }
 0x11e   : > { %v875_v40 = vpop.f32.mrb[1].mxu0 }
 0x11f   : > { %v876_v41 = vadd.f32 %v875_v40, %v874_v39  ;;  %v877_v42 = vpop.f32.mrb[2].mxu0  ;;  %v914_v43 = vpop.f32.mrb[0].mxu1 }
 0x120   : > { %v878_v44 = vpop.f32.mrb[3].mxu0  ;;  %v624_v46 = vpop.f32.mrb[1].mxu1 }
 0x121   : > { %v879_v47 = vadd.f32 %v878_v44, %v877_v42  ;;  %v625_v48 = vadd.f32 %v876_v41, %v624_v46  ;;  %v915_v49 = vpop.f32.mrb[2].mxu1 }
 0x122   : > { %v627_v51 = vpop.f32.mrb[3].mxu1 }
 0x123   : > { %v639_v52 = vadd.f32 %v625_v48, %v305_v45  ;;  %v628_v53 = vadd.f32 %v879_v47, %v627_v51 }
 0x125   : > { %643 = vst [vmem:[#allocation2] sm:$0xff] %v639_v52  ;;  %v640_v54 = vadd.f32 %v628_v53, %v306_v50  ;;  %v880_v55 = vpop.f32.mrb[4].mxu0 }
 0x126   : > { %v881_v56 = vpop.f32.mrb[5].mxu0 }
 0x127   : > { %644 = vst [vmem:[#allocation2 + $0x8] sm:$0xff] %v640_v54  ;;  %v882_v57 = vadd.f32 %v881_v56, %v880_v55  ;;  %v883_v58 = vpop.f32.mrb[6].mxu0 }
 0x128   : > { %v884_v60 = vpop.f32.mrb[7].mxu0 }
 0x129   : > { %v633_v61 = vadd.f32 %v914_v43, %v882_v57  ;;  %v885_v62 = vadd.f32 %v884_v60, %v883_v58  ;;  %650 = sbr.rel (%p851_p11) target bundleno = 321 (0x141), region = 66 }
 0x12b   : > { %v641_v0 = vadd.f32 %v633_v61, %v307_v59  ;;  %v636_v1 = vadd.f32 %v915_v49, %v885_v62 }
 0x12c   : > { %v651_v3 = vld [vmem:[#allocation2] sm:$0xff] (!%p851_p11) }
 0x12d   : > { %645 = vst [vmem:[#allocation2 + $0x10] sm:$0xff] %v641_v0  ;;  %v642_v2 = vadd.f32 %v636_v1, %v308_v63  ;;  %v655_v6 = vmul.f32 (!%p851_p11), 0.041666668, %v651_v3 }
 0x12e   : > { %v652_v5 = vld [vmem:[#allocation2 + $0x8] sm:$0xff] (!%p851_p11) }
 0x12f   : > { %646 = vst [vmem:[#allocation2 + $0x18] sm:$0xff] %v642_v2  ;;  %v656_v7 = vmul.f32 (!%p851_p11), 0.041666668, %v652_v5  ;;  %v666_v12 = vadd.f32 (!%p851_p11), %v852_v4, %v655_v6 }
 0x131   : > { %v667_v13 = vadd.f32 %v852_v4, %v656_v7  ;;  %vm670_vm0 = vcmp.ge.f32.partialorder %v666_v12, 0.0  ;;  %v674_v16 = vmul.f32 0.2, %v666_v12 }
 0x133   : > { %vm671_vm1 = vcmp.ge.f32.partialorder %v667_v13, 0.0  ;;  %v675_v17 = vmul.f32 0.2, %v667_v13  ;;  %v678_v20 = vsel %vm670_vm0, %v666_v12, %v674_v16 }
 0x134   : > { %v653_v8 = vld [vmem:[#allocation2 + $0x10] sm:$0xff]  ;;  %v682_v22 = vmul.f32 1.4142135, %v678_v20 }
 0x135   : > { %v657_v10 = vmul.f32 0.041666668, %v653_v8  ;;  %v679_v21 = vsel %vm671_vm1, %v667_v13, %v675_v17 }
 0x136   : > { %v654_v9 = vld [vmem:[#allocation2 + $0x18] sm:$0xff]  ;;  %v683_v23 = vmul.f32 1.4142135, %v679_v21  ;;  %686 = vst [vmem:[%s1171_s3] sm:$0xff] %v682_v22 }
 0x137   : > { %v658_v11 = vmul.f32 0.041666668, %v654_v9  ;;  %v668_v14 = vadd.f32 %v852_v4, %v657_v10 }
 0x138   : > { %687 = vst [vmem:[%s1171_s3 + $0x8] sm:$0xff] %v683_v23 }
 0x139   : > { %v669_v15 = vadd.f32 %v852_v4, %v658_v11  ;;  %vm672_vm2 = vcmp.ge.f32.partialorder %v668_v14, 0.0  ;;  %v676_v18 = vmul.f32 0.2, %v668_v14 }
 0x13b   : > { %vm673_vm3 = vcmp.ge.f32.partialorder %v669_v15, 0.0  ;;  %v677_v19 = vmul.f32 0.2, %v669_v15  ;;  %v680_v24 = vsel %vm672_vm2, %v668_v14, %v676_v18 }
 0x13c   : > { %v684_v26 = vmul.f32 1.4142135, %v680_v24 }
 0x13d   : > { %v681_v25 = vsel %vm673_vm3, %v669_v15, %v677_v19 }
 0x13e   : > { %v685_v27 = vmul.f32 1.4142135, %v681_v25  ;;  %688 = vst [vmem:[%s1171_s3 + $0x10] sm:$0xff] %v684_v26 }
 0x140   : > { %689 = vst [vmem:[%s1171_s3 + $0x18] sm:$0xff] %v685_v27 }
 0x141 PF: > { %s13_s16 = sadd.s32 1, %s1029_s16   ;;  %s1172_s12 = smov %s1017_s13 }
 0x142   : > { %p10_p12 = scmp.ge.s32.totalorder %s13_s16, 5   ;;  %s1173_s13 = smov %s1087_s20 }
 0x143   : > { %s1174_s14 = smov %s1025_s15  ;;  %s1175_s15 = smov %s1177_s17 }
 0x144   :  { %12 = sbr.rel (!%p10_p12) target bundleno = 3 (0x3), region = 113 }

// kernel: _lambda_.26
= control target key start
LH: loop header
LB: loop body
LE: loop exit
PB: predicated region body
PF: predicated region fallthrough
CT: control target
= control target key end

     0   :  { %s1413_s12 = smov 0   ;;  %s1415_s13 = smov 0   ;;  %s1530_s0 = inlined_call_operand.vmem [shape: bf16[8,2048], index: 0, kind: input, shape index: {}]   ;;  %s1531_s1 = inlined_call_operand.vmem [shape: bf16[2048,128], index: 1, kind: input, shape index: {}]   ;;  %s1532_s2 = inlined_call_operand.vmem [shape: f32[1,128], index: 2, kind: input, shape index: {}]   ;;  %s1533_s3 = inlined_call_operand.vmem [shape: f32[8,128], index: 3, kind: output, shape index: {}]  }
   0x1   :  { %s1417_s14 = smov 0  }
   0x2 LB: > { %s25_s15 = sadd.s32 1, %s1386_s13  ;;  %p1100_p0 = scmp.ge.s32.totalorder %s1390_s14, 1  ;;  %s1390_s14 = sphi %s1417_s14, %s13_s14   ;;  %s1386_s13 = sphi %s1415_s13, %s1535_s13   ;;  %s1382_s12 = sphi %s1413_s12, %s1534_s12  }
   0x3   : > { %p26_p1 = scmp.ge.s32.totalorder %s25_s15, 2  ;;  %p189_p2 = scmp.lt.s32.totalorder %s1390_s14, 3 }
   0x5   : > { %s1537_s15 = smov (%p26_p1, %s25_s15), 0  ;;  %p190_p3 = pnand %p1100_p0, %p189_p2 }
   0x6   : > { %s1101_s16 = sshll.u32 (!%p190_p3), %s1382_s12, 3  ;;  %s1103_s17 = sshll.u32 (!%p190_p3), %s1382_s12, 7 }
   0x7   : > { %193 = sbr.rel (%p190_p3) target bundleno = 329 (0x149), region = 32  ;;  %p233_p4 = scmp.lt.s32.totalorder (!%p190_p3), %s1101_s16, 15 }
   0x8   : > { %p241_p5 = scmp.lt.s32.totalorder (!%p190_p3), %s1103_s17, 255  ;;  %p1105_p6 = scmp.ne.s32.totalorder (!%p190_p3), %s1382_s12, 0 }
   0xe   : > { %s1539_s16 = smov (!%p233_p4, %s1101_s16), 15  ;;  %s1541_s17 = smov (!%p241_p5, %s1103_s17), 255 }
   0xf   : > { %s1102_s18 = sshll.u32 %s1539_s16, 2  ;;  %s1104_s22 = sshll.u32 %s1541_s17, 2  ;;  %v1392_v0 = vmov (!%p1105_p6), 0.0  }
  0x10   : > { %s1438_s21 = scalar_lea.vmem %s1530_s0, %s1102_s18  ;;  %s1443_s25 = scalar_lea.vmem %s1531_s1, %s1104_s22  ;;  %264 = vst [vmem:[#allocation2] sm:$0xff] (!%p1105_p6), %v1392_v0 }
  0x11   : > { %263 = sbr.rel (%p1105_p6) target bundleno = 24 (0x18), region = 36 }
  0x18 PF: > { %v1296_v1 = vld [vmem:[%s1443_s25 + $0x40] sm:$0xff]   ;;  %v1300_v5 = vld [vmem:[%s1443_s25 + $0x48] sm:$0xff]   ;;  %v1304_v9 = vld [vmem:[%s1443_s25 + $0x50] sm:$0xff]   ;;  %p1178_p7 = scmp.ne.s32.totalorder %s1382_s12, 1 }
  0x19   : > { %v1297_v2 = vld [vmem:[%s1443_s25 + $0xc0] sm:$0xff]   ;;  %1183 = vmatprep.subr.bf16.mxu0 %v1296_v1  ;;  %v1301_v6 = vld [vmem:[%s1443_s25 + $0xc8] sm:$0xff]   ;;  %v1305_v10 = vld [vmem:[%s1443_s25 + $0xd0] sm:$0xff]  }
  0x1a   : > { %v1298_v3 = vld [vmem:[%s1443_s25] sm:$0xff]   ;;  %1205 = vmatprep.subr.bf16.mxu1 %v1297_v2  ;;  %v1302_v7 = vld [vmem:[%s1443_s25 + $0x8] sm:$0xff]   ;;  %v1306_v11 = vld [vmem:[%s1443_s25 + $0x10] sm:$0xff]  }
  0x1b   : > { %v1299_v4 = vld [vmem:[%s1443_s25 + $0x80] sm:$0xff]   ;;  %1184 = vmatpush3.bf16.msra.mxu0 %v1298_v3  ;;  %v1303_v8 = vld [vmem:[%s1443_s25 + $0x88] sm:$0xff]   ;;  %v1307_v12 = vld [vmem:[%s1443_s25 + $0x90] sm:$0xff]  }
  0x1c   : > { %1206 = vmatpush3.bf16.msra.mxu1 %v1299_v4  ;;  %1185 = vmatprep.subr.bf16.mxu0 %v1300_v5  ;;  %v1308_v13 = vld [vmem:[%s1443_s25 + $0x58] sm:$0xff]   ;;  %v1312_v17 = vld [vmem:[%s1443_s25 + $0x60] sm:$0xff]   ;;  %v1316_v21 = vld [vmem:[%s1443_s25 + $0x68] sm:$0xff]  }
  0x1d   : > { %1207 = vmatprep.subr.bf16.mxu1 %v1301_v6  ;;  %v1309_v14 = vld [vmem:[%s1443_s25 + $0xd8] sm:$0xff]   ;;  %v1313_v18 = vld [vmem:[%s1443_s25 + $0xe0] sm:$0xff]   ;;  %v1317_v22 = vld [vmem:[%s1443_s25 + $0xe8] sm:$0xff]  }
  0x1e   : > { %v1310_v15 = vld [vmem:[%s1443_s25 + $0x18] sm:$0xff]   ;;  %v1314_v19 = vld [vmem:[%s1443_s25 + $0x20] sm:$0xff]   ;;  %v1318_v23 = vld [vmem:[%s1443_s25 + $0x28] sm:$0xff]  }
  0x1f   : > { %1186 = vmatpush3.bf16.msra.mxu0 %v1302_v7  ;;  %v1311_v16 = vld [vmem:[%s1443_s25 + $0x98] sm:$0xff]   ;;  %v1315_v20 = vld [vmem:[%s1443_s25 + $0xa0] sm:$0xff]   ;;  %v1319_v24 = vld [vmem:[%s1443_s25 + $0xa8] sm:$0xff]  }
  0x20   : > { %1208 = vmatpush3.bf16.msra.mxu1 %v1303_v8  ;;  %1187 = vmatprep.subr.bf16.mxu0 %v1304_v9  ;;  %v1320_v25 = vld [vmem:[%s1443_s25 + $0x70] sm:$0xff]   ;;  %v1324_v29 = vld [vmem:[%s1443_s25 + $0x78] sm:$0xff]   ;;  %v266_v33 = vld [vmem:[%s1438_s21] sm:$0xff] }
  0x21   : > { %1209 = vmatprep.subr.bf16.mxu1 %v1305_v10  ;;  %v1321_v26 = vld [vmem:[%s1443_s25 + $0xf0] sm:$0xff]   ;;  %v1325_v30 = vld [vmem:[%s1443_s25 + $0xf8] sm:$0xff]   ;;  %v267_v34 = vld [vmem:[%s1438_s21 + $0x8] sm:$0xff]  ;;  %v1106_v35 = vcombine.low %v266_v33, %v266_v33  ;;  %v1107_v36 = vcombine.high %v266_v33, %v266_v33 }
  0x22   : > { %v1322_v27 = vld [vmem:[%s1443_s25 + $0x30] sm:$0xff]   ;;  %v1326_v31 = vld [vmem:[%s1443_s25 + $0x38] sm:$0xff]   ;;  %v1108_v37 = vcombine.low %v267_v34, %v267_v34  ;;  %v1109_v38 = vcombine.high %v267_v34, %v267_v34  ;;  %v1332_v39 = vld [vmem:[%s1443_s25 + $0x140] sm:$0xff]  }
  0x23   : > { %1188 = vmatpush3.bf16.msra.mxu0 %v1306_v11  ;;  %v1323_v28 = vld [vmem:[%s1443_s25 + $0xb0] sm:$0xff]   ;;  %v1327_v32 = vld [vmem:[%s1443_s25 + $0xb8] sm:$0xff]   ;;  %v1333_v40 = vld [vmem:[%s1443_s25 + $0x1c0] sm:$0xff]   ;;  %842 = vmatprep.mubr.bf16.mxu0 %v1107_v36 }
  0x24   : > { %1210 = vmatpush3.bf16.msra.mxu1 %v1307_v12  ;;  %1189 = vmatprep.subr.bf16.mxu0 %v1308_v13  ;;  %v1334_v41 = vld [vmem:[%s1443_s25 + $0x100] sm:$0xff]   ;;  %v1336_v43 = vld [vmem:[%s1443_s25 + $0x148] sm:$0xff]   ;;  %v1340_v47 = vld [vmem:[%s1443_s25 + $0x150] sm:$0xff]  }
  0x25   : > { %1211 = vmatprep.subr.bf16.mxu1 %v1309_v14  ;;  %882 = vmatprep.mubr.bf16.mxu1 %v1109_v38  ;;  %v1335_v42 = vld [vmem:[%s1443_s25 + $0x180] sm:$0xff]   ;;  %v1337_v44 = vld [vmem:[%s1443_s25 + $0x1c8] sm:$0xff]   ;;  %v1341_v48 = vld [vmem:[%s1443_s25 + $0x1d0] sm:$0xff]  }
  0x26   : > { %v1338_v45 = vld [vmem:[%s1443_s25 + $0x108] sm:$0xff]   ;;  %v1342_v49 = vld [vmem:[%s1443_s25 + $0x110] sm:$0xff]   ;;  %v1344_v51 = vld [vmem:[%s1443_s25 + $0x158] sm:$0xff]  }
  0x27   : > { %1190 = vmatpush3.bf16.msra.mxu0 %v1310_v15  ;;  %v1339_v46 = vld [vmem:[%s1443_s25 + $0x188] sm:$0xff]   ;;  %v1343_v50 = vld [vmem:[%s1443_s25 + $0x190] sm:$0xff]   ;;  %v1345_v52 = vld [vmem:[%s1443_s25 + $0x1d8] sm:$0xff]  }
  0x28   : > { %1212 = vmatpush3.bf16.msra.mxu1 %v1311_v16  ;;  %1191 = vmatprep.subr.bf16.mxu0 %v1312_v17  ;;  %v1346_v53 = vld [vmem:[%s1443_s25 + $0x118] sm:$0xff]   ;;  %v1348_v55 = vld [vmem:[%s1443_s25 + $0x160] sm:$0xff]   ;;  %v1352_v59 = vld [vmem:[%s1443_s25 + $0x168] sm:$0xff]  }
  0x29   : > { %1213 = vmatprep.subr.bf16.mxu1 %v1313_v18  ;;  %v1347_v54 = vld [vmem:[%s1443_s25 + $0x198] sm:$0xff]   ;;  %v1349_v56 = vld [vmem:[%s1443_s25 + $0x1e0] sm:$0xff]   ;;  %v1353_v60 = vld [vmem:[%s1443_s25 + $0x1e8] sm:$0xff]  }
  0x2a   : > { %v1350_v57 = vld [vmem:[%s1443_s25 + $0x120] sm:$0xff]   ;;  %v1354_v61 = vld [vmem:[%s1443_s25 + $0x128] sm:$0xff]   ;;  %v1356_v63 = vld [vmem:[%s1443_s25 + $0x170] sm:$0xff]  }
  0x2b   : > { %1192 = vmatpush3.bf16.msra.mxu0 %v1314_v19  ;;  %v1351_v58 = vld [vmem:[%s1443_s25 + $0x1a0] sm:$0xff]   ;;  %v1355_v62 = vld [vmem:[%s1443_s25 + $0x1a8] sm:$0xff]   ;;  %v1357_v0 = vld [vmem:[%s1443_s25 + $0x1f0] sm:$0xff]  }
  0x2c   : > { %1214 = vmatpush3.bf16.msra.mxu1 %v1315_v20  ;;  %1193 = vmatprep.subr.bf16.mxu0 %v1316_v21  ;;  %v1358_v1 = vld [vmem:[%s1443_s25 + $0x130] sm:$0xff]   ;;  %v1360_v3 = vld [vmem:[%s1443_s25 + $0x178] sm:$0xff]  }
  0x2d   : > { %1215 = vmatprep.subr.bf16.mxu1 %v1317_v22  ;;  %v1359_v2 = vld [vmem:[%s1443_s25 + $0x1b0] sm:$0xff]   ;;  %v1361_v4 = vld [vmem:[%s1443_s25 + $0x1f8] sm:$0xff]  }
  0x2e   : > { %v1362_v5 = vld [vmem:[%s1443_s25 + $0x138] sm:$0xff]   ;;  %v268_v7 = vld [vmem:[%s1438_s21 + $0x10] sm:$0xff] }
  0x2f   : > { %1194 = vmatpush3.bf16.msra.mxu0 %v1318_v23  ;;  %v1363_v6 = vld [vmem:[%s1443_s25 + $0x1b8] sm:$0xff]   ;;  %v1110_v8 = vcombine.low %v268_v7, %v268_v7  ;;  %v1111_v9 = vcombine.high %v268_v7, %v268_v7 }
  0x30   : > { %1216 = vmatpush3.bf16.msra.mxu1 %v1319_v24  ;;  %1195 = vmatprep.subr.bf16.mxu0 %v1320_v25  ;;  %v269_v10 = vld [vmem:[%s1438_s21 + $0x18] sm:$0xff] }
  0x31   : > { %1217 = vmatprep.subr.bf16.mxu1 %v1321_v26  ;;  %v1112_v11 = vcombine.low %v269_v10, %v269_v10  ;;  %v1113_v12 = vcombine.high %v269_v10, %v269_v10 }
  0x33   : > { %1196 = vmatpush3.bf16.msra.mxu0 %v1322_v27 }
  0x34   : > { %1218 = vmatpush3.bf16.msra.mxu1 %v1323_v28  ;;  %1197 = vmatprep.subr.bf16.mxu0 %v1324_v29 }
  0x35   : > { %1219 = vmatprep.subr.bf16.mxu1 %v1325_v30 }
  0x37   : > { %1198 = vmatpush3.bf16.msra.mxu0 %v1326_v31 }
  0x38   : > { %1220 = vmatpush3.bf16.msra.mxu1 %v1327_v32  ;;  %1227 = vmatprep.subr.bf16.mxu0 %v1332_v39  ;;  %v1179_v39 = vld [vmem:[%s1532_s2] ss:$0 sm:$0xff] (!%p1178_p7) }
  0x39   : > { %1249 = vmatprep.subr.bf16.mxu1 %v1333_v40 }
  0x3a   : > { %843 = vmatmul.mubr.bf16.vlgmr.msra.gmra.mrb[0].mxu0 %v1106_v35  ;;  %v265_v35 = vld [vmem:[#allocation2] sm:$0xff] }
  0x3b   : > { %883 = vmatmul.mubr.bf16.vlgmr.msra.gmra.mrb[0].mxu1 %v1108_v37  ;;  %1228 = vmatpush3.bf16.msra.mxu0 %v1334_v41 }
  0x3c   : > { %1250 = vmatpush3.bf16.msra.mxu1 %v1335_v42  ;;  %1229 = vmatprep.subr.bf16.mxu0 %v1336_v43 }
  0x3d   : > { %1251 = vmatprep.subr.bf16.mxu1 %v1337_v44  ;;  %922 = vmatprep.mubr.bf16.mxu0 %v1111_v9 }
  0x3e   : > { %962 = vmatprep.mubr.bf16.mxu1 %v1113_v12 }
  0x3f   : > { %1230 = vmatpush3.bf16.msra.mxu0 %v1338_v45 }
  0x40   : > { %1252 = vmatpush3.bf16.msra.mxu1 %v1339_v46  ;;  %1231 = vmatprep.subr.bf16.mxu0 %v1340_v47 }
  0x41   : > { %1253 = vmatprep.subr.bf16.mxu1 %v1341_v48 }
  0x43   : > { %1232 = vmatpush3.bf16.msra.mxu0 %v1342_v49 }
  0x44   : > { %1254 = vmatpush3.bf16.msra.mxu1 %v1343_v50  ;;  %1233 = vmatprep.subr.bf16.mxu0 %v1344_v51 }
  0x45   : > { %1255 = vmatprep.subr.bf16.mxu1 %v1345_v52 }
  0x47   : > { %1234 = vmatpush3.bf16.msra.mxu0 %v1346_v53 }
  0x48   : > { %1256 = vmatpush3.bf16.msra.mxu1 %v1347_v54  ;;  %1235 = vmatprep.subr.bf16.mxu0 %v1348_v55 }
  0x49   : > { %1257 = vmatprep.subr.bf16.mxu1 %v1349_v56 }
  0x4b   : > { %1236 = vmatpush3.bf16.msra.mxu0 %v1350_v57 }
  0x4c   : > { %1258 = vmatpush3.bf16.msra.mxu1 %v1351_v58  ;;  %1237 = vmatprep.subr.bf16.mxu0 %v1352_v59 }
  0x4d   : > { %1259 = vmatprep.subr.bf16.mxu1 %v1353_v60 }
  0x4f   : > { %1238 = vmatpush3.bf16.msra.mxu0 %v1354_v61 }
  0x50   : > { %1260 = vmatpush3.bf16.msra.mxu1 %v1355_v62  ;;  %1239 = vmatprep.subr.bf16.mxu0 %v1356_v63 }
  0x51   : > { %1261 = vmatprep.subr.bf16.mxu1 %v1357_v0 }
  0x53   : > { %1240 = vmatpush3.bf16.msra.mxu0 %v1358_v1 }
  0x54   : > { %1262 = vmatpush3.bf16.msra.mxu1 %v1359_v2  ;;  %1241 = vmatprep.subr.bf16.mxu0 %v1360_v3 }
  0x55   : > { %1263 = vmatprep.subr.bf16.mxu1 %v1361_v4 }
  0x57   : > { %1242 = vmatpush3.bf16.msra.mxu0 %v1362_v5 }
  0x58   : > { %1264 = vmatpush3.bf16.msra.mxu1 %v1363_v6 }
  0x5a   : > { %923 = vmatmul.mubr.bf16.vlgmr.msra.gmra.mrb[4].mxu0 %v1110_v8 }
  0x5b   : > { %963 = vmatmul.mubr.bf16.vlgmr.msra.gmra.mrb[4].mxu1 %v1112_v11 }
 0x10d   : > { %v1199_v13 = vpop.f32.mrb[0].mxu0 }
 0x10e   : > { %v1221_v14 = vpop.f32.mrb[0].mxu1  ;;  %v1200_v15 = vpop.f32.mrb[1].mxu0 }
 0x10f   : > { %v1222_v16 = vpop.f32.mrb[1].mxu1  ;;  %v1201_v17 = vadd.f32 %v1200_v15, %v1199_v13  ;;  %v1202_v19 = vpop.f32.mrb[2].mxu0 }
 0x110   : > { %v1223_v18 = vadd.f32 %v1222_v16, %v1221_v14  ;;  %v1224_v20 = vpop.f32.mrb[2].mxu1  ;;  %v1203_v21 = vpop.f32.mrb[3].mxu0 }
 0x111   : > { %v1225_v22 = vpop.f32.mrb[3].mxu1 }
 0x112   : > { %v885_v23 = vadd.f32 %v1223_v18, %v1201_v17 }
 0x12d   : > { %v1243_v24 = vpop.f32.mrb[4].mxu0 }
 0x12e   : > { %v1265_v25 = vpop.f32.mrb[4].mxu1  ;;  %v1244_v26 = vpop.f32.mrb[5].mxu0 }
 0x12f   : > { %v1266_v27 = vpop.f32.mrb[5].mxu1  ;;  %v1245_v28 = vadd.f32 %v1244_v26, %v1243_v24  ;;  %v1246_v30 = vpop.f32.mrb[6].mxu0 }
 0x130   : > { %v1267_v29 = vadd.f32 %v1266_v27, %v1265_v25  ;;  %v1268_v31 = vpop.f32.mrb[6].mxu1  ;;  %v1247_v32 = vpop.f32.mrb[7].mxu0 }
 0x131   : > { %v1269_v33 = vpop.f32.mrb[7].mxu1  ;;  %v925_v34 = vadd.f32 %v1245_v28, %v885_v23  ;;  %975 = sbr.rel (%p1178_p7) target bundleno = 329 (0x149), region = 40 }
 0x133   : > { %v965_v36 = vadd.f32 %v1267_v29, %v925_v34 }
 0x135   : > { %v970_v37 = vadd.f32 %v965_v36, %v265_v35 }
 0x137   : > { %971 = vst [vmem:[#allocation2] sm:$0xff] %v970_v37 }
 0x13e   : > { %v976_v38 = vld [vmem:[#allocation2] sm:$0xff] }
 0x13f   : > { %v977_v40 = vmul.f32 0.03125, %v976_v38 }
 0x141   : > { %v985_v41 = vadd.f32 %v1179_v39, %v977_v40 }
 0x143   : > { %vm986_vm0 = vcmp.ge.f32.partialorder %v985_v41, 0.0  ;;  %v987_v42 = vmul.f32 0.2, %v985_v41 }
 0x145   : > { %v988_v43 = vsel %vm986_vm0, %v985_v41, %v987_v42 }
 0x146   : > { %v989_v44 = vmul.f32 1.4142135, %v988_v43 }
 0x148   : > { %990 = vst [vmem:[%s1533_s3] sm:$0xff] %v989_v44 }
 0x149 PF: > { %s13_s14 = sadd.s32 1, %s1390_s14   ;;  %s1534_s12 = smov %s1386_s13 }
 0x14a   : > { %p10_p8 = scmp.ge.s32.totalorder %s13_s14, 4   ;;  %s1535_s13 = smov %s1537_s15 }
 0x14c   :  { %12 = sbr.rel (!%p10_p8) target bundleno = 2 (0x2), region = 76 }

</bundles_post_ra>
